<compile_context>
chip_gen: v5e
topology: v5e:2x2
jax: 0.10.0
libtpu: 0.0.40
codegen_flags: <defaults>
</compile_context>

<pallas_src>
import numpy as np
import jax
import jax.numpy as jnp
from jax.experimental import pallas as pl
from jax.experimental.pallas import tpu as pltpu


# ---------------------------------------------------------------------------
# PyTorch trilinear (align_corners=False) 1-D interpolation matrix
# ---------------------------------------------------------------------------
def interp_matrix_1d(n_in, scale):
    n_out = n_in * scale
    i = np.arange(n_out, dtype=np.float64)
    src = (i + 0.5) / scale - 0.5
    src = np.maximum(src, 0.0)                       # PyTorch clamps to 0
    i0 = np.minimum(np.floor(src).astype(np.int64), n_in - 1)
    i1 = np.minimum(i0 + 1, n_in - 1)
    lam = src - i0
    M = np.zeros((n_out, n_in), dtype=np.float64)
    M[np.arange(n_out), i0] += 1.0 - lam
    M[np.arange(n_out), i1] += lam
    return M


# ---------------------------------------------------------------------------
# Geometry-only constants.  Batch is folded into the lane axis: n = b*P + p.
# ---------------------------------------------------------------------------
def build_geometry(B, D, H, W, scale):
    P = D * H * W
    N = B * P
    HW = H * W
    Do, Ho, Wo = D * scale, H * scale, W * scale
    Md = interp_matrix_1d(D, scale)                  # (Do, D)
    Mh = interp_matrix_1d(H, scale)                  # (Ho, H)
    Mw = interp_matrix_1d(W, scale)                  # (Wo, W)
    Mhw = np.kron(Mh, Mw)                            # (Ho*Wo, H*W)

    p = np.arange(P)
    pd, ph, pw = p // HW, (p // W) % H, p % W

    # 3x3x3 tap flat offsets + per-output-position validity masks (zero pad).
    # m_dst[k, n] == 1  <=>  voxel n + tap_k is in-bounds (same batch slice),
    # which also guarantees a circular roll over N never leaks across the
    # batch seam or across a spatial dimension.
    deltas = []
    mdst = np.zeros((27, P), np.float32)
    k = 0
    for kd in range(3):
        for kh in range(3):
            for kw in range(3):
                ad, ah, aw = kd - 1, kh - 1, kw - 1
                deltas.append(ad * HW + ah * W + aw)
                ok = ((pd + ad >= 0) & (pd + ad < D) &
                      (ph + ah >= 0) & (ph + ah < H) &
                      (pw + aw >= 0) & (pw + aw < W))
                mdst[k] = ok.astype(np.float32)
                k += 1
    mdstN = np.tile(mdst, (1, B))                    # (27, N)

    # Depth-upsample weights with the batch block-diagonal folded in.
    A = np.zeros((B * Do, N), np.float32)
    for b in range(B):
        A[b * Do:(b + 1) * Do, b * P:(b + 1) * P] = Md[:, pd]

    # Lane -> (H*W) column-selection matrix (sums over the depth axis).
    S = np.zeros((N, HW), np.float32)
    S[np.arange(N), np.arange(N) % HW] = 1.0         # P is a multiple of H*W

    return (jnp.asarray(mdstN), jnp.asarray(A), jnp.asarray(S),
            jnp.asarray(Mhw.T, jnp.float32), tuple(deltas), (Do, Ho, Wo))


# ---------------------------------------------------------------------------
# Fused branch kernel: im2col -> conv1 -> conv2(diff) -> x8 upsample -> softmax
# ---------------------------------------------------------------------------
def make_branch_kernel(Cin, N, B, Do, deltas):
    K1 = 27 * Cin
    shifts = [(-dlt) % N for dlt in deltas]          # gather of index n + delta

    def kernel(x_ref, w1_ref, wd_ref, m_ref, a_ref, s_ref, hw_ref,
               o_ref, patch_ref):
        x = x_ref[0]                                 # (Cin, N)

        # --- im2col in-kernel: 27 masked XLU lane rotations ----------------
        for k in range(27):
            rolled = pltpu.roll(x, shifts[k], axis=1) if shifts[k] else x
            patch_ref[k * Cin:(k + 1) * Cin, :] = rolled * m_ref[k:k + 1, :]
        patch_ref[K1:K1 + 1, :] = jnp.ones((1, N), jnp.float32)   # bias row

        # --- conv1: ONE MXU matmul (bias + constant channel folded in) -----
        h1 = jnp.dot(w1_ref[0], patch_ref[...],
                     preferred_element_type=jnp.float32)          # (33, N)

        # --- conv2, difference channel only (softmax over 2 == sigmoid) ----
        t2 = jnp.dot(wd_ref[0], h1,
                     preferred_element_type=jnp.float32)          # (27, N)
        rows = []
        for k in range(27):
            row = t2[k:k + 1, :]
            if shifts[k]:
                row = pltpu.roll(row, shifts[k], axis=1)
            rows.append(row * m_ref[k:k + 1, :])
        while len(rows) > 1:                         # log-depth tree reduce
            nxt = [rows[i] + rows[i + 1] for i in range(0, len(rows) - 1, 2)]
            if len(rows) % 2:
                nxt.append(rows[-1])
            rows = nxt
        d = rows[0]                                  # (1, N) coarse logit diff
                                                     # (conv2 bias already in)

        # --- separable trilinear x8 upsample (all f32) ---------------------
        stage1 = jnp.dot(a_ref[...] * d, s_ref[...],
                         preferred_element_type=jnp.float32)      # (B*Do, H*W)
        for b in range(B):                           # per-batch slab: lower
            up = jnp.dot(stage1[b * Do:(b + 1) * Do, :], hw_ref[...],
                         preferred_element_type=jnp.float32)      # (Do, Ho*Wo)
            p0 = pl.reciprocal(1.0 + jnp.exp(-up), approx=True)   # sigmoid
            o_ref[0, b, 0] = p0
            o_ref[0, b, 1] = 1.0 - p0

    return kernel


# ---------------------------------------------------------------------------
# Forward pass for the whole module (3 branches in one pallas_call)
# ---------------------------------------------------------------------------
def supervise_label_forward(inputs, params, scale=8):
    # inputs: 3 arrays (B, Cin, D, H, W);  params: 3 tuples
    #   (w1 (3,3,3,Cin,32), b1 (32,), w2 (3,3,3,32,2), b2 (2,))
    shapes = {tuple(x.shape) for x in inputs}
    assert len(shapes) == 1, "fused path assumes the 3 inputs share a shape"
    B, Cin, D, H, W = inputs[0].shape
    P = D * H * W
    N = B * P
    HW = H * W
    K1 = 27 * Cin
    mdst, A, S, MhwT, deltas, (Do, Ho, Wo) = build_geometry(B, D, H, W, scale)

    # raw inputs, batch folded into the lane axis: (3, Cin, B*P)
    xs = jnp.stack(inputs)                                        # (3,B,Cin,D,H,W)
    xs = jnp.transpose(xs, (0, 2, 1, 3, 4, 5)).reshape(3, Cin, N)

    # conv1 weights: bias folded in as an extra column, plus a constant "ones"
    # output channel (row 32) used to carry the conv2-difference bias.
    # conv2 difference weights: extra column hits only the centre tap so the
    # constant channel contributes exactly (b2[0]-b2[1]) at every voxel.
    w1_list, wd_list = [], []
    for (w1, b1, w2, b2) in params:
        w1m = jnp.concatenate([w1.reshape(K1, 32).T, b1[:, None]], axis=1)
        ones_row = jnp.concatenate([jnp.zeros((1, K1), jnp.float32),
                                    jnp.ones((1, 1), jnp.float32)], axis=1)
        w1_list.append(jnp.concatenate([w1m, ones_row], axis=0))  # (33, K1+1)
        wdiff = (w2[..., 0] - w2[..., 1]).reshape(27, 32)
        bcol = jnp.zeros((27, 1), jnp.float32).at[13, 0].set(b2[0] - b2[1])
        wd_list.append(jnp.concatenate([wdiff, bcol], axis=1))    # (27, 33)
    w1a = jnp.stack(w1_list)                                      # (3, 33, K1+1)
    wd = jnp.stack(wd_list)                                       # (3, 27, 33)

    kernel = make_branch_kernel(Cin, N, B, Do, deltas)
    out = pl.pallas_call(
        kernel,
        out_shape=jax.ShapeDtypeStruct((3, B, 2, Do, Ho * Wo), jnp.float32),
        grid=(3,),
        in_specs=[
            pl.BlockSpec((1, Cin, N),     lambda r: (r, 0, 0)),   # raw input
            pl.BlockSpec((1, 33, K1 + 1), lambda r: (r, 0, 0)),   # conv1 (+b1)
            pl.BlockSpec((1, 27, 33),     lambda r: (r, 0, 0)),   # conv2 diff
            pl.BlockSpec((27, N),         lambda r: (0, 0)),      # tap masks
            pl.BlockSpec((B * Do, N),     lambda r: (0, 0)),      # depth ups.
            pl.BlockSpec((N, HW),         lambda r: (0, 0)),      # lane->HW sel
            pl.BlockSpec((HW, Ho * Wo),   lambda r: (0, 0)),      # Mhw^T
        ],
        out_specs=pl.BlockSpec((1, B, 2, Do, Ho * Wo),
                               lambda r: (r, 0, 0, 0, 0)),
        scratch_shapes=[pltpu.VMEM((K1 + 1, N), jnp.float32)],    # patch matrix
        compiler_params=pltpu.CompilerParams(
            dimension_semantics=("parallel",)),
    )(xs, w1a, wd, mdst, A, S, MhwT)

    out = out.reshape(3, B, 2, Do, Ho, Wo)                        # free reshape
    return {'01': out[0], '02': out[1], '04': out[2]}


# ---------------------------------------------------------------------------
# Pure-JAX reference (high precision) for the correctness check
# ---------------------------------------------------------------------------
def ref_branch(x_ncdhw, w1, b1, w2, b2, scale):
    hp = jax.lax.Precision.HIGHEST
    x = jnp.transpose(x_ncdhw, (0, 2, 3, 4, 1))
    dn = ('NDHWC', 'DHWIO', 'NDHWC')
    h = jax.lax.conv_general_dilated(x, w1, (1, 1, 1), 'SAME',
                                     dimension_numbers=dn, precision=hp) + b1
    h = jax.lax.conv_general_dilated(h, w2, (1, 1, 1), 'SAME',
                                     dimension_numbers=dn, precision=hp) + b2
    Bb, D, H, W, C = h.shape
    Md = interp_matrix_1d(D, scale)
    Mh = interp_matrix_1d(H, scale)
    Mw = interp_matrix_1d(W, scale)
    M = jnp.asarray(np.kron(Md, np.kron(Mh, Mw)), jnp.float32)   # (Nout, Nin)
    hf = jnp.transpose(h, (0, 4, 1, 2, 3)).reshape(Bb, C, D * H * W)
    up = jnp.einsum('bck,nk->bcn', hf, M, precision=hp)
    up = up.reshape(Bb, C, D * scale, H * scale, W * scale)
    return jax.nn.softmax(up, axis=1)


def init_conv_params(key, cin, cout):
    kw, kb = jax.random.split(key)
    bound = 1.0 / np.sqrt(cin * 27)
    w = jax.random.uniform(kw, (3, 3, 3, cin, cout), jnp.float32, -bound, bound)
    b = jax.random.uniform(kb, (cout,), jnp.float32, -bound, bound)
    return w, b


if __name__ == "__main__":
    key = jax.random.PRNGKey(0)
    B, Cin, D, H, W = 2, 4, 4, 4, 4      # item_future_num = 4
    scale = 8

    keys = jax.random.split(key, 9)
    params = []
    for i in range(3):
        w1, b1 = init_conv_params(keys[2 * i], Cin, 32)
        w2, b2 = init_conv_params(keys[2 * i + 1], 32, 2)
        params.append((w1, b1, w2, b2))

    x1 = jax.random.normal(keys[6], (B, Cin, D, H, W), jnp.float32)
    x2 = jax.random.normal(keys[7], (B, Cin, D, H, W), jnp.float32)
    x4 = jax.random.normal(keys[8], (B, Cin, D, H, W), jnp.float32)

    fwd = jax.jit(lambda a, b, c: supervise_label_forward([a, b, c], params, scale))
    loss = fwd(x1, x2, x4)
    jax.block_until_ready(loss)

    # correctness: all three branches against a high-precision pure-JAX reference
    assert loss['01'].shape == (B, 2, D * scale, H * scale, W * scale)
    refs = {'01': ref_branch(x1, *params[0], scale),
            '02': ref_branch(x2, *params[1], scale),
            '04': ref_branch(x4, *params[2], scale)}
    for name in ('01', '02', '04'):
        assert bool(jnp.allclose(loss[name], refs[name], atol=2e-3, rtol=2e-3)), name
        assert bool(jnp.allclose(jnp.sum(loss[name], axis=1), 1.0, atol=1e-5))

    print("KERNEL_OK")
</pallas_src>

<mosaic_0001>
module attributes {stable_mosaic.version = 11 : i64} {
  func.func @kernel(%arg0: i32, %arg1: memref<1x4x128xf32, #tpu.memory_space<vmem>>, %arg2: memref<1x33x109xf32, #tpu.memory_space<vmem>>, %arg3: memref<1x27x33xf32, #tpu.memory_space<vmem>>, %arg4: memref<27x128xf32, #tpu.memory_space<vmem>>, %arg5: memref<64x128xf32, #tpu.memory_space<vmem>>, %arg6: memref<128x16xf32, #tpu.memory_space<vmem>>, %arg7: memref<16x1024xf32, #tpu.memory_space<vmem>>, %arg8: memref<1x2x2x32x1024xf32, #tpu.memory_space<vmem>>, %arg9: memref<109x128xf32, #tpu.memory_space<vmem>>) attributes {dimension_semantics = [#tpu.dimension_semantics<parallel>], iteration_bounds = array<i64: 3>, scalar_prefetch = 0 : i64, scratch_operands = 1 : i64, tpu.core_type = #tpu.core_type<tc>, window_params = [{transform_indices = @transform_0, window_bounds = array<i64: 1, 4, 128>}, {transform_indices = @transform_1, window_bounds = array<i64: 1, 33, 109>}, {transform_indices = @transform_2, window_bounds = array<i64: 1, 27, 33>}, {pipeline_mode = #tpu.pipeline_mode<synchronous>, transform_indices = @transform_3, window_bounds = array<i64: 27, 128>}, {pipeline_mode = #tpu.pipeline_mode<synchronous>, transform_indices = @transform_4, window_bounds = array<i64: 64, 128>}, {pipeline_mode = #tpu.pipeline_mode<synchronous>, transform_indices = @transform_5, window_bounds = array<i64: 128, 16>}, {pipeline_mode = #tpu.pipeline_mode<synchronous>, transform_indices = @transform_6, window_bounds = array<i64: 16, 1024>}, {transform_indices = @transform_7, window_bounds = array<i64: 1, 2, 2, 32, 1024>}]} {
    %c0 = arith.constant 0 : index
    %c0_0 = arith.constant 0 : index
    %c0_1 = arith.constant 0 : index
    %0 = vector.load %arg1[%c0, %c0_0, %c0_1] : memref<1x4x128xf32, #tpu.memory_space<vmem>>, vector<1x4x128xf32>
    %1 = vector.shape_cast %0 : vector<1x4x128xf32> to vector<4x128xf32>
    %c21_i32 = arith.constant 21 : i32
    %2 = tpu.dynamic_rotate %1 by %c21_i32 dim 1 : vector<4x128xf32>, i32 -> vector<4x128xf32>
    %c0_2 = arith.constant 0 : index
    %c0_3 = arith.constant 0 : index
    %3 = vector.load %arg4[%c0_2, %c0_3] : memref<27x128xf32, #tpu.memory_space<vmem>>, vector<1x128xf32>
    %4 = vector.broadcast %3 : vector<1x128xf32> to vector<4x128xf32>
    %5 = arith.mulf %2, %4 : vector<4x128xf32>
    %c0_4 = arith.constant 0 : index
    %c0_5 = arith.constant 0 : index
    %6 = vector.load %arg9[%c0_4, %c0_5] : memref<109x128xf32, #tpu.memory_space<vmem>>, vector<4x128xf32>
    tpu.vector_store %arg9[%c0_4, %c0_5], %5 {strides = array<i32>} : memref<109x128xf32, #tpu.memory_space<vmem>>, vector<4x128xf32>,
    %c20_i32 = arith.constant 20 : i32
    %7 = tpu.dynamic_rotate %1 by %c20_i32 dim 1 : vector<4x128xf32>, i32 -> vector<4x128xf32>
    %c1 = arith.constant 1 : index
    %c0_6 = arith.constant 0 : index
    %8 = vector.load %arg4[%c1, %c0_6] : memref<27x128xf32, #tpu.memory_space<vmem>>, vector<1x128xf32>
    %9 = vector.broadcast %8 : vector<1x128xf32> to vector<4x128xf32>
    %10 = arith.mulf %7, %9 : vector<4x128xf32>
    %c4 = arith.constant 4 : index
    %c0_7 = arith.constant 0 : index
    %11 = vector.load %arg9[%c4, %c0_7] : memref<109x128xf32, #tpu.memory_space<vmem>>, vector<4x128xf32>
    tpu.vector_store %arg9[%c4, %c0_7], %10 {strides = array<i32>} : memref<109x128xf32, #tpu.memory_space<vmem>>, vector<4x128xf32>,
    %c19_i32 = arith.constant 19 : i32
    %12 = tpu.dynamic_rotate %1 by %c19_i32 dim 1 : vector<4x128xf32>, i32 -> vector<4x128xf32>
    %c2 = arith.constant 2 : index
    %c0_8 = arith.constant 0 : index
    %13 = vector.load %arg4[%c2, %c0_8] : memref<27x128xf32, #tpu.memory_space<vmem>>, vector<1x128xf32>
    %14 = vector.broadcast %13 : vector<1x128xf32> to vector<4x128xf32>
    %15 = arith.mulf %12, %14 : vector<4x128xf32>
    %c8 = arith.constant 8 : index
    %c0_9 = arith.constant 0 : index
    %16 = vector.load %arg9[%c8, %c0_9] : memref<109x128xf32, #tpu.memory_space<vmem>>, vector<4x128xf32>
    tpu.vector_store %arg9[%c8, %c0_9], %15 {strides = array<i32>} : memref<109x128xf32, #tpu.memory_space<vmem>>, vector<4x128xf32>,
    %c17_i32 = arith.constant 17 : i32
    %17 = tpu.dynamic_rotate %1 by %c17_i32 dim 1 : vector<4x128xf32>, i32 -> vector<4x128xf32>
    %c3 = arith.constant 3 : index
    %c0_10 = arith.constant 0 : index
    %18 = vector.load %arg4[%c3, %c0_10] : memref<27x128xf32, #tpu.memory_space<vmem>>, vector<1x128xf32>
    %19 = vector.broadcast %18 : vector<1x128xf32> to vector<4x128xf32>
    %20 = arith.mulf %17, %19 : vector<4x128xf32>
    %c12 = arith.constant 12 : index
    %c0_11 = arith.constant 0 : index
    %21 = vector.load %arg9[%c12, %c0_11] : memref<109x128xf32, #tpu.memory_space<vmem>>, vector<4x128xf32>
    tpu.vector_store %arg9[%c12, %c0_11], %20 {strides = array<i32>} : memref<109x128xf32, #tpu.memory_space<vmem>>, vector<4x128xf32>,
    %c16_i32 = arith.constant 16 : i32
    %22 = tpu.dynamic_rotate %1 by %c16_i32 dim 1 : vector<4x128xf32>, i32 -> vector<4x128xf32>
    %c4_12 = arith.constant 4 : index
    %c0_13 = arith.constant 0 : index
    %23 = vector.load %arg4[%c4_12, %c0_13] : memref<27x128xf32, #tpu.memory_space<vmem>>, vector<1x128xf32>
    %24 = vector.broadcast %23 : vector<1x128xf32> to vector<4x128xf32>
    %25 = arith.mulf %22, %24 : vector<4x128xf32>
    %c16 = arith.constant 16 : index
    %c0_14 = arith.constant 0 : index
    %26 = vector.load %arg9[%c16, %c0_14] : memref<109x128xf32, #tpu.memory_space<vmem>>, vector<4x128xf32>
    tpu.vector_store %arg9[%c16, %c0_14], %25 {strides = array<i32>} : memref<109x128xf32, #tpu.memory_space<vmem>>, vector<4x128xf32>,
    %c15_i32 = arith.constant 15 : i32
    %27 = tpu.dynamic_rotate %1 by %c15_i32 dim 1 : vector<4x128xf32>, i32 -> vector<4x128xf32>
    %c5 = arith.constant 5 : index
    %c0_15 = arith.constant 0 : index
    %28 = vector.load %arg4[%c5, %c0_15] : memref<27x128xf32, #tpu.memory_space<vmem>>, vector<1x128xf32>
    %29 = vector.broadcast %28 : vector<1x128xf32> to vector<4x128xf32>
    %30 = arith.mulf %27, %29 : vector<4x128xf32>
    %c20 = arith.constant 20 : index
    %c0_16 = arith.constant 0 : index
    %31 = vector.load %arg9[%c20, %c0_16] : memref<109x128xf32, #tpu.memory_space<vmem>>, vector<4x128xf32>
    tpu.vector_store %arg9[%c20, %c0_16], %30 {strides = array<i32>} : memref<109x128xf32, #tpu.memory_space<vmem>>, vector<4x128xf32>,
    %c13_i32 = arith.constant 13 : i32
    %32 = tpu.dynamic_rotate %1 by %c13_i32 dim 1 : vector<4x128xf32>, i32 -> vector<4x128xf32>
    %c6 = arith.constant 6 : index
    %c0_17 = arith.constant 0 : index
    %33 = vector.load %arg4[%c6, %c0_17] : memref<27x128xf32, #tpu.memory_space<vmem>>, vector<1x128xf32>
    %34 = vector.broadcast %33 : vector<1x128xf32> to vector<4x128xf32>
    %35 = arith.mulf %32, %34 : vector<4x128xf32>
    %c24 = arith.constant 24 : index
    %c0_18 = arith.constant 0 : index
    %36 = vector.load %arg9[%c24, %c0_18] : memref<109x128xf32, #tpu.memory_space<vmem>>, vector<4x128xf32>
    tpu.vector_store %arg9[%c24, %c0_18], %35 {strides = array<i32>} : memref<109x128xf32, #tpu.memory_space<vmem>>, vector<4x128xf32>,
    %c12_i32 = arith.constant 12 : i32
    %37 = tpu.dynamic_rotate %1 by %c12_i32 dim 1 : vector<4x128xf32>, i32 -> vector<4x128xf32>
    %c7 = arith.constant 7 : index
    %c0_19 = arith.constant 0 : index
    %38 = vector.load %arg4[%c7, %c0_19] : memref<27x128xf32, #tpu.memory_space<vmem>>, vector<1x128xf32>
    %39 = vector.broadcast %38 : vector<1x128xf32> to vector<4x128xf32>
    %40 = arith.mulf %37, %39 : vector<4x128xf32>
    %c28 = arith.constant 28 : index
    %c0_20 = arith.constant 0 : index
    %41 = vector.load %arg9[%c28, %c0_20] : memref<109x128xf32, #tpu.memory_space<vmem>>, vector<4x128xf32>
    tpu.vector_store %arg9[%c28, %c0_20], %40 {strides = array<i32>} : memref<109x128xf32, #tpu.memory_space<vmem>>, vector<4x128xf32>,
    %c11_i32 = arith.constant 11 : i32
    %42 = tpu.dynamic_rotate %1 by %c11_i32 dim 1 : vector<4x128xf32>, i32 -> vector<4x128xf32>
    %c8_21 = arith.constant 8 : index
    %c0_22 = arith.constant 0 : index
    %43 = vector.load %arg4[%c8_21, %c0_22] : memref<27x128xf32, #tpu.memory_space<vmem>>, vector<1x128xf32>
    %44 = vector.broadcast %43 : vector<1x128xf32> to vector<4x128xf32>
    %45 = arith.mulf %42, %44 : vector<4x128xf32>
    %c32 = arith.constant 32 : index
    %c0_23 = arith.constant 0 : index
    %46 = vector.load %arg9[%c32, %c0_23] : memref<109x128xf32, #tpu.memory_space<vmem>>, vector<4x128xf32>
    tpu.vector_store %arg9[%c32, %c0_23], %45 {strides = array<i32>} : memref<109x128xf32, #tpu.memory_space<vmem>>, vector<4x128xf32>,
    %c5_i32 = arith.constant 5 : i32
    %47 = tpu.dynamic_rotate %1 by %c5_i32 dim 1 : vector<4x128xf32>, i32 -> vector<4x128xf32>
    %c9 = arith.constant 9 : index
    %c0_24 = arith.constant 0 : index
    %48 = vector.load %arg4[%c9, %c0_24] : memref<27x128xf32, #tpu.memory_space<vmem>>, vector<1x128xf32>
    %49 = vector.broadcast %48 : vector<1x128xf32> to vector<4x128xf32>
    %50 = arith.mulf %47, %49 : vector<4x128xf32>
    %c36 = arith.constant 36 : index
    %c0_25 = arith.constant 0 : index
    %51 = vector.load %arg9[%c36, %c0_25] : memref<109x128xf32, #tpu.memory_space<vmem>>, vector<4x128xf32>
    tpu.vector_store %arg9[%c36, %c0_25], %50 {strides = array<i32>} : memref<109x128xf32, #tpu.memory_space<vmem>>, vector<4x128xf32>,
    %c4_i32 = arith.constant 4 : i32
    %52 = tpu.dynamic_rotate %1 by %c4_i32 dim 1 : vector<4x128xf32>, i32 -> vector<4x128xf32>
    %c10 = arith.constant 10 : index
    %c0_26 = arith.constant 0 : index
    %53 = vector.load %arg4[%c10, %c0_26] : memref<27x128xf32, #tpu.memory_space<vmem>>, vector<1x128xf32>
    %54 = vector.broadcast %53 : vector<1x128xf32> to vector<4x128xf32>
    %55 = arith.mulf %52, %54 : vector<4x128xf32>
    %c40 = arith.constant 40 : index
    %c0_27 = arith.constant 0 : index
    %56 = vector.load %arg9[%c40, %c0_27] : memref<109x128xf32, #tpu.memory_space<vmem>>, vector<4x128xf32>
    tpu.vector_store %arg9[%c40, %c0_27], %55 {strides = array<i32>} : memref<109x128xf32, #tpu.memory_space<vmem>>, vector<4x128xf32>,
    %c3_i32 = arith.constant 3 : i32
    %57 = tpu.dynamic_rotate %1 by %c3_i32 dim 1 : vector<4x128xf32>, i32 -> vector<4x128xf32>
    %c11 = arith.constant 11 : index
    %c0_28 = arith.constant 0 : index
    %58 = vector.load %arg4[%c11, %c0_28] : memref<27x128xf32, #tpu.memory_space<vmem>>, vector<1x128xf32>
    %59 = vector.broadcast %58 : vector<1x128xf32> to vector<4x128xf32>
    %60 = arith.mulf %57, %59 : vector<4x128xf32>
    %c44 = arith.constant 44 : index
    %c0_29 = arith.constant 0 : index
    %61 = vector.load %arg9[%c44, %c0_29] : memref<109x128xf32, #tpu.memory_space<vmem>>, vector<4x128xf32>
    tpu.vector_store %arg9[%c44, %c0_29], %60 {strides = array<i32>} : memref<109x128xf32, #tpu.memory_space<vmem>>, vector<4x128xf32>,
    %c1_i32 = arith.constant 1 : i32
    %62 = tpu.dynamic_rotate %1 by %c1_i32 dim 1 : vector<4x128xf32>, i32 -> vector<4x128xf32>
    %c12_30 = arith.constant 12 : index
    %c0_31 = arith.constant 0 : index
    %63 = vector.load %arg4[%c12_30, %c0_31] : memref<27x128xf32, #tpu.memory_space<vmem>>, vector<1x128xf32>
    %64 = vector.broadcast %63 : vector<1x128xf32> to vector<4x128xf32>
    %65 = arith.mulf %62, %64 : vector<4x128xf32>
    %c48 = arith.constant 48 : index
    %c0_32 = arith.constant 0 : index
    %66 = vector.load %arg9[%c48, %c0_32] : memref<109x128xf32, #tpu.memory_space<vmem>>, vector<4x128xf32>
    tpu.vector_store %arg9[%c48, %c0_32], %65 {strides = array<i32>} : memref<109x128xf32, #tpu.memory_space<vmem>>, vector<4x128xf32>,
    %c13 = arith.constant 13 : index
    %c0_33 = arith.constant 0 : index
    %67 = vector.load %arg4[%c13, %c0_33] : memref<27x128xf32, #tpu.memory_space<vmem>>, vector<1x128xf32>
    %68 = vector.broadcast %67 : vector<1x128xf32> to vector<4x128xf32>
    %69 = arith.mulf %1, %68 : vector<4x128xf32>
    %c52 = arith.constant 52 : index
    %c0_34 = arith.constant 0 : index
    %70 = vector.load %arg9[%c52, %c0_34] : memref<109x128xf32, #tpu.memory_space<vmem>>, vector<4x128xf32>
    tpu.vector_store %arg9[%c52, %c0_34], %69 {strides = array<i32>} : memref<109x128xf32, #tpu.memory_space<vmem>>, vector<4x128xf32>,
    %c127_i32 = arith.constant 127 : i32
    %71 = tpu.dynamic_rotate %1 by %c127_i32 dim 1 : vector<4x128xf32>, i32 -> vector<4x128xf32>
    %c14 = arith.constant 14 : index
    %c0_35 = arith.constant 0 : index
    %72 = vector.load %arg4[%c14, %c0_35] : memref<27x128xf32, #tpu.memory_space<vmem>>, vector<1x128xf32>
    %73 = vector.broadcast %72 : vector<1x128xf32> to vector<4x128xf32>
    %74 = arith.mulf %71, %73 : vector<4x128xf32>
    %c56 = arith.constant 56 : index
    %c0_36 = arith.constant 0 : index
    %75 = vector.load %arg9[%c56, %c0_36] : memref<109x128xf32, #tpu.memory_space<vmem>>, vector<4x128xf32>
    tpu.vector_store %arg9[%c56, %c0_36], %74 {strides = array<i32>} : memref<109x128xf32, #tpu.memory_space<vmem>>, vector<4x128xf32>,
    %c125_i32 = arith.constant 125 : i32
    %76 = tpu.dynamic_rotate %1 by %c125_i32 dim 1 : vector<4x128xf32>, i32 -> vector<4x128xf32>
    %c15 = arith.constant 15 : index
    %c0_37 = arith.constant 0 : index
    %77 = vector.load %arg4[%c15, %c0_37] : memref<27x128xf32, #tpu.memory_space<vmem>>, vector<1x128xf32>
    %78 = vector.broadcast %77 : vector<1x128xf32> to vector<4x128xf32>
    %79 = arith.mulf %76, %78 : vector<4x128xf32>
    %c60 = arith.constant 60 : index
    %c0_38 = arith.constant 0 : index
    %80 = vector.load %arg9[%c60, %c0_38] : memref<109x128xf32, #tpu.memory_space<vmem>>, vector<4x128xf32>
    tpu.vector_store %arg9[%c60, %c0_38], %79 {strides = array<i32>} : memref<109x128xf32, #tpu.memory_space<vmem>>, vector<4x128xf32>,
    %c124_i32 = arith.constant 124 : i32
    %81 = tpu.dynamic_rotate %1 by %c124_i32 dim 1 : vector<4x128xf32>, i32 -> vector<4x128xf32>
    %c16_39 = arith.constant 16 : index
    %c0_40 = arith.constant 0 : index
    %82 = vector.load %arg4[%c16_39, %c0_40] : memref<27x128xf32, #tpu.memory_space<vmem>>, vector<1x128xf32>
    %83 = vector.broadcast %82 : vector<1x128xf32> to vector<4x128xf32>
    %84 = arith.mulf %81, %83 : vector<4x128xf32>
    %c64 = arith.constant 64 : index
    %c0_41 = arith.constant 0 : index
    %85 = vector.load %arg9[%c64, %c0_41] : memref<109x128xf32, #tpu.memory_space<vmem>>, vector<4x128xf32>
    tpu.vector_store %arg9[%c64, %c0_41], %84 {strides = array<i32>} : memref<109x128xf32, #tpu.memory_space<vmem>>, vector<4x128xf32>,
    %c123_i32 = arith.constant 123 : i32
    %86 = tpu.dynamic_rotate %1 by %c123_i32 dim 1 : vector<4x128xf32>, i32 -> vector<4x128xf32>
    %c17 = arith.constant 17 : index
    %c0_42 = arith.constant 0 : index
    %87 = vector.load %arg4[%c17, %c0_42] : memref<27x128xf32, #tpu.memory_space<vmem>>, vector<1x128xf32>
    %88 = vector.broadcast %87 : vector<1x128xf32> to vector<4x128xf32>
    %89 = arith.mulf %86, %88 : vector<4x128xf32>
    %c68 = arith.constant 68 : index
    %c0_43 = arith.constant 0 : index
    %90 = vector.load %arg9[%c68, %c0_43] : memref<109x128xf32, #tpu.memory_space<vmem>>, vector<4x128xf32>
    tpu.vector_store %arg9[%c68, %c0_43], %89 {strides = array<i32>} : memref<109x128xf32, #tpu.memory_space<vmem>>, vector<4x128xf32>,
    %c117_i32 = arith.constant 117 : i32
    %91 = tpu.dynamic_rotate %1 by %c117_i32 dim 1 : vector<4x128xf32>, i32 -> vector<4x128xf32>
    %c18 = arith.constant 18 : index
    %c0_44 = arith.constant 0 : index
    %92 = vector.load %arg4[%c18, %c0_44] : memref<27x128xf32, #tpu.memory_space<vmem>>, vector<1x128xf32>
    %93 = vector.broadcast %92 : vector<1x128xf32> to vector<4x128xf32>
    %94 = arith.mulf %91, %93 : vector<4x128xf32>
    %c72 = arith.constant 72 : index
    %c0_45 = arith.constant 0 : index
    %95 = vector.load %arg9[%c72, %c0_45] : memref<109x128xf32, #tpu.memory_space<vmem>>, vector<4x128xf32>
    tpu.vector_store %arg9[%c72, %c0_45], %94 {strides = array<i32>} : memref<109x128xf32, #tpu.memory_space<vmem>>, vector<4x128xf32>,
    %c116_i32 = arith.constant 116 : i32
    %96 = tpu.dynamic_rotate %1 by %c116_i32 dim 1 : vector<4x128xf32>, i32 -> vector<4x128xf32>
    %c19 = arith.constant 19 : index
    %c0_46 = arith.constant 0 : index
    %97 = vector.load %arg4[%c19, %c0_46] : memref<27x128xf32, #tpu.memory_space<vmem>>, vector<1x128xf32>
    %98 = vector.broadcast %97 : vector<1x128xf32> to vector<4x128xf32>
    %99 = arith.mulf %96, %98 : vector<4x128xf32>
    %c76 = arith.constant 76 : index
    %c0_47 = arith.constant 0 : index
    %100 = vector.load %arg9[%c76, %c0_47] : memref<109x128xf32, #tpu.memory_space<vmem>>, vector<4x128xf32>
    tpu.vector_store %arg9[%c76, %c0_47], %99 {strides = array<i32>} : memref<109x128xf32, #tpu.memory_space<vmem>>, vector<4x128xf32>,
    %c115_i32 = arith.constant 115 : i32
    %101 = tpu.dynamic_rotate %1 by %c115_i32 dim 1 : vector<4x128xf32>, i32 -> vector<4x128xf32>
    %c20_48 = arith.constant 20 : index
    %c0_49 = arith.constant 0 : index
    %102 = vector.load %arg4[%c20_48, %c0_49] : memref<27x128xf32, #tpu.memory_space<vmem>>, vector<1x128xf32>
    %103 = vector.broadcast %102 : vector<1x128xf32> to vector<4x128xf32>
    %104 = arith.mulf %101, %103 : vector<4x128xf32>
    %c80 = arith.constant 80 : index
    %c0_50 = arith.constant 0 : index
    %105 = vector.load %arg9[%c80, %c0_50] : memref<109x128xf32, #tpu.memory_space<vmem>>, vector<4x128xf32>
    tpu.vector_store %arg9[%c80, %c0_50], %104 {strides = array<i32>} : memref<109x128xf32, #tpu.memory_space<vmem>>, vector<4x128xf32>,
    %c113_i32 = arith.constant 113 : i32
    %106 = tpu.dynamic_rotate %1 by %c113_i32 dim 1 : vector<4x128xf32>, i32 -> vector<4x128xf32>
    %c21 = arith.constant 21 : index
    %c0_51 = arith.constant 0 : index
    %107 = vector.load %arg4[%c21, %c0_51] : memref<27x128xf32, #tpu.memory_space<vmem>>, vector<1x128xf32>
    %108 = vector.broadcast %107 : vector<1x128xf32> to vector<4x128xf32>
    %109 = arith.mulf %106, %108 : vector<4x128xf32>
    %c84 = arith.constant 84 : index
    %c0_52 = arith.constant 0 : index
    %110 = vector.load %arg9[%c84, %c0_52] : memref<109x128xf32, #tpu.memory_space<vmem>>, vector<4x128xf32>
    tpu.vector_store %arg9[%c84, %c0_52], %109 {strides = array<i32>} : memref<109x128xf32, #tpu.memory_space<vmem>>, vector<4x128xf32>,
    %c112_i32 = arith.constant 112 : i32
    %111 = tpu.dynamic_rotate %1 by %c112_i32 dim 1 : vector<4x128xf32>, i32 -> vector<4x128xf32>
    %c22 = arith.constant 22 : index
    %c0_53 = arith.constant 0 : index
    %112 = vector.load %arg4[%c22, %c0_53] : memref<27x128xf32, #tpu.memory_space<vmem>>, vector<1x128xf32>
    %113 = vector.broadcast %112 : vector<1x128xf32> to vector<4x128xf32>
    %114 = arith.mulf %111, %113 : vector<4x128xf32>
    %c88 = arith.constant 88 : index
    %c0_54 = arith.constant 0 : index
    %115 = vector.load %arg9[%c88, %c0_54] : memref<109x128xf32, #tpu.memory_space<vmem>>, vector<4x128xf32>
    tpu.vector_store %arg9[%c88, %c0_54], %114 {strides = array<i32>} : memref<109x128xf32, #tpu.memory_space<vmem>>, vector<4x128xf32>,
    %c111_i32 = arith.constant 111 : i32
    %116 = tpu.dynamic_rotate %1 by %c111_i32 dim 1 : vector<4x128xf32>, i32 -> vector<4x128xf32>
    %c23 = arith.constant 23 : index
    %c0_55 = arith.constant 0 : index
    %117 = vector.load %arg4[%c23, %c0_55] : memref<27x128xf32, #tpu.memory_space<vmem>>, vector<1x128xf32>
    %118 = vector.broadcast %117 : vector<1x128xf32> to vector<4x128xf32>
    %119 = arith.mulf %116, %118 : vector<4x128xf32>
    %c92 = arith.constant 92 : index
    %c0_56 = arith.constant 0 : index
    %120 = vector.load %arg9[%c92, %c0_56] : memref<109x128xf32, #tpu.memory_space<vmem>>, vector<4x128xf32>
    tpu.vector_store %arg9[%c92, %c0_56], %119 {strides = array<i32>} : memref<109x128xf32, #tpu.memory_space<vmem>>, vector<4x128xf32>,
    %c109_i32 = arith.constant 109 : i32
    %121 = tpu.dynamic_rotate %1 by %c109_i32 dim 1 : vector<4x128xf32>, i32 -> vector<4x128xf32>
    %c24_57 = arith.constant 24 : index
    %c0_58 = arith.constant 0 : index
    %122 = vector.load %arg4[%c24_57, %c0_58] : memref<27x128xf32, #tpu.memory_space<vmem>>, vector<1x128xf32>
    %123 = vector.broadcast %122 : vector<1x128xf32> to vector<4x128xf32>
    %124 = arith.mulf %121, %123 : vector<4x128xf32>
    %c96 = arith.constant 96 : index
    %c0_59 = arith.constant 0 : index
    %125 = vector.load %arg9[%c96, %c0_59] : memref<109x128xf32, #tpu.memory_space<vmem>>, vector<4x128xf32>
    tpu.vector_store %arg9[%c96, %c0_59], %124 {strides = array<i32>} : memref<109x128xf32, #tpu.memory_space<vmem>>, vector<4x128xf32>,
    %c108_i32 = arith.constant 108 : i32
    %126 = tpu.dynamic_rotate %1 by %c108_i32 dim 1 : vector<4x128xf32>, i32 -> vector<4x128xf32>
    %c25 = arith.constant 25 : index
    %c0_60 = arith.constant 0 : index
    %127 = vector.load %arg4[%c25, %c0_60] : memref<27x128xf32, #tpu.memory_space<vmem>>, vector<1x128xf32>
    %128 = vector.broadcast %127 : vector<1x128xf32> to vector<4x128xf32>
    %129 = arith.mulf %126, %128 : vector<4x128xf32>
    %c100 = arith.constant 100 : index
    %c0_61 = arith.constant 0 : index
    %130 = vector.load %arg9[%c100, %c0_61] : memref<109x128xf32, #tpu.memory_space<vmem>>, vector<4x128xf32>
    tpu.vector_store %arg9[%c100, %c0_61], %129 {strides = array<i32>} : memref<109x128xf32, #tpu.memory_space<vmem>>, vector<4x128xf32>,
    %c107_i32 = arith.constant 107 : i32
    %131 = tpu.dynamic_rotate %1 by %c107_i32 dim 1 : vector<4x128xf32>, i32 -> vector<4x128xf32>
    %c26 = arith.constant 26 : index
    %c0_62 = arith.constant 0 : index
    %132 = vector.load %arg4[%c26, %c0_62] : memref<27x128xf32, #tpu.memory_space<vmem>>, vector<1x128xf32>
    %133 = vector.broadcast %132 : vector<1x128xf32> to vector<4x128xf32>
    %134 = arith.mulf %131, %133 : vector<4x128xf32>
    %c104 = arith.constant 104 : index
    %c0_63 = arith.constant 0 : index
    %135 = vector.load %arg9[%c104, %c0_63] : memref<109x128xf32, #tpu.memory_space<vmem>>, vector<4x128xf32>
    tpu.vector_store %arg9[%c104, %c0_63], %134 {strides = array<i32>} : memref<109x128xf32, #tpu.memory_space<vmem>>, vector<4x128xf32>,
    %cst = arith.constant 1.000000e+00 : f32
    %136 = vector.broadcast %cst : f32 to vector<1x128xf32>
    %c108 = arith.constant 108 : index
    %c0_64 = arith.constant 0 : index
    %137 = vector.load %arg9[%c108, %c0_64] : memref<109x128xf32, #tpu.memory_space<vmem>>, vector<1x128xf32>
    tpu.vector_store %arg9[%c108, %c0_64], %136 {strides = array<i32>} : memref<109x128xf32, #tpu.memory_space<vmem>>, vector<1x128xf32>,
    %c0_65 = arith.constant 0 : index
    %c0_66 = arith.constant 0 : index
    %c0_67 = arith.constant 0 : index
    %138 = vector.load %arg2[%c0_65, %c0_66, %c0_67] : memref<1x33x109xf32, #tpu.memory_space<vmem>>, vector<1x33x109xf32>
    %139 = vector.shape_cast %138 : vector<1x33x109xf32> to vector<33x109xf32>
    %c0_68 = arith.constant 0 : index
    %c0_69 = arith.constant 0 : index
    %140 = vector.load %arg9[%c0_68, %c0_69] : memref<109x128xf32, #tpu.memory_space<vmem>>, vector<109x128xf32>
    %cst_70 = arith.constant dense<0.000000e+00> : vector<33x128xf32>
    %141 = tpu.matmul %139, %140, %cst_70 {dimension_numbers = #tpu.dot_dimension_numbers<[1], [0], [0], [1], [0, 0, 1, 1], [], []>} : vector<33x109xf32>, vector<109x128xf32>, vector<33x128xf32> -> vector<33x128xf32>
    %c0_71 = arith.constant 0 : index
    %c0_72 = arith.constant 0 : index
    %c0_73 = arith.constant 0 : index
    %142 = vector.load %arg3[%c0_71, %c0_72, %c0_73] : memref<1x27x33xf32, #tpu.memory_space<vmem>>, vector<1x27x33xf32>
    %143 = vector.shape_cast %142 : vector<1x27x33xf32> to vector<27x33xf32>
    %cst_74 = arith.constant dense<0.000000e+00> : vector<27x128xf32>
    %144 = tpu.matmul %143, %141, %cst_74 {dimension_numbers = #tpu.dot_dimension_numbers<[1], [0], [0], [1], [0, 0, 1, 1], [], []>} : vector<27x33xf32>, vector<33x128xf32>, vector<27x128xf32> -> vector<27x128xf32>
    %145 = vector.extract_strided_slice %144 {offsets = [0, 0], sizes = [1, 128], strides = [1, 1]} : vector<27x128xf32> to vector<1x128xf32>
    %c21_i32_75 = arith.constant 21 : i32
    %146 = tpu.dynamic_rotate %145 by %c21_i32_75 dim 1 : vector<1x128xf32>, i32 -> vector<1x128xf32>
    %c0_76 = arith.constant 0 : index
    %c0_77 = arith.constant 0 : index
    %147 = vector.load %arg4[%c0_76, %c0_77] : memref<27x128xf32, #tpu.memory_space<vmem>>, vector<1x128xf32>
    %148 = arith.mulf %146, %147 : vector<1x128xf32>
    %149 = vector.extract_strided_slice %144 {offsets = [1, 0], sizes = [1, 128], strides = [1, 1]} : vector<27x128xf32> to vector<1x128xf32>
    %c20_i32_78 = arith.constant 20 : i32
    %150 = tpu.dynamic_rotate %149 by %c20_i32_78 dim 1 : vector<1x128xf32>, i32 -> vector<1x128xf32>
    %c1_79 = arith.constant 1 : index
    %c0_80 = arith.constant 0 : index
    %151 = vector.load %arg4[%c1_79, %c0_80] : memref<27x128xf32, #tpu.memory_space<vmem>>, vector<1x128xf32>
    %152 = arith.mulf %150, %151 : vector<1x128xf32>
    %153 = vector.extract_strided_slice %144 {offsets = [2, 0], sizes = [1, 128], strides = [1, 1]} : vector<27x128xf32> to vector<1x128xf32>
    %c19_i32_81 = arith.constant 19 : i32
    %154 = tpu.dynamic_rotate %153 by %c19_i32_81 dim 1 : vector<1x128xf32>, i32 -> vector<1x128xf32>
    %c2_82 = arith.constant 2 : index
    %c0_83 = arith.constant 0 : index
    %155 = vector.load %arg4[%c2_82, %c0_83] : memref<27x128xf32, #tpu.memory_space<vmem>>, vector<1x128xf32>
    %156 = arith.mulf %154, %155 : vector<1x128xf32>
    %157 = vector.extract_strided_slice %144 {offsets = [3, 0], sizes = [1, 128], strides = [1, 1]} : vector<27x128xf32> to vector<1x128xf32>
    %c17_i32_84 = arith.constant 17 : i32
    %158 = tpu.dynamic_rotate %157 by %c17_i32_84 dim 1 : vector<1x128xf32>, i32 -> vector<1x128xf32>
    %c3_85 = arith.constant 3 : index
    %c0_86 = arith.constant 0 : index
    %159 = vector.load %arg4[%c3_85, %c0_86] : memref<27x128xf32, #tpu.memory_space<vmem>>, vector<1x128xf32>
    %160 = arith.mulf %158, %159 : vector<1x128xf32>
    %161 = vector.extract_strided_slice %144 {offsets = [4, 0], sizes = [1, 128], strides = [1, 1]} : vector<27x128xf32> to vector<1x128xf32>
    %c16_i32_87 = arith.constant 16 : i32
    %162 = tpu.dynamic_rotate %161 by %c16_i32_87 dim 1 : vector<1x128xf32>, i32 -> vector<1x128xf32>
    %c4_88 = arith.constant 4 : index
    %c0_89 = arith.constant 0 : index
    %163 = vector.load %arg4[%c4_88, %c0_89] : memref<27x128xf32, #tpu.memory_space<vmem>>, vector<1x128xf32>
    %164 = arith.mulf %162, %163 : vector<1x128xf32>
    %165 = vector.extract_strided_slice %144 {offsets = [5, 0], sizes = [1, 128], strides = [1, 1]} : vector<27x128xf32> to vector<1x128xf32>
    %c15_i32_90 = arith.constant 15 : i32
    %166 = tpu.dynamic_rotate %165 by %c15_i32_90 dim 1 : vector<1x128xf32>, i32 -> vector<1x128xf32>
    %c5_91 = arith.constant 5 : index
    %c0_92 = arith.constant 0 : index
    %167 = vector.load %arg4[%c5_91, %c0_92] : memref<27x128xf32, #tpu.memory_space<vmem>>, vector<1x128xf32>
    %168 = arith.mulf %166, %167 : vector<1x128xf32>
    %169 = vector.extract_strided_slice %144 {offsets = [6, 0], sizes = [1, 128], strides = [1, 1]} : vector<27x128xf32> to vector<1x128xf32>
    %c13_i32_93 = arith.constant 13 : i32
    %170 = tpu.dynamic_rotate %169 by %c13_i32_93 dim 1 : vector<1x128xf32>, i32 -> vector<1x128xf32>
    %c6_94 = arith.constant 6 : index
    %c0_95 = arith.constant 0 : index
    %171 = vector.load %arg4[%c6_94, %c0_95] : memref<27x128xf32, #tpu.memory_space<vmem>>, vector<1x128xf32>
    %172 = arith.mulf %170, %171 : vector<1x128xf32>
    %173 = vector.extract_strided_slice %144 {offsets = [7, 0], sizes = [1, 128], strides = [1, 1]} : vector<27x128xf32> to vector<1x128xf32>
    %c12_i32_96 = arith.constant 12 : i32
    %174 = tpu.dynamic_rotate %173 by %c12_i32_96 dim 1 : vector<1x128xf32>, i32 -> vector<1x128xf32>
    %c7_97 = arith.constant 7 : index
    %c0_98 = arith.constant 0 : index
    %175 = vector.load %arg4[%c7_97, %c0_98] : memref<27x128xf32, #tpu.memory_space<vmem>>, vector<1x128xf32>
    %176 = arith.mulf %174, %175 : vector<1x128xf32>
    %177 = vector.extract_strided_slice %144 {offsets = [8, 0], sizes = [1, 128], strides = [1, 1]} : vector<27x128xf32> to vector<1x128xf32>
    %c11_i32_99 = arith.constant 11 : i32
    %178 = tpu.dynamic_rotate %177 by %c11_i32_99 dim 1 : vector<1x128xf32>, i32 -> vector<1x128xf32>
    %c8_100 = arith.constant 8 : index
    %c0_101 = arith.constant 0 : index
    %179 = vector.load %arg4[%c8_100, %c0_101] : memref<27x128xf32, #tpu.memory_space<vmem>>, vector<1x128xf32>
    %180 = arith.mulf %178, %179 : vector<1x128xf32>
    %181 = vector.extract_strided_slice %144 {offsets = [9, 0], sizes = [1, 128], strides = [1, 1]} : vector<27x128xf32> to vector<1x128xf32>
    %c5_i32_102 = arith.constant 5 : i32
    %182 = tpu.dynamic_rotate %181 by %c5_i32_102 dim 1 : vector<1x128xf32>, i32 -> vector<1x128xf32>
    %c9_103 = arith.constant 9 : index
    %c0_104 = arith.constant 0 : index
    %183 = vector.load %arg4[%c9_103, %c0_104] : memref<27x128xf32, #tpu.memory_space<vmem>>, vector<1x128xf32>
    %184 = arith.mulf %182, %183 : vector<1x128xf32>
    %185 = vector.extract_strided_slice %144 {offsets = [10, 0], sizes = [1, 128], strides = [1, 1]} : vector<27x128xf32> to vector<1x128xf32>
    %c4_i32_105 = arith.constant 4 : i32
    %186 = tpu.dynamic_rotate %185 by %c4_i32_105 dim 1 : vector<1x128xf32>, i32 -> vector<1x128xf32>
    %c10_106 = arith.constant 10 : index
    %c0_107 = arith.constant 0 : index
    %187 = vector.load %arg4[%c10_106, %c0_107] : memref<27x128xf32, #tpu.memory_space<vmem>>, vector<1x128xf32>
    %188 = arith.mulf %186, %187 : vector<1x128xf32>
    %189 = vector.extract_strided_slice %144 {offsets = [11, 0], sizes = [1, 128], strides = [1, 1]} : vector<27x128xf32> to vector<1x128xf32>
    %c3_i32_108 = arith.constant 3 : i32
    %190 = tpu.dynamic_rotate %189 by %c3_i32_108 dim 1 : vector<1x128xf32>, i32 -> vector<1x128xf32>
    %c11_109 = arith.constant 11 : index
    %c0_110 = arith.constant 0 : index
    %191 = vector.load %arg4[%c11_109, %c0_110] : memref<27x128xf32, #tpu.memory_space<vmem>>, vector<1x128xf32>
    %192 = arith.mulf %190, %191 : vector<1x128xf32>
    %193 = vector.extract_strided_slice %144 {offsets = [12, 0], sizes = [1, 128], strides = [1, 1]} : vector<27x128xf32> to vector<1x128xf32>
    %c1_i32_111 = arith.constant 1 : i32
    %194 = tpu.dynamic_rotate %193 by %c1_i32_111 dim 1 : vector<1x128xf32>, i32 -> vector<1x128xf32>
    %c12_112 = arith.constant 12 : index
    %c0_113 = arith.constant 0 : index
    %195 = vector.load %arg4[%c12_112, %c0_113] : memref<27x128xf32, #tpu.memory_space<vmem>>, vector<1x128xf32>
    %196 = arith.mulf %194, %195 : vector<1x128xf32>
    %197 = vector.extract_strided_slice %144 {offsets = [13, 0], sizes = [1, 128], strides = [1, 1]} : vector<27x128xf32> to vector<1x128xf32>
    %c13_114 = arith.constant 13 : index
    %c0_115 = arith.constant 0 : index
    %198 = vector.load %arg4[%c13_114, %c0_115] : memref<27x128xf32, #tpu.memory_space<vmem>>, vector<1x128xf32>
    %199 = arith.mulf %197, %198 : vector<1x128xf32>
    %200 = vector.extract_strided_slice %144 {offsets = [14, 0], sizes = [1, 128], strides = [1, 1]} : vector<27x128xf32> to vector<1x128xf32>
    %c127_i32_116 = arith.constant 127 : i32
    %201 = tpu.dynamic_rotate %200 by %c127_i32_116 dim 1 : vector<1x128xf32>, i32 -> vector<1x128xf32>
    %c14_117 = arith.constant 14 : index
    %c0_118 = arith.constant 0 : index
    %202 = vector.load %arg4[%c14_117, %c0_118] : memref<27x128xf32, #tpu.memory_space<vmem>>, vector<1x128xf32>
    %203 = arith.mulf %201, %202 : vector<1x128xf32>
    %204 = vector.extract_strided_slice %144 {offsets = [15, 0], sizes = [1, 128], strides = [1, 1]} : vector<27x128xf32> to vector<1x128xf32>
    %c125_i32_119 = arith.constant 125 : i32
    %205 = tpu.dynamic_rotate %204 by %c125_i32_119 dim 1 : vector<1x128xf32>, i32 -> vector<1x128xf32>
    %c15_120 = arith.constant 15 : index
    %c0_121 = arith.constant 0 : index
    %206 = vector.load %arg4[%c15_120, %c0_121] : memref<27x128xf32, #tpu.memory_space<vmem>>, vector<1x128xf32>
    %207 = arith.mulf %205, %206 : vector<1x128xf32>
    %208 = vector.extract_strided_slice %144 {offsets = [16, 0], sizes = [1, 128], strides = [1, 1]} : vector<27x128xf32> to vector<1x128xf32>
    %c124_i32_122 = arith.constant 124 : i32
    %209 = tpu.dynamic_rotate %208 by %c124_i32_122 dim 1 : vector<1x128xf32>, i32 -> vector<1x128xf32>
    %c16_123 = arith.constant 16 : index
    %c0_124 = arith.constant 0 : index
    %210 = vector.load %arg4[%c16_123, %c0_124] : memref<27x128xf32, #tpu.memory_space<vmem>>, vector<1x128xf32>
    %211 = arith.mulf %209, %210 : vector<1x128xf32>
    %212 = vector.extract_strided_slice %144 {offsets = [17, 0], sizes = [1, 128], strides = [1, 1]} : vector<27x128xf32> to vector<1x128xf32>
    %c123_i32_125 = arith.constant 123 : i32
    %213 = tpu.dynamic_rotate %212 by %c123_i32_125 dim 1 : vector<1x128xf32>, i32 -> vector<1x128xf32>
    %c17_126 = arith.constant 17 : index
    %c0_127 = arith.constant 0 : index
    %214 = vector.load %arg4[%c17_126, %c0_127] : memref<27x128xf32, #tpu.memory_space<vmem>>, vector<1x128xf32>
    %215 = arith.mulf %213, %214 : vector<1x128xf32>
    %216 = vector.extract_strided_slice %144 {offsets = [18, 0], sizes = [1, 128], strides = [1, 1]} : vector<27x128xf32> to vector<1x128xf32>
    %c117_i32_128 = arith.constant 117 : i32
    %217 = tpu.dynamic_rotate %216 by %c117_i32_128 dim 1 : vector<1x128xf32>, i32 -> vector<1x128xf32>
    %c18_129 = arith.constant 18 : index
    %c0_130 = arith.constant 0 : index
    %218 = vector.load %arg4[%c18_129, %c0_130] : memref<27x128xf32, #tpu.memory_space<vmem>>, vector<1x128xf32>
    %219 = arith.mulf %217, %218 : vector<1x128xf32>
    %220 = vector.extract_strided_slice %144 {offsets = [19, 0], sizes = [1, 128], strides = [1, 1]} : vector<27x128xf32> to vector<1x128xf32>
    %c116_i32_131 = arith.constant 116 : i32
    %221 = tpu.dynamic_rotate %220 by %c116_i32_131 dim 1 : vector<1x128xf32>, i32 -> vector<1x128xf32>
    %c19_132 = arith.constant 19 : index
    %c0_133 = arith.constant 0 : index
    %222 = vector.load %arg4[%c19_132, %c0_133] : memref<27x128xf32, #tpu.memory_space<vmem>>, vector<1x128xf32>
    %223 = arith.mulf %221, %222 : vector<1x128xf32>
    %224 = vector.extract_strided_slice %144 {offsets = [20, 0], sizes = [1, 128], strides = [1, 1]} : vector<27x128xf32> to vector<1x128xf32>
    %c115_i32_134 = arith.constant 115 : i32
    %225 = tpu.dynamic_rotate %224 by %c115_i32_134 dim 1 : vector<1x128xf32>, i32 -> vector<1x128xf32>
    %c20_135 = arith.constant 20 : index
    %c0_136 = arith.constant 0 : index
    %226 = vector.load %arg4[%c20_135, %c0_136] : memref<27x128xf32, #tpu.memory_space<vmem>>, vector<1x128xf32>
    %227 = arith.mulf %225, %226 : vector<1x128xf32>
    %228 = vector.extract_strided_slice %144 {offsets = [21, 0], sizes = [1, 128], strides = [1, 1]} : vector<27x128xf32> to vector<1x128xf32>
    %c113_i32_137 = arith.constant 113 : i32
    %229 = tpu.dynamic_rotate %228 by %c113_i32_137 dim 1 : vector<1x128xf32>, i32 -> vector<1x128xf32>
    %c21_138 = arith.constant 21 : index
    %c0_139 = arith.constant 0 : index
    %230 = vector.load %arg4[%c21_138, %c0_139] : memref<27x128xf32, #tpu.memory_space<vmem>>, vector<1x128xf32>
    %231 = arith.mulf %229, %230 : vector<1x128xf32>
    %232 = vector.extract_strided_slice %144 {offsets = [22, 0], sizes = [1, 128], strides = [1, 1]} : vector<27x128xf32> to vector<1x128xf32>
    %c112_i32_140 = arith.constant 112 : i32
    %233 = tpu.dynamic_rotate %232 by %c112_i32_140 dim 1 : vector<1x128xf32>, i32 -> vector<1x128xf32>
    %c22_141 = arith.constant 22 : index
    %c0_142 = arith.constant 0 : index
    %234 = vector.load %arg4[%c22_141, %c0_142] : memref<27x128xf32, #tpu.memory_space<vmem>>, vector<1x128xf32>
    %235 = arith.mulf %233, %234 : vector<1x128xf32>
    %236 = vector.extract_strided_slice %144 {offsets = [23, 0], sizes = [1, 128], strides = [1, 1]} : vector<27x128xf32> to vector<1x128xf32>
    %c111_i32_143 = arith.constant 111 : i32
    %237 = tpu.dynamic_rotate %236 by %c111_i32_143 dim 1 : vector<1x128xf32>, i32 -> vector<1x128xf32>
    %c23_144 = arith.constant 23 : index
    %c0_145 = arith.constant 0 : index
    %238 = vector.load %arg4[%c23_144, %c0_145] : memref<27x128xf32, #tpu.memory_space<vmem>>, vector<1x128xf32>
    %239 = arith.mulf %237, %238 : vector<1x128xf32>
    %240 = vector.extract_strided_slice %144 {offsets = [24, 0], sizes = [1, 128], strides = [1, 1]} : vector<27x128xf32> to vector<1x128xf32>
    %c109_i32_146 = arith.constant 109 : i32
    %241 = tpu.dynamic_rotate %240 by %c109_i32_146 dim 1 : vector<1x128xf32>, i32 -> vector<1x128xf32>
    %c24_147 = arith.constant 24 : index
    %c0_148 = arith.constant 0 : index
    %242 = vector.load %arg4[%c24_147, %c0_148] : memref<27x128xf32, #tpu.memory_space<vmem>>, vector<1x128xf32>
    %243 = arith.mulf %241, %242 : vector<1x128xf32>
    %244 = vector.extract_strided_slice %144 {offsets = [25, 0], sizes = [1, 128], strides = [1, 1]} : vector<27x128xf32> to vector<1x128xf32>
    %c108_i32_149 = arith.constant 108 : i32
    %245 = tpu.dynamic_rotate %244 by %c108_i32_149 dim 1 : vector<1x128xf32>, i32 -> vector<1x128xf32>
    %c25_150 = arith.constant 25 : index
    %c0_151 = arith.constant 0 : index
    %246 = vector.load %arg4[%c25_150, %c0_151] : memref<27x128xf32, #tpu.memory_space<vmem>>, vector<1x128xf32>
    %247 = arith.mulf %245, %246 : vector<1x128xf32>
    %248 = vector.extract_strided_slice %144 {offsets = [26, 0], sizes = [1, 128], strides = [1, 1]} : vector<27x128xf32> to vector<1x128xf32>
    %c107_i32_152 = arith.constant 107 : i32
    %249 = tpu.dynamic_rotate %248 by %c107_i32_152 dim 1 : vector<1x128xf32>, i32 -> vector<1x128xf32>
    %c26_153 = arith.constant 26 : index
    %c0_154 = arith.constant 0 : index
    %250 = vector.load %arg4[%c26_153, %c0_154] : memref<27x128xf32, #tpu.memory_space<vmem>>, vector<1x128xf32>
    %251 = arith.mulf %249, %250 : vector<1x128xf32>
    %252 = arith.addf %148, %152 : vector<1x128xf32>
    %253 = arith.addf %156, %160 : vector<1x128xf32>
    %254 = arith.addf %164, %168 : vector<1x128xf32>
    %255 = arith.addf %172, %176 : vector<1x128xf32>
    %256 = arith.addf %180, %184 : vector<1x128xf32>
    %257 = arith.addf %188, %192 : vector<1x128xf32>
    %258 = arith.addf %196, %199 : vector<1x128xf32>
    %259 = arith.addf %203, %207 : vector<1x128xf32>
    %260 = arith.addf %211, %215 : vector<1x128xf32>
    %261 = arith.addf %219, %223 : vector<1x128xf32>
    %262 = arith.addf %227, %231 : vector<1x128xf32>
    %263 = arith.addf %235, %239 : vector<1x128xf32>
    %264 = arith.addf %243, %247 : vector<1x128xf32>
    %265 = arith.addf %252, %253 : vector<1x128xf32>
    %266 = arith.addf %254, %255 : vector<1x128xf32>
    %267 = arith.addf %256, %257 : vector<1x128xf32>
    %268 = arith.addf %258, %259 : vector<1x128xf32>
    %269 = arith.addf %260, %261 : vector<1x128xf32>
    %270 = arith.addf %262, %263 : vector<1x128xf32>
    %271 = arith.addf %264, %251 : vector<1x128xf32>
    %272 = arith.addf %265, %266 : vector<1x128xf32>
    %273 = arith.addf %267, %268 : vector<1x128xf32>
    %274 = arith.addf %269, %270 : vector<1x128xf32>
    %275 = arith.addf %272, %273 : vector<1x128xf32>
    %276 = arith.addf %274, %271 : vector<1x128xf32>
    %277 = arith.addf %275, %276 : vector<1x128xf32>
    %c0_155 = arith.constant 0 : index
    %c0_156 = arith.constant 0 : index
    %278 = vector.load %arg5[%c0_155, %c0_156] : memref<64x128xf32, #tpu.memory_space<vmem>>, vector<64x128xf32>
    %279 = vector.broadcast %277 : vector<1x128xf32> to vector<64x128xf32>
    %280 = arith.mulf %278, %279 : vector<64x128xf32>
    %c0_157 = arith.constant 0 : index
    %c0_158 = arith.constant 0 : index
    %281 = vector.load %arg6[%c0_157, %c0_158] : memref<128x16xf32, #tpu.memory_space<vmem>>, vector<128x16xf32>
    %cst_159 = arith.constant dense<0.000000e+00> : vector<64x16xf32>
    %282 = tpu.matmul %280, %281, %cst_159 {dimension_numbers = #tpu.dot_dimension_numbers<[1], [0], [0], [1], [0, 0, 1, 1], [], []>} : vector<64x128xf32>, vector<128x16xf32>, vector<64x16xf32> -> vector<64x16xf32>
    %283 = vector.extract_strided_slice %282 {offsets = [0, 0], sizes = [32, 16], strides = [1, 1]} : vector<64x16xf32> to vector<32x16xf32>
    %c0_160 = arith.constant 0 : index
    %c0_161 = arith.constant 0 : index
    %284 = vector.load %arg7[%c0_160, %c0_161] : memref<16x1024xf32, #tpu.memory_space<vmem>>, vector<16x1024xf32>
    %cst_162 = arith.constant dense<0.000000e+00> : vector<32x1024xf32>
    %285 = tpu.matmul %283, %284, %cst_162 {dimension_numbers = #tpu.dot_dimension_numbers<[1], [0], [0], [1], [0, 0, 1, 1], [], []>} : vector<32x16xf32>, vector<16x1024xf32>, vector<32x1024xf32> -> vector<32x1024xf32>
    %cst_163 = arith.constant 0.000000e+00 : f32
    %286 = vector.broadcast %cst_163 : f32 to vector<32x1024xf32>
    %287 = arith.subf %286, %285 : vector<32x1024xf32>
    %288 = math.exp %287 : vector<32x1024xf32>
    %cst_164 = arith.constant 1.000000e+00 : f32
    %289 = vector.broadcast %cst_164 : f32 to vector<32x1024xf32>
    %290 = arith.addf %289, %288 : vector<32x1024xf32>
    %291 = tpu.reciprocal %290 {approx = true} : vector<32x1024xf32> -> vector<32x1024xf32>
    %c0_165 = arith.constant 0 : index
    %c0_166 = arith.constant 0 : index
    %c0_167 = arith.constant 0 : index
    %c0_168 = arith.constant 0 : index
    %c0_169 = arith.constant 0 : index
    %292 = vector.load %arg8[%c0_165, %c0_166, %c0_167, %c0_168, %c0_169] : memref<1x2x2x32x1024xf32, #tpu.memory_space<vmem>>, vector<1x1x1x32x1024xf32>
    %293 = vector.shape_cast %292 : vector<1x1x1x32x1024xf32> to vector<32x1024xf32>
    %294 = vector.shape_cast %291 : vector<32x1024xf32> to vector<1x1x1x32x1024xf32>
    tpu.vector_store %arg8[%c0_165, %c0_166, %c0_167, %c0_168, %c0_169], %294 {strides = array<i32>} : memref<1x2x2x32x1024xf32, #tpu.memory_space<vmem>>, vector<1x1x1x32x1024xf32>,
    %cst_170 = arith.constant 1.000000e+00 : f32
    %295 = vector.broadcast %cst_170 : f32 to vector<32x1024xf32>
    %296 = arith.subf %295, %291 : vector<32x1024xf32>
    %c0_171 = arith.constant 0 : index
    %c0_172 = arith.constant 0 : index
    %c1_173 = arith.constant 1 : index
    %c0_174 = arith.constant 0 : index
    %c0_175 = arith.constant 0 : index
    %297 = vector.load %arg8[%c0_171, %c0_172, %c1_173, %c0_174, %c0_175] : memref<1x2x2x32x1024xf32, #tpu.memory_space<vmem>>, vector<1x1x1x32x1024xf32>
    %298 = vector.shape_cast %297 : vector<1x1x1x32x1024xf32> to vector<32x1024xf32>
    %299 = vector.shape_cast %296 : vector<32x1024xf32> to vector<1x1x1x32x1024xf32>
    tpu.vector_store %arg8[%c0_171, %c0_172, %c1_173, %c0_174, %c0_175], %299 {strides = array<i32>} : memref<1x2x2x32x1024xf32, #tpu.memory_space<vmem>>, vector<1x1x1x32x1024xf32>,
    %300 = vector.extract_strided_slice %282 {offsets = [32, 0], sizes = [32, 16], strides = [1, 1]} : vector<64x16xf32> to vector<32x16xf32>
    %c0_176 = arith.constant 0 : index
    %c0_177 = arith.constant 0 : index
    %301 = vector.load %arg7[%c0_176, %c0_177] : memref<16x1024xf32, #tpu.memory_space<vmem>>, vector<16x1024xf32>
    %cst_178 = arith.constant dense<0.000000e+00> : vector<32x1024xf32>
    %302 = tpu.matmul %300, %301, %cst_178 {dimension_numbers = #tpu.dot_dimension_numbers<[1], [0], [0], [1], [0, 0, 1, 1], [], []>} : vector<32x16xf32>, vector<16x1024xf32>, vector<32x1024xf32> -> vector<32x1024xf32>
    %cst_179 = arith.constant 0.000000e+00 : f32
    %303 = vector.broadcast %cst_179 : f32 to vector<32x1024xf32>
    %304 = arith.subf %303, %302 : vector<32x1024xf32>
    %305 = math.exp %304 : vector<32x1024xf32>
    %cst_180 = arith.constant 1.000000e+00 : f32
    %306 = vector.broadcast %cst_180 : f32 to vector<32x1024xf32>
    %307 = arith.addf %306, %305 : vector<32x1024xf32>
    %308 = tpu.reciprocal %307 {approx = true} : vector<32x1024xf32> -> vector<32x1024xf32>
    %c0_181 = arith.constant 0 : index
    %c1_182 = arith.constant 1 : index
    %c0_183 = arith.constant 0 : index
    %c0_184 = arith.constant 0 : index
    %c0_185 = arith.constant 0 : index
    %309 = vector.load %arg8[%c0_181, %c1_182, %c0_183, %c0_184, %c0_185] : memref<1x2x2x32x1024xf32, #tpu.memory_space<vmem>>, vector<1x1x1x32x1024xf32>
    %310 = vector.shape_cast %309 : vector<1x1x1x32x1024xf32> to vector<32x1024xf32>
    %311 = vector.shape_cast %308 : vector<32x1024xf32> to vector<1x1x1x32x1024xf32>
    tpu.vector_store %arg8[%c0_181, %c1_182, %c0_183, %c0_184, %c0_185], %311 {strides = array<i32>} : memref<1x2x2x32x1024xf32, #tpu.memory_space<vmem>>, vector<1x1x1x32x1024xf32>,
    %cst_186 = arith.constant 1.000000e+00 : f32
    %312 = vector.broadcast %cst_186 : f32 to vector<32x1024xf32>
    %313 = arith.subf %312, %308 : vector<32x1024xf32>
    %c0_187 = arith.constant 0 : index
    %c1_188 = arith.constant 1 : index
    %c1_189 = arith.constant 1 : index
    %c0_190 = arith.constant 0 : index
    %c0_191 = arith.constant 0 : index
    %314 = vector.load %arg8[%c0_187, %c1_188, %c1_189, %c0_190, %c0_191] : memref<1x2x2x32x1024xf32, #tpu.memory_space<vmem>>, vector<1x1x1x32x1024xf32>
    %315 = vector.shape_cast %314 : vector<1x1x1x32x1024xf32> to vector<32x1024xf32>
    %316 = vector.shape_cast %313 : vector<32x1024xf32> to vector<1x1x1x32x1024xf32>
    tpu.vector_store %arg8[%c0_187, %c1_188, %c1_189, %c0_190, %c0_191], %316 {strides = array<i32>} : memref<1x2x2x32x1024xf32, #tpu.memory_space<vmem>>, vector<1x1x1x32x1024xf32>,
    return
  }
  func.func @transform_0(%arg0: i32) -> (i32, i32, i32) {
    %c0_i32 = arith.constant 0 : i32
    %c0_i32_0 = arith.constant 0 : i32
    %c0_i32_1 = arith.constant 0 : i32
    return %arg0, %c0_i32, %c0_i32_0 : i32, i32, i32
  }
  func.func @transform_1(%arg0: i32) -> (i32, i32, i32) {
    %c0_i32 = arith.constant 0 : i32
    %c0_i32_0 = arith.constant 0 : i32
    %c0_i32_1 = arith.constant 0 : i32
    return %arg0, %c0_i32, %c0_i32_0 : i32, i32, i32
  }
  func.func @transform_2(%arg0: i32) -> (i32, i32, i32) {
    %c0_i32 = arith.constant 0 : i32
    %c0_i32_0 = arith.constant 0 : i32
    %c0_i32_1 = arith.constant 0 : i32
    return %arg0, %c0_i32, %c0_i32_0 : i32, i32, i32
  }
  func.func @transform_3(%arg0: i32) -> (i32, i32) {
    %c0_i32 = arith.constant 0 : i32
    %c0_i32_0 = arith.constant 0 : i32
    %c0_i32_1 = arith.constant 0 : i32
    return %c0_i32, %c0_i32_0 : i32, i32
  }
  func.func @transform_4(%arg0: i32) -> (i32, i32) {
    %c0_i32 = arith.constant 0 : i32
    %c0_i32_0 = arith.constant 0 : i32
    %c0_i32_1 = arith.constant 0 : i32
    return %c0_i32, %c0_i32_0 : i32, i32
  }
  func.func @transform_5(%arg0: i32) -> (i32, i32) {
    %c0_i32 = arith.constant 0 : i32
    %c0_i32_0 = arith.constant 0 : i32
    %c0_i32_1 = arith.constant 0 : i32
    return %c0_i32, %c0_i32_0 : i32, i32
  }
  func.func @transform_6(%arg0: i32) -> (i32, i32) {
    %c0_i32 = arith.constant 0 : i32
    %c0_i32_0 = arith.constant 0 : i32
    %c0_i32_1 = arith.constant 0 : i32
    return %c0_i32, %c0_i32_0 : i32, i32
  }
  func.func @transform_7(%arg0: i32) -> (i32, i32, i32, i32, i32) {
    %c0_i32 = arith.constant 0 : i32
    %c0_i32_0 = arith.constant 0 : i32
    %c0_i32_1 = arith.constant 0 : i32
    %c0_i32_2 = arith.constant 0 : i32
    %c0_i32_3 = arith.constant 0 : i32
    return %arg0, %c0_i32, %c0_i32_0, %c0_i32_1, %c0_i32_2 : i32, i32, i32, i32, i32
  }
}

</mosaic_0001>

<bundles_post_ra>
// kernel: squeeze.3
= control target key start
LH: loop header
LB: loop body
LE: loop exit
PB: predicated region body
PF: predicated region fallthrough
CT: control target
= control target key end

     0   :  { %vm2435_vm0 = vcmask 1047556   ;;  %s7582_s14 = smov 96   ;;  %s12463_s0 = inlined_call_operand.vmem [shape: f32[1,2,2,32,1024], index: 0, kind: input, shape index: {}]   ;;  %s12464_s1 = inlined_call_operand.hbm [shape: f32[2,2,32,32,32], index: 1, kind: output, shape index: {}]  }
   0x1   :  { %v6792_v0 = vld [vmem:[%s12463_s0 + $0x2] ss:$8 sm:$0xf]   ;;  %v2433_v2 = vld [vmem:[%s12463_s0] ss:$8 sm:$0xf]  }
   0x2   :  { %v6793_v1 = vld [vmem:[%s12463_s0 + $0x2] ss:$8 sm:$0xf0]   ;;  %v2434_v4 = vld [vmem:[%s12463_s0] ss:$8 sm:$0xf0]  }
   0x3   :  { %v2458_v3 = vsel %vm2435_vm0, %v6793_v1, %v6792_v0  ;;  %v2436_v5 = vsel %vm2435_vm0, %v2434_v4, %v2433_v2  ;;  %v6794_v6 = vld [vmem:[%s12463_s0 + $0x3] ss:$8 sm:$0xf]   ;;  %v6790_v8 = vld [vmem:[%s12463_s0 + $0x1] ss:$8 sm:$0xf]  }
   0x4   :  { %2459 = vrot.lane.b32.xlu1 %v2458_v3, %s7582_s14  ;;  %2437 = vrot.lane.b32.xlu0 %v2436_v5, %s7582_s14  ;;  %v6795_v7 = vld [vmem:[%s12463_s0 + $0x3] ss:$8 sm:$0xf0]   ;;  %v6791_v9 = vld [vmem:[%s12463_s0 + $0x1] ss:$8 sm:$0xf0]  }
   0x5   :  { %v6796_v10 = vld [vmem:[%s12463_s0 + $0x4] ss:$8 sm:$0xf]   ;;  %v2469_v12 = vsel %vm2435_vm0, %v6795_v7, %v6794_v6  ;;  %v2447_v14 = vsel %vm2435_vm0, %v6791_v9, %v6790_v8  ;;  %v6798_v15 = vld [vmem:[%s12463_s0 + $0x5] ss:$8 sm:$0xf]  }
   0x6   :  { %v6797_v11 = vld [vmem:[%s12463_s0 + $0x4] ss:$8 sm:$0xf0]   ;;  %v6799_v16 = vld [vmem:[%s12463_s0 + $0x5] ss:$8 sm:$0xf0]  }
   0x7   :  { %v2480_v13 = vsel %vm2435_vm0, %v6797_v11, %v6796_v10  ;;  %v6802_v17 = vld [vmem:[%s12463_s0 + $0x7] ss:$8 sm:$0xf]   ;;  %v6800_v19 = vld [vmem:[%s12463_s0 + $0x6] ss:$8 sm:$0xf]   ;;  %v2491_v21 = vsel %vm2435_vm0, %v6799_v16, %v6798_v15 }
   0x8   :  { %2481 = vrot.lane.b32.xlu2 %v2480_v13, %s7582_s14  ;;  %v6803_v18 = vld [vmem:[%s12463_s0 + $0x7] ss:$8 sm:$0xf0]   ;;  %v6801_v20 = vld [vmem:[%s12463_s0 + $0x6] ss:$8 sm:$0xf0]  }
   0x9   :  { %v2513_v22 = vsel %vm2435_vm0, %v6803_v18, %v6802_v17  ;;  %v2502_v23 = vsel %vm2435_vm0, %v6801_v20, %v6800_v19 }
   0xc   :  { %2470 = vrot.lane.b32.xlu1 %v2469_v12, %s7582_s14  ;;  %2448 = vrot.lane.b32.xlu0 %v2447_v14, %s7582_s14 }
  0x10   :  { %2492 = vrot.lane.b32.xlu2 %v2491_v21, %s7582_s14 }
  0x11   :  { %2 = vsyncpa [#allocation1], 0  ;;  %v6804_v24 = vld [vmem:[%s12463_s0 + $0x40] ss:$8 sm:$0xf]   ;;  %vm4_vm1 = vcmask 261120  }
  0x12   :  { %v6805_v25 = vld [vmem:[%s12463_s0 + $0x40] ss:$8 sm:$0xf0]   ;;  %v6808_v26 = vld [vmem:[%s12463_s0 + $0x42] ss:$8 sm:$0xf]  }
  0x13   :  { %v6809_v27 = vld [vmem:[%s12463_s0 + $0x42] ss:$8 sm:$0xf0]   ;;  %v6806_v28 = vld [vmem:[%s12463_s0 + $0x41] ss:$8 sm:$0xf]   ;;  %v2524_v30 = vsel %vm2435_vm0, %v6805_v25, %v6804_v24 }
  0x14   :  { %2514 = vrot.lane.b32.xlu1 %v2513_v22, %s7582_s14  ;;  %2503 = vrot.lane.b32.xlu0 %v2502_v23, %s7582_s14  ;;  %v6807_v29 = vld [vmem:[%s12463_s0 + $0x41] ss:$8 sm:$0xf0]   ;;  %v2546_v31 = vsel %vm2435_vm0, %v6809_v27, %v6808_v26  ;;  %v6810_v33 = vld [vmem:[%s12463_s0 + $0x43] ss:$8 sm:$0xf]  }
  0x15   :  { %v2535_v32 = vsel %vm2435_vm0, %v6807_v29, %v6806_v28  ;;  %v6811_v34 = vld [vmem:[%s12463_s0 + $0x43] ss:$8 sm:$0xf0]   ;;  %v6814_v35 = vld [vmem:[%s12463_s0 + $0x45] ss:$8 sm:$0xf]  }
  0x16   :  { %v6815_v36 = vld [vmem:[%s12463_s0 + $0x45] ss:$8 sm:$0xf0]   ;;  %v6812_v37 = vld [vmem:[%s12463_s0 + $0x44] ss:$8 sm:$0xf]   ;;  %v2557_v39 = vsel %vm2435_vm0, %v6811_v34, %v6810_v33 }
  0x17   :  { %v6813_v38 = vld [vmem:[%s12463_s0 + $0x44] ss:$8 sm:$0xf0]   ;;  %v2579_v40 = vsel %vm2435_vm0, %v6815_v36, %v6814_v35  ;;  %v6816_v42 = vld [vmem:[%s12463_s0 + $0x46] ss:$8 sm:$0xf]  }
  0x18   :  { %2525 = vrot.lane.b32.xlu2 %v2524_v30, %s7582_s14  ;;  %v2568_v41 = vsel %vm2435_vm0, %v6813_v38, %v6812_v37  ;;  %v6817_v43 = vld [vmem:[%s12463_s0 + $0x46] ss:$8 sm:$0xf0]   ;;  %v6820_v44 = vld [vmem:[%s12463_s0 + $0x80] ss:$8 sm:$0xf]  }
  0x19   :  { %v6821_v45 = vld [vmem:[%s12463_s0 + $0x80] ss:$8 sm:$0xf0]   ;;  %v6818_v46 = vld [vmem:[%s12463_s0 + $0x47] ss:$8 sm:$0xf]   ;;  %v2590_v48 = vsel %vm2435_vm0, %v6817_v43, %v6816_v42 }
  0x1a   :  { %v6819_v47 = vld [vmem:[%s12463_s0 + $0x47] ss:$8 sm:$0xf0]   ;;  %v2612_v49 = vsel %vm2435_vm0, %v6821_v45, %v6820_v44  ;;  %v6822_v51 = vld [vmem:[%s12463_s0 + $0x81] ss:$8 sm:$0xf]  }
  0x1b   :  { %v2601_v50 = vsel %vm2435_vm0, %v6819_v47, %v6818_v46  ;;  %v6823_v52 = vld [vmem:[%s12463_s0 + $0x81] ss:$8 sm:$0xf0]   ;;  %v6826_v53 = vld [vmem:[%s12463_s0 + $0x83] ss:$8 sm:$0xf]  }
  0x1c   :  { %2547 = vrot.lane.b32.xlu1 %v2546_v31, %s7582_s14  ;;  %2536 = vrot.lane.b32.xlu0 %v2535_v32, %s7582_s14  ;;  %v6827_v54 = vld [vmem:[%s12463_s0 + $0x83] ss:$8 sm:$0xf0]   ;;  %v6824_v55 = vld [vmem:[%s12463_s0 + $0x82] ss:$8 sm:$0xf]   ;;  %v2623_v57 = vsel %vm2435_vm0, %v6823_v52, %v6822_v51 }
  0x1d   :  { %v6825_v56 = vld [vmem:[%s12463_s0 + $0x82] ss:$8 sm:$0xf0]   ;;  %v2645_v58 = vsel %vm2435_vm0, %v6827_v54, %v6826_v53  ;;  %v6828_v60 = vld [vmem:[%s12463_s0 + $0x84] ss:$8 sm:$0xf]  }
  0x1e   :  { %v2634_v59 = vsel %vm2435_vm0, %v6825_v56, %v6824_v55  ;;  %v6829_v61 = vld [vmem:[%s12463_s0 + $0x84] ss:$8 sm:$0xf0]   ;;  %v6832_v62 = vld [vmem:[%s12463_s0 + $0x86] ss:$8 sm:$0xf]  }
  0x1f   :  { %v6833_v63 = vld [vmem:[%s12463_s0 + $0x86] ss:$8 sm:$0xf0]   ;;  %v6830_v0 = vld [vmem:[%s12463_s0 + $0x85] ss:$8 sm:$0xf]   ;;  %v2656_v2 = vsel %vm2435_vm0, %v6829_v61, %v6828_v60 }
  0x20   :  { %2558 = vrot.lane.b32.xlu2 %v2557_v39, %s7582_s14  ;;  %v6831_v1 = vld [vmem:[%s12463_s0 + $0x85] ss:$8 sm:$0xf0]   ;;  %v2678_v3 = vsel %vm2435_vm0, %v6833_v63, %v6832_v62  ;;  %v6834_v5 = vld [vmem:[%s12463_s0 + $0x87] ss:$8 sm:$0xf]  }
  0x21   :  { %v2667_v4 = vsel %vm2435_vm0, %v6831_v1, %v6830_v0  ;;  %v6835_v6 = vld [vmem:[%s12463_s0 + $0x87] ss:$8 sm:$0xf0]   ;;  %v6838_v7 = vld [vmem:[%s12463_s0 + $0xc1] ss:$8 sm:$0xf]  }
  0x22   :  { %v6839_v8 = vld [vmem:[%s12463_s0 + $0xc1] ss:$8 sm:$0xf0]   ;;  %v6836_v9 = vld [vmem:[%s12463_s0 + $0xc0] ss:$8 sm:$0xf]   ;;  %v2689_v11 = vsel %vm2435_vm0, %v6835_v6, %v6834_v5 }
  0x23   :  { %v6837_v10 = vld [vmem:[%s12463_s0 + $0xc0] ss:$8 sm:$0xf0]   ;;  %v2711_v12 = vsel %vm2435_vm0, %v6839_v8, %v6838_v7  ;;  %v6840_v14 = vld [vmem:[%s12463_s0 + $0xc2] ss:$8 sm:$0xf]  }
  0x24   :  { %2580 = vrot.lane.b32.xlu1 %v2579_v40, %s7582_s14  ;;  %2569 = vrot.lane.b32.xlu0 %v2568_v41, %s7582_s14  ;;  %v2700_v13 = vsel %vm2435_vm0, %v6837_v10, %v6836_v9  ;;  %v6841_v15 = vld [vmem:[%s12463_s0 + $0xc2] ss:$8 sm:$0xf0]   ;;  %v6844_v16 = vld [vmem:[%s12463_s0 + $0xc4] ss:$8 sm:$0xf]  }
  0x25   :  { %v6845_v17 = vld [vmem:[%s12463_s0 + $0xc4] ss:$8 sm:$0xf0]   ;;  %v6842_v18 = vld [vmem:[%s12463_s0 + $0xc3] ss:$8 sm:$0xf]   ;;  %v2722_v20 = vsel %vm2435_vm0, %v6841_v15, %v6840_v14 }
  0x26   :  { %v6843_v19 = vld [vmem:[%s12463_s0 + $0xc3] ss:$8 sm:$0xf0]   ;;  %v2744_v21 = vsel %vm2435_vm0, %v6845_v17, %v6844_v16  ;;  %v6846_v23 = vld [vmem:[%s12463_s0 + $0xc5] ss:$8 sm:$0xf]  }
  0x27   :  { %v2733_v22 = vsel %vm2435_vm0, %v6843_v19, %v6842_v18  ;;  %v6847_v24 = vld [vmem:[%s12463_s0 + $0xc5] ss:$8 sm:$0xf0]   ;;  %v6850_v25 = vld [vmem:[%s12463_s0 + $0xc7] ss:$8 sm:$0xf]  }
  0x28   :  { %2591 = vrot.lane.b32.xlu2 %v2590_v48, %s7582_s14  ;;  %v6851_v26 = vld [vmem:[%s12463_s0 + $0xc7] ss:$8 sm:$0xf0]   ;;  %v6848_v27 = vld [vmem:[%s12463_s0 + $0xc6] ss:$8 sm:$0xf]   ;;  %v2755_v29 = vsel %vm2435_vm0, %v6847_v24, %v6846_v23 }
  0x29   :  { %v6849_v28 = vld [vmem:[%s12463_s0 + $0xc6] ss:$8 sm:$0xf0]   ;;  %v2777_v30 = vsel %vm2435_vm0, %v6851_v26, %v6850_v25  ;;  %v6852_v32 = vld [vmem:[%s12463_s0 + $0x100] ss:$8 sm:$0xf]  }
  0x2a   :  { %v2766_v31 = vsel %vm2435_vm0, %v6849_v28, %v6848_v27  ;;  %v6853_v33 = vld [vmem:[%s12463_s0 + $0x100] ss:$8 sm:$0xf0]   ;;  %v6856_v34 = vld [vmem:[%s12463_s0 + $0x102] ss:$8 sm:$0xf]  }
  0x2b   :  { %v6857_v35 = vld [vmem:[%s12463_s0 + $0x102] ss:$8 sm:$0xf0]   ;;  %v6854_v36 = vld [vmem:[%s12463_s0 + $0x101] ss:$8 sm:$0xf]   ;;  %v2788_v38 = vsel %vm2435_vm0, %v6853_v33, %v6852_v32 }
  0x2c   :  { %2613 = vrot.lane.b32.xlu1 %v2612_v49, %s7582_s14  ;;  %2602 = vrot.lane.b32.xlu0 %v2601_v50, %s7582_s14  ;;  %v6855_v37 = vld [vmem:[%s12463_s0 + $0x101] ss:$8 sm:$0xf0]   ;;  %v2810_v39 = vsel %vm2435_vm0, %v6857_v35, %v6856_v34  ;;  %v6858_v41 = vld [vmem:[%s12463_s0 + $0x103] ss:$8 sm:$0xf]  }
  0x2d   :  { %v2799_v40 = vsel %vm2435_vm0, %v6855_v37, %v6854_v36  ;;  %v6859_v42 = vld [vmem:[%s12463_s0 + $0x103] ss:$8 sm:$0xf0]   ;;  %v6862_v43 = vld [vmem:[%s12463_s0 + $0x105] ss:$8 sm:$0xf]  }
  0x2e   :  { %v6863_v44 = vld [vmem:[%s12463_s0 + $0x105] ss:$8 sm:$0xf0]   ;;  %v6860_v45 = vld [vmem:[%s12463_s0 + $0x104] ss:$8 sm:$0xf]   ;;  %v2821_v47 = vsel %vm2435_vm0, %v6859_v42, %v6858_v41 }
  0x2f   :  { %v6861_v46 = vld [vmem:[%s12463_s0 + $0x104] ss:$8 sm:$0xf0]   ;;  %v2843_v48 = vsel %vm2435_vm0, %v6863_v44, %v6862_v43  ;;  %v6864_v51 = vld [vmem:[%s12463_s0 + $0x106] ss:$8 sm:$0xf]  }
  0x30   :  { %2624 = vrot.lane.b32.xlu2 %v2623_v57, %s7582_s14  ;;  %v2832_v49 = vsel %vm2435_vm0, %v6861_v46, %v6860_v45  ;;  %v6865_v52 = vld [vmem:[%s12463_s0 + $0x106] ss:$8 sm:$0xf0]   ;;  %v6868_v53 = vld [vmem:[%s12463_s0 + $0x140] ss:$8 sm:$0xf]  }
  0x31   :  { %v6869_v54 = vld [vmem:[%s12463_s0 + $0x140] ss:$8 sm:$0xf0]   ;;  %v6866_v55 = vld [vmem:[%s12463_s0 + $0x107] ss:$8 sm:$0xf]   ;;  %v2854_v57 = vsel %vm2435_vm0, %v6865_v52, %v6864_v51 }
  0x32   :  { %v6867_v56 = vld [vmem:[%s12463_s0 + $0x107] ss:$8 sm:$0xf0]   ;;  %v6870_v61 = vld [vmem:[%s12463_s0 + $0x141] ss:$8 sm:$0xf]  }
  0x33   :  { %v6871_v62 = vld [vmem:[%s12463_s0 + $0x141] ss:$8 sm:$0xf0]   ;;  %v6874_v63 = vld [vmem:[%s12463_s0 + $0x143] ss:$8 sm:$0xf]  }
  0x34   :  { %2646 = vrot.lane.b32.xlu1 %v2645_v58, %s7582_s14  ;;  %2635 = vrot.lane.b32.xlu0 %v2634_v59, %s7582_s14  ;;  %v2876_v58 = vsel %vm2435_vm0, %v6869_v54, %v6868_v53  ;;  %v2865_v59 = vsel %vm2435_vm0, %v6867_v56, %v6866_v55  ;;  %v6875_v0 = vld [vmem:[%s12463_s0 + $0x143] ss:$8 sm:$0xf0]   ;;  %v6872_v1 = vld [vmem:[%s12463_s0 + $0x142] ss:$8 sm:$0xf]  }
  0x35   :  { %v6876_v7 = vld [vmem:[%s12463_s0 + $0x144] ss:$8 sm:$0xf]   ;;  %v6880_v9 = vld [vmem:[%s12463_s0 + $0x146] ss:$8 sm:$0xf]  }
  0x36   :  { %v6877_v8 = vld [vmem:[%s12463_s0 + $0x144] ss:$8 sm:$0xf0]   ;;  %v6879_v14 = vld [vmem:[%s12463_s0 + $0x145] ss:$8 sm:$0xf0]  }
  0x37   :  { %v2920_v15 = vsel %vm2435_vm0, %v6877_v8, %v6876_v7  ;;  %v6882_v19 = vld [vmem:[%s12463_s0 + $0x147] ss:$8 sm:$0xf]   ;;  %v6887_v23 = vld [vmem:[%s12463_s0 + $0x181] ss:$8 sm:$0xf0]  }
  0x38   :  { %2657 = vrot.lane.b32.xlu2 %v2656_v2, %s7582_s14  ;;  %v6873_v2 = vld [vmem:[%s12463_s0 + $0x142] ss:$8 sm:$0xf0]   ;;  %v6884_v24 = vld [vmem:[%s12463_s0 + $0x180] ss:$8 sm:$0xf]  }
  0x39   :  { %v2898_v5 = vsel %vm2435_vm0, %v6873_v2, %v6872_v1  ;;  %v6885_v26 = vld [vmem:[%s12463_s0 + $0x180] ss:$8 sm:$0xf0]   ;;  %v6889_v32 = vld [vmem:[%s12463_s0 + $0x182] ss:$8 sm:$0xf0]  }
  0x3a   :  { %v6892_v33 = vld [vmem:[%s12463_s0 + $0x184] ss:$8 sm:$0xf]   ;;  %v6890_v36 = vld [vmem:[%s12463_s0 + $0x183] ss:$8 sm:$0xf]  }
  0x3b   :  { %v6893_v35 = vld [vmem:[%s12463_s0 + $0x184] ss:$8 sm:$0xf0]   ;;  %v6894_v43 = vld [vmem:[%s12463_s0 + $0x185] ss:$8 sm:$0xf]  }
  0x3c   :  { %2679 = vrot.lane.b32.xlu1 %v2678_v3, %s7582_s14  ;;  %2668 = vrot.lane.b32.xlu0 %v2667_v4, %s7582_s14  ;;  %v2887_v3 = vsel %vm2435_vm0, %v6871_v62, %v6870_v61  ;;  %v2909_v4 = vsel %vm2435_vm0, %v6875_v0, %v6874_v63  ;;  %v6895_v44 = vld [vmem:[%s12463_s0 + $0x185] ss:$8 sm:$0xf0]   ;;  %v6898_v45 = vld [vmem:[%s12463_s0 + $0x187] ss:$8 sm:$0xf]  }
  0x3d   :  { %v3019_v51 = vsel %vm2435_vm0, %v6895_v44, %v6894_v43  ;;  %v6900_v55 = vld [vmem:[%s12463_s0 + $0x1c0] ss:$8 sm:$0xf]   ;;  %v6903_v62 = vld [vmem:[%s12463_s0 + $0x1c1] ss:$8 sm:$0xf0]  }
  0x3e   :  { %v6901_v56 = vld [vmem:[%s12463_s0 + $0x1c0] ss:$8 sm:$0xf0]   ;;  %v6911_v7 = vld [vmem:[%s12463_s0 + $0x1c5] ss:$8 sm:$0xf0]  }
  0x3f   :  { %v3052_v63 = vsel %vm2435_vm0, %v6901_v56, %v6900_v55  ;;  %v6908_v8 = vld [vmem:[%s12463_s0 + $0x1c4] ss:$8 sm:$0xf]   ;;  %v6929_v43 = vld [vmem:[%s12463_s0 + $0x206] ss:$8 sm:$0xf0]  }
  0x40   :  { %2690 = vrot.lane.b32.xlu2 %v2689_v11, %s7582_s14  ;;  %v6881_v11 = vld [vmem:[%s12463_s0 + $0x146] ss:$8 sm:$0xf0]   ;;  %v6926_v44 = vld [vmem:[%s12463_s0 + $0x205] ss:$8 sm:$0xf]  }
  0x41   :  { %v2942_v16 = vsel %vm2435_vm0, %v6881_v11, %v6880_v9  ;;  %v6935_v55 = vld [vmem:[%s12463_s0 + $0x241] ss:$8 sm:$0xf0]   ;;  %v6932_v56 = vld [vmem:[%s12463_s0 + $0x240] ss:$8 sm:$0xf]  }
  0x42   :  { %s7583_s26 = smov 64   ;;  %s7584_s27 = smov 32  }
  0x43   :  { %s6656_s1 = sshll.u32 %s12464_s1, 4  ;;  %s6657_s1 = int_to_ptr.hbm [resolvable:$true] %s6656_s1 }
  0x44   :  { %2712 = vrot.lane.b32.xlu1 %v2711_v12, %s7582_s14  ;;  %2701 = vrot.lane.b32.xlu0 %v2700_v13, %s7582_s14  ;;  %v6878_v12 = vld [vmem:[%s12463_s0 + $0x145] ss:$8 sm:$0xf]  }
  0x45   :  { %v2931_v17 = vsel %vm2435_vm0, %v6879_v14, %v6878_v12 }
  0x48   :  { %2723 = vrot.lane.b32.xlu2 %v2722_v20, %s7582_s14  ;;  %v6883_v20 = vld [vmem:[%s12463_s0 + $0x147] ss:$8 sm:$0xf0]  }
  0x49   :  { %v2953_v27 = vsel %vm2435_vm0, %v6883_v20, %v6882_v19  ;;  %v6917_v19 = vld [vmem:[%s12463_s0 + $0x200] ss:$8 sm:$0xf0]   ;;  %v6914_v20 = vld [vmem:[%s12463_s0 + $0x1c7] ss:$8 sm:$0xf]  }
  0x4c   :  { %2745 = vrot.lane.b32.xlu1 %v2744_v21, %s7582_s14  ;;  %2734 = vrot.lane.b32.xlu0 %v2733_v22, %s7582_s14  ;;  %v6886_v21 = vld [vmem:[%s12463_s0 + $0x181] ss:$8 sm:$0xf]  }
  0x4d   :  { %v2975_v28 = vsel %vm2435_vm0, %v6887_v23, %v6886_v21 }
  0x50   :  { %2756 = vrot.lane.b32.xlu2 %v2755_v29, %s7582_s14  ;;  %v2964_v29 = vsel %vm2435_vm0, %v6885_v26, %v6884_v24 }
  0x54   :  { %2778 = vrot.lane.b32.xlu1 %v2777_v30, %s7582_s14  ;;  %2767 = vrot.lane.b32.xlu0 %v2766_v31, %s7582_s14  ;;  %v6888_v31 = vld [vmem:[%s12463_s0 + $0x182] ss:$8 sm:$0xf]  }
  0x58   :  { %2789 = vrot.lane.b32.xlu2 %v2788_v38, %s7582_s14  ;;  %v6891_v38 = vld [vmem:[%s12463_s0 + $0x183] ss:$8 sm:$0xf0]  }
  0x59   :  { %v2997_v41 = vsel %vm2435_vm0, %v6891_v38, %v6890_v36 }
  0x5c   :  { %2811 = vrot.lane.b32.xlu1 %v2810_v39, %s7582_s14  ;;  %2800 = vrot.lane.b32.xlu0 %v2799_v40, %s7582_s14  ;;  %v2986_v39 = vsel %vm2435_vm0, %v6889_v32, %v6888_v31  ;;  %v3008_v40 = vsel %vm2435_vm0, %v6893_v35, %v6892_v33  ;;  %v6923_v31 = vld [vmem:[%s12463_s0 + $0x203] ss:$8 sm:$0xf0]   ;;  %v6920_v32 = vld [vmem:[%s12463_s0 + $0x202] ss:$8 sm:$0xf]  }
  0x60   :  { %2822 = vrot.lane.b32.xlu2 %v2821_v47, %s7582_s14  ;;  %v6899_v47 = vld [vmem:[%s12463_s0 + $0x187] ss:$8 sm:$0xf0]  }
  0x61   :  { %v3041_v52 = vsel %vm2435_vm0, %v6899_v47, %v6898_v45 }
  0x62   :  { %v2482_v50 = vpop.permute.xlu2 %2481  }
  0x63   :  { %2485 = vst.msk [vmem:[#allocation0 + $0x81] ss:$4 sm:$0xff] %vm4_vm1, %v2482_v50   ;;  %v6897_v50 = vld [vmem:[%s12463_s0 + $0x186] ss:$8 sm:$0xf0]  }
  0x64   :  { %2844 = vrot.lane.b32.xlu1 %v2843_v48, %s7582_s14  ;;  %2833 = vrot.lane.b32.xlu0 %v2832_v49, %s7582_s14  ;;  %v6896_v48 = vld [vmem:[%s12463_s0 + $0x186] ss:$8 sm:$0xf]  }
  0x65   :  { %v3030_v53 = vsel %vm2435_vm0, %v6897_v50, %v6896_v48 }
  0x68   :  { %2855 = vrot.lane.b32.xlu2 %v2854_v57, %s7582_s14  ;;  %v6904_v57 = vld [vmem:[%s12463_s0 + $0x1c2] ss:$8 sm:$0xf]  }
  0x6a   :  { %v2493_v60 = vpop.permute.xlu2 %2492  }
  0x6b   :  { %2496 = vst.msk [vmem:[#allocation0 + $0xa1] ss:$4 sm:$0xff] %vm4_vm1, %v2493_v60   ;;  %v6902_v60 = vld [vmem:[%s12463_s0 + $0x1c1] ss:$8 sm:$0xf]  }
  0x6c   :  { %2877 = vrot.lane.b32.xlu1 %v2876_v58, %s7582_s14  ;;  %2866 = vrot.lane.b32.xlu0 %v2865_v59, %s7582_s14  ;;  %v6905_v59 = vld [vmem:[%s12463_s0 + $0x1c2] ss:$8 sm:$0xf0]   ;;  %v3063_v1 = vsel %vm2435_vm0, %v6903_v62, %v6902_v60 }
  0x6d   :  { %v3074_v0 = vsel %vm2435_vm0, %v6905_v59, %v6904_v57 }
  0x70   :  { %2888 = vrot.lane.b32.xlu2 %v2887_v3, %s7582_s14  ;;  %v6906_v3 = vld [vmem:[%s12463_s0 + $0x1c3] ss:$8 sm:$0xf]  }
  0x72   :  { %v2526_v6 = vpop.permute.xlu2 %2525  }
  0x73   :  { %2529 = vst.msk [vmem:[#allocation0 + $0x101] ss:$4 sm:$0xff] %vm4_vm1, %v2526_v6  }
  0x74   :  { %2910 = vrot.lane.b32.xlu1 %v2909_v4, %s7582_s14  ;;  %2899 = vrot.lane.b32.xlu0 %v2898_v5, %s7582_s14  ;;  %v6907_v4 = vld [vmem:[%s12463_s0 + $0x1c3] ss:$8 sm:$0xf0]   ;;  %v6910_v5 = vld [vmem:[%s12463_s0 + $0x1c5] ss:$8 sm:$0xf]  }
  0x75   :  { %v3085_v11 = vsel %vm2435_vm0, %v6907_v4, %v6906_v3  ;;  %v3107_v12 = vsel %vm2435_vm0, %v6911_v7, %v6910_v5  ;;  %v6941_v3 = vld [vmem:[%s12463_s0 + $0x244] ss:$8 sm:$0xf0]   ;;  %v6938_v4 = vld [vmem:[%s12463_s0 + $0x243] ss:$8 sm:$0xf]  }
  0x76   :  { %v2460_v10 = vpop.permute.xlu1 %2459   ;;  %v2438_v13 = vpop.permute.xlu0 %2437  }
  0x77   :  { %2463 = vst.msk [vmem:[#allocation0 + $0x41] ss:$4 sm:$0xff] %vm4_vm1, %v2460_v10   ;;  %v6909_v10 = vld [vmem:[%s12463_s0 + $0x1c4] ss:$8 sm:$0xf0]  }
  0x78   :  { %2441 = vst.msk [vmem:[#allocation0 + $0x1] ss:$4 sm:$0xff] %vm4_vm1, %v2438_v13   ;;  %2921 = vrot.lane.b32.xlu2 %v2920_v15, %s7582_s14  ;;  %v3096_v13 = vsel %vm2435_vm0, %v6909_v10, %v6908_v8  ;;  %v6912_v15 = vld [vmem:[%s12463_s0 + $0x1c6] ss:$8 sm:$0xf]  }
  0x7a   :  { %v2559_v18 = vpop.permute.xlu2 %2558  }
  0x7b   :  { %2562 = vst.msk [vmem:[#allocation0 + $0x161] ss:$4 sm:$0xff] %vm4_vm1, %v2559_v18  }
  0x7c   :  { %2943 = vrot.lane.b32.xlu1 %v2942_v16, %s7582_s14  ;;  %2932 = vrot.lane.b32.xlu0 %v2931_v17, %s7582_s14  ;;  %v6913_v16 = vld [vmem:[%s12463_s0 + $0x1c6] ss:$8 sm:$0xf0]   ;;  %v6916_v17 = vld [vmem:[%s12463_s0 + $0x200] ss:$8 sm:$0xf]  }
  0x7d   :  { %v3118_v23 = vsel %vm2435_vm0, %v6913_v16, %v6912_v15  ;;  %v3140_v24 = vsel %vm2435_vm0, %v6917_v19, %v6916_v17  ;;  %v6947_v15 = vld [vmem:[%s12463_s0 + $0x247] ss:$8 sm:$0xf0]   ;;  %v6944_v16 = vld [vmem:[%s12463_s0 + $0x246] ss:$8 sm:$0xf]  }
  0x7e   :  { %v2471_v22 = vpop.permute.xlu1 %2470   ;;  %v2449_v25 = vpop.permute.xlu0 %2448  }
  0x7f   :  { %2474 = vst.msk [vmem:[#allocation0 + $0x61] ss:$4 sm:$0xff] %vm4_vm1, %v2471_v22   ;;  %v6915_v22 = vld [vmem:[%s12463_s0 + $0x1c7] ss:$8 sm:$0xf0]  }
  0x80   :  { %2452 = vst.msk [vmem:[#allocation0 + $0x21] ss:$4 sm:$0xff] %vm4_vm1, %v2449_v25   ;;  %2954 = vrot.lane.b32.xlu2 %v2953_v27, %s7582_s14  ;;  %v3129_v25 = vsel %vm2435_vm0, %v6915_v22, %v6914_v20  ;;  %v6918_v27 = vld [vmem:[%s12463_s0 + $0x201] ss:$8 sm:$0xf]  }
  0x82   :  { %v2592_v30 = vpop.permute.xlu2 %2591  }
  0x83   :  { %2595 = vst.msk [vmem:[#allocation0 + $0x1c1] ss:$4 sm:$0xff] %vm4_vm1, %v2592_v30  }
  0x84   :  { %2976 = vrot.lane.b32.xlu1 %v2975_v28, %s7582_s14  ;;  %2965 = vrot.lane.b32.xlu0 %v2964_v29, %s7582_s14  ;;  %v6919_v28 = vld [vmem:[%s12463_s0 + $0x201] ss:$8 sm:$0xf0]   ;;  %v6922_v29 = vld [vmem:[%s12463_s0 + $0x203] ss:$8 sm:$0xf]  }
  0x85   :  { %v3151_v35 = vsel %vm2435_vm0, %v6919_v28, %v6918_v27  ;;  %v3173_v36 = vsel %vm2435_vm0, %v6923_v31, %v6922_v29  ;;  %v6953_v27 = vld [vmem:[%s12463_s0 + $0x282] ss:$8 sm:$0xf0]   ;;  %v6950_v28 = vld [vmem:[%s12463_s0 + $0x281] ss:$8 sm:$0xf]  }
  0x86   :  { %v2515_v34 = vpop.permute.xlu1 %2514   ;;  %v2504_v37 = vpop.permute.xlu0 %2503  }
  0x87   :  { %2518 = vst.msk [vmem:[#allocation0 + $0xe1] ss:$4 sm:$0xff] %vm4_vm1, %v2515_v34   ;;  %v6921_v34 = vld [vmem:[%s12463_s0 + $0x202] ss:$8 sm:$0xf0]  }
  0x88   :  { %2507 = vst.msk [vmem:[#allocation0 + $0xc1] ss:$4 sm:$0xff] %vm4_vm1, %v2504_v37   ;;  %2987 = vrot.lane.b32.xlu2 %v2986_v39, %s7582_s14  ;;  %v3162_v37 = vsel %vm2435_vm0, %v6921_v34, %v6920_v32  ;;  %v6924_v39 = vld [vmem:[%s12463_s0 + $0x204] ss:$8 sm:$0xf]  }
  0x8a   :  { %v2625_v42 = vpop.permute.xlu2 %2624  }
  0x8b   :  { %2628 = vst.msk [vmem:[#allocation0 + $0x221] ss:$4 sm:$0xff] %vm4_vm1, %v2625_v42  }
  0x8c   :  { %3009 = vrot.lane.b32.xlu1 %v3008_v40, %s7582_s14  ;;  %2998 = vrot.lane.b32.xlu0 %v2997_v41, %s7582_s14  ;;  %v6925_v40 = vld [vmem:[%s12463_s0 + $0x204] ss:$8 sm:$0xf0]   ;;  %v6928_v41 = vld [vmem:[%s12463_s0 + $0x206] ss:$8 sm:$0xf]  }
  0x8d   :  { %v3184_v47 = vsel %vm2435_vm0, %v6925_v40, %v6924_v39  ;;  %v3206_v48 = vsel %vm2435_vm0, %v6929_v43, %v6928_v41  ;;  %v6959_v39 = vld [vmem:[%s12463_s0 + $0x285] ss:$8 sm:$0xf0]   ;;  %v6956_v40 = vld [vmem:[%s12463_s0 + $0x284] ss:$8 sm:$0xf]  }
  0x8e   :  { %v2548_v46 = vpop.permute.xlu1 %2547   ;;  %v2537_v49 = vpop.permute.xlu0 %2536  }
  0x8f   :  { %2551 = vst.msk [vmem:[#allocation0 + $0x141] ss:$4 sm:$0xff] %vm4_vm1, %v2548_v46   ;;  %v6927_v46 = vld [vmem:[%s12463_s0 + $0x205] ss:$8 sm:$0xf0]  }
  0x90   :  { %2540 = vst.msk [vmem:[#allocation0 + $0x121] ss:$4 sm:$0xff] %vm4_vm1, %v2537_v49   ;;  %3020 = vrot.lane.b32.xlu2 %v3019_v51, %s7582_s14  ;;  %v3195_v49 = vsel %vm2435_vm0, %v6927_v46, %v6926_v44  ;;  %v6930_v51 = vld [vmem:[%s12463_s0 + $0x207] ss:$8 sm:$0xf]  }
  0x92   :  { %v2658_v54 = vpop.permute.xlu2 %2657  }
  0x93   :  { %2661 = vst.msk [vmem:[#allocation0 + $0x281] ss:$4 sm:$0xff] %vm4_vm1, %v2658_v54  }
  0x94   :  { %3042 = vrot.lane.b32.xlu1 %v3041_v52, %s7582_s14  ;;  %3031 = vrot.lane.b32.xlu0 %v3030_v53, %s7582_s14  ;;  %v6931_v52 = vld [vmem:[%s12463_s0 + $0x207] ss:$8 sm:$0xf0]   ;;  %v6934_v53 = vld [vmem:[%s12463_s0 + $0x241] ss:$8 sm:$0xf]  }
  0x95   :  { %v3217_v59 = vsel %vm2435_vm0, %v6931_v52, %v6930_v51  ;;  %v3239_v60 = vsel %vm2435_vm0, %v6935_v55, %v6934_v53  ;;  %v6965_v51 = vld [vmem:[%s12463_s0 + $0x2c0] ss:$8 sm:$0xf0]   ;;  %v6962_v52 = vld [vmem:[%s12463_s0 + $0x287] ss:$8 sm:$0xf]  }
  0x96   :  { %v2581_v58 = vpop.permute.xlu1 %2580   ;;  %v2570_v61 = vpop.permute.xlu0 %2569  }
  0x97   :  { %2584 = vst.msk [vmem:[#allocation0 + $0x1a1] ss:$4 sm:$0xff] %vm4_vm1, %v2581_v58   ;;  %v6933_v58 = vld [vmem:[%s12463_s0 + $0x240] ss:$8 sm:$0xf0]  }
  0x98   :  { %2573 = vst.msk [vmem:[#allocation0 + $0x181] ss:$4 sm:$0xff] %vm4_vm1, %v2570_v61   ;;  %3053 = vrot.lane.b32.xlu2 %v3052_v63, %s7582_s14  ;;  %v3228_v61 = vsel %vm2435_vm0, %v6933_v58, %v6932_v56  ;;  %v6936_v63 = vld [vmem:[%s12463_s0 + $0x242] ss:$8 sm:$0xf]  }
  0x9a   :  { %v2691_v2 = vpop.permute.xlu2 %2690  }
  0x9b   :  { %2694 = vst.msk [vmem:[#allocation0 + $0x2e1] ss:$4 sm:$0xff] %vm4_vm1, %v2691_v2  }
  0x9c   :  { %3075 = vrot.lane.b32.xlu1 %v3074_v0, %s7582_s14  ;;  %3064 = vrot.lane.b32.xlu0 %v3063_v1, %s7582_s14  ;;  %v6937_v0 = vld [vmem:[%s12463_s0 + $0x242] ss:$8 sm:$0xf0]   ;;  %v6940_v1 = vld [vmem:[%s12463_s0 + $0x244] ss:$8 sm:$0xf]  }
  0x9d   :  { %v3250_v7 = vsel %vm2435_vm0, %v6937_v0, %v6936_v63  ;;  %v3272_v8 = vsel %vm2435_vm0, %v6941_v3, %v6940_v1  ;;  %v6971_v63 = vld [vmem:[%s12463_s0 + $0x2c3] ss:$8 sm:$0xf0]   ;;  %v6968_v0 = vld [vmem:[%s12463_s0 + $0x2c2] ss:$8 sm:$0xf]  }
  0x9e   :  { %v2614_v6 = vpop.permute.xlu1 %2613   ;;  %v2603_v9 = vpop.permute.xlu0 %2602  }
  0x9f   :  { %2617 = vst.msk [vmem:[#allocation0 + $0x201] ss:$4 sm:$0xff] %vm4_vm1, %v2614_v6   ;;  %v6939_v6 = vld [vmem:[%s12463_s0 + $0x243] ss:$8 sm:$0xf0]  }
  0xa0   :  { %2606 = vst.msk [vmem:[#allocation0 + $0x1e1] ss:$4 sm:$0xff] %vm4_vm1, %v2603_v9   ;;  %3086 = vrot.lane.b32.xlu2 %v3085_v11, %s7582_s14  ;;  %v3261_v9 = vsel %vm2435_vm0, %v6939_v6, %v6938_v4  ;;  %v6942_v11 = vld [vmem:[%s12463_s0 + $0x245] ss:$8 sm:$0xf]  }
  0xa2   :  { %v2724_v14 = vpop.permute.xlu2 %2723  }
  0xa3   :  { %2727 = vst.msk [vmem:[#allocation0 + $0x341] ss:$4 sm:$0xff] %vm4_vm1, %v2724_v14  }
  0xa4   :  { %3108 = vrot.lane.b32.xlu1 %v3107_v12, %s7582_s14  ;;  %3097 = vrot.lane.b32.xlu0 %v3096_v13, %s7582_s14  ;;  %v6943_v12 = vld [vmem:[%s12463_s0 + $0x245] ss:$8 sm:$0xf0]   ;;  %v6946_v13 = vld [vmem:[%s12463_s0 + $0x247] ss:$8 sm:$0xf]  }
  0xa5   :  { %v3283_v19 = vsel %vm2435_vm0, %v6943_v12, %v6942_v11  ;;  %v3305_v20 = vsel %vm2435_vm0, %v6947_v15, %v6946_v13  ;;  %v6977_v11 = vld [vmem:[%s12463_s0 + $0x2c6] ss:$8 sm:$0xf0]   ;;  %v6974_v12 = vld [vmem:[%s12463_s0 + $0x2c5] ss:$8 sm:$0xf]  }
  0xa6   :  { %v2647_v18 = vpop.permute.xlu1 %2646   ;;  %v2636_v21 = vpop.permute.xlu0 %2635  }
  0xa7   :  { %2650 = vst.msk [vmem:[#allocation0 + $0x261] ss:$4 sm:$0xff] %vm4_vm1, %v2647_v18   ;;  %v6945_v18 = vld [vmem:[%s12463_s0 + $0x246] ss:$8 sm:$0xf0]  }
  0xa8   :  { %2639 = vst.msk [vmem:[#allocation0 + $0x241] ss:$4 sm:$0xff] %vm4_vm1, %v2636_v21   ;;  %3119 = vrot.lane.b32.xlu2 %v3118_v23, %s7582_s14  ;;  %v3294_v21 = vsel %vm2435_vm0, %v6945_v18, %v6944_v16  ;;  %v6948_v23 = vld [vmem:[%s12463_s0 + $0x280] ss:$8 sm:$0xf]  }
  0xaa   :  { %v2757_v26 = vpop.permute.xlu2 %2756  }
  0xab   :  { %2760 = vst.msk [vmem:[#allocation0 + $0x3a1] ss:$4 sm:$0xff] %vm4_vm1, %v2757_v26  }
  0xac   :  { %3141 = vrot.lane.b32.xlu1 %v3140_v24, %s7582_s14  ;;  %3130 = vrot.lane.b32.xlu0 %v3129_v25, %s7582_s14  ;;  %v6949_v24 = vld [vmem:[%s12463_s0 + $0x280] ss:$8 sm:$0xf0]   ;;  %v6952_v25 = vld [vmem:[%s12463_s0 + $0x282] ss:$8 sm:$0xf]  }
  0xad   :  { %v3316_v31 = vsel %vm2435_vm0, %v6949_v24, %v6948_v23  ;;  %v3338_v32 = vsel %vm2435_vm0, %v6953_v27, %v6952_v25  ;;  %v6983_v23 = vld [vmem:[%s12463_s0 + $0x301] ss:$8 sm:$0xf0]   ;;  %v6980_v24 = vld [vmem:[%s12463_s0 + $0x300] ss:$8 sm:$0xf]  }
  0xae   :  { %v2680_v30 = vpop.permute.xlu1 %2679   ;;  %v2669_v33 = vpop.permute.xlu0 %2668  }
  0xaf   :  { %2683 = vst.msk [vmem:[#allocation0 + $0x2c1] ss:$4 sm:$0xff] %vm4_vm1, %v2680_v30   ;;  %v6951_v30 = vld [vmem:[%s12463_s0 + $0x281] ss:$8 sm:$0xf0]  }
  0xb0   :  { %2672 = vst.msk [vmem:[#allocation0 + $0x2a1] ss:$4 sm:$0xff] %vm4_vm1, %v2669_v33   ;;  %3152 = vrot.lane.b32.xlu2 %v3151_v35, %s7582_s14  ;;  %v3327_v33 = vsel %vm2435_vm0, %v6951_v30, %v6950_v28  ;;  %v6954_v35 = vld [vmem:[%s12463_s0 + $0x283] ss:$8 sm:$0xf]  }
  0xb2   :  { %v2790_v38 = vpop.permute.xlu2 %2789  }
  0xb3   :  { %2793 = vst.msk [vmem:[#allocation0 + $0x401] ss:$4 sm:$0xff] %vm4_vm1, %v2790_v38  }
  0xb4   :  { %3174 = vrot.lane.b32.xlu1 %v3173_v36, %s7582_s14  ;;  %3163 = vrot.lane.b32.xlu0 %v3162_v37, %s7582_s14  ;;  %v6955_v36 = vld [vmem:[%s12463_s0 + $0x283] ss:$8 sm:$0xf0]   ;;  %v6958_v37 = vld [vmem:[%s12463_s0 + $0x285] ss:$8 sm:$0xf]  }
  0xb5   :  { %v3349_v43 = vsel %vm2435_vm0, %v6955_v36, %v6954_v35  ;;  %v3371_v44 = vsel %vm2435_vm0, %v6959_v39, %v6958_v37  ;;  %v6989_v35 = vld [vmem:[%s12463_s0 + $0x304] ss:$8 sm:$0xf0]   ;;  %v6986_v36 = vld [vmem:[%s12463_s0 + $0x303] ss:$8 sm:$0xf]  }
  0xb6   :  { %v2713_v42 = vpop.permute.xlu1 %2712   ;;  %v2702_v45 = vpop.permute.xlu0 %2701  }
  0xb7   :  { %2716 = vst.msk [vmem:[#allocation0 + $0x321] ss:$4 sm:$0xff] %vm4_vm1, %v2713_v42   ;;  %v6957_v42 = vld [vmem:[%s12463_s0 + $0x284] ss:$8 sm:$0xf0]  }
  0xb8   :  { %2705 = vst.msk [vmem:[#allocation0 + $0x301] ss:$4 sm:$0xff] %vm4_vm1, %v2702_v45   ;;  %3185 = vrot.lane.b32.xlu2 %v3184_v47, %s7582_s14  ;;  %v3360_v45 = vsel %vm2435_vm0, %v6957_v42, %v6956_v40  ;;  %v6960_v47 = vld [vmem:[%s12463_s0 + $0x286] ss:$8 sm:$0xf]  }
  0xba   :  { %v2823_v50 = vpop.permute.xlu2 %2822  }
  0xbb   :  { %2826 = vst.msk [vmem:[#allocation0 + $0x461] ss:$4 sm:$0xff] %vm4_vm1, %v2823_v50  }
  0xbc   :  { %3207 = vrot.lane.b32.xlu1 %v3206_v48, %s7582_s14  ;;  %3196 = vrot.lane.b32.xlu0 %v3195_v49, %s7582_s14  ;;  %v6961_v48 = vld [vmem:[%s12463_s0 + $0x286] ss:$8 sm:$0xf0]   ;;  %v6964_v49 = vld [vmem:[%s12463_s0 + $0x2c0] ss:$8 sm:$0xf]  }
  0xbd   :  { %v3382_v55 = vsel %vm2435_vm0, %v6961_v48, %v6960_v47  ;;  %v3404_v56 = vsel %vm2435_vm0, %v6965_v51, %v6964_v49  ;;  %v6995_v47 = vld [vmem:[%s12463_s0 + $0x307] ss:$8 sm:$0xf0]   ;;  %v6992_v48 = vld [vmem:[%s12463_s0 + $0x306] ss:$8 sm:$0xf]  }
  0xbe   :  { %v2746_v54 = vpop.permute.xlu1 %2745   ;;  %v2735_v57 = vpop.permute.xlu0 %2734  }
  0xbf   :  { %2749 = vst.msk [vmem:[#allocation0 + $0x381] ss:$4 sm:$0xff] %vm4_vm1, %v2746_v54   ;;  %v6963_v54 = vld [vmem:[%s12463_s0 + $0x287] ss:$8 sm:$0xf0]  }
  0xc0   :  { %2738 = vst.msk [vmem:[#allocation0 + $0x361] ss:$4 sm:$0xff] %vm4_vm1, %v2735_v57   ;;  %3218 = vrot.lane.b32.xlu2 %v3217_v59, %s7582_s14  ;;  %v3393_v57 = vsel %vm2435_vm0, %v6963_v54, %v6962_v52  ;;  %v6966_v59 = vld [vmem:[%s12463_s0 + $0x2c1] ss:$8 sm:$0xf]  }
  0xc2   :  { %v2856_v62 = vpop.permute.xlu2 %2855  }
  0xc3   :  { %2859 = vst.msk [vmem:[#allocation0 + $0x4c1] ss:$4 sm:$0xff] %vm4_vm1, %v2856_v62  }
  0xc4   :  { %3240 = vrot.lane.b32.xlu1 %v3239_v60, %s7582_s14  ;;  %3229 = vrot.lane.b32.xlu0 %v3228_v61, %s7582_s14  ;;  %v6967_v60 = vld [vmem:[%s12463_s0 + $0x2c1] ss:$8 sm:$0xf0]   ;;  %v6970_v61 = vld [vmem:[%s12463_s0 + $0x2c3] ss:$8 sm:$0xf]  }
  0xc5   :  { %v3415_v3 = vsel %vm2435_vm0, %v6967_v60, %v6966_v59  ;;  %v3437_v4 = vsel %vm2435_vm0, %v6971_v63, %v6970_v61  ;;  %v7001_v59 = vld [vmem:[%s12463_s0 + $0x342] ss:$8 sm:$0xf0]   ;;  %v6998_v60 = vld [vmem:[%s12463_s0 + $0x341] ss:$8 sm:$0xf]  }
  0xc6   :  { %v2779_v2 = vpop.permute.xlu1 %2778   ;;  %v2768_v5 = vpop.permute.xlu0 %2767  }
  0xc7   :  { %2782 = vst.msk [vmem:[#allocation0 + $0x3e1] ss:$4 sm:$0xff] %vm4_vm1, %v2779_v2   ;;  %v6969_v2 = vld [vmem:[%s12463_s0 + $0x2c2] ss:$8 sm:$0xf0]  }
  0xc8   :  { %2771 = vst.msk [vmem:[#allocation0 + $0x3c1] ss:$4 sm:$0xff] %vm4_vm1, %v2768_v5   ;;  %3251 = vrot.lane.b32.xlu2 %v3250_v7, %s7582_s14  ;;  %v3426_v5 = vsel %vm2435_vm0, %v6969_v2, %v6968_v0  ;;  %v6972_v7 = vld [vmem:[%s12463_s0 + $0x2c4] ss:$8 sm:$0xf]  }
  0xca   :  { %v2889_v10 = vpop.permute.xlu2 %2888  }
  0xcb   :  { %2892 = vst.msk [vmem:[#allocation0 + $0x521] ss:$4 sm:$0xff] %vm4_vm1, %v2889_v10  }
  0xcc   :  { %3273 = vrot.lane.b32.xlu1 %v3272_v8, %s7582_s14  ;;  %3262 = vrot.lane.b32.xlu0 %v3261_v9, %s7582_s14  ;;  %v6973_v8 = vld [vmem:[%s12463_s0 + $0x2c4] ss:$8 sm:$0xf0]   ;;  %v6976_v9 = vld [vmem:[%s12463_s0 + $0x2c6] ss:$8 sm:$0xf]  }
  0xcd   :  { %v3448_v15 = vsel %vm2435_vm0, %v6973_v8, %v6972_v7  ;;  %v3470_v16 = vsel %vm2435_vm0, %v6977_v11, %v6976_v9  ;;  %v7007_v7 = vld [vmem:[%s12463_s0 + $0x345] ss:$8 sm:$0xf0]   ;;  %v7004_v8 = vld [vmem:[%s12463_s0 + $0x344] ss:$8 sm:$0xf]  }
  0xce   :  { %v2812_v14 = vpop.permute.xlu1 %2811   ;;  %v2801_v17 = vpop.permute.xlu0 %2800  }
  0xcf   :  { %2815 = vst.msk [vmem:[#allocation0 + $0x441] ss:$4 sm:$0xff] %vm4_vm1, %v2812_v14   ;;  %v6975_v14 = vld [vmem:[%s12463_s0 + $0x2c5] ss:$8 sm:$0xf0]  }
  0xd0   :  { %2804 = vst.msk [vmem:[#allocation0 + $0x421] ss:$4 sm:$0xff] %vm4_vm1, %v2801_v17   ;;  %3284 = vrot.lane.b32.xlu2 %v3283_v19, %s7582_s14  ;;  %v3459_v17 = vsel %vm2435_vm0, %v6975_v14, %v6974_v12  ;;  %v6978_v19 = vld [vmem:[%s12463_s0 + $0x2c7] ss:$8 sm:$0xf]  }
  0xd2   :  { %v2922_v22 = vpop.permute.xlu2 %2921  }
  0xd3   :  { %2925 = vst.msk [vmem:[#allocation0 + $0x581] ss:$4 sm:$0xff] %vm4_vm1, %v2922_v22  }
  0xd4   :  { %3306 = vrot.lane.b32.xlu1 %v3305_v20, %s7582_s14  ;;  %3295 = vrot.lane.b32.xlu0 %v3294_v21, %s7582_s14  ;;  %v6979_v20 = vld [vmem:[%s12463_s0 + $0x2c7] ss:$8 sm:$0xf0]   ;;  %v6982_v21 = vld [vmem:[%s12463_s0 + $0x301] ss:$8 sm:$0xf]  }
  0xd5   :  { %v3481_v27 = vsel %vm2435_vm0, %v6979_v20, %v6978_v19  ;;  %v3503_v28 = vsel %vm2435_vm0, %v6983_v23, %v6982_v21  ;;  %v7013_v19 = vld [vmem:[%s12463_s0 + $0x380] ss:$8 sm:$0xf0]   ;;  %v7010_v20 = vld [vmem:[%s12463_s0 + $0x347] ss:$8 sm:$0xf]  }
  0xd6   :  { %v2845_v26 = vpop.permute.xlu1 %2844   ;;  %v2834_v29 = vpop.permute.xlu0 %2833  }
  0xd7   :  { %2848 = vst.msk [vmem:[#allocation0 + $0x4a1] ss:$4 sm:$0xff] %vm4_vm1, %v2845_v26   ;;  %v6981_v26 = vld [vmem:[%s12463_s0 + $0x300] ss:$8 sm:$0xf0]  }
  0xd8   :  { %2837 = vst.msk [vmem:[#allocation0 + $0x481] ss:$4 sm:$0xff] %vm4_vm1, %v2834_v29   ;;  %3317 = vrot.lane.b32.xlu2 %v3316_v31, %s7582_s14  ;;  %v3492_v29 = vsel %vm2435_vm0, %v6981_v26, %v6980_v24  ;;  %v6984_v31 = vld [vmem:[%s12463_s0 + $0x302] ss:$8 sm:$0xf]  }
  0xda   :  { %v2955_v34 = vpop.permute.xlu2 %2954  }
  0xdb   :  { %2958 = vst.msk [vmem:[#allocation0 + $0x5e1] ss:$4 sm:$0xff] %vm4_vm1, %v2955_v34  }
  0xdc   :  { %3339 = vrot.lane.b32.xlu1 %v3338_v32, %s7582_s14  ;;  %3328 = vrot.lane.b32.xlu0 %v3327_v33, %s7582_s14  ;;  %v6985_v32 = vld [vmem:[%s12463_s0 + $0x302] ss:$8 sm:$0xf0]   ;;  %v6988_v33 = vld [vmem:[%s12463_s0 + $0x304] ss:$8 sm:$0xf]  }
  0xdd   :  { %v3514_v39 = vsel %vm2435_vm0, %v6985_v32, %v6984_v31  ;;  %v3536_v40 = vsel %vm2435_vm0, %v6989_v35, %v6988_v33  ;;  %v7019_v31 = vld [vmem:[%s12463_s0 + $0x383] ss:$8 sm:$0xf0]   ;;  %v7016_v32 = vld [vmem:[%s12463_s0 + $0x382] ss:$8 sm:$0xf]  }
  0xde   :  { %v2878_v38 = vpop.permute.xlu1 %2877   ;;  %v2867_v41 = vpop.permute.xlu0 %2866  }
  0xdf   :  { %2881 = vst.msk [vmem:[#allocation0 + $0x501] ss:$4 sm:$0xff] %vm4_vm1, %v2878_v38   ;;  %v6987_v38 = vld [vmem:[%s12463_s0 + $0x303] ss:$8 sm:$0xf0]  }
  0xe0   :  { %2870 = vst.msk [vmem:[#allocation0 + $0x4e1] ss:$4 sm:$0xff] %vm4_vm1, %v2867_v41   ;;  %3350 = vrot.lane.b32.xlu2 %v3349_v43, %s7582_s14  ;;  %v3525_v41 = vsel %vm2435_vm0, %v6987_v38, %v6986_v36  ;;  %v6990_v43 = vld [vmem:[%s12463_s0 + $0x305] ss:$8 sm:$0xf]  }
  0xe2   :  { %v2988_v46 = vpop.permute.xlu2 %2987  }
  0xe3   :  { %2991 = vst.msk [vmem:[#allocation0 + $0x641] ss:$4 sm:$0xff] %vm4_vm1, %v2988_v46  }
  0xe4   :  { %3372 = vrot.lane.b32.xlu1 %v3371_v44, %s7582_s14  ;;  %3361 = vrot.lane.b32.xlu0 %v3360_v45, %s7582_s14  ;;  %v6991_v44 = vld [vmem:[%s12463_s0 + $0x305] ss:$8 sm:$0xf0]   ;;  %v6994_v45 = vld [vmem:[%s12463_s0 + $0x307] ss:$8 sm:$0xf]  }
  0xe5   :  { %v3547_v51 = vsel %vm2435_vm0, %v6991_v44, %v6990_v43  ;;  %v3569_v52 = vsel %vm2435_vm0, %v6995_v47, %v6994_v45  ;;  %v7025_v43 = vld [vmem:[%s12463_s0 + $0x386] ss:$8 sm:$0xf0]   ;;  %v7022_v44 = vld [vmem:[%s12463_s0 + $0x385] ss:$8 sm:$0xf]  }
  0xe6   :  { %v2911_v50 = vpop.permute.xlu1 %2910   ;;  %v2900_v53 = vpop.permute.xlu0 %2899  }
  0xe7   :  { %2914 = vst.msk [vmem:[#allocation0 + $0x561] ss:$4 sm:$0xff] %vm4_vm1, %v2911_v50   ;;  %v6993_v50 = vld [vmem:[%s12463_s0 + $0x306] ss:$8 sm:$0xf0]  }
  0xe8   :  { %2903 = vst.msk [vmem:[#allocation0 + $0x541] ss:$4 sm:$0xff] %vm4_vm1, %v2900_v53   ;;  %3383 = vrot.lane.b32.xlu2 %v3382_v55, %s7582_s14  ;;  %v3558_v53 = vsel %vm2435_vm0, %v6993_v50, %v6992_v48  ;;  %v6996_v55 = vld [vmem:[%s12463_s0 + $0x340] ss:$8 sm:$0xf]  }
  0xea   :  { %v3021_v58 = vpop.permute.xlu2 %3020  }
  0xeb   :  { %3024 = vst.msk [vmem:[#allocation0 + $0x6a1] ss:$4 sm:$0xff] %vm4_vm1, %v3021_v58  }
  0xec   :  { %3405 = vrot.lane.b32.xlu1 %v3404_v56, %s7582_s14  ;;  %3394 = vrot.lane.b32.xlu0 %v3393_v57, %s7582_s14  ;;  %v6997_v56 = vld [vmem:[%s12463_s0 + $0x340] ss:$8 sm:$0xf0]   ;;  %v7000_v57 = vld [vmem:[%s12463_s0 + $0x342] ss:$8 sm:$0xf]  }
  0xed   :  { %v3580_v63 = vsel %vm2435_vm0, %v6997_v56, %v6996_v55  ;;  %v3602_v0 = vsel %vm2435_vm0, %v7001_v59, %v7000_v57  ;;  %v7031_v55 = vld [vmem:[%s12463_s0 + $0x3c1] ss:$8 sm:$0xf0]   ;;  %v7028_v56 = vld [vmem:[%s12463_s0 + $0x3c0] ss:$8 sm:$0xf]  }
  0xee   :  { %v2944_v62 = vpop.permute.xlu1 %2943   ;;  %v2933_v1 = vpop.permute.xlu0 %2932  }
  0xef   :  { %2947 = vst.msk [vmem:[#allocation0 + $0x5c1] ss:$4 sm:$0xff] %vm4_vm1, %v2944_v62   ;;  %v6999_v62 = vld [vmem:[%s12463_s0 + $0x341] ss:$8 sm:$0xf0]  }
  0xf0   :  { %2936 = vst.msk [vmem:[#allocation0 + $0x5a1] ss:$4 sm:$0xff] %vm4_vm1, %v2933_v1   ;;  %3416 = vrot.lane.b32.xlu2 %v3415_v3, %s7582_s14  ;;  %v3591_v1 = vsel %vm2435_vm0, %v6999_v62, %v6998_v60  ;;  %v7002_v3 = vld [vmem:[%s12463_s0 + $0x343] ss:$8 sm:$0xf]  }
  0xf2   :  { %v3054_v6 = vpop.permute.xlu2 %3053  }
  0xf3   :  { %3057 = vst.msk [vmem:[#allocation0 + $0x701] ss:$4 sm:$0xff] %vm4_vm1, %v3054_v6  }
  0xf4   :  { %3438 = vrot.lane.b32.xlu1 %v3437_v4, %s7582_s14  ;;  %3427 = vrot.lane.b32.xlu0 %v3426_v5, %s7582_s14  ;;  %v7003_v4 = vld [vmem:[%s12463_s0 + $0x343] ss:$8 sm:$0xf0]   ;;  %v7006_v5 = vld [vmem:[%s12463_s0 + $0x345] ss:$8 sm:$0xf]  }
  0xf5   :  { %v3613_v11 = vsel %vm2435_vm0, %v7003_v4, %v7002_v3  ;;  %v3635_v12 = vsel %vm2435_vm0, %v7007_v7, %v7006_v5  ;;  %v7037_v3 = vld [vmem:[%s12463_s0 + $0x3c4] ss:$8 sm:$0xf0]   ;;  %v7034_v4 = vld [vmem:[%s12463_s0 + $0x3c3] ss:$8 sm:$0xf]  }
  0xf6   :  { %v2977_v10 = vpop.permute.xlu1 %2976   ;;  %v2966_v13 = vpop.permute.xlu0 %2965  }
  0xf7   :  { %2980 = vst.msk [vmem:[#allocation0 + $0x621] ss:$4 sm:$0xff] %vm4_vm1, %v2977_v10   ;;  %v7005_v10 = vld [vmem:[%s12463_s0 + $0x344] ss:$8 sm:$0xf0]  }
  0xf8   :  { %2969 = vst.msk [vmem:[#allocation0 + $0x601] ss:$4 sm:$0xff] %vm4_vm1, %v2966_v13   ;;  %3449 = vrot.lane.b32.xlu2 %v3448_v15, %s7582_s14  ;;  %v3624_v13 = vsel %vm2435_vm0, %v7005_v10, %v7004_v8  ;;  %v7008_v15 = vld [vmem:[%s12463_s0 + $0x346] ss:$8 sm:$0xf]  }
  0xfa   :  { %v3087_v18 = vpop.permute.xlu2 %3086  }
  0xfb   :  { %3090 = vst.msk [vmem:[#allocation0 + $0x761] ss:$4 sm:$0xff] %vm4_vm1, %v3087_v18  }
  0xfc   :  { %3471 = vrot.lane.b32.xlu1 %v3470_v16, %s7582_s14  ;;  %3460 = vrot.lane.b32.xlu0 %v3459_v17, %s7582_s14  ;;  %v7009_v16 = vld [vmem:[%s12463_s0 + $0x346] ss:$8 sm:$0xf0]   ;;  %v7012_v17 = vld [vmem:[%s12463_s0 + $0x380] ss:$8 sm:$0xf]  }
  0xfd   :  { %v3646_v23 = vsel %vm2435_vm0, %v7009_v16, %v7008_v15  ;;  %v3668_v24 = vsel %vm2435_vm0, %v7013_v19, %v7012_v17  ;;  %v7043_v15 = vld [vmem:[%s12463_s0 + $0x3c7] ss:$8 sm:$0xf0]   ;;  %v7040_v16 = vld [vmem:[%s12463_s0 + $0x3c6] ss:$8 sm:$0xf]  }
  0xfe   :  { %v3010_v22 = vpop.permute.xlu1 %3009   ;;  %v2999_v25 = vpop.permute.xlu0 %2998  }
  0xff   :  { %3013 = vst.msk [vmem:[#allocation0 + $0x681] ss:$4 sm:$0xff] %vm4_vm1, %v3010_v22   ;;  %v7011_v22 = vld [vmem:[%s12463_s0 + $0x347] ss:$8 sm:$0xf0]  }
 0x100   :  { %3002 = vst.msk [vmem:[#allocation0 + $0x661] ss:$4 sm:$0xff] %vm4_vm1, %v2999_v25   ;;  %3482 = vrot.lane.b32.xlu2 %v3481_v27, %s7582_s14  ;;  %v3657_v25 = vsel %vm2435_vm0, %v7011_v22, %v7010_v20  ;;  %v7014_v27 = vld [vmem:[%s12463_s0 + $0x381] ss:$8 sm:$0xf]  }
 0x102   :  { %v3120_v30 = vpop.permute.xlu2 %3119  }
 0x103   :  { %3123 = vst.msk [vmem:[#allocation0 + $0x7c1] ss:$4 sm:$0xff] %vm4_vm1, %v3120_v30  }
 0x104   :  { %3504 = vrot.lane.b32.xlu1 %v3503_v28, %s7582_s14  ;;  %3493 = vrot.lane.b32.xlu0 %v3492_v29, %s7582_s14  ;;  %v7015_v28 = vld [vmem:[%s12463_s0 + $0x381] ss:$8 sm:$0xf0]   ;;  %v7018_v29 = vld [vmem:[%s12463_s0 + $0x383] ss:$8 sm:$0xf]  }
 0x105   :  { %v3679_v35 = vsel %vm2435_vm0, %v7015_v28, %v7014_v27  ;;  %v3701_v36 = vsel %vm2435_vm0, %v7019_v31, %v7018_v29  ;;  %v7047_v27 = vld [vmem:[%s12463_s0 + $0x2] ss:$8 sm:$0xf0]   ;;  %v7044_v28 = vld [vmem:[%s12463_s0 + $0x1] ss:$8 sm:$0xf]  }
 0x106   :  { %v3043_v34 = vpop.permute.xlu1 %3042   ;;  %v3032_v37 = vpop.permute.xlu0 %3031  }
 0x107   :  { %3046 = vst.msk [vmem:[#allocation0 + $0x6e1] ss:$4 sm:$0xff] %vm4_vm1, %v3043_v34   ;;  %v7017_v34 = vld [vmem:[%s12463_s0 + $0x382] ss:$8 sm:$0xf0]  }
 0x108   :  { %3035 = vst.msk [vmem:[#allocation0 + $0x6c1] ss:$4 sm:$0xff] %vm4_vm1, %v3032_v37   ;;  %3515 = vrot.lane.b32.xlu2 %v3514_v39, %s7582_s14  ;;  %v3690_v37 = vsel %vm2435_vm0, %v7017_v34, %v7016_v32  ;;  %v7020_v39 = vld [vmem:[%s12463_s0 + $0x384] ss:$8 sm:$0xf]  }
 0x10a   :  { %v3153_v42 = vpop.permute.xlu2 %3152  }
 0x10b   :  { %3156 = vst.msk [vmem:[#allocation0 + $0x821] ss:$4 sm:$0xff] %vm4_vm1, %v3153_v42  }
 0x10c   :  { %3537 = vrot.lane.b32.xlu1 %v3536_v40, %s7582_s14  ;;  %3526 = vrot.lane.b32.xlu0 %v3525_v41, %s7582_s14  ;;  %v7021_v40 = vld [vmem:[%s12463_s0 + $0x384] ss:$8 sm:$0xf0]   ;;  %v7024_v41 = vld [vmem:[%s12463_s0 + $0x386] ss:$8 sm:$0xf]  }
 0x10d   :  { %v3712_v47 = vsel %vm2435_vm0, %v7021_v40, %v7020_v39  ;;  %v3734_v48 = vsel %vm2435_vm0, %v7025_v43, %v7024_v41  ;;  %v7053_v39 = vld [vmem:[%s12463_s0 + $0x5] ss:$8 sm:$0xf0]   ;;  %v7050_v40 = vld [vmem:[%s12463_s0 + $0x4] ss:$8 sm:$0xf]  }
 0x10e   :  { %v3076_v46 = vpop.permute.xlu1 %3075   ;;  %v3065_v49 = vpop.permute.xlu0 %3064  }
 0x10f   :  { %3079 = vst.msk [vmem:[#allocation0 + $0x741] ss:$4 sm:$0xff] %vm4_vm1, %v3076_v46   ;;  %v7023_v46 = vld [vmem:[%s12463_s0 + $0x385] ss:$8 sm:$0xf0]  }
 0x110   :  { %3068 = vst.msk [vmem:[#allocation0 + $0x721] ss:$4 sm:$0xff] %vm4_vm1, %v3065_v49   ;;  %3548 = vrot.lane.b32.xlu2 %v3547_v51, %s7582_s14  ;;  %v3723_v49 = vsel %vm2435_vm0, %v7023_v46, %v7022_v44  ;;  %v7026_v51 = vld [vmem:[%s12463_s0 + $0x387] ss:$8 sm:$0xf]  }
 0x112   :  { %v3186_v54 = vpop.permute.xlu2 %3185  }
 0x113   :  { %3189 = vst.msk [vmem:[#allocation0 + $0x881] ss:$4 sm:$0xff] %vm4_vm1, %v3186_v54  }
 0x114   :  { %3570 = vrot.lane.b32.xlu1 %v3569_v52, %s7582_s14  ;;  %3559 = vrot.lane.b32.xlu0 %v3558_v53, %s7582_s14  ;;  %v7027_v52 = vld [vmem:[%s12463_s0 + $0x387] ss:$8 sm:$0xf0]   ;;  %v7030_v53 = vld [vmem:[%s12463_s0 + $0x3c1] ss:$8 sm:$0xf]  }
 0x115   :  { %v3745_v59 = vsel %vm2435_vm0, %v7027_v52, %v7026_v51  ;;  %v3767_v60 = vsel %vm2435_vm0, %v7031_v55, %v7030_v53  ;;  %v7059_v51 = vld [vmem:[%s12463_s0 + $0x40] ss:$8 sm:$0xf0]   ;;  %v7056_v52 = vld [vmem:[%s12463_s0 + $0x7] ss:$8 sm:$0xf]  }
 0x116   :  { %v3109_v58 = vpop.permute.xlu1 %3108   ;;  %v3098_v61 = vpop.permute.xlu0 %3097  }
 0x117   :  { %3112 = vst.msk [vmem:[#allocation0 + $0x7a1] ss:$4 sm:$0xff] %vm4_vm1, %v3109_v58   ;;  %v7029_v58 = vld [vmem:[%s12463_s0 + $0x3c0] ss:$8 sm:$0xf0]  }
 0x118   :  { %3101 = vst.msk [vmem:[#allocation0 + $0x781] ss:$4 sm:$0xff] %vm4_vm1, %v3098_v61   ;;  %3581 = vrot.lane.b32.xlu2 %v3580_v63, %s7582_s14  ;;  %v3756_v61 = vsel %vm2435_vm0, %v7029_v58, %v7028_v56  ;;  %v7032_v63 = vld [vmem:[%s12463_s0 + $0x3c2] ss:$8 sm:$0xf]  }
 0x11a   :  { %v3219_v2 = vpop.permute.xlu2 %3218  }
 0x11b   :  { %3222 = vst.msk [vmem:[#allocation0 + $0x8e1] ss:$4 sm:$0xff] %vm4_vm1, %v3219_v2  }
 0x11c   :  { %3603 = vrot.lane.b32.xlu1 %v3602_v0, %s7582_s14  ;;  %3592 = vrot.lane.b32.xlu0 %v3591_v1, %s7582_s14  ;;  %v7033_v0 = vld [vmem:[%s12463_s0 + $0x3c2] ss:$8 sm:$0xf0]   ;;  %v7036_v1 = vld [vmem:[%s12463_s0 + $0x3c4] ss:$8 sm:$0xf]  }
 0x11d   :  { %v3778_v7 = vsel %vm2435_vm0, %v7033_v0, %v7032_v63  ;;  %v3800_v8 = vsel %vm2435_vm0, %v7037_v3, %v7036_v1  ;;  %v7065_v63 = vld [vmem:[%s12463_s0 + $0x43] ss:$8 sm:$0xf0]   ;;  %v7062_v0 = vld [vmem:[%s12463_s0 + $0x42] ss:$8 sm:$0xf]  }
 0x11e   :  { %v3142_v6 = vpop.permute.xlu1 %3141   ;;  %v3131_v9 = vpop.permute.xlu0 %3130  }
 0x11f   :  { %3145 = vst.msk [vmem:[#allocation0 + $0x801] ss:$4 sm:$0xff] %vm4_vm1, %v3142_v6   ;;  %v7035_v6 = vld [vmem:[%s12463_s0 + $0x3c3] ss:$8 sm:$0xf0]  }
 0x120   :  { %3134 = vst.msk [vmem:[#allocation0 + $0x7e1] ss:$4 sm:$0xff] %vm4_vm1, %v3131_v9   ;;  %3614 = vrot.lane.b32.xlu2 %v3613_v11, %s7582_s14  ;;  %v3789_v9 = vsel %vm2435_vm0, %v7035_v6, %v7034_v4  ;;  %v7038_v11 = vld [vmem:[%s12463_s0 + $0x3c5] ss:$8 sm:$0xf]  }
 0x122   :  { %v3252_v14 = vpop.permute.xlu2 %3251  }
 0x123   :  { %3255 = vst.msk [vmem:[#allocation0 + $0x941] ss:$4 sm:$0xff] %vm4_vm1, %v3252_v14  }
 0x124   :  { %3636 = vrot.lane.b32.xlu1 %v3635_v12, %s7582_s14  ;;  %3625 = vrot.lane.b32.xlu0 %v3624_v13, %s7582_s14  ;;  %v7039_v12 = vld [vmem:[%s12463_s0 + $0x3c5] ss:$8 sm:$0xf0]   ;;  %v7042_v13 = vld [vmem:[%s12463_s0 + $0x3c7] ss:$8 sm:$0xf]  }
 0x125   :  { %v3811_v19 = vsel %vm2435_vm0, %v7039_v12, %v7038_v11  ;;  %v3833_v20 = vsel %vm2435_vm0, %v7043_v15, %v7042_v13  ;;  %v7071_v11 = vld [vmem:[%s12463_s0 + $0x46] ss:$8 sm:$0xf0]   ;;  %v7068_v12 = vld [vmem:[%s12463_s0 + $0x45] ss:$8 sm:$0xf]  }
 0x126   :  { %v3175_v18 = vpop.permute.xlu1 %3174   ;;  %v3164_v21 = vpop.permute.xlu0 %3163  }
 0x127   :  { %3178 = vst.msk [vmem:[#allocation0 + $0x861] ss:$4 sm:$0xff] %vm4_vm1, %v3175_v18   ;;  %v7041_v18 = vld [vmem:[%s12463_s0 + $0x3c6] ss:$8 sm:$0xf0]  }
 0x128   :  { %3167 = vst.msk [vmem:[#allocation0 + $0x841] ss:$4 sm:$0xff] %vm4_vm1, %v3164_v21   ;;  %3647 = vrot.lane.b32.xlu2 %v3646_v23, %s7582_s14  ;;  %v3822_v21 = vsel %vm2435_vm0, %v7041_v18, %v7040_v16  ;;  %v3839_v23 = vld [vmem:[%s12463_s0] ss:$8 sm:$0xf]  }
 0x12a   :  { %v3285_v26 = vpop.permute.xlu2 %3284  }
 0x12b   :  { %3288 = vst.msk [vmem:[#allocation0 + $0x9a1] ss:$4 sm:$0xff] %vm4_vm1, %v3285_v26  }
 0x12c   :  { %3669 = vrot.lane.b32.xlu1 %v3668_v24, %s7582_s14  ;;  %3658 = vrot.lane.b32.xlu0 %v3657_v25, %s7582_s14  ;;  %v3840_v24 = vld [vmem:[%s12463_s0] ss:$8 sm:$0xf0]   ;;  %v7046_v25 = vld [vmem:[%s12463_s0 + $0x2] ss:$8 sm:$0xf]  }
 0x12d   :  { %v3842_v31 = vsel %vm2435_vm0, %v3840_v24, %v3839_v23  ;;  %v3864_v32 = vsel %vm2435_vm0, %v7047_v27, %v7046_v25  ;;  %v7077_v23 = vld [vmem:[%s12463_s0 + $0x81] ss:$8 sm:$0xf0]   ;;  %v7074_v24 = vld [vmem:[%s12463_s0 + $0x80] ss:$8 sm:$0xf]  }
 0x12e   :  { %v3208_v30 = vpop.permute.xlu1 %3207   ;;  %v3197_v33 = vpop.permute.xlu0 %3196  }
 0x12f   :  { %3211 = vst.msk [vmem:[#allocation0 + $0x8c1] ss:$4 sm:$0xff] %vm4_vm1, %v3208_v30   ;;  %v7045_v30 = vld [vmem:[%s12463_s0 + $0x1] ss:$8 sm:$0xf0]  }
 0x130   :  { %3200 = vst.msk [vmem:[#allocation0 + $0x8a1] ss:$4 sm:$0xff] %vm4_vm1, %v3197_v33   ;;  %3680 = vrot.lane.b32.xlu2 %v3679_v35, %s7582_s14  ;;  %v3853_v33 = vsel %vm2435_vm0, %v7045_v30, %v7044_v28  ;;  %v7048_v35 = vld [vmem:[%s12463_s0 + $0x3] ss:$8 sm:$0xf]  }
 0x132   :  { %v3318_v38 = vpop.permute.xlu2 %3317  }
 0x133   :  { %3321 = vst.msk [vmem:[#allocation0 + $0xa01] ss:$4 sm:$0xff] %vm4_vm1, %v3318_v38  }
 0x134   :  { %3702 = vrot.lane.b32.xlu1 %v3701_v36, %s7582_s14  ;;  %3691 = vrot.lane.b32.xlu0 %v3690_v37, %s7582_s14  ;;  %v7049_v36 = vld [vmem:[%s12463_s0 + $0x3] ss:$8 sm:$0xf0]   ;;  %v7052_v37 = vld [vmem:[%s12463_s0 + $0x5] ss:$8 sm:$0xf]  }
 0x135   :  { %v3875_v43 = vsel %vm2435_vm0, %v7049_v36, %v7048_v35  ;;  %v3897_v44 = vsel %vm2435_vm0, %v7053_v39, %v7052_v37  ;;  %v7083_v35 = vld [vmem:[%s12463_s0 + $0x84] ss:$8 sm:$0xf0]   ;;  %v7080_v36 = vld [vmem:[%s12463_s0 + $0x83] ss:$8 sm:$0xf]  }
 0x136   :  { %v3241_v42 = vpop.permute.xlu1 %3240   ;;  %v3230_v45 = vpop.permute.xlu0 %3229  }
 0x137   :  { %3244 = vst.msk [vmem:[#allocation0 + $0x921] ss:$4 sm:$0xff] %vm4_vm1, %v3241_v42   ;;  %v7051_v42 = vld [vmem:[%s12463_s0 + $0x4] ss:$8 sm:$0xf0]  }
 0x138   :  { %3233 = vst.msk [vmem:[#allocation0 + $0x901] ss:$4 sm:$0xff] %vm4_vm1, %v3230_v45   ;;  %3713 = vrot.lane.b32.xlu2 %v3712_v47, %s7582_s14  ;;  %v3886_v45 = vsel %vm2435_vm0, %v7051_v42, %v7050_v40  ;;  %v7054_v47 = vld [vmem:[%s12463_s0 + $0x6] ss:$8 sm:$0xf]  }
 0x13a   :  { %v3351_v50 = vpop.permute.xlu2 %3350  }
 0x13b   :  { %3354 = vst.msk [vmem:[#allocation0 + $0xa61] ss:$4 sm:$0xff] %vm4_vm1, %v3351_v50  }
 0x13c   :  { %3735 = vrot.lane.b32.xlu1 %v3734_v48, %s7582_s14  ;;  %3724 = vrot.lane.b32.xlu0 %v3723_v49, %s7582_s14  ;;  %v7055_v48 = vld [vmem:[%s12463_s0 + $0x6] ss:$8 sm:$0xf0]   ;;  %v7058_v49 = vld [vmem:[%s12463_s0 + $0x40] ss:$8 sm:$0xf]  }
 0x13d   :  { %v3908_v55 = vsel %vm2435_vm0, %v7055_v48, %v7054_v47  ;;  %v3930_v56 = vsel %vm2435_vm0, %v7059_v51, %v7058_v49  ;;  %v7089_v47 = vld [vmem:[%s12463_s0 + $0x87] ss:$8 sm:$0xf0]   ;;  %v7086_v48 = vld [vmem:[%s12463_s0 + $0x86] ss:$8 sm:$0xf]  }
 0x13e   :  { %v3274_v54 = vpop.permute.xlu1 %3273   ;;  %v3263_v57 = vpop.permute.xlu0 %3262  }
 0x13f   :  { %3277 = vst.msk [vmem:[#allocation0 + $0x981] ss:$4 sm:$0xff] %vm4_vm1, %v3274_v54   ;;  %v7057_v54 = vld [vmem:[%s12463_s0 + $0x7] ss:$8 sm:$0xf0]  }
 0x140   :  { %3266 = vst.msk [vmem:[#allocation0 + $0x961] ss:$4 sm:$0xff] %vm4_vm1, %v3263_v57   ;;  %3746 = vrot.lane.b32.xlu2 %v3745_v59, %s7582_s14  ;;  %v3919_v57 = vsel %vm2435_vm0, %v7057_v54, %v7056_v52  ;;  %v7060_v59 = vld [vmem:[%s12463_s0 + $0x41] ss:$8 sm:$0xf]  }
 0x142   :  { %v3384_v62 = vpop.permute.xlu2 %3383  }
 0x143   :  { %3387 = vst.msk [vmem:[#allocation0 + $0xac1] ss:$4 sm:$0xff] %vm4_vm1, %v3384_v62  }
 0x144   :  { %3768 = vrot.lane.b32.xlu1 %v3767_v60, %s7582_s14  ;;  %3757 = vrot.lane.b32.xlu0 %v3756_v61, %s7582_s14  ;;  %v7061_v60 = vld [vmem:[%s12463_s0 + $0x41] ss:$8 sm:$0xf0]   ;;  %v7064_v61 = vld [vmem:[%s12463_s0 + $0x43] ss:$8 sm:$0xf]  }
 0x145   :  { %v3941_v3 = vsel %vm2435_vm0, %v7061_v60, %v7060_v59  ;;  %v3963_v4 = vsel %vm2435_vm0, %v7065_v63, %v7064_v61  ;;  %v7095_v59 = vld [vmem:[%s12463_s0 + $0xc2] ss:$8 sm:$0xf0]   ;;  %v7092_v60 = vld [vmem:[%s12463_s0 + $0xc1] ss:$8 sm:$0xf]  }
 0x146   :  { %v3307_v2 = vpop.permute.xlu1 %3306   ;;  %v3296_v5 = vpop.permute.xlu0 %3295  }
 0x147   :  { %3310 = vst.msk [vmem:[#allocation0 + $0x9e1] ss:$4 sm:$0xff] %vm4_vm1, %v3307_v2   ;;  %v7063_v2 = vld [vmem:[%s12463_s0 + $0x42] ss:$8 sm:$0xf0]  }
 0x148   :  { %3299 = vst.msk [vmem:[#allocation0 + $0x9c1] ss:$4 sm:$0xff] %vm4_vm1, %v3296_v5   ;;  %3779 = vrot.lane.b32.xlu2 %v3778_v7, %s7582_s14  ;;  %v3952_v5 = vsel %vm2435_vm0, %v7063_v2, %v7062_v0  ;;  %v7066_v7 = vld [vmem:[%s12463_s0 + $0x44] ss:$8 sm:$0xf]  }
 0x14a   :  { %v3417_v10 = vpop.permute.xlu2 %3416  }
 0x14b   :  { %3420 = vst.msk [vmem:[#allocation0 + $0xb21] ss:$4 sm:$0xff] %vm4_vm1, %v3417_v10  }
 0x14c   :  { %3801 = vrot.lane.b32.xlu1 %v3800_v8, %s7582_s14  ;;  %3790 = vrot.lane.b32.xlu0 %v3789_v9, %s7582_s14  ;;  %v7067_v8 = vld [vmem:[%s12463_s0 + $0x44] ss:$8 sm:$0xf0]   ;;  %v7070_v9 = vld [vmem:[%s12463_s0 + $0x46] ss:$8 sm:$0xf]  }
 0x14d   :  { %v3974_v15 = vsel %vm2435_vm0, %v7067_v8, %v7066_v7  ;;  %v3996_v16 = vsel %vm2435_vm0, %v7071_v11, %v7070_v9  ;;  %v7101_v7 = vld [vmem:[%s12463_s0 + $0xc5] ss:$8 sm:$0xf0]   ;;  %v7098_v8 = vld [vmem:[%s12463_s0 + $0xc4] ss:$8 sm:$0xf]  }
 0x14e   :  { %v3340_v14 = vpop.permute.xlu1 %3339   ;;  %v3329_v17 = vpop.permute.xlu0 %3328  }
 0x14f   :  { %3343 = vst.msk [vmem:[#allocation0 + $0xa41] ss:$4 sm:$0xff] %vm4_vm1, %v3340_v14   ;;  %v7069_v14 = vld [vmem:[%s12463_s0 + $0x45] ss:$8 sm:$0xf0]  }
 0x150   :  { %3332 = vst.msk [vmem:[#allocation0 + $0xa21] ss:$4 sm:$0xff] %vm4_vm1, %v3329_v17   ;;  %3812 = vrot.lane.b32.xlu2 %v3811_v19, %s7582_s14  ;;  %v3985_v17 = vsel %vm2435_vm0, %v7069_v14, %v7068_v12  ;;  %v7072_v19 = vld [vmem:[%s12463_s0 + $0x47] ss:$8 sm:$0xf]  }
 0x152   :  { %v3450_v22 = vpop.permute.xlu2 %3449  }
 0x153   :  { %3453 = vst.msk [vmem:[#allocation0 + $0xb81] ss:$4 sm:$0xff] %vm4_vm1, %v3450_v22  }
 0x154   :  { %3834 = vrot.lane.b32.xlu1 %v3833_v20, %s7582_s14  ;;  %3823 = vrot.lane.b32.xlu0 %v3822_v21, %s7582_s14  ;;  %v7073_v20 = vld [vmem:[%s12463_s0 + $0x47] ss:$8 sm:$0xf0]   ;;  %v7076_v21 = vld [vmem:[%s12463_s0 + $0x81] ss:$8 sm:$0xf]  }
 0x155   :  { %v4007_v27 = vsel %vm2435_vm0, %v7073_v20, %v7072_v19  ;;  %v4029_v28 = vsel %vm2435_vm0, %v7077_v23, %v7076_v21  ;;  %v7107_v19 = vld [vmem:[%s12463_s0 + $0x100] ss:$8 sm:$0xf0]   ;;  %v7104_v20 = vld [vmem:[%s12463_s0 + $0xc7] ss:$8 sm:$0xf]  }
 0x156   :  { %v3373_v26 = vpop.permute.xlu1 %3372   ;;  %v3362_v29 = vpop.permute.xlu0 %3361  }
 0x157   :  { %3376 = vst.msk [vmem:[#allocation0 + $0xaa1] ss:$4 sm:$0xff] %vm4_vm1, %v3373_v26   ;;  %v7075_v26 = vld [vmem:[%s12463_s0 + $0x80] ss:$8 sm:$0xf0]  }
 0x158   :  { %3365 = vst.msk [vmem:[#allocation0 + $0xa81] ss:$4 sm:$0xff] %vm4_vm1, %v3362_v29   ;;  %3843 = vrot.lane.b32.xlu2 %v3842_v31, %s7583_s26  ;;  %v4018_v29 = vsel %vm2435_vm0, %v7075_v26, %v7074_v24  ;;  %v7078_v31 = vld [vmem:[%s12463_s0 + $0x82] ss:$8 sm:$0xf]  }
 0x15a   :  { %v3483_v34 = vpop.permute.xlu2 %3482  }
 0x15b   :  { %3486 = vst.msk [vmem:[#allocation0 + $0xbe1] ss:$4 sm:$0xff] %vm4_vm1, %v3483_v34  }
 0x15c   :  { %3865 = vrot.lane.b32.xlu1 %v3864_v32, %s7583_s26  ;;  %3854 = vrot.lane.b32.xlu0 %v3853_v33, %s7583_s26  ;;  %v7079_v32 = vld [vmem:[%s12463_s0 + $0x82] ss:$8 sm:$0xf0]   ;;  %v7082_v33 = vld [vmem:[%s12463_s0 + $0x84] ss:$8 sm:$0xf]  }
 0x15d   :  { %v4040_v39 = vsel %vm2435_vm0, %v7079_v32, %v7078_v31  ;;  %v4062_v40 = vsel %vm2435_vm0, %v7083_v35, %v7082_v33  ;;  %v7113_v31 = vld [vmem:[%s12463_s0 + $0x103] ss:$8 sm:$0xf0]   ;;  %v7110_v32 = vld [vmem:[%s12463_s0 + $0x102] ss:$8 sm:$0xf]  }
 0x15e   :  { %v3406_v38 = vpop.permute.xlu1 %3405   ;;  %v3395_v41 = vpop.permute.xlu0 %3394  }
 0x15f   :  { %3409 = vst.msk [vmem:[#allocation0 + $0xb01] ss:$4 sm:$0xff] %vm4_vm1, %v3406_v38   ;;  %v7081_v38 = vld [vmem:[%s12463_s0 + $0x83] ss:$8 sm:$0xf0]  }
 0x160   :  { %3398 = vst.msk [vmem:[#allocation0 + $0xae1] ss:$4 sm:$0xff] %vm4_vm1, %v3395_v41   ;;  %3876 = vrot.lane.b32.xlu2 %v3875_v43, %s7583_s26  ;;  %v4051_v41 = vsel %vm2435_vm0, %v7081_v38, %v7080_v36  ;;  %v7084_v43 = vld [vmem:[%s12463_s0 + $0x85] ss:$8 sm:$0xf]  }
 0x162   :  { %v3516_v46 = vpop.permute.xlu2 %3515  }
 0x163   :  { %3519 = vst.msk [vmem:[#allocation0 + $0xc41] ss:$4 sm:$0xff] %vm4_vm1, %v3516_v46  }
 0x164   :  { %3898 = vrot.lane.b32.xlu1 %v3897_v44, %s7583_s26  ;;  %3887 = vrot.lane.b32.xlu0 %v3886_v45, %s7583_s26  ;;  %v7085_v44 = vld [vmem:[%s12463_s0 + $0x85] ss:$8 sm:$0xf0]   ;;  %v7088_v45 = vld [vmem:[%s12463_s0 + $0x87] ss:$8 sm:$0xf]  }
 0x165   :  { %v4073_v51 = vsel %vm2435_vm0, %v7085_v44, %v7084_v43  ;;  %v4095_v52 = vsel %vm2435_vm0, %v7089_v47, %v7088_v45  ;;  %v7119_v43 = vld [vmem:[%s12463_s0 + $0x106] ss:$8 sm:$0xf0]   ;;  %v7116_v44 = vld [vmem:[%s12463_s0 + $0x105] ss:$8 sm:$0xf]  }
 0x166   :  { %v3439_v50 = vpop.permute.xlu1 %3438   ;;  %v3428_v53 = vpop.permute.xlu0 %3427  }
 0x167   :  { %3442 = vst.msk [vmem:[#allocation0 + $0xb61] ss:$4 sm:$0xff] %vm4_vm1, %v3439_v50   ;;  %v7087_v50 = vld [vmem:[%s12463_s0 + $0x86] ss:$8 sm:$0xf0]  }
 0x168   :  { %3431 = vst.msk [vmem:[#allocation0 + $0xb41] ss:$4 sm:$0xff] %vm4_vm1, %v3428_v53   ;;  %3909 = vrot.lane.b32.xlu2 %v3908_v55, %s7583_s26  ;;  %v4084_v53 = vsel %vm2435_vm0, %v7087_v50, %v7086_v48  ;;  %v7090_v55 = vld [vmem:[%s12463_s0 + $0xc0] ss:$8 sm:$0xf]  }
 0x16a   :  { %v3549_v58 = vpop.permute.xlu2 %3548  }
 0x16b   :  { %3552 = vst.msk [vmem:[#allocation0 + $0xca1] ss:$4 sm:$0xff] %vm4_vm1, %v3549_v58  }
 0x16c   :  { %3931 = vrot.lane.b32.xlu1 %v3930_v56, %s7583_s26  ;;  %3920 = vrot.lane.b32.xlu0 %v3919_v57, %s7583_s26  ;;  %v7091_v56 = vld [vmem:[%s12463_s0 + $0xc0] ss:$8 sm:$0xf0]   ;;  %v7094_v57 = vld [vmem:[%s12463_s0 + $0xc2] ss:$8 sm:$0xf]  }
 0x16d   :  { %v4106_v63 = vsel %vm2435_vm0, %v7091_v56, %v7090_v55  ;;  %v4128_v0 = vsel %vm2435_vm0, %v7095_v59, %v7094_v57  ;;  %v7125_v55 = vld [vmem:[%s12463_s0 + $0x141] ss:$8 sm:$0xf0]   ;;  %v7122_v56 = vld [vmem:[%s12463_s0 + $0x140] ss:$8 sm:$0xf]  }
 0x16e   :  { %v3472_v62 = vpop.permute.xlu1 %3471   ;;  %v3461_v1 = vpop.permute.xlu0 %3460  }
 0x16f   :  { %3475 = vst.msk [vmem:[#allocation0 + $0xbc1] ss:$4 sm:$0xff] %vm4_vm1, %v3472_v62   ;;  %v7093_v62 = vld [vmem:[%s12463_s0 + $0xc1] ss:$8 sm:$0xf0]  }
 0x170   :  { %3464 = vst.msk [vmem:[#allocation0 + $0xba1] ss:$4 sm:$0xff] %vm4_vm1, %v3461_v1   ;;  %3942 = vrot.lane.b32.xlu2 %v3941_v3, %s7583_s26  ;;  %v4117_v1 = vsel %vm2435_vm0, %v7093_v62, %v7092_v60  ;;  %v7096_v3 = vld [vmem:[%s12463_s0 + $0xc3] ss:$8 sm:$0xf]  }
 0x172   :  { %v3582_v6 = vpop.permute.xlu2 %3581  }
 0x173   :  { %3585 = vst.msk [vmem:[#allocation0 + $0xd01] ss:$4 sm:$0xff] %vm4_vm1, %v3582_v6  }
 0x174   :  { %3964 = vrot.lane.b32.xlu1 %v3963_v4, %s7583_s26  ;;  %3953 = vrot.lane.b32.xlu0 %v3952_v5, %s7583_s26  ;;  %v7097_v4 = vld [vmem:[%s12463_s0 + $0xc3] ss:$8 sm:$0xf0]   ;;  %v7100_v5 = vld [vmem:[%s12463_s0 + $0xc5] ss:$8 sm:$0xf]  }
 0x175   :  { %v4139_v11 = vsel %vm2435_vm0, %v7097_v4, %v7096_v3  ;;  %v4161_v12 = vsel %vm2435_vm0, %v7101_v7, %v7100_v5  ;;  %v7131_v3 = vld [vmem:[%s12463_s0 + $0x144] ss:$8 sm:$0xf0]   ;;  %v7128_v4 = vld [vmem:[%s12463_s0 + $0x143] ss:$8 sm:$0xf]  }
 0x176   :  { %v3505_v10 = vpop.permute.xlu1 %3504   ;;  %v3494_v13 = vpop.permute.xlu0 %3493  }
 0x177   :  { %3508 = vst.msk [vmem:[#allocation0 + $0xc21] ss:$4 sm:$0xff] %vm4_vm1, %v3505_v10   ;;  %v7099_v10 = vld [vmem:[%s12463_s0 + $0xc4] ss:$8 sm:$0xf0]  }
 0x178   :  { %3497 = vst.msk [vmem:[#allocation0 + $0xc01] ss:$4 sm:$0xff] %vm4_vm1, %v3494_v13   ;;  %3975 = vrot.lane.b32.xlu2 %v3974_v15, %s7583_s26  ;;  %v4150_v13 = vsel %vm2435_vm0, %v7099_v10, %v7098_v8  ;;  %v7102_v15 = vld [vmem:[%s12463_s0 + $0xc6] ss:$8 sm:$0xf]  }
 0x17a   :  { %v3615_v18 = vpop.permute.xlu2 %3614  }
 0x17b   :  { %3618 = vst.msk [vmem:[#allocation0 + $0xd61] ss:$4 sm:$0xff] %vm4_vm1, %v3615_v18  }
 0x17c   :  { %3997 = vrot.lane.b32.xlu1 %v3996_v16, %s7583_s26  ;;  %3986 = vrot.lane.b32.xlu0 %v3985_v17, %s7583_s26  ;;  %v7103_v16 = vld [vmem:[%s12463_s0 + $0xc6] ss:$8 sm:$0xf0]   ;;  %v7106_v17 = vld [vmem:[%s12463_s0 + $0x100] ss:$8 sm:$0xf]  }
 0x17d   :  { %v4172_v23 = vsel %vm2435_vm0, %v7103_v16, %v7102_v15  ;;  %v4194_v24 = vsel %vm2435_vm0, %v7107_v19, %v7106_v17  ;;  %v7137_v15 = vld [vmem:[%s12463_s0 + $0x147] ss:$8 sm:$0xf0]   ;;  %v7134_v16 = vld [vmem:[%s12463_s0 + $0x146] ss:$8 sm:$0xf]  }
 0x17e   :  { %v3538_v22 = vpop.permute.xlu1 %3537   ;;  %v3527_v25 = vpop.permute.xlu0 %3526  }
 0x17f   :  { %3541 = vst.msk [vmem:[#allocation0 + $0xc81] ss:$4 sm:$0xff] %vm4_vm1, %v3538_v22   ;;  %v7105_v22 = vld [vmem:[%s12463_s0 + $0xc7] ss:$8 sm:$0xf0]  }
 0x180   :  { %3530 = vst.msk [vmem:[#allocation0 + $0xc61] ss:$4 sm:$0xff] %vm4_vm1, %v3527_v25   ;;  %4008 = vrot.lane.b32.xlu2 %v4007_v27, %s7583_s26  ;;  %v4183_v25 = vsel %vm2435_vm0, %v7105_v22, %v7104_v20  ;;  %v7108_v27 = vld [vmem:[%s12463_s0 + $0x101] ss:$8 sm:$0xf]  }
 0x182   :  { %v3648_v30 = vpop.permute.xlu2 %3647  }
 0x183   :  { %3651 = vst.msk [vmem:[#allocation0 + $0xdc1] ss:$4 sm:$0xff] %vm4_vm1, %v3648_v30  }
 0x184   :  { %4030 = vrot.lane.b32.xlu1 %v4029_v28, %s7583_s26  ;;  %4019 = vrot.lane.b32.xlu0 %v4018_v29, %s7583_s26  ;;  %v7109_v28 = vld [vmem:[%s12463_s0 + $0x101] ss:$8 sm:$0xf0]   ;;  %v7112_v29 = vld [vmem:[%s12463_s0 + $0x103] ss:$8 sm:$0xf]  }
 0x185   :  { %v4205_v35 = vsel %vm2435_vm0, %v7109_v28, %v7108_v27  ;;  %v4227_v36 = vsel %vm2435_vm0, %v7113_v31, %v7112_v29  ;;  %v7143_v27 = vld [vmem:[%s12463_s0 + $0x182] ss:$8 sm:$0xf0]   ;;  %v7140_v28 = vld [vmem:[%s12463_s0 + $0x181] ss:$8 sm:$0xf]  }
 0x186   :  { %v3571_v34 = vpop.permute.xlu1 %3570   ;;  %v3560_v37 = vpop.permute.xlu0 %3559  }
 0x187   :  { %3574 = vst.msk [vmem:[#allocation0 + $0xce1] ss:$4 sm:$0xff] %vm4_vm1, %v3571_v34   ;;  %v7111_v34 = vld [vmem:[%s12463_s0 + $0x102] ss:$8 sm:$0xf0]  }
 0x188   :  { %3563 = vst.msk [vmem:[#allocation0 + $0xcc1] ss:$4 sm:$0xff] %vm4_vm1, %v3560_v37   ;;  %4041 = vrot.lane.b32.xlu2 %v4040_v39, %s7583_s26  ;;  %v4216_v37 = vsel %vm2435_vm0, %v7111_v34, %v7110_v32  ;;  %v7114_v39 = vld [vmem:[%s12463_s0 + $0x104] ss:$8 sm:$0xf]  }
 0x18a   :  { %v3681_v42 = vpop.permute.xlu2 %3680  }
 0x18b   :  { %3684 = vst.msk [vmem:[#allocation0 + $0xe21] ss:$4 sm:$0xff] %vm4_vm1, %v3681_v42  }
 0x18c   :  { %4063 = vrot.lane.b32.xlu1 %v4062_v40, %s7583_s26  ;;  %4052 = vrot.lane.b32.xlu0 %v4051_v41, %s7583_s26  ;;  %v7115_v40 = vld [vmem:[%s12463_s0 + $0x104] ss:$8 sm:$0xf0]   ;;  %v7118_v41 = vld [vmem:[%s12463_s0 + $0x106] ss:$8 sm:$0xf]  }
 0x18d   :  { %v4238_v47 = vsel %vm2435_vm0, %v7115_v40, %v7114_v39  ;;  %v4260_v48 = vsel %vm2435_vm0, %v7119_v43, %v7118_v41  ;;  %v7149_v39 = vld [vmem:[%s12463_s0 + $0x185] ss:$8 sm:$0xf0]   ;;  %v7146_v40 = vld [vmem:[%s12463_s0 + $0x184] ss:$8 sm:$0xf]  }
 0x18e   :  { %v3604_v46 = vpop.permute.xlu1 %3603   ;;  %v3593_v49 = vpop.permute.xlu0 %3592  }
 0x18f   :  { %3607 = vst.msk [vmem:[#allocation0 + $0xd41] ss:$4 sm:$0xff] %vm4_vm1, %v3604_v46   ;;  %v7117_v46 = vld [vmem:[%s12463_s0 + $0x105] ss:$8 sm:$0xf0]  }
 0x190   :  { %3596 = vst.msk [vmem:[#allocation0 + $0xd21] ss:$4 sm:$0xff] %vm4_vm1, %v3593_v49   ;;  %4074 = vrot.lane.b32.xlu2 %v4073_v51, %s7583_s26  ;;  %v4249_v49 = vsel %vm2435_vm0, %v7117_v46, %v7116_v44  ;;  %v7120_v51 = vld [vmem:[%s12463_s0 + $0x107] ss:$8 sm:$0xf]  }
 0x192   :  { %v3714_v54 = vpop.permute.xlu2 %3713  }
 0x193   :  { %3717 = vst.msk [vmem:[#allocation0 + $0xe81] ss:$4 sm:$0xff] %vm4_vm1, %v3714_v54  }
 0x194   :  { %4096 = vrot.lane.b32.xlu1 %v4095_v52, %s7583_s26  ;;  %4085 = vrot.lane.b32.xlu0 %v4084_v53, %s7583_s26  ;;  %v7121_v52 = vld [vmem:[%s12463_s0 + $0x107] ss:$8 sm:$0xf0]   ;;  %v7124_v53 = vld [vmem:[%s12463_s0 + $0x141] ss:$8 sm:$0xf]  }
 0x195   :  { %v4271_v59 = vsel %vm2435_vm0, %v7121_v52, %v7120_v51  ;;  %v4293_v60 = vsel %vm2435_vm0, %v7125_v55, %v7124_v53  ;;  %v7155_v51 = vld [vmem:[%s12463_s0 + $0x1c0] ss:$8 sm:$0xf0]   ;;  %v7152_v52 = vld [vmem:[%s12463_s0 + $0x187] ss:$8 sm:$0xf]  }
 0x196   :  { %v3637_v58 = vpop.permute.xlu1 %3636   ;;  %v3626_v61 = vpop.permute.xlu0 %3625  }
 0x197   :  { %3640 = vst.msk [vmem:[#allocation0 + $0xda1] ss:$4 sm:$0xff] %vm4_vm1, %v3637_v58   ;;  %v7123_v58 = vld [vmem:[%s12463_s0 + $0x140] ss:$8 sm:$0xf0]  }
 0x198   :  { %3629 = vst.msk [vmem:[#allocation0 + $0xd81] ss:$4 sm:$0xff] %vm4_vm1, %v3626_v61   ;;  %4107 = vrot.lane.b32.xlu2 %v4106_v63, %s7583_s26  ;;  %v4282_v61 = vsel %vm2435_vm0, %v7123_v58, %v7122_v56  ;;  %v7126_v63 = vld [vmem:[%s12463_s0 + $0x142] ss:$8 sm:$0xf]  }
 0x19a   :  { %v3747_v2 = vpop.permute.xlu2 %3746  }
 0x19b   :  { %3750 = vst.msk [vmem:[#allocation0 + $0xee1] ss:$4 sm:$0xff] %vm4_vm1, %v3747_v2  }
 0x19c   :  { %4129 = vrot.lane.b32.xlu1 %v4128_v0, %s7583_s26  ;;  %4118 = vrot.lane.b32.xlu0 %v4117_v1, %s7583_s26  ;;  %v7127_v0 = vld [vmem:[%s12463_s0 + $0x142] ss:$8 sm:$0xf0]   ;;  %v7130_v1 = vld [vmem:[%s12463_s0 + $0x144] ss:$8 sm:$0xf]  }
 0x19d   :  { %v4304_v7 = vsel %vm2435_vm0, %v7127_v0, %v7126_v63  ;;  %v4326_v8 = vsel %vm2435_vm0, %v7131_v3, %v7130_v1  ;;  %v7161_v63 = vld [vmem:[%s12463_s0 + $0x1c3] ss:$8 sm:$0xf0]   ;;  %v7158_v0 = vld [vmem:[%s12463_s0 + $0x1c2] ss:$8 sm:$0xf]  }
 0x19e   :  { %v3670_v6 = vpop.permute.xlu1 %3669   ;;  %v3659_v9 = vpop.permute.xlu0 %3658  }
 0x19f   :  { %3673 = vst.msk [vmem:[#allocation0 + $0xe01] ss:$4 sm:$0xff] %vm4_vm1, %v3670_v6   ;;  %v7129_v6 = vld [vmem:[%s12463_s0 + $0x143] ss:$8 sm:$0xf0]  }
 0x1a0   :  { %3662 = vst.msk [vmem:[#allocation0 + $0xde1] ss:$4 sm:$0xff] %vm4_vm1, %v3659_v9   ;;  %4140 = vrot.lane.b32.xlu2 %v4139_v11, %s7583_s26  ;;  %v4315_v9 = vsel %vm2435_vm0, %v7129_v6, %v7128_v4  ;;  %v7132_v11 = vld [vmem:[%s12463_s0 + $0x145] ss:$8 sm:$0xf]  }
 0x1a2   :  { %v3780_v14 = vpop.permute.xlu2 %3779  }
 0x1a3   :  { %3783 = vst.msk [vmem:[#allocation0 + $0xf41] ss:$4 sm:$0xff] %vm4_vm1, %v3780_v14  }
 0x1a4   :  { %4162 = vrot.lane.b32.xlu1 %v4161_v12, %s7583_s26  ;;  %4151 = vrot.lane.b32.xlu0 %v4150_v13, %s7583_s26  ;;  %v7133_v12 = vld [vmem:[%s12463_s0 + $0x145] ss:$8 sm:$0xf0]   ;;  %v7136_v13 = vld [vmem:[%s12463_s0 + $0x147] ss:$8 sm:$0xf]  }
 0x1a5   :  { %v4337_v19 = vsel %vm2435_vm0, %v7133_v12, %v7132_v11  ;;  %v4359_v20 = vsel %vm2435_vm0, %v7137_v15, %v7136_v13  ;;  %v7167_v11 = vld [vmem:[%s12463_s0 + $0x1c6] ss:$8 sm:$0xf0]   ;;  %v7164_v12 = vld [vmem:[%s12463_s0 + $0x1c5] ss:$8 sm:$0xf]  }
 0x1a6   :  { %v3703_v18 = vpop.permute.xlu1 %3702   ;;  %v3692_v21 = vpop.permute.xlu0 %3691  }
 0x1a7   :  { %3706 = vst.msk [vmem:[#allocation0 + $0xe61] ss:$4 sm:$0xff] %vm4_vm1, %v3703_v18   ;;  %v7135_v18 = vld [vmem:[%s12463_s0 + $0x146] ss:$8 sm:$0xf0]  }
 0x1a8   :  { %3695 = vst.msk [vmem:[#allocation0 + $0xe41] ss:$4 sm:$0xff] %vm4_vm1, %v3692_v21   ;;  %4173 = vrot.lane.b32.xlu2 %v4172_v23, %s7583_s26  ;;  %v4348_v21 = vsel %vm2435_vm0, %v7135_v18, %v7134_v16  ;;  %v7138_v23 = vld [vmem:[%s12463_s0 + $0x180] ss:$8 sm:$0xf]  }
 0x1aa   :  { %v3813_v26 = vpop.permute.xlu2 %3812  }
 0x1ab   :  { %3816 = vst.msk [vmem:[#allocation0 + $0xfa1] ss:$4 sm:$0xff] %vm4_vm1, %v3813_v26  }
 0x1ac   :  { %4195 = vrot.lane.b32.xlu1 %v4194_v24, %s7583_s26  ;;  %4184 = vrot.lane.b32.xlu0 %v4183_v25, %s7583_s26  ;;  %v7139_v24 = vld [vmem:[%s12463_s0 + $0x180] ss:$8 sm:$0xf0]   ;;  %v7142_v25 = vld [vmem:[%s12463_s0 + $0x182] ss:$8 sm:$0xf]  }
 0x1ad   :  { %v4370_v31 = vsel %vm2435_vm0, %v7139_v24, %v7138_v23  ;;  %v4392_v32 = vsel %vm2435_vm0, %v7143_v27, %v7142_v25  ;;  %v7173_v23 = vld [vmem:[%s12463_s0 + $0x201] ss:$8 sm:$0xf0]   ;;  %v7170_v24 = vld [vmem:[%s12463_s0 + $0x200] ss:$8 sm:$0xf]  }
 0x1ae   :  { %v3736_v30 = vpop.permute.xlu1 %3735   ;;  %v3725_v33 = vpop.permute.xlu0 %3724  }
 0x1af   :  { %3739 = vst.msk [vmem:[#allocation0 + $0xec1] ss:$4 sm:$0xff] %vm4_vm1, %v3736_v30   ;;  %v7141_v30 = vld [vmem:[%s12463_s0 + $0x181] ss:$8 sm:$0xf0]  }
 0x1b0   :  { %3728 = vst.msk [vmem:[#allocation0 + $0xea1] ss:$4 sm:$0xff] %vm4_vm1, %v3725_v33   ;;  %4206 = vrot.lane.b32.xlu2 %v4205_v35, %s7583_s26  ;;  %v4381_v33 = vsel %vm2435_vm0, %v7141_v30, %v7140_v28  ;;  %v7144_v35 = vld [vmem:[%s12463_s0 + $0x183] ss:$8 sm:$0xf]  }
 0x1b2   :  { %v3844_v38 = vpop.permute.xlu2 %3843  }
 0x1b3   :  { %3847 = vst.msk [vmem:[#allocation0 + $0x2] ss:$4 sm:$0xff] %vm4_vm1, %v3844_v38  }
 0x1b4   :  { %4228 = vrot.lane.b32.xlu1 %v4227_v36, %s7583_s26  ;;  %4217 = vrot.lane.b32.xlu0 %v4216_v37, %s7583_s26  ;;  %v7145_v36 = vld [vmem:[%s12463_s0 + $0x183] ss:$8 sm:$0xf0]   ;;  %v7148_v37 = vld [vmem:[%s12463_s0 + $0x185] ss:$8 sm:$0xf]  }
 0x1b5   :  { %v4403_v43 = vsel %vm2435_vm0, %v7145_v36, %v7144_v35  ;;  %v4425_v44 = vsel %vm2435_vm0, %v7149_v39, %v7148_v37  ;;  %v7179_v35 = vld [vmem:[%s12463_s0 + $0x204] ss:$8 sm:$0xf0]   ;;  %v7176_v36 = vld [vmem:[%s12463_s0 + $0x203] ss:$8 sm:$0xf]  }
 0x1b6   :  { %v3769_v42 = vpop.permute.xlu1 %3768   ;;  %v3758_v45 = vpop.permute.xlu0 %3757  }
 0x1b7   :  { %3772 = vst.msk [vmem:[#allocation0 + $0xf21] ss:$4 sm:$0xff] %vm4_vm1, %v3769_v42   ;;  %v7147_v42 = vld [vmem:[%s12463_s0 + $0x184] ss:$8 sm:$0xf0]  }
 0x1b8   :  { %3761 = vst.msk [vmem:[#allocation0 + $0xf01] ss:$4 sm:$0xff] %vm4_vm1, %v3758_v45   ;;  %4239 = vrot.lane.b32.xlu2 %v4238_v47, %s7583_s26  ;;  %v4414_v45 = vsel %vm2435_vm0, %v7147_v42, %v7146_v40  ;;  %v7150_v47 = vld [vmem:[%s12463_s0 + $0x186] ss:$8 sm:$0xf]  }
 0x1ba   :  { %v3877_v50 = vpop.permute.xlu2 %3876  }
 0x1bb   :  { %3880 = vst.msk [vmem:[#allocation0 + $0x62] ss:$4 sm:$0xff] %vm4_vm1, %v3877_v50  }
 0x1bc   :  { %4261 = vrot.lane.b32.xlu1 %v4260_v48, %s7583_s26  ;;  %4250 = vrot.lane.b32.xlu0 %v4249_v49, %s7583_s26  ;;  %v7151_v48 = vld [vmem:[%s12463_s0 + $0x186] ss:$8 sm:$0xf0]   ;;  %v7154_v49 = vld [vmem:[%s12463_s0 + $0x1c0] ss:$8 sm:$0xf]  }
 0x1bd   :  { %v4436_v55 = vsel %vm2435_vm0, %v7151_v48, %v7150_v47  ;;  %v4458_v56 = vsel %vm2435_vm0, %v7155_v51, %v7154_v49  ;;  %v7185_v47 = vld [vmem:[%s12463_s0 + $0x207] ss:$8 sm:$0xf0]   ;;  %v7182_v48 = vld [vmem:[%s12463_s0 + $0x206] ss:$8 sm:$0xf]  }
 0x1be   :  { %v3802_v54 = vpop.permute.xlu1 %3801   ;;  %v3791_v57 = vpop.permute.xlu0 %3790  }
 0x1bf   :  { %3805 = vst.msk [vmem:[#allocation0 + $0xf81] ss:$4 sm:$0xff] %vm4_vm1, %v3802_v54   ;;  %v7153_v54 = vld [vmem:[%s12463_s0 + $0x187] ss:$8 sm:$0xf0]  }
 0x1c0   :  { %3794 = vst.msk [vmem:[#allocation0 + $0xf61] ss:$4 sm:$0xff] %vm4_vm1, %v3791_v57   ;;  %4272 = vrot.lane.b32.xlu2 %v4271_v59, %s7583_s26  ;;  %v4447_v57 = vsel %vm2435_vm0, %v7153_v54, %v7152_v52  ;;  %v7156_v59 = vld [vmem:[%s12463_s0 + $0x1c1] ss:$8 sm:$0xf]  }
 0x1c2   :  { %v3910_v62 = vpop.permute.xlu2 %3909  }
 0x1c3   :  { %3913 = vst.msk [vmem:[#allocation0 + $0xc2] ss:$4 sm:$0xff] %vm4_vm1, %v3910_v62  }
 0x1c4   :  { %4294 = vrot.lane.b32.xlu1 %v4293_v60, %s7583_s26  ;;  %4283 = vrot.lane.b32.xlu0 %v4282_v61, %s7583_s26  ;;  %v7157_v60 = vld [vmem:[%s12463_s0 + $0x1c1] ss:$8 sm:$0xf0]   ;;  %v7160_v61 = vld [vmem:[%s12463_s0 + $0x1c3] ss:$8 sm:$0xf]  }
 0x1c5   :  { %v4469_v3 = vsel %vm2435_vm0, %v7157_v60, %v7156_v59  ;;  %v4491_v4 = vsel %vm2435_vm0, %v7161_v63, %v7160_v61  ;;  %v7191_v59 = vld [vmem:[%s12463_s0 + $0x242] ss:$8 sm:$0xf0]   ;;  %v7188_v60 = vld [vmem:[%s12463_s0 + $0x241] ss:$8 sm:$0xf]  }
 0x1c6   :  { %v3835_v2 = vpop.permute.xlu1 %3834   ;;  %v3824_v5 = vpop.permute.xlu0 %3823  }
 0x1c7   :  { %3838 = vst.msk [vmem:[#allocation0 + $0xfe1] ss:$4 sm:$0xff] %vm4_vm1, %v3835_v2   ;;  %v7159_v2 = vld [vmem:[%s12463_s0 + $0x1c2] ss:$8 sm:$0xf0]  }
 0x1c8   :  { %3827 = vst.msk [vmem:[#allocation0 + $0xfc1] ss:$4 sm:$0xff] %vm4_vm1, %v3824_v5   ;;  %4305 = vrot.lane.b32.xlu2 %v4304_v7, %s7583_s26  ;;  %v4480_v5 = vsel %vm2435_vm0, %v7159_v2, %v7158_v0  ;;  %v7162_v7 = vld [vmem:[%s12463_s0 + $0x1c4] ss:$8 sm:$0xf]  }
 0x1ca   :  { %v3943_v10 = vpop.permute.xlu2 %3942  }
 0x1cb   :  { %3946 = vst.msk [vmem:[#allocation0 + $0x122] ss:$4 sm:$0xff] %vm4_vm1, %v3943_v10  }
 0x1cc   :  { %4327 = vrot.lane.b32.xlu1 %v4326_v8, %s7583_s26  ;;  %4316 = vrot.lane.b32.xlu0 %v4315_v9, %s7583_s26  ;;  %v7163_v8 = vld [vmem:[%s12463_s0 + $0x1c4] ss:$8 sm:$0xf0]   ;;  %v7166_v9 = vld [vmem:[%s12463_s0 + $0x1c6] ss:$8 sm:$0xf]  }
 0x1cd   :  { %v4502_v15 = vsel %vm2435_vm0, %v7163_v8, %v7162_v7  ;;  %v4524_v16 = vsel %vm2435_vm0, %v7167_v11, %v7166_v9  ;;  %v7197_v7 = vld [vmem:[%s12463_s0 + $0x245] ss:$8 sm:$0xf0]   ;;  %v7194_v8 = vld [vmem:[%s12463_s0 + $0x244] ss:$8 sm:$0xf]  }
 0x1ce   :  { %v3866_v14 = vpop.permute.xlu1 %3865   ;;  %v3855_v17 = vpop.permute.xlu0 %3854  }
 0x1cf   :  { %3869 = vst.msk [vmem:[#allocation0 + $0x42] ss:$4 sm:$0xff] %vm4_vm1, %v3866_v14   ;;  %v7165_v14 = vld [vmem:[%s12463_s0 + $0x1c5] ss:$8 sm:$0xf0]  }
 0x1d0   :  { %3858 = vst.msk [vmem:[#allocation0 + $0x22] ss:$4 sm:$0xff] %vm4_vm1, %v3855_v17   ;;  %4338 = vrot.lane.b32.xlu2 %v4337_v19, %s7583_s26  ;;  %v4513_v17 = vsel %vm2435_vm0, %v7165_v14, %v7164_v12  ;;  %v7168_v19 = vld [vmem:[%s12463_s0 + $0x1c7] ss:$8 sm:$0xf]  }
 0x1d2   :  { %v3976_v22 = vpop.permute.xlu2 %3975  }
 0x1d3   :  { %3979 = vst.msk [vmem:[#allocation0 + $0x182] ss:$4 sm:$0xff] %vm4_vm1, %v3976_v22  }
 0x1d4   :  { %4360 = vrot.lane.b32.xlu1 %v4359_v20, %s7583_s26  ;;  %4349 = vrot.lane.b32.xlu0 %v4348_v21, %s7583_s26  ;;  %v7169_v20 = vld [vmem:[%s12463_s0 + $0x1c7] ss:$8 sm:$0xf0]   ;;  %v7172_v21 = vld [vmem:[%s12463_s0 + $0x201] ss:$8 sm:$0xf]  }
 0x1d5   :  { %v4535_v27 = vsel %vm2435_vm0, %v7169_v20, %v7168_v19  ;;  %v4557_v28 = vsel %vm2435_vm0, %v7173_v23, %v7172_v21  ;;  %v7203_v19 = vld [vmem:[%s12463_s0 + $0x280] ss:$8 sm:$0xf0]   ;;  %v7200_v20 = vld [vmem:[%s12463_s0 + $0x247] ss:$8 sm:$0xf]  }
 0x1d6   :  { %v3899_v26 = vpop.permute.xlu1 %3898   ;;  %v3888_v29 = vpop.permute.xlu0 %3887  }
 0x1d7   :  { %3902 = vst.msk [vmem:[#allocation0 + $0xa2] ss:$4 sm:$0xff] %vm4_vm1, %v3899_v26   ;;  %v7171_v26 = vld [vmem:[%s12463_s0 + $0x200] ss:$8 sm:$0xf0]  }
 0x1d8   :  { %3891 = vst.msk [vmem:[#allocation0 + $0x82] ss:$4 sm:$0xff] %vm4_vm1, %v3888_v29   ;;  %4371 = vrot.lane.b32.xlu2 %v4370_v31, %s7583_s26  ;;  %v4546_v29 = vsel %vm2435_vm0, %v7171_v26, %v7170_v24  ;;  %v7174_v31 = vld [vmem:[%s12463_s0 + $0x202] ss:$8 sm:$0xf]  }
 0x1da   :  { %v4009_v34 = vpop.permute.xlu2 %4008  }
 0x1db   :  { %4012 = vst.msk [vmem:[#allocation0 + $0x1e2] ss:$4 sm:$0xff] %vm4_vm1, %v4009_v34  }
 0x1dc   :  { %4393 = vrot.lane.b32.xlu1 %v4392_v32, %s7583_s26  ;;  %4382 = vrot.lane.b32.xlu0 %v4381_v33, %s7583_s26  ;;  %v7175_v32 = vld [vmem:[%s12463_s0 + $0x202] ss:$8 sm:$0xf0]   ;;  %v7178_v33 = vld [vmem:[%s12463_s0 + $0x204] ss:$8 sm:$0xf]  }
 0x1dd   :  { %v4568_v39 = vsel %vm2435_vm0, %v7175_v32, %v7174_v31  ;;  %v4590_v40 = vsel %vm2435_vm0, %v7179_v35, %v7178_v33  ;;  %v7209_v31 = vld [vmem:[%s12463_s0 + $0x283] ss:$8 sm:$0xf0]   ;;  %v7206_v32 = vld [vmem:[%s12463_s0 + $0x282] ss:$8 sm:$0xf]  }
 0x1de   :  { %v3932_v38 = vpop.permute.xlu1 %3931   ;;  %v3921_v41 = vpop.permute.xlu0 %3920  }
 0x1df   :  { %3935 = vst.msk [vmem:[#allocation0 + $0x102] ss:$4 sm:$0xff] %vm4_vm1, %v3932_v38   ;;  %v7177_v38 = vld [vmem:[%s12463_s0 + $0x203] ss:$8 sm:$0xf0]  }
 0x1e0   :  { %3924 = vst.msk [vmem:[#allocation0 + $0xe2] ss:$4 sm:$0xff] %vm4_vm1, %v3921_v41   ;;  %4404 = vrot.lane.b32.xlu2 %v4403_v43, %s7583_s26  ;;  %v4579_v41 = vsel %vm2435_vm0, %v7177_v38, %v7176_v36  ;;  %v7180_v43 = vld [vmem:[%s12463_s0 + $0x205] ss:$8 sm:$0xf]  }
 0x1e2   :  { %v4042_v46 = vpop.permute.xlu2 %4041  }
 0x1e3   :  { %4045 = vst.msk [vmem:[#allocation0 + $0x242] ss:$4 sm:$0xff] %vm4_vm1, %v4042_v46  }
 0x1e4   :  { %4426 = vrot.lane.b32.xlu1 %v4425_v44, %s7583_s26  ;;  %4415 = vrot.lane.b32.xlu0 %v4414_v45, %s7583_s26  ;;  %v7181_v44 = vld [vmem:[%s12463_s0 + $0x205] ss:$8 sm:$0xf0]   ;;  %v7184_v45 = vld [vmem:[%s12463_s0 + $0x207] ss:$8 sm:$0xf]  }
 0x1e5   :  { %v4601_v51 = vsel %vm2435_vm0, %v7181_v44, %v7180_v43  ;;  %v4623_v52 = vsel %vm2435_vm0, %v7185_v47, %v7184_v45  ;;  %v7215_v43 = vld [vmem:[%s12463_s0 + $0x286] ss:$8 sm:$0xf0]   ;;  %v7212_v44 = vld [vmem:[%s12463_s0 + $0x285] ss:$8 sm:$0xf]  }
 0x1e6   :  { %v3965_v50 = vpop.permute.xlu1 %3964   ;;  %v3954_v53 = vpop.permute.xlu0 %3953  }
 0x1e7   :  { %3968 = vst.msk [vmem:[#allocation0 + $0x162] ss:$4 sm:$0xff] %vm4_vm1, %v3965_v50   ;;  %v7183_v50 = vld [vmem:[%s12463_s0 + $0x206] ss:$8 sm:$0xf0]  }
 0x1e8   :  { %3957 = vst.msk [vmem:[#allocation0 + $0x142] ss:$4 sm:$0xff] %vm4_vm1, %v3954_v53   ;;  %4437 = vrot.lane.b32.xlu2 %v4436_v55, %s7583_s26  ;;  %v4612_v53 = vsel %vm2435_vm0, %v7183_v50, %v7182_v48  ;;  %v7186_v55 = vld [vmem:[%s12463_s0 + $0x240] ss:$8 sm:$0xf]  }
 0x1ea   :  { %v4075_v58 = vpop.permute.xlu2 %4074  }
 0x1eb   :  { %4078 = vst.msk [vmem:[#allocation0 + $0x2a2] ss:$4 sm:$0xff] %vm4_vm1, %v4075_v58  }
 0x1ec   :  { %4459 = vrot.lane.b32.xlu1 %v4458_v56, %s7583_s26  ;;  %4448 = vrot.lane.b32.xlu0 %v4447_v57, %s7583_s26  ;;  %v7187_v56 = vld [vmem:[%s12463_s0 + $0x240] ss:$8 sm:$0xf0]   ;;  %v7190_v57 = vld [vmem:[%s12463_s0 + $0x242] ss:$8 sm:$0xf]  }
 0x1ed   :  { %v4634_v63 = vsel %vm2435_vm0, %v7187_v56, %v7186_v55  ;;  %v4656_v0 = vsel %vm2435_vm0, %v7191_v59, %v7190_v57  ;;  %v7221_v55 = vld [vmem:[%s12463_s0 + $0x2c1] ss:$8 sm:$0xf0]   ;;  %v7218_v56 = vld [vmem:[%s12463_s0 + $0x2c0] ss:$8 sm:$0xf]  }
 0x1ee   :  { %v3998_v62 = vpop.permute.xlu1 %3997   ;;  %v3987_v1 = vpop.permute.xlu0 %3986  }
 0x1ef   :  { %4001 = vst.msk [vmem:[#allocation0 + $0x1c2] ss:$4 sm:$0xff] %vm4_vm1, %v3998_v62   ;;  %v7189_v62 = vld [vmem:[%s12463_s0 + $0x241] ss:$8 sm:$0xf0]  }
 0x1f0   :  { %3990 = vst.msk [vmem:[#allocation0 + $0x1a2] ss:$4 sm:$0xff] %vm4_vm1, %v3987_v1   ;;  %4470 = vrot.lane.b32.xlu2 %v4469_v3, %s7583_s26  ;;  %v4645_v1 = vsel %vm2435_vm0, %v7189_v62, %v7188_v60  ;;  %v7192_v3 = vld [vmem:[%s12463_s0 + $0x243] ss:$8 sm:$0xf]  }
 0x1f2   :  { %v4108_v6 = vpop.permute.xlu2 %4107  }
 0x1f3   :  { %4111 = vst.msk [vmem:[#allocation0 + $0x302] ss:$4 sm:$0xff] %vm4_vm1, %v4108_v6  }
 0x1f4   :  { %4492 = vrot.lane.b32.xlu1 %v4491_v4, %s7583_s26  ;;  %4481 = vrot.lane.b32.xlu0 %v4480_v5, %s7583_s26  ;;  %v7193_v4 = vld [vmem:[%s12463_s0 + $0x243] ss:$8 sm:$0xf0]   ;;  %v7196_v5 = vld [vmem:[%s12463_s0 + $0x245] ss:$8 sm:$0xf]  }
 0x1f5   :  { %v4667_v11 = vsel %vm2435_vm0, %v7193_v4, %v7192_v3  ;;  %v4689_v12 = vsel %vm2435_vm0, %v7197_v7, %v7196_v5  ;;  %v7227_v3 = vld [vmem:[%s12463_s0 + $0x2c4] ss:$8 sm:$0xf0]   ;;  %v7224_v4 = vld [vmem:[%s12463_s0 + $0x2c3] ss:$8 sm:$0xf]  }
 0x1f6   :  { %v4031_v10 = vpop.permute.xlu1 %4030   ;;  %v4020_v13 = vpop.permute.xlu0 %4019  }
 0x1f7   :  { %4034 = vst.msk [vmem:[#allocation0 + $0x222] ss:$4 sm:$0xff] %vm4_vm1, %v4031_v10   ;;  %v7195_v10 = vld [vmem:[%s12463_s0 + $0x244] ss:$8 sm:$0xf0]  }
 0x1f8   :  { %4023 = vst.msk [vmem:[#allocation0 + $0x202] ss:$4 sm:$0xff] %vm4_vm1, %v4020_v13   ;;  %4503 = vrot.lane.b32.xlu2 %v4502_v15, %s7583_s26  ;;  %v4678_v13 = vsel %vm2435_vm0, %v7195_v10, %v7194_v8  ;;  %v7198_v15 = vld [vmem:[%s12463_s0 + $0x246] ss:$8 sm:$0xf]  }
 0x1fa   :  { %v4141_v18 = vpop.permute.xlu2 %4140  }
 0x1fb   :  { %4144 = vst.msk [vmem:[#allocation0 + $0x362] ss:$4 sm:$0xff] %vm4_vm1, %v4141_v18  }
 0x1fc   :  { %4525 = vrot.lane.b32.xlu1 %v4524_v16, %s7583_s26  ;;  %4514 = vrot.lane.b32.xlu0 %v4513_v17, %s7583_s26  ;;  %v7199_v16 = vld [vmem:[%s12463_s0 + $0x246] ss:$8 sm:$0xf0]   ;;  %v7202_v17 = vld [vmem:[%s12463_s0 + $0x280] ss:$8 sm:$0xf]  }
 0x1fd   :  { %v4700_v23 = vsel %vm2435_vm0, %v7199_v16, %v7198_v15  ;;  %v4722_v24 = vsel %vm2435_vm0, %v7203_v19, %v7202_v17  ;;  %v7233_v15 = vld [vmem:[%s12463_s0 + $0x2c7] ss:$8 sm:$0xf0]   ;;  %v7230_v16 = vld [vmem:[%s12463_s0 + $0x2c6] ss:$8 sm:$0xf]  }
 0x1fe   :  { %v4064_v22 = vpop.permute.xlu1 %4063   ;;  %v4053_v25 = vpop.permute.xlu0 %4052  }
 0x1ff   :  { %4067 = vst.msk [vmem:[#allocation0 + $0x282] ss:$4 sm:$0xff] %vm4_vm1, %v4064_v22   ;;  %v7201_v22 = vld [vmem:[%s12463_s0 + $0x247] ss:$8 sm:$0xf0]  }
 0x200   :  { %4056 = vst.msk [vmem:[#allocation0 + $0x262] ss:$4 sm:$0xff] %vm4_vm1, %v4053_v25   ;;  %4536 = vrot.lane.b32.xlu2 %v4535_v27, %s7583_s26  ;;  %v4711_v25 = vsel %vm2435_vm0, %v7201_v22, %v7200_v20  ;;  %v7204_v27 = vld [vmem:[%s12463_s0 + $0x281] ss:$8 sm:$0xf]  }
 0x202   :  { %v4174_v30 = vpop.permute.xlu2 %4173  }
 0x203   :  { %4177 = vst.msk [vmem:[#allocation0 + $0x3c2] ss:$4 sm:$0xff] %vm4_vm1, %v4174_v30  }
 0x204   :  { %4558 = vrot.lane.b32.xlu1 %v4557_v28, %s7583_s26  ;;  %4547 = vrot.lane.b32.xlu0 %v4546_v29, %s7583_s26  ;;  %v7205_v28 = vld [vmem:[%s12463_s0 + $0x281] ss:$8 sm:$0xf0]   ;;  %v7208_v29 = vld [vmem:[%s12463_s0 + $0x283] ss:$8 sm:$0xf]  }
 0x205   :  { %v4733_v35 = vsel %vm2435_vm0, %v7205_v28, %v7204_v27  ;;  %v4755_v36 = vsel %vm2435_vm0, %v7209_v31, %v7208_v29  ;;  %v7239_v27 = vld [vmem:[%s12463_s0 + $0x302] ss:$8 sm:$0xf0]   ;;  %v7236_v28 = vld [vmem:[%s12463_s0 + $0x301] ss:$8 sm:$0xf]  }
 0x206   :  { %v4097_v34 = vpop.permute.xlu1 %4096   ;;  %v4086_v37 = vpop.permute.xlu0 %4085  }
 0x207   :  { %4100 = vst.msk [vmem:[#allocation0 + $0x2e2] ss:$4 sm:$0xff] %vm4_vm1, %v4097_v34   ;;  %v7207_v34 = vld [vmem:[%s12463_s0 + $0x282] ss:$8 sm:$0xf0]  }
 0x208   :  { %4089 = vst.msk [vmem:[#allocation0 + $0x2c2] ss:$4 sm:$0xff] %vm4_vm1, %v4086_v37   ;;  %4569 = vrot.lane.b32.xlu2 %v4568_v39, %s7583_s26  ;;  %v4744_v37 = vsel %vm2435_vm0, %v7207_v34, %v7206_v32  ;;  %v7210_v39 = vld [vmem:[%s12463_s0 + $0x284] ss:$8 sm:$0xf]  }
 0x20a   :  { %v4207_v42 = vpop.permute.xlu2 %4206  }
 0x20b   :  { %4210 = vst.msk [vmem:[#allocation0 + $0x422] ss:$4 sm:$0xff] %vm4_vm1, %v4207_v42  }
 0x20c   :  { %4591 = vrot.lane.b32.xlu1 %v4590_v40, %s7583_s26  ;;  %4580 = vrot.lane.b32.xlu0 %v4579_v41, %s7583_s26  ;;  %v7211_v40 = vld [vmem:[%s12463_s0 + $0x284] ss:$8 sm:$0xf0]   ;;  %v7214_v41 = vld [vmem:[%s12463_s0 + $0x286] ss:$8 sm:$0xf]  }
 0x20d   :  { %v4766_v47 = vsel %vm2435_vm0, %v7211_v40, %v7210_v39  ;;  %v4788_v48 = vsel %vm2435_vm0, %v7215_v43, %v7214_v41  ;;  %v7245_v39 = vld [vmem:[%s12463_s0 + $0x305] ss:$8 sm:$0xf0]   ;;  %v7242_v40 = vld [vmem:[%s12463_s0 + $0x304] ss:$8 sm:$0xf]  }
 0x20e   :  { %v4130_v46 = vpop.permute.xlu1 %4129   ;;  %v4119_v49 = vpop.permute.xlu0 %4118  }
 0x20f   :  { %4133 = vst.msk [vmem:[#allocation0 + $0x342] ss:$4 sm:$0xff] %vm4_vm1, %v4130_v46   ;;  %v7213_v46 = vld [vmem:[%s12463_s0 + $0x285] ss:$8 sm:$0xf0]  }
 0x210   :  { %4122 = vst.msk [vmem:[#allocation0 + $0x322] ss:$4 sm:$0xff] %vm4_vm1, %v4119_v49   ;;  %4602 = vrot.lane.b32.xlu2 %v4601_v51, %s7583_s26  ;;  %v4777_v49 = vsel %vm2435_vm0, %v7213_v46, %v7212_v44  ;;  %v7216_v51 = vld [vmem:[%s12463_s0 + $0x287] ss:$8 sm:$0xf]  }
 0x212   :  { %v4240_v54 = vpop.permute.xlu2 %4239  }
 0x213   :  { %4243 = vst.msk [vmem:[#allocation0 + $0x482] ss:$4 sm:$0xff] %vm4_vm1, %v4240_v54  }
 0x214   :  { %4624 = vrot.lane.b32.xlu1 %v4623_v52, %s7583_s26  ;;  %4613 = vrot.lane.b32.xlu0 %v4612_v53, %s7583_s26  ;;  %v7217_v52 = vld [vmem:[%s12463_s0 + $0x287] ss:$8 sm:$0xf0]   ;;  %v7220_v53 = vld [vmem:[%s12463_s0 + $0x2c1] ss:$8 sm:$0xf]  }
 0x215   :  { %v4799_v59 = vsel %vm2435_vm0, %v7217_v52, %v7216_v51  ;;  %v4821_v60 = vsel %vm2435_vm0, %v7221_v55, %v7220_v53  ;;  %v7251_v51 = vld [vmem:[%s12463_s0 + $0x340] ss:$8 sm:$0xf0]   ;;  %v7248_v52 = vld [vmem:[%s12463_s0 + $0x307] ss:$8 sm:$0xf]  }
 0x216   :  { %v4163_v58 = vpop.permute.xlu1 %4162   ;;  %v4152_v61 = vpop.permute.xlu0 %4151  }
 0x217   :  { %4166 = vst.msk [vmem:[#allocation0 + $0x3a2] ss:$4 sm:$0xff] %vm4_vm1, %v4163_v58   ;;  %v7219_v58 = vld [vmem:[%s12463_s0 + $0x2c0] ss:$8 sm:$0xf0]  }
 0x218   :  { %4155 = vst.msk [vmem:[#allocation0 + $0x382] ss:$4 sm:$0xff] %vm4_vm1, %v4152_v61   ;;  %4635 = vrot.lane.b32.xlu2 %v4634_v63, %s7583_s26  ;;  %v4810_v61 = vsel %vm2435_vm0, %v7219_v58, %v7218_v56  ;;  %v7222_v63 = vld [vmem:[%s12463_s0 + $0x2c2] ss:$8 sm:$0xf]  }
 0x21a   :  { %v4273_v2 = vpop.permute.xlu2 %4272  }
 0x21b   :  { %4276 = vst.msk [vmem:[#allocation0 + $0x4e2] ss:$4 sm:$0xff] %vm4_vm1, %v4273_v2  }
 0x21c   :  { %4657 = vrot.lane.b32.xlu1 %v4656_v0, %s7583_s26  ;;  %4646 = vrot.lane.b32.xlu0 %v4645_v1, %s7583_s26  ;;  %v7223_v0 = vld [vmem:[%s12463_s0 + $0x2c2] ss:$8 sm:$0xf0]   ;;  %v7226_v1 = vld [vmem:[%s12463_s0 + $0x2c4] ss:$8 sm:$0xf]  }
 0x21d   :  { %v4832_v7 = vsel %vm2435_vm0, %v7223_v0, %v7222_v63  ;;  %v4854_v8 = vsel %vm2435_vm0, %v7227_v3, %v7226_v1  ;;  %v7257_v63 = vld [vmem:[%s12463_s0 + $0x343] ss:$8 sm:$0xf0]   ;;  %v7254_v0 = vld [vmem:[%s12463_s0 + $0x342] ss:$8 sm:$0xf]  }
 0x21e   :  { %v4196_v6 = vpop.permute.xlu1 %4195   ;;  %v4185_v9 = vpop.permute.xlu0 %4184  }
 0x21f   :  { %4199 = vst.msk [vmem:[#allocation0 + $0x402] ss:$4 sm:$0xff] %vm4_vm1, %v4196_v6   ;;  %v7225_v6 = vld [vmem:[%s12463_s0 + $0x2c3] ss:$8 sm:$0xf0]  }
 0x220   :  { %4188 = vst.msk [vmem:[#allocation0 + $0x3e2] ss:$4 sm:$0xff] %vm4_vm1, %v4185_v9   ;;  %4668 = vrot.lane.b32.xlu2 %v4667_v11, %s7583_s26  ;;  %v4843_v9 = vsel %vm2435_vm0, %v7225_v6, %v7224_v4  ;;  %v7228_v11 = vld [vmem:[%s12463_s0 + $0x2c5] ss:$8 sm:$0xf]  }
 0x222   :  { %v4306_v14 = vpop.permute.xlu2 %4305  }
 0x223   :  { %4309 = vst.msk [vmem:[#allocation0 + $0x542] ss:$4 sm:$0xff] %vm4_vm1, %v4306_v14  }
 0x224   :  { %4690 = vrot.lane.b32.xlu1 %v4689_v12, %s7583_s26  ;;  %4679 = vrot.lane.b32.xlu0 %v4678_v13, %s7583_s26  ;;  %v7229_v12 = vld [vmem:[%s12463_s0 + $0x2c5] ss:$8 sm:$0xf0]   ;;  %v7232_v13 = vld [vmem:[%s12463_s0 + $0x2c7] ss:$8 sm:$0xf]  }
 0x225   :  { %v4865_v19 = vsel %vm2435_vm0, %v7229_v12, %v7228_v11  ;;  %v4887_v20 = vsel %vm2435_vm0, %v7233_v15, %v7232_v13  ;;  %v7263_v11 = vld [vmem:[%s12463_s0 + $0x346] ss:$8 sm:$0xf0]   ;;  %v7260_v12 = vld [vmem:[%s12463_s0 + $0x345] ss:$8 sm:$0xf]  }
 0x226   :  { %v4229_v18 = vpop.permute.xlu1 %4228   ;;  %v4218_v21 = vpop.permute.xlu0 %4217  }
 0x227   :  { %4232 = vst.msk [vmem:[#allocation0 + $0x462] ss:$4 sm:$0xff] %vm4_vm1, %v4229_v18   ;;  %v7231_v18 = vld [vmem:[%s12463_s0 + $0x2c6] ss:$8 sm:$0xf0]  }
 0x228   :  { %4221 = vst.msk [vmem:[#allocation0 + $0x442] ss:$4 sm:$0xff] %vm4_vm1, %v4218_v21   ;;  %4701 = vrot.lane.b32.xlu2 %v4700_v23, %s7583_s26  ;;  %v4876_v21 = vsel %vm2435_vm0, %v7231_v18, %v7230_v16  ;;  %v7234_v23 = vld [vmem:[%s12463_s0 + $0x300] ss:$8 sm:$0xf]  }
 0x22a   :  { %v4339_v26 = vpop.permute.xlu2 %4338  }
 0x22b   :  { %4342 = vst.msk [vmem:[#allocation0 + $0x5a2] ss:$4 sm:$0xff] %vm4_vm1, %v4339_v26  }
 0x22c   :  { %4723 = vrot.lane.b32.xlu1 %v4722_v24, %s7583_s26  ;;  %4712 = vrot.lane.b32.xlu0 %v4711_v25, %s7583_s26  ;;  %v7235_v24 = vld [vmem:[%s12463_s0 + $0x300] ss:$8 sm:$0xf0]   ;;  %v7238_v25 = vld [vmem:[%s12463_s0 + $0x302] ss:$8 sm:$0xf]  }
 0x22d   :  { %v4898_v31 = vsel %vm2435_vm0, %v7235_v24, %v7234_v23  ;;  %v4920_v32 = vsel %vm2435_vm0, %v7239_v27, %v7238_v25  ;;  %v7269_v23 = vld [vmem:[%s12463_s0 + $0x381] ss:$8 sm:$0xf0]   ;;  %v7266_v24 = vld [vmem:[%s12463_s0 + $0x380] ss:$8 sm:$0xf]  }
 0x22e   :  { %v4262_v30 = vpop.permute.xlu1 %4261   ;;  %v4251_v33 = vpop.permute.xlu0 %4250  }
 0x22f   :  { %4265 = vst.msk [vmem:[#allocation0 + $0x4c2] ss:$4 sm:$0xff] %vm4_vm1, %v4262_v30   ;;  %v7237_v30 = vld [vmem:[%s12463_s0 + $0x301] ss:$8 sm:$0xf0]  }
 0x230   :  { %4254 = vst.msk [vmem:[#allocation0 + $0x4a2] ss:$4 sm:$0xff] %vm4_vm1, %v4251_v33   ;;  %4734 = vrot.lane.b32.xlu2 %v4733_v35, %s7583_s26  ;;  %v4909_v33 = vsel %vm2435_vm0, %v7237_v30, %v7236_v28  ;;  %v7240_v35 = vld [vmem:[%s12463_s0 + $0x303] ss:$8 sm:$0xf]  }
 0x232   :  { %v4372_v38 = vpop.permute.xlu2 %4371  }
 0x233   :  { %4375 = vst.msk [vmem:[#allocation0 + $0x602] ss:$4 sm:$0xff] %vm4_vm1, %v4372_v38  }
 0x234   :  { %4756 = vrot.lane.b32.xlu1 %v4755_v36, %s7583_s26  ;;  %4745 = vrot.lane.b32.xlu0 %v4744_v37, %s7583_s26  ;;  %v7241_v36 = vld [vmem:[%s12463_s0 + $0x303] ss:$8 sm:$0xf0]   ;;  %v7244_v37 = vld [vmem:[%s12463_s0 + $0x305] ss:$8 sm:$0xf]  }
 0x235   :  { %v4931_v43 = vsel %vm2435_vm0, %v7241_v36, %v7240_v35  ;;  %v4953_v44 = vsel %vm2435_vm0, %v7245_v39, %v7244_v37  ;;  %v7275_v35 = vld [vmem:[%s12463_s0 + $0x384] ss:$8 sm:$0xf0]   ;;  %v7272_v36 = vld [vmem:[%s12463_s0 + $0x383] ss:$8 sm:$0xf]  }
 0x236   :  { %v4295_v42 = vpop.permute.xlu1 %4294   ;;  %v4284_v45 = vpop.permute.xlu0 %4283  }
 0x237   :  { %4298 = vst.msk [vmem:[#allocation0 + $0x522] ss:$4 sm:$0xff] %vm4_vm1, %v4295_v42   ;;  %v7243_v42 = vld [vmem:[%s12463_s0 + $0x304] ss:$8 sm:$0xf0]  }
 0x238   :  { %4287 = vst.msk [vmem:[#allocation0 + $0x502] ss:$4 sm:$0xff] %vm4_vm1, %v4284_v45   ;;  %4767 = vrot.lane.b32.xlu2 %v4766_v47, %s7583_s26  ;;  %v4942_v45 = vsel %vm2435_vm0, %v7243_v42, %v7242_v40  ;;  %v7246_v47 = vld [vmem:[%s12463_s0 + $0x306] ss:$8 sm:$0xf]  }
 0x23a   :  { %v4405_v50 = vpop.permute.xlu2 %4404  }
 0x23b   :  { %4408 = vst.msk [vmem:[#allocation0 + $0x662] ss:$4 sm:$0xff] %vm4_vm1, %v4405_v50  }
 0x23c   :  { %4789 = vrot.lane.b32.xlu1 %v4788_v48, %s7583_s26  ;;  %4778 = vrot.lane.b32.xlu0 %v4777_v49, %s7583_s26  ;;  %v7247_v48 = vld [vmem:[%s12463_s0 + $0x306] ss:$8 sm:$0xf0]   ;;  %v7250_v49 = vld [vmem:[%s12463_s0 + $0x340] ss:$8 sm:$0xf]  }
 0x23d   :  { %v4964_v55 = vsel %vm2435_vm0, %v7247_v48, %v7246_v47  ;;  %v4986_v56 = vsel %vm2435_vm0, %v7251_v51, %v7250_v49  ;;  %v7281_v47 = vld [vmem:[%s12463_s0 + $0x387] ss:$8 sm:$0xf0]   ;;  %v7278_v48 = vld [vmem:[%s12463_s0 + $0x386] ss:$8 sm:$0xf]  }
 0x23e   :  { %v4328_v54 = vpop.permute.xlu1 %4327   ;;  %v4317_v57 = vpop.permute.xlu0 %4316  }
 0x23f   :  { %4331 = vst.msk [vmem:[#allocation0 + $0x582] ss:$4 sm:$0xff] %vm4_vm1, %v4328_v54   ;;  %v7249_v54 = vld [vmem:[%s12463_s0 + $0x307] ss:$8 sm:$0xf0]  }
 0x240   :  { %4320 = vst.msk [vmem:[#allocation0 + $0x562] ss:$4 sm:$0xff] %vm4_vm1, %v4317_v57   ;;  %4800 = vrot.lane.b32.xlu2 %v4799_v59, %s7583_s26  ;;  %v4975_v57 = vsel %vm2435_vm0, %v7249_v54, %v7248_v52  ;;  %v7252_v59 = vld [vmem:[%s12463_s0 + $0x341] ss:$8 sm:$0xf]  }
 0x242   :  { %v4438_v62 = vpop.permute.xlu2 %4437  }
 0x243   :  { %4441 = vst.msk [vmem:[#allocation0 + $0x6c2] ss:$4 sm:$0xff] %vm4_vm1, %v4438_v62  }
 0x244   :  { %4822 = vrot.lane.b32.xlu1 %v4821_v60, %s7583_s26  ;;  %4811 = vrot.lane.b32.xlu0 %v4810_v61, %s7583_s26  ;;  %v7253_v60 = vld [vmem:[%s12463_s0 + $0x341] ss:$8 sm:$0xf0]   ;;  %v7256_v61 = vld [vmem:[%s12463_s0 + $0x343] ss:$8 sm:$0xf]  }
 0x245   :  { %v4997_v3 = vsel %vm2435_vm0, %v7253_v60, %v7252_v59  ;;  %v5019_v4 = vsel %vm2435_vm0, %v7257_v63, %v7256_v61  ;;  %v7287_v59 = vld [vmem:[%s12463_s0 + $0x3c2] ss:$8 sm:$0xf0]   ;;  %v7284_v60 = vld [vmem:[%s12463_s0 + $0x3c1] ss:$8 sm:$0xf]  }
 0x246   :  { %v4361_v2 = vpop.permute.xlu1 %4360   ;;  %v4350_v5 = vpop.permute.xlu0 %4349  }
 0x247   :  { %4364 = vst.msk [vmem:[#allocation0 + $0x5e2] ss:$4 sm:$0xff] %vm4_vm1, %v4361_v2   ;;  %v7255_v2 = vld [vmem:[%s12463_s0 + $0x342] ss:$8 sm:$0xf0]  }
 0x248   :  { %4353 = vst.msk [vmem:[#allocation0 + $0x5c2] ss:$4 sm:$0xff] %vm4_vm1, %v4350_v5   ;;  %4833 = vrot.lane.b32.xlu2 %v4832_v7, %s7583_s26  ;;  %v5008_v5 = vsel %vm2435_vm0, %v7255_v2, %v7254_v0  ;;  %v7258_v7 = vld [vmem:[%s12463_s0 + $0x344] ss:$8 sm:$0xf]  }
 0x24a   :  { %v4471_v10 = vpop.permute.xlu2 %4470  }
 0x24b   :  { %4474 = vst.msk [vmem:[#allocation0 + $0x722] ss:$4 sm:$0xff] %vm4_vm1, %v4471_v10  }
 0x24c   :  { %4855 = vrot.lane.b32.xlu1 %v4854_v8, %s7583_s26  ;;  %4844 = vrot.lane.b32.xlu0 %v4843_v9, %s7583_s26  ;;  %v7259_v8 = vld [vmem:[%s12463_s0 + $0x344] ss:$8 sm:$0xf0]   ;;  %v7262_v9 = vld [vmem:[%s12463_s0 + $0x346] ss:$8 sm:$0xf]  }
 0x24d   :  { %v5030_v15 = vsel %vm2435_vm0, %v7259_v8, %v7258_v7  ;;  %v5052_v16 = vsel %vm2435_vm0, %v7263_v11, %v7262_v9  ;;  %v7293_v7 = vld [vmem:[%s12463_s0 + $0x3c5] ss:$8 sm:$0xf0]   ;;  %v7290_v8 = vld [vmem:[%s12463_s0 + $0x3c4] ss:$8 sm:$0xf]  }
 0x24e   :  { %v4394_v14 = vpop.permute.xlu1 %4393   ;;  %v4383_v17 = vpop.permute.xlu0 %4382  }
 0x24f   :  { %4397 = vst.msk [vmem:[#allocation0 + $0x642] ss:$4 sm:$0xff] %vm4_vm1, %v4394_v14   ;;  %v7261_v14 = vld [vmem:[%s12463_s0 + $0x345] ss:$8 sm:$0xf0]  }
 0x250   :  { %4386 = vst.msk [vmem:[#allocation0 + $0x622] ss:$4 sm:$0xff] %vm4_vm1, %v4383_v17   ;;  %4866 = vrot.lane.b32.xlu2 %v4865_v19, %s7583_s26  ;;  %v5041_v17 = vsel %vm2435_vm0, %v7261_v14, %v7260_v12  ;;  %v7264_v19 = vld [vmem:[%s12463_s0 + $0x347] ss:$8 sm:$0xf]  }
 0x252   :  { %v4504_v22 = vpop.permute.xlu2 %4503  }
 0x253   :  { %4507 = vst.msk [vmem:[#allocation0 + $0x782] ss:$4 sm:$0xff] %vm4_vm1, %v4504_v22  }
 0x254   :  { %4888 = vrot.lane.b32.xlu1 %v4887_v20, %s7583_s26  ;;  %4877 = vrot.lane.b32.xlu0 %v4876_v21, %s7583_s26  ;;  %v7265_v20 = vld [vmem:[%s12463_s0 + $0x347] ss:$8 sm:$0xf0]   ;;  %v7268_v21 = vld [vmem:[%s12463_s0 + $0x381] ss:$8 sm:$0xf]  }
 0x255   :  { %v5063_v27 = vsel %vm2435_vm0, %v7265_v20, %v7264_v19  ;;  %v5085_v28 = vsel %vm2435_vm0, %v7269_v23, %v7268_v21  ;;  %v5246_v19 = vld [vmem:[%s12463_s0] ss:$8 sm:$0xf0]   ;;  %v7296_v20 = vld [vmem:[%s12463_s0 + $0x3c7] ss:$8 sm:$0xf]  }
 0x256   :  { %v4427_v26 = vpop.permute.xlu1 %4426   ;;  %v4416_v29 = vpop.permute.xlu0 %4415  }
 0x257   :  { %4430 = vst.msk [vmem:[#allocation0 + $0x6a2] ss:$4 sm:$0xff] %vm4_vm1, %v4427_v26   ;;  %v7267_v26 = vld [vmem:[%s12463_s0 + $0x380] ss:$8 sm:$0xf0]  }
 0x258   :  { %4419 = vst.msk [vmem:[#allocation0 + $0x682] ss:$4 sm:$0xff] %vm4_vm1, %v4416_v29   ;;  %4899 = vrot.lane.b32.xlu2 %v4898_v31, %s7583_s26  ;;  %v5074_v29 = vsel %vm2435_vm0, %v7267_v26, %v7266_v24  ;;  %v7270_v31 = vld [vmem:[%s12463_s0 + $0x382] ss:$8 sm:$0xf]  }
 0x25a   :  { %v4537_v34 = vpop.permute.xlu2 %4536  }
 0x25b   :  { %4540 = vst.msk [vmem:[#allocation0 + $0x7e2] ss:$4 sm:$0xff] %vm4_vm1, %v4537_v34  }
 0x25c   :  { %4921 = vrot.lane.b32.xlu1 %v4920_v32, %s7583_s26  ;;  %4910 = vrot.lane.b32.xlu0 %v4909_v33, %s7583_s26  ;;  %v7271_v32 = vld [vmem:[%s12463_s0 + $0x382] ss:$8 sm:$0xf0]   ;;  %v7274_v33 = vld [vmem:[%s12463_s0 + $0x384] ss:$8 sm:$0xf]  }
 0x25d   :  { %v5096_v39 = vsel %vm2435_vm0, %v7271_v32, %v7270_v31  ;;  %v5118_v40 = vsel %vm2435_vm0, %v7275_v35, %v7274_v33  ;;  %v7303_v31 = vld [vmem:[%s12463_s0 + $0x3] ss:$8 sm:$0xf0]   ;;  %v7300_v32 = vld [vmem:[%s12463_s0 + $0x2] ss:$8 sm:$0xf]  }
 0x25e   :  { %v4460_v38 = vpop.permute.xlu1 %4459   ;;  %v4449_v41 = vpop.permute.xlu0 %4448  }
 0x25f   :  { %4463 = vst.msk [vmem:[#allocation0 + $0x702] ss:$4 sm:$0xff] %vm4_vm1, %v4460_v38   ;;  %v7273_v38 = vld [vmem:[%s12463_s0 + $0x383] ss:$8 sm:$0xf0]  }
 0x260   :  { %4452 = vst.msk [vmem:[#allocation0 + $0x6e2] ss:$4 sm:$0xff] %vm4_vm1, %v4449_v41   ;;  %4932 = vrot.lane.b32.xlu2 %v4931_v43, %s7583_s26  ;;  %v5107_v41 = vsel %vm2435_vm0, %v7273_v38, %v7272_v36  ;;  %v7276_v43 = vld [vmem:[%s12463_s0 + $0x385] ss:$8 sm:$0xf]  }
 0x262   :  { %v4570_v46 = vpop.permute.xlu2 %4569  }
 0x263   :  { %4573 = vst.msk [vmem:[#allocation0 + $0x842] ss:$4 sm:$0xff] %vm4_vm1, %v4570_v46  }
 0x264   :  { %4954 = vrot.lane.b32.xlu1 %v4953_v44, %s7583_s26  ;;  %4943 = vrot.lane.b32.xlu0 %v4942_v45, %s7583_s26  ;;  %v7277_v44 = vld [vmem:[%s12463_s0 + $0x385] ss:$8 sm:$0xf0]   ;;  %v7280_v45 = vld [vmem:[%s12463_s0 + $0x387] ss:$8 sm:$0xf]  }
 0x265   :  { %v5129_v51 = vsel %vm2435_vm0, %v7277_v44, %v7276_v43  ;;  %v5151_v52 = vsel %vm2435_vm0, %v7281_v47, %v7280_v45  ;;  %v7309_v43 = vld [vmem:[%s12463_s0 + $0x6] ss:$8 sm:$0xf0]   ;;  %v7306_v44 = vld [vmem:[%s12463_s0 + $0x5] ss:$8 sm:$0xf]  }
 0x266   :  { %v4493_v50 = vpop.permute.xlu1 %4492   ;;  %v4482_v53 = vpop.permute.xlu0 %4481  }
 0x267   :  { %4496 = vst.msk [vmem:[#allocation0 + $0x762] ss:$4 sm:$0xff] %vm4_vm1, %v4493_v50   ;;  %v7279_v50 = vld [vmem:[%s12463_s0 + $0x386] ss:$8 sm:$0xf0]  }
 0x268   :  { %4485 = vst.msk [vmem:[#allocation0 + $0x742] ss:$4 sm:$0xff] %vm4_vm1, %v4482_v53   ;;  %4965 = vrot.lane.b32.xlu2 %v4964_v55, %s7583_s26  ;;  %v5140_v53 = vsel %vm2435_vm0, %v7279_v50, %v7278_v48  ;;  %v7282_v55 = vld [vmem:[%s12463_s0 + $0x3c0] ss:$8 sm:$0xf]  }
 0x26a   :  { %v4603_v58 = vpop.permute.xlu2 %4602  }
 0x26b   :  { %4606 = vst.msk [vmem:[#allocation0 + $0x8a2] ss:$4 sm:$0xff] %vm4_vm1, %v4603_v58  }
 0x26c   :  { %4987 = vrot.lane.b32.xlu1 %v4986_v56, %s7583_s26  ;;  %4976 = vrot.lane.b32.xlu0 %v4975_v57, %s7583_s26  ;;  %v7283_v56 = vld [vmem:[%s12463_s0 + $0x3c0] ss:$8 sm:$0xf0]   ;;  %v7286_v57 = vld [vmem:[%s12463_s0 + $0x3c2] ss:$8 sm:$0xf]  }
 0x26d   :  { %v5162_v63 = vsel %vm2435_vm0, %v7283_v56, %v7282_v55  ;;  %v5184_v0 = vsel %vm2435_vm0, %v7287_v59, %v7286_v57  ;;  %v7315_v55 = vld [vmem:[%s12463_s0 + $0x41] ss:$8 sm:$0xf0]   ;;  %v7312_v56 = vld [vmem:[%s12463_s0 + $0x40] ss:$8 sm:$0xf]  }
 0x26e   :  { %v4526_v62 = vpop.permute.xlu1 %4525   ;;  %v4515_v1 = vpop.permute.xlu0 %4514  }
 0x26f   :  { %4529 = vst.msk [vmem:[#allocation0 + $0x7c2] ss:$4 sm:$0xff] %vm4_vm1, %v4526_v62   ;;  %v7285_v62 = vld [vmem:[%s12463_s0 + $0x3c1] ss:$8 sm:$0xf0]  }
 0x270   :  { %4518 = vst.msk [vmem:[#allocation0 + $0x7a2] ss:$4 sm:$0xff] %vm4_vm1, %v4515_v1   ;;  %4998 = vrot.lane.b32.xlu2 %v4997_v3, %s7583_s26  ;;  %v5173_v1 = vsel %vm2435_vm0, %v7285_v62, %v7284_v60  ;;  %v7288_v3 = vld [vmem:[%s12463_s0 + $0x3c3] ss:$8 sm:$0xf]  }
 0x272   :  { %v4636_v6 = vpop.permute.xlu2 %4635  }
 0x273   :  { %4639 = vst.msk [vmem:[#allocation0 + $0x902] ss:$4 sm:$0xff] %vm4_vm1, %v4636_v6  }
 0x274   :  { %5020 = vrot.lane.b32.xlu1 %v5019_v4, %s7583_s26  ;;  %5009 = vrot.lane.b32.xlu0 %v5008_v5, %s7583_s26  ;;  %v7289_v4 = vld [vmem:[%s12463_s0 + $0x3c3] ss:$8 sm:$0xf0]   ;;  %v7292_v5 = vld [vmem:[%s12463_s0 + $0x3c5] ss:$8 sm:$0xf]  }
 0x275   :  { %v5195_v11 = vsel %vm2435_vm0, %v7289_v4, %v7288_v3  ;;  %v5217_v12 = vsel %vm2435_vm0, %v7293_v7, %v7292_v5  ;;  %v7321_v3 = vld [vmem:[%s12463_s0 + $0x44] ss:$8 sm:$0xf0]   ;;  %v7318_v4 = vld [vmem:[%s12463_s0 + $0x43] ss:$8 sm:$0xf]  }
 0x276   :  { %v4559_v10 = vpop.permute.xlu1 %4558   ;;  %v4548_v13 = vpop.permute.xlu0 %4547  }
 0x277   :  { %4562 = vst.msk [vmem:[#allocation0 + $0x822] ss:$4 sm:$0xff] %vm4_vm1, %v4559_v10   ;;  %v7291_v10 = vld [vmem:[%s12463_s0 + $0x3c4] ss:$8 sm:$0xf0]  }
 0x278   :  { %4551 = vst.msk [vmem:[#allocation0 + $0x802] ss:$4 sm:$0xff] %vm4_vm1, %v4548_v13   ;;  %5031 = vrot.lane.b32.xlu2 %v5030_v15, %s7583_s26  ;;  %v5206_v13 = vsel %vm2435_vm0, %v7291_v10, %v7290_v8  ;;  %v7294_v15 = vld [vmem:[%s12463_s0 + $0x3c6] ss:$8 sm:$0xf]  }
 0x27a   :  { %v4669_v18 = vpop.permute.xlu2 %4668  }
 0x27b   :  { %4672 = vst.msk [vmem:[#allocation0 + $0x962] ss:$4 sm:$0xff] %vm4_vm1, %v4669_v18  }
 0x27c   :  { %5053 = vrot.lane.b32.xlu1 %v5052_v16, %s7583_s26  ;;  %5042 = vrot.lane.b32.xlu0 %v5041_v17, %s7583_s26  ;;  %v7295_v16 = vld [vmem:[%s12463_s0 + $0x3c6] ss:$8 sm:$0xf0]   ;;  %v5245_v17 = vld [vmem:[%s12463_s0] ss:$8 sm:$0xf]  }
 0x27d   :  { %v5228_v23 = vsel %vm2435_vm0, %v7295_v16, %v7294_v15  ;;  %v5248_v24 = vsel %vm2435_vm0, %v5246_v19, %v5245_v17  ;;  %v7327_v15 = vld [vmem:[%s12463_s0 + $0x47] ss:$8 sm:$0xf0]   ;;  %v7324_v16 = vld [vmem:[%s12463_s0 + $0x46] ss:$8 sm:$0xf]  }
 0x27e   :  { %v4592_v22 = vpop.permute.xlu1 %4591   ;;  %v4581_v25 = vpop.permute.xlu0 %4580  }
 0x27f   :  { %4595 = vst.msk [vmem:[#allocation0 + $0x882] ss:$4 sm:$0xff] %vm4_vm1, %v4592_v22   ;;  %v7297_v22 = vld [vmem:[%s12463_s0 + $0x3c7] ss:$8 sm:$0xf0]  }
 0x280   :  { %4584 = vst.msk [vmem:[#allocation0 + $0x862] ss:$4 sm:$0xff] %vm4_vm1, %v4581_v25   ;;  %5064 = vrot.lane.b32.xlu2 %v5063_v27, %s7583_s26  ;;  %v5239_v25 = vsel %vm2435_vm0, %v7297_v22, %v7296_v20  ;;  %v7298_v27 = vld [vmem:[%s12463_s0 + $0x1] ss:$8 sm:$0xf]  }
 0x282   :  { %v4702_v30 = vpop.permute.xlu2 %4701  }
 0x283   :  { %4705 = vst.msk [vmem:[#allocation0 + $0x9c2] ss:$4 sm:$0xff] %vm4_vm1, %v4702_v30  }
 0x284   :  { %5086 = vrot.lane.b32.xlu1 %v5085_v28, %s7583_s26  ;;  %5075 = vrot.lane.b32.xlu0 %v5074_v29, %s7583_s26  ;;  %v7299_v28 = vld [vmem:[%s12463_s0 + $0x1] ss:$8 sm:$0xf0]   ;;  %v7302_v29 = vld [vmem:[%s12463_s0 + $0x3] ss:$8 sm:$0xf]  }
 0x285   :  { %v5259_v35 = vsel %vm2435_vm0, %v7299_v28, %v7298_v27  ;;  %v5281_v36 = vsel %vm2435_vm0, %v7303_v31, %v7302_v29  ;;  %v7333_v27 = vld [vmem:[%s12463_s0 + $0x82] ss:$8 sm:$0xf0]   ;;  %v7330_v28 = vld [vmem:[%s12463_s0 + $0x81] ss:$8 sm:$0xf]  }
 0x286   :  { %v4625_v34 = vpop.permute.xlu1 %4624   ;;  %v4614_v37 = vpop.permute.xlu0 %4613  }
 0x287   :  { %4628 = vst.msk [vmem:[#allocation0 + $0x8e2] ss:$4 sm:$0xff] %vm4_vm1, %v4625_v34   ;;  %v7301_v34 = vld [vmem:[%s12463_s0 + $0x2] ss:$8 sm:$0xf0]  }
 0x288   :  { %4617 = vst.msk [vmem:[#allocation0 + $0x8c2] ss:$4 sm:$0xff] %vm4_vm1, %v4614_v37   ;;  %5097 = vrot.lane.b32.xlu2 %v5096_v39, %s7583_s26  ;;  %v5270_v37 = vsel %vm2435_vm0, %v7301_v34, %v7300_v32  ;;  %v7304_v39 = vld [vmem:[%s12463_s0 + $0x4] ss:$8 sm:$0xf]  }
 0x28a   :  { %v4735_v42 = vpop.permute.xlu2 %4734  }
 0x28b   :  { %4738 = vst.msk [vmem:[#allocation0 + $0xa22] ss:$4 sm:$0xff] %vm4_vm1, %v4735_v42  }
 0x28c   :  { %5119 = vrot.lane.b32.xlu1 %v5118_v40, %s7583_s26  ;;  %5108 = vrot.lane.b32.xlu0 %v5107_v41, %s7583_s26  ;;  %v7305_v40 = vld [vmem:[%s12463_s0 + $0x4] ss:$8 sm:$0xf0]   ;;  %v7308_v41 = vld [vmem:[%s12463_s0 + $0x6] ss:$8 sm:$0xf]  }
 0x28d   :  { %v5292_v47 = vsel %vm2435_vm0, %v7305_v40, %v7304_v39  ;;  %v5314_v48 = vsel %vm2435_vm0, %v7309_v43, %v7308_v41  ;;  %v7339_v39 = vld [vmem:[%s12463_s0 + $0x85] ss:$8 sm:$0xf0]   ;;  %v7336_v40 = vld [vmem:[%s12463_s0 + $0x84] ss:$8 sm:$0xf]  }
 0x28e   :  { %v4658_v46 = vpop.permute.xlu1 %4657   ;;  %v4647_v49 = vpop.permute.xlu0 %4646  }
 0x28f   :  { %4661 = vst.msk [vmem:[#allocation0 + $0x942] ss:$4 sm:$0xff] %vm4_vm1, %v4658_v46   ;;  %v7307_v46 = vld [vmem:[%s12463_s0 + $0x5] ss:$8 sm:$0xf0]  }
 0x290   :  { %4650 = vst.msk [vmem:[#allocation0 + $0x922] ss:$4 sm:$0xff] %vm4_vm1, %v4647_v49   ;;  %5130 = vrot.lane.b32.xlu2 %v5129_v51, %s7583_s26  ;;  %v5303_v49 = vsel %vm2435_vm0, %v7307_v46, %v7306_v44  ;;  %v7310_v51 = vld [vmem:[%s12463_s0 + $0x7] ss:$8 sm:$0xf]  }
 0x292   :  { %v4768_v54 = vpop.permute.xlu2 %4767  }
 0x293   :  { %4771 = vst.msk [vmem:[#allocation0 + $0xa82] ss:$4 sm:$0xff] %vm4_vm1, %v4768_v54  }
 0x294   :  { %5152 = vrot.lane.b32.xlu1 %v5151_v52, %s7583_s26  ;;  %5141 = vrot.lane.b32.xlu0 %v5140_v53, %s7583_s26  ;;  %v7311_v52 = vld [vmem:[%s12463_s0 + $0x7] ss:$8 sm:$0xf0]   ;;  %v7314_v53 = vld [vmem:[%s12463_s0 + $0x41] ss:$8 sm:$0xf]  }
 0x295   :  { %v5325_v59 = vsel %vm2435_vm0, %v7311_v52, %v7310_v51  ;;  %v5347_v60 = vsel %vm2435_vm0, %v7315_v55, %v7314_v53  ;;  %v7345_v51 = vld [vmem:[%s12463_s0 + $0xc0] ss:$8 sm:$0xf0]   ;;  %v7342_v52 = vld [vmem:[%s12463_s0 + $0x87] ss:$8 sm:$0xf]  }
 0x296   :  { %v4691_v58 = vpop.permute.xlu1 %4690   ;;  %v4680_v61 = vpop.permute.xlu0 %4679  }
 0x297   :  { %4694 = vst.msk [vmem:[#allocation0 + $0x9a2] ss:$4 sm:$0xff] %vm4_vm1, %v4691_v58   ;;  %v7313_v58 = vld [vmem:[%s12463_s0 + $0x40] ss:$8 sm:$0xf0]  }
 0x298   :  { %4683 = vst.msk [vmem:[#allocation0 + $0x982] ss:$4 sm:$0xff] %vm4_vm1, %v4680_v61   ;;  %5163 = vrot.lane.b32.xlu2 %v5162_v63, %s7583_s26  ;;  %v5336_v61 = vsel %vm2435_vm0, %v7313_v58, %v7312_v56  ;;  %v7316_v63 = vld [vmem:[%s12463_s0 + $0x42] ss:$8 sm:$0xf]  }
 0x29a   :  { %v4801_v2 = vpop.permute.xlu2 %4800  }
 0x29b   :  { %4804 = vst.msk [vmem:[#allocation0 + $0xae2] ss:$4 sm:$0xff] %vm4_vm1, %v4801_v2  }
 0x29c   :  { %5185 = vrot.lane.b32.xlu1 %v5184_v0, %s7583_s26  ;;  %5174 = vrot.lane.b32.xlu0 %v5173_v1, %s7583_s26  ;;  %v7317_v0 = vld [vmem:[%s12463_s0 + $0x42] ss:$8 sm:$0xf0]   ;;  %v7320_v1 = vld [vmem:[%s12463_s0 + $0x44] ss:$8 sm:$0xf]  }
 0x29d   :  { %v5358_v7 = vsel %vm2435_vm0, %v7317_v0, %v7316_v63  ;;  %v5380_v8 = vsel %vm2435_vm0, %v7321_v3, %v7320_v1  ;;  %v7351_v63 = vld [vmem:[%s12463_s0 + $0xc3] ss:$8 sm:$0xf0]   ;;  %v7348_v0 = vld [vmem:[%s12463_s0 + $0xc2] ss:$8 sm:$0xf]  }
 0x29e   :  { %v4724_v6 = vpop.permute.xlu1 %4723   ;;  %v4713_v9 = vpop.permute.xlu0 %4712  }
 0x29f   :  { %4727 = vst.msk [vmem:[#allocation0 + $0xa02] ss:$4 sm:$0xff] %vm4_vm1, %v4724_v6   ;;  %v7319_v6 = vld [vmem:[%s12463_s0 + $0x43] ss:$8 sm:$0xf0]  }
 0x2a0   :  { %4716 = vst.msk [vmem:[#allocation0 + $0x9e2] ss:$4 sm:$0xff] %vm4_vm1, %v4713_v9   ;;  %5196 = vrot.lane.b32.xlu2 %v5195_v11, %s7583_s26  ;;  %v5369_v9 = vsel %vm2435_vm0, %v7319_v6, %v7318_v4  ;;  %v7322_v11 = vld [vmem:[%s12463_s0 + $0x45] ss:$8 sm:$0xf]  }
 0x2a2   :  { %v4834_v14 = vpop.permute.xlu2 %4833  }
 0x2a3   :  { %4837 = vst.msk [vmem:[#allocation0 + $0xb42] ss:$4 sm:$0xff] %vm4_vm1, %v4834_v14  }
 0x2a4   :  { %5218 = vrot.lane.b32.xlu1 %v5217_v12, %s7583_s26  ;;  %5207 = vrot.lane.b32.xlu0 %v5206_v13, %s7583_s26  ;;  %v7323_v12 = vld [vmem:[%s12463_s0 + $0x45] ss:$8 sm:$0xf0]   ;;  %v7326_v13 = vld [vmem:[%s12463_s0 + $0x47] ss:$8 sm:$0xf]  }
 0x2a5   :  { %v5391_v19 = vsel %vm2435_vm0, %v7323_v12, %v7322_v11  ;;  %v5413_v20 = vsel %vm2435_vm0, %v7327_v15, %v7326_v13  ;;  %v7357_v11 = vld [vmem:[%s12463_s0 + $0xc6] ss:$8 sm:$0xf0]   ;;  %v7354_v12 = vld [vmem:[%s12463_s0 + $0xc5] ss:$8 sm:$0xf]  }
 0x2a6   :  { %v4757_v18 = vpop.permute.xlu1 %4756   ;;  %v4746_v21 = vpop.permute.xlu0 %4745  }
 0x2a7   :  { %4760 = vst.msk [vmem:[#allocation0 + $0xa62] ss:$4 sm:$0xff] %vm4_vm1, %v4757_v18   ;;  %v7325_v18 = vld [vmem:[%s12463_s0 + $0x46] ss:$8 sm:$0xf0]  }
 0x2a8   :  { %4749 = vst.msk [vmem:[#allocation0 + $0xa42] ss:$4 sm:$0xff] %vm4_vm1, %v4746_v21   ;;  %5229 = vrot.lane.b32.xlu2 %v5228_v23, %s7583_s26  ;;  %v5402_v21 = vsel %vm2435_vm0, %v7325_v18, %v7324_v16  ;;  %v7328_v23 = vld [vmem:[%s12463_s0 + $0x80] ss:$8 sm:$0xf]  }
 0x2aa   :  { %v4867_v26 = vpop.permute.xlu2 %4866  }
 0x2ab   :  { %4870 = vst.msk [vmem:[#allocation0 + $0xba2] ss:$4 sm:$0xff] %vm4_vm1, %v4867_v26  }
 0x2ac   :  { %5249 = vrot.lane.b32.xlu1 %v5248_v24, %s7584_s27  ;;  %5240 = vrot.lane.b32.xlu0 %v5239_v25, %s7583_s26  ;;  %v7329_v24 = vld [vmem:[%s12463_s0 + $0x80] ss:$8 sm:$0xf0]   ;;  %v7332_v25 = vld [vmem:[%s12463_s0 + $0x82] ss:$8 sm:$0xf]  }
 0x2ad   :  { %v5424_v31 = vsel %vm2435_vm0, %v7329_v24, %v7328_v23  ;;  %v5446_v32 = vsel %vm2435_vm0, %v7333_v27, %v7332_v25  ;;  %v7363_v23 = vld [vmem:[%s12463_s0 + $0x101] ss:$8 sm:$0xf0]   ;;  %v7360_v24 = vld [vmem:[%s12463_s0 + $0x100] ss:$8 sm:$0xf]  }
 0x2ae   :  { %v4790_v30 = vpop.permute.xlu1 %4789   ;;  %v4779_v33 = vpop.permute.xlu0 %4778  }
 0x2af   :  { %4793 = vst.msk [vmem:[#allocation0 + $0xac2] ss:$4 sm:$0xff] %vm4_vm1, %v4790_v30   ;;  %v7331_v30 = vld [vmem:[%s12463_s0 + $0x81] ss:$8 sm:$0xf0]  }
 0x2b0   :  { %4782 = vst.msk [vmem:[#allocation0 + $0xaa2] ss:$4 sm:$0xff] %vm4_vm1, %v4779_v33   ;;  %5260 = vrot.lane.b32.xlu2 %v5259_v35, %s7584_s27  ;;  %v5435_v33 = vsel %vm2435_vm0, %v7331_v30, %v7330_v28  ;;  %v7334_v35 = vld [vmem:[%s12463_s0 + $0x83] ss:$8 sm:$0xf]  }
 0x2b2   :  { %v4900_v38 = vpop.permute.xlu2 %4899  }
 0x2b3   :  { %4903 = vst.msk [vmem:[#allocation0 + $0xc02] ss:$4 sm:$0xff] %vm4_vm1, %v4900_v38  }
 0x2b4   :  { %5282 = vrot.lane.b32.xlu1 %v5281_v36, %s7584_s27  ;;  %5271 = vrot.lane.b32.xlu0 %v5270_v37, %s7584_s27  ;;  %v7335_v36 = vld [vmem:[%s12463_s0 + $0x83] ss:$8 sm:$0xf0]   ;;  %v7338_v37 = vld [vmem:[%s12463_s0 + $0x85] ss:$8 sm:$0xf]  }
 0x2b5   :  { %v5457_v43 = vsel %vm2435_vm0, %v7335_v36, %v7334_v35  ;;  %v5479_v44 = vsel %vm2435_vm0, %v7339_v39, %v7338_v37  ;;  %v7369_v35 = vld [vmem:[%s12463_s0 + $0x104] ss:$8 sm:$0xf0]   ;;  %v7366_v36 = vld [vmem:[%s12463_s0 + $0x103] ss:$8 sm:$0xf]  }
 0x2b6   :  { %v4823_v42 = vpop.permute.xlu1 %4822   ;;  %v4812_v45 = vpop.permute.xlu0 %4811  }
 0x2b7   :  { %4826 = vst.msk [vmem:[#allocation0 + $0xb22] ss:$4 sm:$0xff] %vm4_vm1, %v4823_v42   ;;  %v7337_v42 = vld [vmem:[%s12463_s0 + $0x84] ss:$8 sm:$0xf0]  }
 0x2b8   :  { %4815 = vst.msk [vmem:[#allocation0 + $0xb02] ss:$4 sm:$0xff] %vm4_vm1, %v4812_v45   ;;  %5293 = vrot.lane.b32.xlu2 %v5292_v47, %s7584_s27  ;;  %v5468_v45 = vsel %vm2435_vm0, %v7337_v42, %v7336_v40  ;;  %v7340_v47 = vld [vmem:[%s12463_s0 + $0x86] ss:$8 sm:$0xf]  }
 0x2ba   :  { %v4933_v50 = vpop.permute.xlu2 %4932  }
 0x2bb   :  { %4936 = vst.msk [vmem:[#allocation0 + $0xc62] ss:$4 sm:$0xff] %vm4_vm1, %v4933_v50  }
 0x2bc   :  { %5315 = vrot.lane.b32.xlu1 %v5314_v48, %s7584_s27  ;;  %5304 = vrot.lane.b32.xlu0 %v5303_v49, %s7584_s27  ;;  %v7341_v48 = vld [vmem:[%s12463_s0 + $0x86] ss:$8 sm:$0xf0]   ;;  %v7344_v49 = vld [vmem:[%s12463_s0 + $0xc0] ss:$8 sm:$0xf]  }
 0x2bd   :  { %v5490_v55 = vsel %vm2435_vm0, %v7341_v48, %v7340_v47  ;;  %v5512_v56 = vsel %vm2435_vm0, %v7345_v51, %v7344_v49  ;;  %v7375_v47 = vld [vmem:[%s12463_s0 + $0x107] ss:$8 sm:$0xf0]   ;;  %v7372_v48 = vld [vmem:[%s12463_s0 + $0x106] ss:$8 sm:$0xf]  }
 0x2be   :  { %v4856_v54 = vpop.permute.xlu1 %4855   ;;  %v4845_v57 = vpop.permute.xlu0 %4844  }
 0x2bf   :  { %4859 = vst.msk [vmem:[#allocation0 + $0xb82] ss:$4 sm:$0xff] %vm4_vm1, %v4856_v54   ;;  %v7343_v54 = vld [vmem:[%s12463_s0 + $0x87] ss:$8 sm:$0xf0]  }
 0x2c0   :  { %4848 = vst.msk [vmem:[#allocation0 + $0xb62] ss:$4 sm:$0xff] %vm4_vm1, %v4845_v57   ;;  %5326 = vrot.lane.b32.xlu2 %v5325_v59, %s7584_s27  ;;  %v5501_v57 = vsel %vm2435_vm0, %v7343_v54, %v7342_v52  ;;  %v7346_v59 = vld [vmem:[%s12463_s0 + $0xc1] ss:$8 sm:$0xf]  }
 0x2c2   :  { %v4966_v62 = vpop.permute.xlu2 %4965  }
 0x2c3   :  { %4969 = vst.msk [vmem:[#allocation0 + $0xcc2] ss:$4 sm:$0xff] %vm4_vm1, %v4966_v62  }
 0x2c4   :  { %5348 = vrot.lane.b32.xlu1 %v5347_v60, %s7584_s27  ;;  %5337 = vrot.lane.b32.xlu0 %v5336_v61, %s7584_s27  ;;  %v7347_v60 = vld [vmem:[%s12463_s0 + $0xc1] ss:$8 sm:$0xf0]   ;;  %v7350_v61 = vld [vmem:[%s12463_s0 + $0xc3] ss:$8 sm:$0xf]  }
 0x2c5   :  { %v5523_v3 = vsel %vm2435_vm0, %v7347_v60, %v7346_v59  ;;  %v5545_v4 = vsel %vm2435_vm0, %v7351_v63, %v7350_v61  ;;  %v7381_v59 = vld [vmem:[%s12463_s0 + $0x142] ss:$8 sm:$0xf0]   ;;  %v7378_v60 = vld [vmem:[%s12463_s0 + $0x141] ss:$8 sm:$0xf]  }
 0x2c6   :  { %v4889_v2 = vpop.permute.xlu1 %4888   ;;  %v4878_v5 = vpop.permute.xlu0 %4877  }
 0x2c7   :  { %4892 = vst.msk [vmem:[#allocation0 + $0xbe2] ss:$4 sm:$0xff] %vm4_vm1, %v4889_v2   ;;  %v7349_v2 = vld [vmem:[%s12463_s0 + $0xc2] ss:$8 sm:$0xf0]  }
 0x2c8   :  { %4881 = vst.msk [vmem:[#allocation0 + $0xbc2] ss:$4 sm:$0xff] %vm4_vm1, %v4878_v5   ;;  %5359 = vrot.lane.b32.xlu2 %v5358_v7, %s7584_s27  ;;  %v5534_v5 = vsel %vm2435_vm0, %v7349_v2, %v7348_v0  ;;  %v7352_v7 = vld [vmem:[%s12463_s0 + $0xc4] ss:$8 sm:$0xf]  }
 0x2ca   :  { %v4999_v10 = vpop.permute.xlu2 %4998  }
 0x2cb   :  { %5002 = vst.msk [vmem:[#allocation0 + $0xd22] ss:$4 sm:$0xff] %vm4_vm1, %v4999_v10  }
 0x2cc   :  { %5381 = vrot.lane.b32.xlu1 %v5380_v8, %s7584_s27  ;;  %5370 = vrot.lane.b32.xlu0 %v5369_v9, %s7584_s27  ;;  %v7353_v8 = vld [vmem:[%s12463_s0 + $0xc4] ss:$8 sm:$0xf0]   ;;  %v7356_v9 = vld [vmem:[%s12463_s0 + $0xc6] ss:$8 sm:$0xf]  }
 0x2cd   :  { %v5556_v15 = vsel %vm2435_vm0, %v7353_v8, %v7352_v7  ;;  %v5578_v16 = vsel %vm2435_vm0, %v7357_v11, %v7356_v9  ;;  %v7387_v7 = vld [vmem:[%s12463_s0 + $0x145] ss:$8 sm:$0xf0]   ;;  %v7384_v8 = vld [vmem:[%s12463_s0 + $0x144] ss:$8 sm:$0xf]  }
 0x2ce   :  { %v4922_v14 = vpop.permute.xlu1 %4921   ;;  %v4911_v17 = vpop.permute.xlu0 %4910  }
 0x2cf   :  { %4925 = vst.msk [vmem:[#allocation0 + $0xc42] ss:$4 sm:$0xff] %vm4_vm1, %v4922_v14   ;;  %v7355_v14 = vld [vmem:[%s12463_s0 + $0xc5] ss:$8 sm:$0xf0]  }
 0x2d0   :  { %4914 = vst.msk [vmem:[#allocation0 + $0xc22] ss:$4 sm:$0xff] %vm4_vm1, %v4911_v17   ;;  %5392 = vrot.lane.b32.xlu2 %v5391_v19, %s7584_s27  ;;  %v5567_v17 = vsel %vm2435_vm0, %v7355_v14, %v7354_v12  ;;  %v7358_v19 = vld [vmem:[%s12463_s0 + $0xc7] ss:$8 sm:$0xf]  }
 0x2d2   :  { %v5032_v22 = vpop.permute.xlu2 %5031  }
 0x2d3   :  { %5035 = vst.msk [vmem:[#allocation0 + $0xd82] ss:$4 sm:$0xff] %vm4_vm1, %v5032_v22  }
 0x2d4   :  { %5414 = vrot.lane.b32.xlu1 %v5413_v20, %s7584_s27  ;;  %5403 = vrot.lane.b32.xlu0 %v5402_v21, %s7584_s27  ;;  %v7359_v20 = vld [vmem:[%s12463_s0 + $0xc7] ss:$8 sm:$0xf0]   ;;  %v7362_v21 = vld [vmem:[%s12463_s0 + $0x101] ss:$8 sm:$0xf]  }
 0x2d5   :  { %v5589_v27 = vsel %vm2435_vm0, %v7359_v20, %v7358_v19  ;;  %v5611_v28 = vsel %vm2435_vm0, %v7363_v23, %v7362_v21  ;;  %v7393_v19 = vld [vmem:[%s12463_s0 + $0x180] ss:$8 sm:$0xf0]   ;;  %v7390_v20 = vld [vmem:[%s12463_s0 + $0x147] ss:$8 sm:$0xf]  }
 0x2d6   :  { %v4955_v26 = vpop.permute.xlu1 %4954   ;;  %v4944_v29 = vpop.permute.xlu0 %4943  }
 0x2d7   :  { %4958 = vst.msk [vmem:[#allocation0 + $0xca2] ss:$4 sm:$0xff] %vm4_vm1, %v4955_v26   ;;  %v7361_v26 = vld [vmem:[%s12463_s0 + $0x100] ss:$8 sm:$0xf0]  }
 0x2d8   :  { %4947 = vst.msk [vmem:[#allocation0 + $0xc82] ss:$4 sm:$0xff] %vm4_vm1, %v4944_v29   ;;  %5425 = vrot.lane.b32.xlu2 %v5424_v31, %s7584_s27  ;;  %v5600_v29 = vsel %vm2435_vm0, %v7361_v26, %v7360_v24  ;;  %v7364_v31 = vld [vmem:[%s12463_s0 + $0x102] ss:$8 sm:$0xf]  }
 0x2da   :  { %v5065_v34 = vpop.permute.xlu2 %5064  }
 0x2db   :  { %5068 = vst.msk [vmem:[#allocation0 + $0xde2] ss:$4 sm:$0xff] %vm4_vm1, %v5065_v34  }
 0x2dc   :  { %5447 = vrot.lane.b32.xlu1 %v5446_v32, %s7584_s27  ;;  %5436 = vrot.lane.b32.xlu0 %v5435_v33, %s7584_s27  ;;  %v7365_v32 = vld [vmem:[%s12463_s0 + $0x102] ss:$8 sm:$0xf0]   ;;  %v7368_v33 = vld [vmem:[%s12463_s0 + $0x104] ss:$8 sm:$0xf]  }
 0x2dd   :  { %v5622_v39 = vsel %vm2435_vm0, %v7365_v32, %v7364_v31  ;;  %v5644_v40 = vsel %vm2435_vm0, %v7369_v35, %v7368_v33  ;;  %v7399_v31 = vld [vmem:[%s12463_s0 + $0x183] ss:$8 sm:$0xf0]   ;;  %v7396_v32 = vld [vmem:[%s12463_s0 + $0x182] ss:$8 sm:$0xf]  }
 0x2de   :  { %v4988_v38 = vpop.permute.xlu1 %4987   ;;  %v4977_v41 = vpop.permute.xlu0 %4976  }
 0x2df   :  { %4991 = vst.msk [vmem:[#allocation0 + $0xd02] ss:$4 sm:$0xff] %vm4_vm1, %v4988_v38   ;;  %v7367_v38 = vld [vmem:[%s12463_s0 + $0x103] ss:$8 sm:$0xf0]  }
 0x2e0   :  { %4980 = vst.msk [vmem:[#allocation0 + $0xce2] ss:$4 sm:$0xff] %vm4_vm1, %v4977_v41   ;;  %5458 = vrot.lane.b32.xlu2 %v5457_v43, %s7584_s27  ;;  %v5633_v41 = vsel %vm2435_vm0, %v7367_v38, %v7366_v36  ;;  %v7370_v43 = vld [vmem:[%s12463_s0 + $0x105] ss:$8 sm:$0xf]  }
 0x2e2   :  { %v5098_v46 = vpop.permute.xlu2 %5097  }
 0x2e3   :  { %5101 = vst.msk [vmem:[#allocation0 + $0xe42] ss:$4 sm:$0xff] %vm4_vm1, %v5098_v46  }
 0x2e4   :  { %5480 = vrot.lane.b32.xlu1 %v5479_v44, %s7584_s27  ;;  %5469 = vrot.lane.b32.xlu0 %v5468_v45, %s7584_s27  ;;  %v7371_v44 = vld [vmem:[%s12463_s0 + $0x105] ss:$8 sm:$0xf0]   ;;  %v7374_v45 = vld [vmem:[%s12463_s0 + $0x107] ss:$8 sm:$0xf]  }
 0x2e5   :  { %v5655_v51 = vsel %vm2435_vm0, %v7371_v44, %v7370_v43  ;;  %v5677_v52 = vsel %vm2435_vm0, %v7375_v47, %v7374_v45  ;;  %v7405_v43 = vld [vmem:[%s12463_s0 + $0x186] ss:$8 sm:$0xf0]   ;;  %v7402_v44 = vld [vmem:[%s12463_s0 + $0x185] ss:$8 sm:$0xf]  }
 0x2e6   :  { %v5021_v50 = vpop.permute.xlu1 %5020   ;;  %v5010_v53 = vpop.permute.xlu0 %5009  }
 0x2e7   :  { %5024 = vst.msk [vmem:[#allocation0 + $0xd62] ss:$4 sm:$0xff] %vm4_vm1, %v5021_v50   ;;  %v7373_v50 = vld [vmem:[%s12463_s0 + $0x106] ss:$8 sm:$0xf0]  }
 0x2e8   :  { %5013 = vst.msk [vmem:[#allocation0 + $0xd42] ss:$4 sm:$0xff] %vm4_vm1, %v5010_v53   ;;  %5491 = vrot.lane.b32.xlu2 %v5490_v55, %s7584_s27  ;;  %v5666_v53 = vsel %vm2435_vm0, %v7373_v50, %v7372_v48  ;;  %v7376_v55 = vld [vmem:[%s12463_s0 + $0x140] ss:$8 sm:$0xf]  }
 0x2ea   :  { %v5131_v58 = vpop.permute.xlu2 %5130  }
 0x2eb   :  { %5134 = vst.msk [vmem:[#allocation0 + $0xea2] ss:$4 sm:$0xff] %vm4_vm1, %v5131_v58  }
 0x2ec   :  { %5513 = vrot.lane.b32.xlu1 %v5512_v56, %s7584_s27  ;;  %5502 = vrot.lane.b32.xlu0 %v5501_v57, %s7584_s27  ;;  %v7377_v56 = vld [vmem:[%s12463_s0 + $0x140] ss:$8 sm:$0xf0]   ;;  %v7380_v57 = vld [vmem:[%s12463_s0 + $0x142] ss:$8 sm:$0xf]  }
 0x2ed   :  { %v5688_v63 = vsel %vm2435_vm0, %v7377_v56, %v7376_v55  ;;  %v5710_v0 = vsel %vm2435_vm0, %v7381_v59, %v7380_v57  ;;  %v7411_v55 = vld [vmem:[%s12463_s0 + $0x1c1] ss:$8 sm:$0xf0]   ;;  %v7408_v56 = vld [vmem:[%s12463_s0 + $0x1c0] ss:$8 sm:$0xf]  }
 0x2ee   :  { %v5054_v62 = vpop.permute.xlu1 %5053   ;;  %v5043_v1 = vpop.permute.xlu0 %5042  }
 0x2ef   :  { %5057 = vst.msk [vmem:[#allocation0 + $0xdc2] ss:$4 sm:$0xff] %vm4_vm1, %v5054_v62   ;;  %v7379_v62 = vld [vmem:[%s12463_s0 + $0x141] ss:$8 sm:$0xf0]  }
 0x2f0   :  { %5046 = vst.msk [vmem:[#allocation0 + $0xda2] ss:$4 sm:$0xff] %vm4_vm1, %v5043_v1   ;;  %5524 = vrot.lane.b32.xlu2 %v5523_v3, %s7584_s27  ;;  %v5699_v1 = vsel %vm2435_vm0, %v7379_v62, %v7378_v60  ;;  %v7382_v3 = vld [vmem:[%s12463_s0 + $0x143] ss:$8 sm:$0xf]  }
 0x2f2   :  { %v5164_v6 = vpop.permute.xlu2 %5163  }
 0x2f3   :  { %5167 = vst.msk [vmem:[#allocation0 + $0xf02] ss:$4 sm:$0xff] %vm4_vm1, %v5164_v6  }
 0x2f4   :  { %5546 = vrot.lane.b32.xlu1 %v5545_v4, %s7584_s27  ;;  %5535 = vrot.lane.b32.xlu0 %v5534_v5, %s7584_s27  ;;  %v7383_v4 = vld [vmem:[%s12463_s0 + $0x143] ss:$8 sm:$0xf0]   ;;  %v7386_v5 = vld [vmem:[%s12463_s0 + $0x145] ss:$8 sm:$0xf]  }
 0x2f5   :  { %v5721_v11 = vsel %vm2435_vm0, %v7383_v4, %v7382_v3  ;;  %v5743_v12 = vsel %vm2435_vm0, %v7387_v7, %v7386_v5  ;;  %v7417_v3 = vld [vmem:[%s12463_s0 + $0x1c4] ss:$8 sm:$0xf0]   ;;  %v7414_v4 = vld [vmem:[%s12463_s0 + $0x1c3] ss:$8 sm:$0xf]  }
 0x2f6   :  { %v5087_v10 = vpop.permute.xlu1 %5086   ;;  %v5076_v13 = vpop.permute.xlu0 %5075  }
 0x2f7   :  { %5090 = vst.msk [vmem:[#allocation0 + $0xe22] ss:$4 sm:$0xff] %vm4_vm1, %v5087_v10   ;;  %v7385_v10 = vld [vmem:[%s12463_s0 + $0x144] ss:$8 sm:$0xf0]  }
 0x2f8   :  { %5079 = vst.msk [vmem:[#allocation0 + $0xe02] ss:$4 sm:$0xff] %vm4_vm1, %v5076_v13   ;;  %5557 = vrot.lane.b32.xlu2 %v5556_v15, %s7584_s27  ;;  %v5732_v13 = vsel %vm2435_vm0, %v7385_v10, %v7384_v8  ;;  %v7388_v15 = vld [vmem:[%s12463_s0 + $0x146] ss:$8 sm:$0xf]  }
 0x2fa   :  { %v5197_v18 = vpop.permute.xlu2 %5196  }
 0x2fb   :  { %5200 = vst.msk [vmem:[#allocation0 + $0xf62] ss:$4 sm:$0xff] %vm4_vm1, %v5197_v18  }
 0x2fc   :  { %5579 = vrot.lane.b32.xlu1 %v5578_v16, %s7584_s27  ;;  %5568 = vrot.lane.b32.xlu0 %v5567_v17, %s7584_s27  ;;  %v7389_v16 = vld [vmem:[%s12463_s0 + $0x146] ss:$8 sm:$0xf0]   ;;  %v7392_v17 = vld [vmem:[%s12463_s0 + $0x180] ss:$8 sm:$0xf]  }
 0x2fd   :  { %v5754_v23 = vsel %vm2435_vm0, %v7389_v16, %v7388_v15  ;;  %v5776_v24 = vsel %vm2435_vm0, %v7393_v19, %v7392_v17  ;;  %v7423_v15 = vld [vmem:[%s12463_s0 + $0x1c7] ss:$8 sm:$0xf0]   ;;  %v7420_v16 = vld [vmem:[%s12463_s0 + $0x1c6] ss:$8 sm:$0xf]  }
 0x2fe   :  { %v5120_v22 = vpop.permute.xlu1 %5119   ;;  %v5109_v25 = vpop.permute.xlu0 %5108  }
 0x2ff   :  { %5123 = vst.msk [vmem:[#allocation0 + $0xe82] ss:$4 sm:$0xff] %vm4_vm1, %v5120_v22   ;;  %v7391_v22 = vld [vmem:[%s12463_s0 + $0x147] ss:$8 sm:$0xf0]  }
 0x300   :  { %5112 = vst.msk [vmem:[#allocation0 + $0xe62] ss:$4 sm:$0xff] %vm4_vm1, %v5109_v25   ;;  %5590 = vrot.lane.b32.xlu2 %v5589_v27, %s7584_s27  ;;  %v5765_v25 = vsel %vm2435_vm0, %v7391_v22, %v7390_v20  ;;  %v7394_v27 = vld [vmem:[%s12463_s0 + $0x181] ss:$8 sm:$0xf]  }
 0x302   :  { %v5230_v30 = vpop.permute.xlu2 %5229  }
 0x303   :  { %5233 = vst.msk [vmem:[#allocation0 + $0xfc2] ss:$4 sm:$0xff] %vm4_vm1, %v5230_v30  }
 0x304   :  { %5612 = vrot.lane.b32.xlu1 %v5611_v28, %s7584_s27  ;;  %5601 = vrot.lane.b32.xlu0 %v5600_v29, %s7584_s27  ;;  %v7395_v28 = vld [vmem:[%s12463_s0 + $0x181] ss:$8 sm:$0xf0]   ;;  %v7398_v29 = vld [vmem:[%s12463_s0 + $0x183] ss:$8 sm:$0xf]  }
 0x305   :  { %v5787_v35 = vsel %vm2435_vm0, %v7395_v28, %v7394_v27  ;;  %v5809_v36 = vsel %vm2435_vm0, %v7399_v31, %v7398_v29  ;;  %v7429_v27 = vld [vmem:[%s12463_s0 + $0x202] ss:$8 sm:$0xf0]   ;;  %v7426_v28 = vld [vmem:[%s12463_s0 + $0x201] ss:$8 sm:$0xf]  }
 0x306   :  { %v5153_v34 = vpop.permute.xlu1 %5152   ;;  %v5142_v37 = vpop.permute.xlu0 %5141  }
 0x307   :  { %5156 = vst.msk [vmem:[#allocation0 + $0xee2] ss:$4 sm:$0xff] %vm4_vm1, %v5153_v34   ;;  %v7397_v34 = vld [vmem:[%s12463_s0 + $0x182] ss:$8 sm:$0xf0]  }
 0x308   :  { %5145 = vst.msk [vmem:[#allocation0 + $0xec2] ss:$4 sm:$0xff] %vm4_vm1, %v5142_v37   ;;  %5623 = vrot.lane.b32.xlu2 %v5622_v39, %s7584_s27  ;;  %v5798_v37 = vsel %vm2435_vm0, %v7397_v34, %v7396_v32  ;;  %v7400_v39 = vld [vmem:[%s12463_s0 + $0x184] ss:$8 sm:$0xf]  }
 0x30a   :  { %v5261_v42 = vpop.permute.xlu2 %5260  }
 0x30b   :  { %5264 = vst.msk [vmem:[#allocation0 + $0x23] ss:$4 sm:$0xff] %vm4_vm1, %v5261_v42  }
 0x30c   :  { %5645 = vrot.lane.b32.xlu1 %v5644_v40, %s7584_s27  ;;  %5634 = vrot.lane.b32.xlu0 %v5633_v41, %s7584_s27  ;;  %v7401_v40 = vld [vmem:[%s12463_s0 + $0x184] ss:$8 sm:$0xf0]   ;;  %v7404_v41 = vld [vmem:[%s12463_s0 + $0x186] ss:$8 sm:$0xf]  }
 0x30d   :  { %v5820_v47 = vsel %vm2435_vm0, %v7401_v40, %v7400_v39  ;;  %v5842_v48 = vsel %vm2435_vm0, %v7405_v43, %v7404_v41  ;;  %v7435_v39 = vld [vmem:[%s12463_s0 + $0x205] ss:$8 sm:$0xf0]   ;;  %v7432_v40 = vld [vmem:[%s12463_s0 + $0x204] ss:$8 sm:$0xf]  }
 0x30e   :  { %v5186_v46 = vpop.permute.xlu1 %5185   ;;  %v5175_v49 = vpop.permute.xlu0 %5174  }
 0x30f   :  { %5189 = vst.msk [vmem:[#allocation0 + $0xf42] ss:$4 sm:$0xff] %vm4_vm1, %v5186_v46   ;;  %v7403_v46 = vld [vmem:[%s12463_s0 + $0x185] ss:$8 sm:$0xf0]  }
 0x310   :  { %5178 = vst.msk [vmem:[#allocation0 + $0xf22] ss:$4 sm:$0xff] %vm4_vm1, %v5175_v49   ;;  %5656 = vrot.lane.b32.xlu2 %v5655_v51, %s7584_s27  ;;  %v5831_v49 = vsel %vm2435_vm0, %v7403_v46, %v7402_v44  ;;  %v7406_v51 = vld [vmem:[%s12463_s0 + $0x187] ss:$8 sm:$0xf]  }
 0x312   :  { %v5294_v54 = vpop.permute.xlu2 %5293  }
 0x313   :  { %5297 = vst.msk [vmem:[#allocation0 + $0x83] ss:$4 sm:$0xff] %vm4_vm1, %v5294_v54  }
 0x314   :  { %5678 = vrot.lane.b32.xlu1 %v5677_v52, %s7584_s27  ;;  %5667 = vrot.lane.b32.xlu0 %v5666_v53, %s7584_s27  ;;  %v7407_v52 = vld [vmem:[%s12463_s0 + $0x187] ss:$8 sm:$0xf0]   ;;  %v7410_v53 = vld [vmem:[%s12463_s0 + $0x1c1] ss:$8 sm:$0xf]  }
 0x315   :  { %v5853_v59 = vsel %vm2435_vm0, %v7407_v52, %v7406_v51  ;;  %v5875_v60 = vsel %vm2435_vm0, %v7411_v55, %v7410_v53  ;;  %v7441_v51 = vld [vmem:[%s12463_s0 + $0x240] ss:$8 sm:$0xf0]   ;;  %v7438_v52 = vld [vmem:[%s12463_s0 + $0x207] ss:$8 sm:$0xf]  }
 0x316   :  { %v5219_v58 = vpop.permute.xlu1 %5218   ;;  %v5208_v61 = vpop.permute.xlu0 %5207  }
 0x317   :  { %5222 = vst.msk [vmem:[#allocation0 + $0xfa2] ss:$4 sm:$0xff] %vm4_vm1, %v5219_v58   ;;  %v7409_v58 = vld [vmem:[%s12463_s0 + $0x1c0] ss:$8 sm:$0xf0]  }
 0x318   :  { %5211 = vst.msk [vmem:[#allocation0 + $0xf82] ss:$4 sm:$0xff] %vm4_vm1, %v5208_v61   ;;  %5689 = vrot.lane.b32.xlu2 %v5688_v63, %s7584_s27  ;;  %v5864_v61 = vsel %vm2435_vm0, %v7409_v58, %v7408_v56  ;;  %v7412_v63 = vld [vmem:[%s12463_s0 + $0x1c2] ss:$8 sm:$0xf]  }
 0x31a   :  { %v5327_v2 = vpop.permute.xlu2 %5326  }
 0x31b   :  { %5330 = vst.msk [vmem:[#allocation0 + $0xe3] ss:$4 sm:$0xff] %vm4_vm1, %v5327_v2  }
 0x31c   :  { %5711 = vrot.lane.b32.xlu1 %v5710_v0, %s7584_s27  ;;  %5700 = vrot.lane.b32.xlu0 %v5699_v1, %s7584_s27  ;;  %v7413_v0 = vld [vmem:[%s12463_s0 + $0x1c2] ss:$8 sm:$0xf0]   ;;  %v7416_v1 = vld [vmem:[%s12463_s0 + $0x1c4] ss:$8 sm:$0xf]  }
 0x31d   :  { %v5886_v7 = vsel %vm2435_vm0, %v7413_v0, %v7412_v63  ;;  %v5908_v8 = vsel %vm2435_vm0, %v7417_v3, %v7416_v1  ;;  %v7447_v63 = vld [vmem:[%s12463_s0 + $0x243] ss:$8 sm:$0xf0]   ;;  %v7444_v0 = vld [vmem:[%s12463_s0 + $0x242] ss:$8 sm:$0xf]  }
 0x31e   :  { %v5250_v6 = vpop.permute.xlu1 %5249   ;;  %v5241_v9 = vpop.permute.xlu0 %5240  }
 0x31f   :  { %5253 = vst.msk [vmem:[#allocation0 + $0x3] ss:$4 sm:$0xff] %vm4_vm1, %v5250_v6   ;;  %v7415_v6 = vld [vmem:[%s12463_s0 + $0x1c3] ss:$8 sm:$0xf0]  }
 0x320   :  { %5244 = vst.msk [vmem:[#allocation0 + $0xfe2] ss:$4 sm:$0xff] %vm4_vm1, %v5241_v9   ;;  %5722 = vrot.lane.b32.xlu2 %v5721_v11, %s7584_s27  ;;  %v5897_v9 = vsel %vm2435_vm0, %v7415_v6, %v7414_v4  ;;  %v7418_v11 = vld [vmem:[%s12463_s0 + $0x1c5] ss:$8 sm:$0xf]  }
 0x322   :  { %v5360_v14 = vpop.permute.xlu2 %5359  }
 0x323   :  { %5363 = vst.msk [vmem:[#allocation0 + $0x143] ss:$4 sm:$0xff] %vm4_vm1, %v5360_v14  }
 0x324   :  { %5744 = vrot.lane.b32.xlu1 %v5743_v12, %s7584_s27  ;;  %5733 = vrot.lane.b32.xlu0 %v5732_v13, %s7584_s27  ;;  %v7419_v12 = vld [vmem:[%s12463_s0 + $0x1c5] ss:$8 sm:$0xf0]   ;;  %v7422_v13 = vld [vmem:[%s12463_s0 + $0x1c7] ss:$8 sm:$0xf]  }
 0x325   :  { %v5919_v19 = vsel %vm2435_vm0, %v7419_v12, %v7418_v11  ;;  %v5941_v20 = vsel %vm2435_vm0, %v7423_v15, %v7422_v13  ;;  %v7453_v11 = vld [vmem:[%s12463_s0 + $0x246] ss:$8 sm:$0xf0]   ;;  %v7450_v12 = vld [vmem:[%s12463_s0 + $0x245] ss:$8 sm:$0xf]  }
 0x326   :  { %v5283_v18 = vpop.permute.xlu1 %5282   ;;  %v5272_v21 = vpop.permute.xlu0 %5271  }
 0x327   :  { %5286 = vst.msk [vmem:[#allocation0 + $0x63] ss:$4 sm:$0xff] %vm4_vm1, %v5283_v18   ;;  %v7421_v18 = vld [vmem:[%s12463_s0 + $0x1c6] ss:$8 sm:$0xf0]  }
 0x328   :  { %5275 = vst.msk [vmem:[#allocation0 + $0x43] ss:$4 sm:$0xff] %vm4_vm1, %v5272_v21   ;;  %5755 = vrot.lane.b32.xlu2 %v5754_v23, %s7584_s27  ;;  %v5930_v21 = vsel %vm2435_vm0, %v7421_v18, %v7420_v16  ;;  %v7424_v23 = vld [vmem:[%s12463_s0 + $0x200] ss:$8 sm:$0xf]  }
 0x32a   :  { %v5393_v26 = vpop.permute.xlu2 %5392  }
 0x32b   :  { %5396 = vst.msk [vmem:[#allocation0 + $0x1a3] ss:$4 sm:$0xff] %vm4_vm1, %v5393_v26  }
 0x32c   :  { %5777 = vrot.lane.b32.xlu1 %v5776_v24, %s7584_s27  ;;  %5766 = vrot.lane.b32.xlu0 %v5765_v25, %s7584_s27  ;;  %v7425_v24 = vld [vmem:[%s12463_s0 + $0x200] ss:$8 sm:$0xf0]   ;;  %v7428_v25 = vld [vmem:[%s12463_s0 + $0x202] ss:$8 sm:$0xf]  }
 0x32d   :  { %v5952_v31 = vsel %vm2435_vm0, %v7425_v24, %v7424_v23  ;;  %v5974_v32 = vsel %vm2435_vm0, %v7429_v27, %v7428_v25  ;;  %v7459_v23 = vld [vmem:[%s12463_s0 + $0x281] ss:$8 sm:$0xf0]   ;;  %v7456_v24 = vld [vmem:[%s12463_s0 + $0x280] ss:$8 sm:$0xf]  }
 0x32e   :  { %v5316_v30 = vpop.permute.xlu1 %5315   ;;  %v5305_v33 = vpop.permute.xlu0 %5304  }
 0x32f   :  { %5319 = vst.msk [vmem:[#allocation0 + $0xc3] ss:$4 sm:$0xff] %vm4_vm1, %v5316_v30   ;;  %v7427_v30 = vld [vmem:[%s12463_s0 + $0x201] ss:$8 sm:$0xf0]  }
 0x330   :  { %5308 = vst.msk [vmem:[#allocation0 + $0xa3] ss:$4 sm:$0xff] %vm4_vm1, %v5305_v33   ;;  %5788 = vrot.lane.b32.xlu2 %v5787_v35, %s7584_s27  ;;  %v5963_v33 = vsel %vm2435_vm0, %v7427_v30, %v7426_v28  ;;  %v7430_v35 = vld [vmem:[%s12463_s0 + $0x203] ss:$8 sm:$0xf]  }
 0x332   :  { %v5426_v38 = vpop.permute.xlu2 %5425  }
 0x333   :  { %5429 = vst.msk [vmem:[#allocation0 + $0x203] ss:$4 sm:$0xff] %vm4_vm1, %v5426_v38  }
 0x334   :  { %5810 = vrot.lane.b32.xlu1 %v5809_v36, %s7584_s27  ;;  %5799 = vrot.lane.b32.xlu0 %v5798_v37, %s7584_s27  ;;  %v7431_v36 = vld [vmem:[%s12463_s0 + $0x203] ss:$8 sm:$0xf0]   ;;  %v7434_v37 = vld [vmem:[%s12463_s0 + $0x205] ss:$8 sm:$0xf]  }
 0x335   :  { %v5985_v43 = vsel %vm2435_vm0, %v7431_v36, %v7430_v35  ;;  %v6007_v44 = vsel %vm2435_vm0, %v7435_v39, %v7434_v37  ;;  %v7465_v35 = vld [vmem:[%s12463_s0 + $0x284] ss:$8 sm:$0xf0]   ;;  %v7462_v36 = vld [vmem:[%s12463_s0 + $0x283] ss:$8 sm:$0xf]  }
 0x336   :  { %v5349_v42 = vpop.permute.xlu1 %5348   ;;  %v5338_v45 = vpop.permute.xlu0 %5337  }
 0x337   :  { %5352 = vst.msk [vmem:[#allocation0 + $0x123] ss:$4 sm:$0xff] %vm4_vm1, %v5349_v42   ;;  %v7433_v42 = vld [vmem:[%s12463_s0 + $0x204] ss:$8 sm:$0xf0]  }
 0x338   :  { %5341 = vst.msk [vmem:[#allocation0 + $0x103] ss:$4 sm:$0xff] %vm4_vm1, %v5338_v45   ;;  %5821 = vrot.lane.b32.xlu2 %v5820_v47, %s7584_s27  ;;  %v5996_v45 = vsel %vm2435_vm0, %v7433_v42, %v7432_v40  ;;  %v7436_v47 = vld [vmem:[%s12463_s0 + $0x206] ss:$8 sm:$0xf]  }
 0x33a   :  { %v5459_v50 = vpop.permute.xlu2 %5458  }
 0x33b   :  { %5462 = vst.msk [vmem:[#allocation0 + $0x263] ss:$4 sm:$0xff] %vm4_vm1, %v5459_v50  }
 0x33c   :  { %5843 = vrot.lane.b32.xlu1 %v5842_v48, %s7584_s27  ;;  %5832 = vrot.lane.b32.xlu0 %v5831_v49, %s7584_s27  ;;  %v7437_v48 = vld [vmem:[%s12463_s0 + $0x206] ss:$8 sm:$0xf0]   ;;  %v7440_v49 = vld [vmem:[%s12463_s0 + $0x240] ss:$8 sm:$0xf]  }
 0x33d   :  { %v6018_v55 = vsel %vm2435_vm0, %v7437_v48, %v7436_v47  ;;  %v6040_v56 = vsel %vm2435_vm0, %v7441_v51, %v7440_v49  ;;  %v7471_v47 = vld [vmem:[%s12463_s0 + $0x287] ss:$8 sm:$0xf0]   ;;  %v7468_v48 = vld [vmem:[%s12463_s0 + $0x286] ss:$8 sm:$0xf]  }
 0x33e   :  { %v5382_v54 = vpop.permute.xlu1 %5381   ;;  %v5371_v57 = vpop.permute.xlu0 %5370  }
 0x33f   :  { %5385 = vst.msk [vmem:[#allocation0 + $0x183] ss:$4 sm:$0xff] %vm4_vm1, %v5382_v54   ;;  %v7439_v54 = vld [vmem:[%s12463_s0 + $0x207] ss:$8 sm:$0xf0]  }
 0x340   :  { %5374 = vst.msk [vmem:[#allocation0 + $0x163] ss:$4 sm:$0xff] %vm4_vm1, %v5371_v57   ;;  %5854 = vrot.lane.b32.xlu2 %v5853_v59, %s7584_s27  ;;  %v6029_v57 = vsel %vm2435_vm0, %v7439_v54, %v7438_v52  ;;  %v7442_v59 = vld [vmem:[%s12463_s0 + $0x241] ss:$8 sm:$0xf]  }
 0x342   :  { %v5492_v62 = vpop.permute.xlu2 %5491  }
 0x343   :  { %5495 = vst.msk [vmem:[#allocation0 + $0x2c3] ss:$4 sm:$0xff] %vm4_vm1, %v5492_v62  }
 0x344   :  { %5876 = vrot.lane.b32.xlu1 %v5875_v60, %s7584_s27  ;;  %5865 = vrot.lane.b32.xlu0 %v5864_v61, %s7584_s27  ;;  %v7443_v60 = vld [vmem:[%s12463_s0 + $0x241] ss:$8 sm:$0xf0]   ;;  %v7446_v61 = vld [vmem:[%s12463_s0 + $0x243] ss:$8 sm:$0xf]  }
 0x345   :  { %v6051_v3 = vsel %vm2435_vm0, %v7443_v60, %v7442_v59  ;;  %v6073_v4 = vsel %vm2435_vm0, %v7447_v63, %v7446_v61  ;;  %v7477_v59 = vld [vmem:[%s12463_s0 + $0x2c2] ss:$8 sm:$0xf0]   ;;  %v7474_v60 = vld [vmem:[%s12463_s0 + $0x2c1] ss:$8 sm:$0xf]  }
 0x346   :  { %v5415_v2 = vpop.permute.xlu1 %5414   ;;  %v5404_v5 = vpop.permute.xlu0 %5403  }
 0x347   :  { %5418 = vst.msk [vmem:[#allocation0 + $0x1e3] ss:$4 sm:$0xff] %vm4_vm1, %v5415_v2   ;;  %v7445_v2 = vld [vmem:[%s12463_s0 + $0x242] ss:$8 sm:$0xf0]  }
 0x348   :  { %5407 = vst.msk [vmem:[#allocation0 + $0x1c3] ss:$4 sm:$0xff] %vm4_vm1, %v5404_v5   ;;  %5887 = vrot.lane.b32.xlu2 %v5886_v7, %s7584_s27  ;;  %v6062_v5 = vsel %vm2435_vm0, %v7445_v2, %v7444_v0  ;;  %v7448_v7 = vld [vmem:[%s12463_s0 + $0x244] ss:$8 sm:$0xf]  }
 0x34a   :  { %v5525_v10 = vpop.permute.xlu2 %5524  }
 0x34b   :  { %5528 = vst.msk [vmem:[#allocation0 + $0x323] ss:$4 sm:$0xff] %vm4_vm1, %v5525_v10  }
 0x34c   :  { %5909 = vrot.lane.b32.xlu1 %v5908_v8, %s7584_s27  ;;  %5898 = vrot.lane.b32.xlu0 %v5897_v9, %s7584_s27  ;;  %v7449_v8 = vld [vmem:[%s12463_s0 + $0x244] ss:$8 sm:$0xf0]   ;;  %v7452_v9 = vld [vmem:[%s12463_s0 + $0x246] ss:$8 sm:$0xf]  }
 0x34d   :  { %v6084_v15 = vsel %vm2435_vm0, %v7449_v8, %v7448_v7  ;;  %v6106_v16 = vsel %vm2435_vm0, %v7453_v11, %v7452_v9  ;;  %v7483_v7 = vld [vmem:[%s12463_s0 + $0x2c5] ss:$8 sm:$0xf0]   ;;  %v7480_v8 = vld [vmem:[%s12463_s0 + $0x2c4] ss:$8 sm:$0xf]  }
 0x34e   :  { %v5448_v14 = vpop.permute.xlu1 %5447   ;;  %v5437_v17 = vpop.permute.xlu0 %5436  }
 0x34f   :  { %5451 = vst.msk [vmem:[#allocation0 + $0x243] ss:$4 sm:$0xff] %vm4_vm1, %v5448_v14   ;;  %v7451_v14 = vld [vmem:[%s12463_s0 + $0x245] ss:$8 sm:$0xf0]  }
 0x350   :  { %5440 = vst.msk [vmem:[#allocation0 + $0x223] ss:$4 sm:$0xff] %vm4_vm1, %v5437_v17   ;;  %5920 = vrot.lane.b32.xlu2 %v5919_v19, %s7584_s27  ;;  %v6095_v17 = vsel %vm2435_vm0, %v7451_v14, %v7450_v12  ;;  %v7454_v19 = vld [vmem:[%s12463_s0 + $0x247] ss:$8 sm:$0xf]  }
 0x352   :  { %v5558_v22 = vpop.permute.xlu2 %5557  }
 0x353   :  { %5561 = vst.msk [vmem:[#allocation0 + $0x383] ss:$4 sm:$0xff] %vm4_vm1, %v5558_v22  }
 0x354   :  { %5942 = vrot.lane.b32.xlu1 %v5941_v20, %s7584_s27  ;;  %5931 = vrot.lane.b32.xlu0 %v5930_v21, %s7584_s27  ;;  %v7455_v20 = vld [vmem:[%s12463_s0 + $0x247] ss:$8 sm:$0xf0]   ;;  %v7458_v21 = vld [vmem:[%s12463_s0 + $0x281] ss:$8 sm:$0xf]  }
 0x355   :  { %v6117_v27 = vsel %vm2435_vm0, %v7455_v20, %v7454_v19  ;;  %v6139_v28 = vsel %vm2435_vm0, %v7459_v23, %v7458_v21  ;;  %v7489_v19 = vld [vmem:[%s12463_s0 + $0x300] ss:$8 sm:$0xf0]   ;;  %v7486_v20 = vld [vmem:[%s12463_s0 + $0x2c7] ss:$8 sm:$0xf]  }
 0x356   :  { %v5481_v26 = vpop.permute.xlu1 %5480   ;;  %v5470_v29 = vpop.permute.xlu0 %5469  }
 0x357   :  { %5484 = vst.msk [vmem:[#allocation0 + $0x2a3] ss:$4 sm:$0xff] %vm4_vm1, %v5481_v26   ;;  %v7457_v26 = vld [vmem:[%s12463_s0 + $0x280] ss:$8 sm:$0xf0]  }
 0x358   :  { %5473 = vst.msk [vmem:[#allocation0 + $0x283] ss:$4 sm:$0xff] %vm4_vm1, %v5470_v29   ;;  %5953 = vrot.lane.b32.xlu2 %v5952_v31, %s7584_s27  ;;  %v6128_v29 = vsel %vm2435_vm0, %v7457_v26, %v7456_v24  ;;  %v7460_v31 = vld [vmem:[%s12463_s0 + $0x282] ss:$8 sm:$0xf]  }
 0x35a   :  { %v5591_v34 = vpop.permute.xlu2 %5590  }
 0x35b   :  { %5594 = vst.msk [vmem:[#allocation0 + $0x3e3] ss:$4 sm:$0xff] %vm4_vm1, %v5591_v34  }
 0x35c   :  { %5975 = vrot.lane.b32.xlu1 %v5974_v32, %s7584_s27  ;;  %5964 = vrot.lane.b32.xlu0 %v5963_v33, %s7584_s27  ;;  %v7461_v32 = vld [vmem:[%s12463_s0 + $0x282] ss:$8 sm:$0xf0]   ;;  %v7464_v33 = vld [vmem:[%s12463_s0 + $0x284] ss:$8 sm:$0xf]  }
 0x35d   :  { %v6150_v39 = vsel %vm2435_vm0, %v7461_v32, %v7460_v31  ;;  %v6172_v40 = vsel %vm2435_vm0, %v7465_v35, %v7464_v33  ;;  %v7495_v31 = vld [vmem:[%s12463_s0 + $0x303] ss:$8 sm:$0xf0]   ;;  %v7492_v32 = vld [vmem:[%s12463_s0 + $0x302] ss:$8 sm:$0xf]  }
 0x35e   :  { %v5514_v38 = vpop.permute.xlu1 %5513   ;;  %v5503_v41 = vpop.permute.xlu0 %5502  }
 0x35f   :  { %5517 = vst.msk [vmem:[#allocation0 + $0x303] ss:$4 sm:$0xff] %vm4_vm1, %v5514_v38   ;;  %v7463_v38 = vld [vmem:[%s12463_s0 + $0x283] ss:$8 sm:$0xf0]  }
 0x360   :  { %5506 = vst.msk [vmem:[#allocation0 + $0x2e3] ss:$4 sm:$0xff] %vm4_vm1, %v5503_v41   ;;  %5986 = vrot.lane.b32.xlu2 %v5985_v43, %s7584_s27  ;;  %v6161_v41 = vsel %vm2435_vm0, %v7463_v38, %v7462_v36  ;;  %v7466_v43 = vld [vmem:[%s12463_s0 + $0x285] ss:$8 sm:$0xf]  }
 0x362   :  { %v5624_v46 = vpop.permute.xlu2 %5623  }
 0x363   :  { %5627 = vst.msk [vmem:[#allocation0 + $0x443] ss:$4 sm:$0xff] %vm4_vm1, %v5624_v46  }
 0x364   :  { %6008 = vrot.lane.b32.xlu1 %v6007_v44, %s7584_s27  ;;  %5997 = vrot.lane.b32.xlu0 %v5996_v45, %s7584_s27  ;;  %v7467_v44 = vld [vmem:[%s12463_s0 + $0x285] ss:$8 sm:$0xf0]   ;;  %v7470_v45 = vld [vmem:[%s12463_s0 + $0x287] ss:$8 sm:$0xf]  }
 0x365   :  { %v6183_v51 = vsel %vm2435_vm0, %v7467_v44, %v7466_v43  ;;  %v6205_v52 = vsel %vm2435_vm0, %v7471_v47, %v7470_v45  ;;  %v7501_v43 = vld [vmem:[%s12463_s0 + $0x306] ss:$8 sm:$0xf0]   ;;  %v7498_v44 = vld [vmem:[%s12463_s0 + $0x305] ss:$8 sm:$0xf]  }
 0x366   :  { %v5547_v50 = vpop.permute.xlu1 %5546   ;;  %v5536_v53 = vpop.permute.xlu0 %5535  }
 0x367   :  { %5550 = vst.msk [vmem:[#allocation0 + $0x363] ss:$4 sm:$0xff] %vm4_vm1, %v5547_v50   ;;  %v7469_v50 = vld [vmem:[%s12463_s0 + $0x286] ss:$8 sm:$0xf0]  }
 0x368   :  { %5539 = vst.msk [vmem:[#allocation0 + $0x343] ss:$4 sm:$0xff] %vm4_vm1, %v5536_v53   ;;  %6019 = vrot.lane.b32.xlu2 %v6018_v55, %s7584_s27  ;;  %v6194_v53 = vsel %vm2435_vm0, %v7469_v50, %v7468_v48  ;;  %v7472_v55 = vld [vmem:[%s12463_s0 + $0x2c0] ss:$8 sm:$0xf]  }
 0x36a   :  { %v5657_v58 = vpop.permute.xlu2 %5656  }
 0x36b   :  { %5660 = vst.msk [vmem:[#allocation0 + $0x4a3] ss:$4 sm:$0xff] %vm4_vm1, %v5657_v58  }
 0x36c   :  { %6041 = vrot.lane.b32.xlu1 %v6040_v56, %s7584_s27  ;;  %6030 = vrot.lane.b32.xlu0 %v6029_v57, %s7584_s27  ;;  %v7473_v56 = vld [vmem:[%s12463_s0 + $0x2c0] ss:$8 sm:$0xf0]   ;;  %v7476_v57 = vld [vmem:[%s12463_s0 + $0x2c2] ss:$8 sm:$0xf]  }
 0x36d   :  { %v6216_v63 = vsel %vm2435_vm0, %v7473_v56, %v7472_v55  ;;  %v6238_v0 = vsel %vm2435_vm0, %v7477_v59, %v7476_v57  ;;  %v7507_v55 = vld [vmem:[%s12463_s0 + $0x341] ss:$8 sm:$0xf0]   ;;  %v7504_v56 = vld [vmem:[%s12463_s0 + $0x340] ss:$8 sm:$0xf]  }
 0x36e   :  { %v5580_v62 = vpop.permute.xlu1 %5579   ;;  %v5569_v1 = vpop.permute.xlu0 %5568  }
 0x36f   :  { %5583 = vst.msk [vmem:[#allocation0 + $0x3c3] ss:$4 sm:$0xff] %vm4_vm1, %v5580_v62   ;;  %v7475_v62 = vld [vmem:[%s12463_s0 + $0x2c1] ss:$8 sm:$0xf0]  }
 0x370   :  { %5572 = vst.msk [vmem:[#allocation0 + $0x3a3] ss:$4 sm:$0xff] %vm4_vm1, %v5569_v1   ;;  %6052 = vrot.lane.b32.xlu2 %v6051_v3, %s7584_s27  ;;  %v6227_v1 = vsel %vm2435_vm0, %v7475_v62, %v7474_v60  ;;  %v7478_v3 = vld [vmem:[%s12463_s0 + $0x2c3] ss:$8 sm:$0xf]  }
 0x372   :  { %v5690_v6 = vpop.permute.xlu2 %5689  }
 0x373   :  { %5693 = vst.msk [vmem:[#allocation0 + $0x503] ss:$4 sm:$0xff] %vm4_vm1, %v5690_v6  }
 0x374   :  { %6074 = vrot.lane.b32.xlu1 %v6073_v4, %s7584_s27  ;;  %6063 = vrot.lane.b32.xlu0 %v6062_v5, %s7584_s27  ;;  %v7479_v4 = vld [vmem:[%s12463_s0 + $0x2c3] ss:$8 sm:$0xf0]   ;;  %v7482_v5 = vld [vmem:[%s12463_s0 + $0x2c5] ss:$8 sm:$0xf]  }
 0x375   :  { %v6249_v11 = vsel %vm2435_vm0, %v7479_v4, %v7478_v3  ;;  %v6271_v12 = vsel %vm2435_vm0, %v7483_v7, %v7482_v5  ;;  %v7513_v3 = vld [vmem:[%s12463_s0 + $0x344] ss:$8 sm:$0xf0]   ;;  %v7510_v4 = vld [vmem:[%s12463_s0 + $0x343] ss:$8 sm:$0xf]  }
 0x376   :  { %v5613_v10 = vpop.permute.xlu1 %5612   ;;  %v5602_v13 = vpop.permute.xlu0 %5601  }
 0x377   :  { %5616 = vst.msk [vmem:[#allocation0 + $0x423] ss:$4 sm:$0xff] %vm4_vm1, %v5613_v10   ;;  %v7481_v10 = vld [vmem:[%s12463_s0 + $0x2c4] ss:$8 sm:$0xf0]  }
 0x378   :  { %5605 = vst.msk [vmem:[#allocation0 + $0x403] ss:$4 sm:$0xff] %vm4_vm1, %v5602_v13   ;;  %6085 = vrot.lane.b32.xlu2 %v6084_v15, %s7584_s27  ;;  %v6260_v13 = vsel %vm2435_vm0, %v7481_v10, %v7480_v8  ;;  %v7484_v15 = vld [vmem:[%s12463_s0 + $0x2c6] ss:$8 sm:$0xf]  }
 0x37a   :  { %v5723_v18 = vpop.permute.xlu2 %5722  }
 0x37b   :  { %5726 = vst.msk [vmem:[#allocation0 + $0x563] ss:$4 sm:$0xff] %vm4_vm1, %v5723_v18  }
 0x37c   :  { %6107 = vrot.lane.b32.xlu1 %v6106_v16, %s7584_s27  ;;  %6096 = vrot.lane.b32.xlu0 %v6095_v17, %s7584_s27  ;;  %v7485_v16 = vld [vmem:[%s12463_s0 + $0x2c6] ss:$8 sm:$0xf0]   ;;  %v7488_v17 = vld [vmem:[%s12463_s0 + $0x300] ss:$8 sm:$0xf]  }
 0x37d   :  { %v6282_v23 = vsel %vm2435_vm0, %v7485_v16, %v7484_v15  ;;  %v6304_v24 = vsel %vm2435_vm0, %v7489_v19, %v7488_v17  ;;  %v7519_v15 = vld [vmem:[%s12463_s0 + $0x347] ss:$8 sm:$0xf0]   ;;  %v7516_v16 = vld [vmem:[%s12463_s0 + $0x346] ss:$8 sm:$0xf]  }
 0x37e   :  { %v5646_v22 = vpop.permute.xlu1 %5645   ;;  %v5635_v25 = vpop.permute.xlu0 %5634  }
 0x37f   :  { %5649 = vst.msk [vmem:[#allocation0 + $0x483] ss:$4 sm:$0xff] %vm4_vm1, %v5646_v22   ;;  %v7487_v22 = vld [vmem:[%s12463_s0 + $0x2c7] ss:$8 sm:$0xf0]  }
 0x380   :  { %5638 = vst.msk [vmem:[#allocation0 + $0x463] ss:$4 sm:$0xff] %vm4_vm1, %v5635_v25   ;;  %6118 = vrot.lane.b32.xlu2 %v6117_v27, %s7584_s27  ;;  %v6293_v25 = vsel %vm2435_vm0, %v7487_v22, %v7486_v20  ;;  %v7490_v27 = vld [vmem:[%s12463_s0 + $0x301] ss:$8 sm:$0xf]  }
 0x382   :  { %v5756_v30 = vpop.permute.xlu2 %5755  }
 0x383   :  { %5759 = vst.msk [vmem:[#allocation0 + $0x5c3] ss:$4 sm:$0xff] %vm4_vm1, %v5756_v30  }
 0x384   :  { %6140 = vrot.lane.b32.xlu1 %v6139_v28, %s7584_s27  ;;  %6129 = vrot.lane.b32.xlu0 %v6128_v29, %s7584_s27  ;;  %v7491_v28 = vld [vmem:[%s12463_s0 + $0x301] ss:$8 sm:$0xf0]   ;;  %v7494_v29 = vld [vmem:[%s12463_s0 + $0x303] ss:$8 sm:$0xf]  }
 0x385   :  { %v6315_v35 = vsel %vm2435_vm0, %v7491_v28, %v7490_v27  ;;  %v6337_v36 = vsel %vm2435_vm0, %v7495_v31, %v7494_v29  ;;  %v7525_v27 = vld [vmem:[%s12463_s0 + $0x382] ss:$8 sm:$0xf0]   ;;  %v7522_v28 = vld [vmem:[%s12463_s0 + $0x381] ss:$8 sm:$0xf]  }
 0x386   :  { %v5679_v34 = vpop.permute.xlu1 %5678   ;;  %v5668_v37 = vpop.permute.xlu0 %5667  }
 0x387   :  { %5682 = vst.msk [vmem:[#allocation0 + $0x4e3] ss:$4 sm:$0xff] %vm4_vm1, %v5679_v34   ;;  %v7493_v34 = vld [vmem:[%s12463_s0 + $0x302] ss:$8 sm:$0xf0]  }
 0x388   :  { %5671 = vst.msk [vmem:[#allocation0 + $0x4c3] ss:$4 sm:$0xff] %vm4_vm1, %v5668_v37   ;;  %6151 = vrot.lane.b32.xlu2 %v6150_v39, %s7584_s27  ;;  %v6326_v37 = vsel %vm2435_vm0, %v7493_v34, %v7492_v32  ;;  %v7496_v39 = vld [vmem:[%s12463_s0 + $0x304] ss:$8 sm:$0xf]  }
 0x38a   :  { %v5789_v42 = vpop.permute.xlu2 %5788  }
 0x38b   :  { %5792 = vst.msk [vmem:[#allocation0 + $0x623] ss:$4 sm:$0xff] %vm4_vm1, %v5789_v42  }
 0x38c   :  { %6173 = vrot.lane.b32.xlu1 %v6172_v40, %s7584_s27  ;;  %6162 = vrot.lane.b32.xlu0 %v6161_v41, %s7584_s27  ;;  %v7497_v40 = vld [vmem:[%s12463_s0 + $0x304] ss:$8 sm:$0xf0]   ;;  %v7500_v41 = vld [vmem:[%s12463_s0 + $0x306] ss:$8 sm:$0xf]  }
 0x38d   :  { %v6348_v47 = vsel %vm2435_vm0, %v7497_v40, %v7496_v39  ;;  %v6370_v48 = vsel %vm2435_vm0, %v7501_v43, %v7500_v41  ;;  %v7531_v39 = vld [vmem:[%s12463_s0 + $0x385] ss:$8 sm:$0xf0]   ;;  %v7528_v40 = vld [vmem:[%s12463_s0 + $0x384] ss:$8 sm:$0xf]  }
 0x38e   :  { %v5712_v46 = vpop.permute.xlu1 %5711   ;;  %v5701_v49 = vpop.permute.xlu0 %5700  }
 0x38f   :  { %5715 = vst.msk [vmem:[#allocation0 + $0x543] ss:$4 sm:$0xff] %vm4_vm1, %v5712_v46   ;;  %v7499_v46 = vld [vmem:[%s12463_s0 + $0x305] ss:$8 sm:$0xf0]  }
 0x390   :  { %5704 = vst.msk [vmem:[#allocation0 + $0x523] ss:$4 sm:$0xff] %vm4_vm1, %v5701_v49   ;;  %6184 = vrot.lane.b32.xlu2 %v6183_v51, %s7584_s27  ;;  %v6359_v49 = vsel %vm2435_vm0, %v7499_v46, %v7498_v44  ;;  %v7502_v51 = vld [vmem:[%s12463_s0 + $0x307] ss:$8 sm:$0xf]  }
 0x392   :  { %v5822_v54 = vpop.permute.xlu2 %5821  }
 0x393   :  { %5825 = vst.msk [vmem:[#allocation0 + $0x683] ss:$4 sm:$0xff] %vm4_vm1, %v5822_v54  }
 0x394   :  { %6206 = vrot.lane.b32.xlu1 %v6205_v52, %s7584_s27  ;;  %6195 = vrot.lane.b32.xlu0 %v6194_v53, %s7584_s27  ;;  %v7503_v52 = vld [vmem:[%s12463_s0 + $0x307] ss:$8 sm:$0xf0]   ;;  %v7506_v53 = vld [vmem:[%s12463_s0 + $0x341] ss:$8 sm:$0xf]  }
 0x395   :  { %v6381_v59 = vsel %vm2435_vm0, %v7503_v52, %v7502_v51  ;;  %v6403_v60 = vsel %vm2435_vm0, %v7507_v55, %v7506_v53  ;;  %v7537_v51 = vld [vmem:[%s12463_s0 + $0x3c0] ss:$8 sm:$0xf0]   ;;  %v7534_v52 = vld [vmem:[%s12463_s0 + $0x387] ss:$8 sm:$0xf]  }
 0x396   :  { %v5745_v58 = vpop.permute.xlu1 %5744   ;;  %v5734_v61 = vpop.permute.xlu0 %5733  }
 0x397   :  { %5748 = vst.msk [vmem:[#allocation0 + $0x5a3] ss:$4 sm:$0xff] %vm4_vm1, %v5745_v58   ;;  %v7505_v58 = vld [vmem:[%s12463_s0 + $0x340] ss:$8 sm:$0xf0]  }
 0x398   :  { %5737 = vst.msk [vmem:[#allocation0 + $0x583] ss:$4 sm:$0xff] %vm4_vm1, %v5734_v61   ;;  %6217 = vrot.lane.b32.xlu2 %v6216_v63, %s7584_s27  ;;  %v6392_v61 = vsel %vm2435_vm0, %v7505_v58, %v7504_v56  ;;  %v7508_v63 = vld [vmem:[%s12463_s0 + $0x342] ss:$8 sm:$0xf]  }
 0x39a   :  { %v5855_v2 = vpop.permute.xlu2 %5854  }
 0x39b   :  { %5858 = vst.msk [vmem:[#allocation0 + $0x6e3] ss:$4 sm:$0xff] %vm4_vm1, %v5855_v2  }
 0x39c   :  { %6239 = vrot.lane.b32.xlu1 %v6238_v0, %s7584_s27  ;;  %6228 = vrot.lane.b32.xlu0 %v6227_v1, %s7584_s27  ;;  %v7509_v0 = vld [vmem:[%s12463_s0 + $0x342] ss:$8 sm:$0xf0]   ;;  %v7512_v1 = vld [vmem:[%s12463_s0 + $0x344] ss:$8 sm:$0xf]  }
 0x39d   :  { %v6414_v7 = vsel %vm2435_vm0, %v7509_v0, %v7508_v63  ;;  %v6436_v8 = vsel %vm2435_vm0, %v7513_v3, %v7512_v1  ;;  %v7543_v63 = vld [vmem:[%s12463_s0 + $0x3c3] ss:$8 sm:$0xf0]   ;;  %v7540_v0 = vld [vmem:[%s12463_s0 + $0x3c2] ss:$8 sm:$0xf]  }
 0x39e   :  { %v5778_v6 = vpop.permute.xlu1 %5777   ;;  %v5767_v9 = vpop.permute.xlu0 %5766  }
 0x39f   :  { %5781 = vst.msk [vmem:[#allocation0 + $0x603] ss:$4 sm:$0xff] %vm4_vm1, %v5778_v6   ;;  %v7511_v6 = vld [vmem:[%s12463_s0 + $0x343] ss:$8 sm:$0xf0]  }
 0x3a0   :  { %5770 = vst.msk [vmem:[#allocation0 + $0x5e3] ss:$4 sm:$0xff] %vm4_vm1, %v5767_v9   ;;  %6250 = vrot.lane.b32.xlu2 %v6249_v11, %s7584_s27  ;;  %v6425_v9 = vsel %vm2435_vm0, %v7511_v6, %v7510_v4  ;;  %v7514_v11 = vld [vmem:[%s12463_s0 + $0x345] ss:$8 sm:$0xf]  }
 0x3a2   :  { %v5888_v14 = vpop.permute.xlu2 %5887  }
 0x3a3   :  { %5891 = vst.msk [vmem:[#allocation0 + $0x743] ss:$4 sm:$0xff] %vm4_vm1, %v5888_v14  }
 0x3a4   :  { %6272 = vrot.lane.b32.xlu1 %v6271_v12, %s7584_s27  ;;  %6261 = vrot.lane.b32.xlu0 %v6260_v13, %s7584_s27  ;;  %v7515_v12 = vld [vmem:[%s12463_s0 + $0x345] ss:$8 sm:$0xf0]   ;;  %v7518_v13 = vld [vmem:[%s12463_s0 + $0x347] ss:$8 sm:$0xf]  }
 0x3a5   :  { %v6447_v19 = vsel %vm2435_vm0, %v7515_v12, %v7514_v11  ;;  %v6469_v20 = vsel %vm2435_vm0, %v7519_v15, %v7518_v13  ;;  %v7549_v11 = vld [vmem:[%s12463_s0 + $0x3c6] ss:$8 sm:$0xf0]   ;;  %v7546_v12 = vld [vmem:[%s12463_s0 + $0x3c5] ss:$8 sm:$0xf]  }
 0x3a6   :  { %v5811_v18 = vpop.permute.xlu1 %5810   ;;  %v5800_v21 = vpop.permute.xlu0 %5799  }
 0x3a7   :  { %5814 = vst.msk [vmem:[#allocation0 + $0x663] ss:$4 sm:$0xff] %vm4_vm1, %v5811_v18   ;;  %v7517_v18 = vld [vmem:[%s12463_s0 + $0x346] ss:$8 sm:$0xf0]  }
 0x3a8   :  { %5803 = vst.msk [vmem:[#allocation0 + $0x643] ss:$4 sm:$0xff] %vm4_vm1, %v5800_v21   ;;  %6283 = vrot.lane.b32.xlu2 %v6282_v23, %s7584_s27  ;;  %v6458_v21 = vsel %vm2435_vm0, %v7517_v18, %v7516_v16  ;;  %v7520_v23 = vld [vmem:[%s12463_s0 + $0x380] ss:$8 sm:$0xf]  }
 0x3aa   :  { %v5921_v26 = vpop.permute.xlu2 %5920  }
 0x3ab   :  { %5924 = vst.msk [vmem:[#allocation0 + $0x7a3] ss:$4 sm:$0xff] %vm4_vm1, %v5921_v26  }
 0x3ac   :  { %6305 = vrot.lane.b32.xlu1 %v6304_v24, %s7584_s27  ;;  %6294 = vrot.lane.b32.xlu0 %v6293_v25, %s7584_s27  ;;  %v7521_v24 = vld [vmem:[%s12463_s0 + $0x380] ss:$8 sm:$0xf0]   ;;  %v7524_v25 = vld [vmem:[%s12463_s0 + $0x382] ss:$8 sm:$0xf]  }
 0x3ad   :  { %v6480_v31 = vsel %vm2435_vm0, %v7521_v24, %v7520_v23  ;;  %v6502_v32 = vsel %vm2435_vm0, %v7525_v27, %v7524_v25 }
 0x3ae   :  { %v5844_v30 = vpop.permute.xlu1 %5843   ;;  %v5833_v33 = vpop.permute.xlu0 %5832  }
 0x3af   :  { %5847 = vst.msk [vmem:[#allocation0 + $0x6c3] ss:$4 sm:$0xff] %vm4_vm1, %v5844_v30   ;;  %v7523_v30 = vld [vmem:[%s12463_s0 + $0x381] ss:$8 sm:$0xf0]  }
 0x3b0   :  { %5836 = vst.msk [vmem:[#allocation0 + $0x6a3] ss:$4 sm:$0xff] %vm4_vm1, %v5833_v33   ;;  %6316 = vrot.lane.b32.xlu2 %v6315_v35, %s7584_s27  ;;  %v6491_v33 = vsel %vm2435_vm0, %v7523_v30, %v7522_v28  ;;  %v7526_v35 = vld [vmem:[%s12463_s0 + $0x383] ss:$8 sm:$0xf]  }
 0x3b2   :  { %v5954_v38 = vpop.permute.xlu2 %5953  }
 0x3b3   :  { %5957 = vst.msk [vmem:[#allocation0 + $0x803] ss:$4 sm:$0xff] %vm4_vm1, %v5954_v38  }
 0x3b4   :  { %6338 = vrot.lane.b32.xlu1 %v6337_v36, %s7584_s27  ;;  %6327 = vrot.lane.b32.xlu0 %v6326_v37, %s7584_s27  ;;  %v7527_v36 = vld [vmem:[%s12463_s0 + $0x383] ss:$8 sm:$0xf0]   ;;  %v7530_v37 = vld [vmem:[%s12463_s0 + $0x385] ss:$8 sm:$0xf]  }
 0x3b5   :  { %v6513_v43 = vsel %vm2435_vm0, %v7527_v36, %v7526_v35  ;;  %v6535_v44 = vsel %vm2435_vm0, %v7531_v39, %v7530_v37 }
 0x3b6   :  { %v5877_v42 = vpop.permute.xlu1 %5876   ;;  %v5866_v45 = vpop.permute.xlu0 %5865  }
 0x3b7   :  { %5880 = vst.msk [vmem:[#allocation0 + $0x723] ss:$4 sm:$0xff] %vm4_vm1, %v5877_v42   ;;  %v7529_v42 = vld [vmem:[%s12463_s0 + $0x384] ss:$8 sm:$0xf0]  }
 0x3b8   :  { %5869 = vst.msk [vmem:[#allocation0 + $0x703] ss:$4 sm:$0xff] %vm4_vm1, %v5866_v45   ;;  %6349 = vrot.lane.b32.xlu2 %v6348_v47, %s7584_s27  ;;  %v6524_v45 = vsel %vm2435_vm0, %v7529_v42, %v7528_v40  ;;  %v7532_v47 = vld [vmem:[%s12463_s0 + $0x386] ss:$8 sm:$0xf]  }
 0x3ba   :  { %v5987_v50 = vpop.permute.xlu2 %5986  }
 0x3bb   :  { %5990 = vst.msk [vmem:[#allocation0 + $0x863] ss:$4 sm:$0xff] %vm4_vm1, %v5987_v50  }
 0x3bc   :  { %6371 = vrot.lane.b32.xlu1 %v6370_v48, %s7584_s27  ;;  %6360 = vrot.lane.b32.xlu0 %v6359_v49, %s7584_s27  ;;  %v7533_v48 = vld [vmem:[%s12463_s0 + $0x386] ss:$8 sm:$0xf0]   ;;  %v7536_v49 = vld [vmem:[%s12463_s0 + $0x3c0] ss:$8 sm:$0xf]  }
 0x3bd   :  { %v6546_v55 = vsel %vm2435_vm0, %v7533_v48, %v7532_v47  ;;  %v6568_v56 = vsel %vm2435_vm0, %v7537_v51, %v7536_v49 }
 0x3be   :  { %v5910_v54 = vpop.permute.xlu1 %5909   ;;  %v5899_v57 = vpop.permute.xlu0 %5898  }
 0x3bf   :  { %5913 = vst.msk [vmem:[#allocation0 + $0x783] ss:$4 sm:$0xff] %vm4_vm1, %v5910_v54   ;;  %v7535_v54 = vld [vmem:[%s12463_s0 + $0x387] ss:$8 sm:$0xf0]  }
 0x3c0   :  { %5902 = vst.msk [vmem:[#allocation0 + $0x763] ss:$4 sm:$0xff] %vm4_vm1, %v5899_v57   ;;  %6382 = vrot.lane.b32.xlu2 %v6381_v59, %s7584_s27  ;;  %v6557_v57 = vsel %vm2435_vm0, %v7535_v54, %v7534_v52  ;;  %v7538_v59 = vld [vmem:[%s12463_s0 + $0x3c1] ss:$8 sm:$0xf]  }
 0x3c1   :  { %v3_v54 = vld [vmem:[%s12463_s0] sm:$0xff]  }
 0x3c2   :  { %v6020_v62 = vpop.permute.xlu2 %6019   ;;  %5 = vst.msk [vmem:[#allocation0] sm:$0x1] %vm4_vm1, %v3_v54  }
 0x3c3   :  { %6023 = vst.msk [vmem:[#allocation0 + $0x8c3] ss:$4 sm:$0xff] %vm4_vm1, %v6020_v62  }
 0x3c4   :  { %6404 = vrot.lane.b32.xlu1 %v6403_v60, %s7584_s27  ;;  %6393 = vrot.lane.b32.xlu0 %v6392_v61, %s7584_s27  ;;  %v7539_v60 = vld [vmem:[%s12463_s0 + $0x3c1] ss:$8 sm:$0xf0]   ;;  %v7542_v61 = vld [vmem:[%s12463_s0 + $0x3c3] ss:$8 sm:$0xf]  }
 0x3c5   :  { %v6579_v3 = vsel %vm2435_vm0, %v7539_v60, %v7538_v59  ;;  %v6601_v4 = vsel %vm2435_vm0, %v7543_v63, %v7542_v61  ;;  %7 = vst.msk [vmem:[#allocation0 + $0x1f] sm:$0x2] %vm4_vm1, %v3_v54   ;;  %v6664_v63 = vld [vmem:[%s12463_s0 + $0x10] sm:$0xff]  }
 0x3c6   :  { %v5943_v2 = vpop.permute.xlu1 %5942   ;;  %v5932_v5 = vpop.permute.xlu0 %5931   ;;  %9 = vst.msk [vmem:[#allocation0 + $0x3e] sm:$0x4] %vm4_vm1, %v3_v54  }
 0x3c7   :  { %5946 = vst.msk [vmem:[#allocation0 + $0x7e3] ss:$4 sm:$0xff] %vm4_vm1, %v5943_v2   ;;  %v7541_v2 = vld [vmem:[%s12463_s0 + $0x3c2] ss:$8 sm:$0xf0]  }
 0x3c8   :  { %5935 = vst.msk [vmem:[#allocation0 + $0x7c3] ss:$4 sm:$0xff] %vm4_vm1, %v5932_v5   ;;  %6415 = vrot.lane.b32.xlu2 %v6414_v7, %s7584_s27  ;;  %v6590_v5 = vsel %vm2435_vm0, %v7541_v2, %v7540_v0  ;;  %v7544_v7 = vld [vmem:[%s12463_s0 + $0x3c4] ss:$8 sm:$0xf]  }
 0x3c9   :  { %11 = vst.msk [vmem:[#allocation0 + $0x5d] sm:$0x8] %vm4_vm1, %v3_v54  }
 0x3ca   :  { %v6053_v10 = vpop.permute.xlu2 %6052   ;;  %13 = vst.msk [vmem:[#allocation0 + $0x7c] sm:$0x10] %vm4_vm1, %v3_v54  }
 0x3cb   :  { %6056 = vst.msk [vmem:[#allocation0 + $0x923] ss:$4 sm:$0xff] %vm4_vm1, %v6053_v10  }
 0x3cc   :  { %6437 = vrot.lane.b32.xlu1 %v6436_v8, %s7584_s27  ;;  %6426 = vrot.lane.b32.xlu0 %v6425_v9, %s7584_s27  ;;  %v7545_v8 = vld [vmem:[%s12463_s0 + $0x3c4] ss:$8 sm:$0xf0]   ;;  %v7548_v9 = vld [vmem:[%s12463_s0 + $0x3c6] ss:$8 sm:$0xf]  }
 0x3cd   :  { %v6612_v15 = vsel %vm2435_vm0, %v7545_v8, %v7544_v7  ;;  %v6634_v16 = vsel %vm2435_vm0, %v7549_v11, %v7548_v9  ;;  %15 = vst.msk [vmem:[#allocation0 + $0x9b] sm:$0x20] %vm4_vm1, %v3_v54   ;;  %v6669_v7 = vld [vmem:[%s12463_s0 + $0x38] sm:$0xff]   ;;  %v6670_v8 = vld [vmem:[%s12463_s0 + $0x40] sm:$0xff]   ;;  %v6671_v9 = vld [vmem:[%s12463_s0 + $0x48] sm:$0xff]  }
 0x3ce   :  { %v5976_v14 = vpop.permute.xlu1 %5975   ;;  %v5965_v17 = vpop.permute.xlu0 %5964   ;;  %17 = vst.msk [vmem:[#allocation0 + $0xba] sm:$0x40] %vm4_vm1, %v3_v54   ;;  %v6673_v11 = vld [vmem:[%s12463_s0 + $0x58] sm:$0xff]  }
 0x3cf   :  { %5979 = vst.msk [vmem:[#allocation0 + $0x843] ss:$4 sm:$0xff] %vm4_vm1, %v5976_v14   ;;  %v7547_v14 = vld [vmem:[%s12463_s0 + $0x3c5] ss:$8 sm:$0xf0]  }
 0x3d0   :  { %5968 = vst.msk [vmem:[#allocation0 + $0x823] ss:$4 sm:$0xff] %vm4_vm1, %v5965_v17   ;;  %6448 = vrot.lane.b32.xlu2 %v6447_v19, %s7584_s27  ;;  %v6623_v17 = vsel %vm2435_vm0, %v7547_v14, %v7546_v12  ;;  %v7550_v19 = vld [vmem:[%s12463_s0 + $0x3c7] ss:$8 sm:$0xf]  }
 0x3d1   :  { %19 = vst.msk [vmem:[#allocation0 + $0xd9] sm:$0x80] %vm4_vm1, %v3_v54   ;;  %v6674_v12 = vld [vmem:[%s12463_s0 + $0x60] sm:$0xff]   ;;  %v6676_v14 = vld [vmem:[%s12463_s0 + $0x70] sm:$0xff]  }
 0x3d2   :  { %v6086_v22 = vpop.permute.xlu2 %6085   ;;  %43 = vst.msk [vmem:[#allocation0 + $0x8] sm:$0x1] %vm4_vm1, %v6664_v63   ;;  %v6716_v54 = vld [vmem:[%s12463_s0 + $0x1b0] sm:$0xff]  }
 0x3d3   :  { %6089 = vst.msk [vmem:[#allocation0 + $0x983] ss:$4 sm:$0xff] %vm4_vm1, %v6086_v22  }
 0x3d4   :  { %6470 = vrot.lane.b32.xlu1 %v6469_v20, %s7584_s27  ;;  %6459 = vrot.lane.b32.xlu0 %v6458_v21, %s7584_s27  ;;  %v7551_v20 = vld [vmem:[%s12463_s0 + $0x3c7] ss:$8 sm:$0xf0]   ;;  %45 = vst.msk [vmem:[#allocation0 + $0x27] sm:$0x2] %vm4_vm1, %v6664_v63  }
 0x3d5   :  { %v6645_v23 = vsel %vm2435_vm0, %v7551_v20, %v7550_v19  ;;  %47 = vst.msk [vmem:[#allocation0 + $0x46] sm:$0x4] %vm4_vm1, %v6664_v63   ;;  %v6681_v19 = vld [vmem:[%s12463_s0 + $0x98] sm:$0xff]   ;;  %v6682_v20 = vld [vmem:[%s12463_s0 + $0xa0] sm:$0xff]  }
 0x3d6   :  { %v6009_v26 = vpop.permute.xlu1 %6008   ;;  %v5998_v29 = vpop.permute.xlu0 %5997   ;;  %49 = vst.msk [vmem:[#allocation0 + $0x65] sm:$0x8] %vm4_vm1, %v6664_v63  }
 0x3d7   :  { %6012 = vst.msk [vmem:[#allocation0 + $0x8a3] ss:$4 sm:$0xff] %vm4_vm1, %v6009_v26  }
 0x3d8   :  { %6001 = vst.msk [vmem:[#allocation0 + $0x883] ss:$4 sm:$0xff] %vm4_vm1, %v5998_v29   ;;  %6481 = vrot.lane.b32.xlu2 %v6480_v31, %s7584_s27 }
 0x3d9   :  { %51 = vst.msk [vmem:[#allocation0 + $0x84] sm:$0x10] %vm4_vm1, %v6664_v63  }
 0x3da   :  { %v6119_v34 = vpop.permute.xlu2 %6118   ;;  %53 = vst.msk [vmem:[#allocation0 + $0xa3] sm:$0x20] %vm4_vm1, %v6664_v63  }
 0x3db   :  { %6122 = vst.msk [vmem:[#allocation0 + $0x9e3] ss:$4 sm:$0xff] %vm4_vm1, %v6119_v34  }
 0x3dc   :  { %6503 = vrot.lane.b32.xlu1 %v6502_v32, %s7584_s27  ;;  %6492 = vrot.lane.b32.xlu0 %v6491_v33, %s7584_s27  ;;  %55 = vst.msk [vmem:[#allocation0 + $0xc2] sm:$0x40] %vm4_vm1, %v6664_v63  }
 0x3dd   :  { %57 = vst.msk [vmem:[#allocation0 + $0xe1] sm:$0x80] %vm4_vm1, %v6664_v63   ;;  %v6725_v63 = vld [vmem:[%s12463_s0 + $0x1f8] sm:$0xff]  }
 0x3de   :  { %v6042_v38 = vpop.permute.xlu1 %6041   ;;  %v6031_v41 = vpop.permute.xlu0 %6030   ;;  %138 = vst.msk [vmem:[#allocation0 + $0x1c] sm:$0x1] %vm4_vm1, %v6669_v7  }
 0x3df   :  { %6045 = vst.msk [vmem:[#allocation0 + $0x903] ss:$4 sm:$0xff] %vm4_vm1, %v6042_v38  }
 0x3e0   :  { %6034 = vst.msk [vmem:[#allocation0 + $0x8e3] ss:$4 sm:$0xff] %vm4_vm1, %v6031_v41   ;;  %6514 = vrot.lane.b32.xlu2 %v6513_v43, %s7584_s27 }
 0x3e1   :  { %140 = vst.msk [vmem:[#allocation0 + $0x3b] sm:$0x2] %vm4_vm1, %v6669_v7  }
 0x3e2   :  { %v6152_v46 = vpop.permute.xlu2 %6151   ;;  %142 = vst.msk [vmem:[#allocation0 + $0x5a] sm:$0x4] %vm4_vm1, %v6669_v7  }
 0x3e3   :  { %6155 = vst.msk [vmem:[#allocation0 + $0xa43] ss:$4 sm:$0xff] %vm4_vm1, %v6152_v46  }
 0x3e4   :  { %6536 = vrot.lane.b32.xlu1 %v6535_v44, %s7584_s27  ;;  %6525 = vrot.lane.b32.xlu0 %v6524_v45, %s7584_s27  ;;  %144 = vst.msk [vmem:[#allocation0 + $0x79] sm:$0x8] %vm4_vm1, %v6669_v7  }
 0x3e5   :  { %146 = vst.msk [vmem:[#allocation0 + $0x98] sm:$0x10] %vm4_vm1, %v6669_v7  }
 0x3e6   :  { %v6075_v50 = vpop.permute.xlu1 %6074   ;;  %v6064_v53 = vpop.permute.xlu0 %6063   ;;  %148 = vst.msk [vmem:[#allocation0 + $0xb7] sm:$0x20] %vm4_vm1, %v6669_v7  }
 0x3e7   :  { %6078 = vst.msk [vmem:[#allocation0 + $0x963] ss:$4 sm:$0xff] %vm4_vm1, %v6075_v50  }
 0x3e8   :  { %6067 = vst.msk [vmem:[#allocation0 + $0x943] ss:$4 sm:$0xff] %vm4_vm1, %v6064_v53   ;;  %6547 = vrot.lane.b32.xlu2 %v6546_v55, %s7584_s27 }
 0x3e9   :  { %150 = vst.msk [vmem:[#allocation0 + $0xd6] sm:$0x40] %vm4_vm1, %v6669_v7  }
 0x3ea   :  { %v6185_v58 = vpop.permute.xlu2 %6184   ;;  %152 = vst.msk [vmem:[#allocation0 + $0xf5] sm:$0x80] %vm4_vm1, %v6669_v7   ;;  %v6733_v7 = vld [vmem:[%s12463_s0 + $0x238] sm:$0xff]  }
 0x3eb   :  { %6188 = vst.msk [vmem:[#allocation0 + $0xaa3] ss:$4 sm:$0xff] %vm4_vm1, %v6185_v58   ;;  %v6663_v58 = vld [vmem:[%s12463_s0 + $0x8] sm:$0xff]  }
 0x3ec   :  { %6569 = vrot.lane.b32.xlu1 %v6568_v56, %s7584_s27  ;;  %6558 = vrot.lane.b32.xlu0 %v6557_v57, %s7584_s27  ;;  %24 = vst.msk [vmem:[#allocation0 + $0x4] sm:$0x1] %vm4_vm1, %v6663_v58  }
 0x3ed   :  { %26 = vst.msk [vmem:[#allocation0 + $0x23] sm:$0x2] %vm4_vm1, %v6663_v58  }
 0x3ee   :  { %v6108_v62 = vpop.permute.xlu1 %6107   ;;  %v6097_v1 = vpop.permute.xlu0 %6096   ;;  %28 = vst.msk [vmem:[#allocation0 + $0x42] sm:$0x4] %vm4_vm1, %v6663_v58  }
 0x3ef   :  { %6111 = vst.msk [vmem:[#allocation0 + $0x9c3] ss:$4 sm:$0xff] %vm4_vm1, %v6108_v62  }
 0x3f0   :  { %6100 = vst.msk [vmem:[#allocation0 + $0x9a3] ss:$4 sm:$0xff] %vm4_vm1, %v6097_v1   ;;  %6580 = vrot.lane.b32.xlu2 %v6579_v3, %s7584_s27  ;;  %v6665_v3 = vld [vmem:[%s12463_s0 + $0x18] sm:$0xff]  }
 0x3f1   :  { %30 = vst.msk [vmem:[#allocation0 + $0x61] sm:$0x8] %vm4_vm1, %v6663_v58  }
 0x3f2   :  { %v6218_v6 = vpop.permute.xlu2 %6217   ;;  %32 = vst.msk [vmem:[#allocation0 + $0x80] sm:$0x10] %vm4_vm1, %v6663_v58  }
 0x3f3   :  { %6221 = vst.msk [vmem:[#allocation0 + $0xb03] ss:$4 sm:$0xff] %vm4_vm1, %v6218_v6   ;;  %v6668_v6 = vld [vmem:[%s12463_s0 + $0x30] sm:$0xff]  }
 0x3f4   :  { %6602 = vrot.lane.b32.xlu1 %v6601_v4, %s7584_s27  ;;  %6591 = vrot.lane.b32.xlu0 %v6590_v5, %s7584_s27  ;;  %34 = vst.msk [vmem:[#allocation0 + $0x9f] sm:$0x20] %vm4_vm1, %v6663_v58   ;;  %v6666_v4 = vld [vmem:[%s12463_s0 + $0x20] sm:$0xff]   ;;  %v6667_v5 = vld [vmem:[%s12463_s0 + $0x28] sm:$0xff]  }
 0x3f5   :  { %36 = vst.msk [vmem:[#allocation0 + $0xbe] sm:$0x40] %vm4_vm1, %v6663_v58  }
 0x3f6   :  { %v6141_v10 = vpop.permute.xlu1 %6140   ;;  %v6130_v13 = vpop.permute.xlu0 %6129   ;;  %38 = vst.msk [vmem:[#allocation0 + $0xdd] sm:$0x80] %vm4_vm1, %v6663_v58   ;;  %v6720_v58 = vld [vmem:[%s12463_s0 + $0x1d0] sm:$0xff]  }
 0x3f7   :  { %6144 = vst.msk [vmem:[#allocation0 + $0xa23] ss:$4 sm:$0xff] %vm4_vm1, %v6141_v10   ;;  %v6672_v10 = vld [vmem:[%s12463_s0 + $0x50] sm:$0xff]  }
 0x3f8   :  { %6133 = vst.msk [vmem:[#allocation0 + $0xa03] ss:$4 sm:$0xff] %vm4_vm1, %v6130_v13   ;;  %6613 = vrot.lane.b32.xlu2 %v6612_v15, %s7584_s27  ;;  %v6675_v13 = vld [vmem:[%s12463_s0 + $0x68] sm:$0xff]   ;;  %v6677_v15 = vld [vmem:[%s12463_s0 + $0x78] sm:$0xff]  }
 0x3f9   :  { %62 = vst.msk [vmem:[#allocation0 + $0xc] sm:$0x1] %vm4_vm1, %v6665_v3  }
 0x3fa   :  { %v6251_v18 = vpop.permute.xlu2 %6250   ;;  %64 = vst.msk [vmem:[#allocation0 + $0x2b] sm:$0x2] %vm4_vm1, %v6665_v3  }
 0x3fb   :  { %6254 = vst.msk [vmem:[#allocation0 + $0xb63] ss:$4 sm:$0xff] %vm4_vm1, %v6251_v18   ;;  %v6680_v18 = vld [vmem:[%s12463_s0 + $0x90] sm:$0xff]  }
 0x3fc   :  { %6635 = vrot.lane.b32.xlu1 %v6634_v16, %s7584_s27  ;;  %6624 = vrot.lane.b32.xlu0 %v6623_v17, %s7584_s27  ;;  %66 = vst.msk [vmem:[#allocation0 + $0x4a] sm:$0x4] %vm4_vm1, %v6665_v3   ;;  %v6678_v16 = vld [vmem:[%s12463_s0 + $0x80] sm:$0xff]   ;;  %v6679_v17 = vld [vmem:[%s12463_s0 + $0x88] sm:$0xff]  }
 0x3fd   :  { %68 = vst.msk [vmem:[#allocation0 + $0x69] sm:$0x8] %vm4_vm1, %v6665_v3  }
 0x3fe   :  { %v6174_v21 = vpop.permute.xlu1 %6173   ;;  %v6163_v22 = vpop.permute.xlu0 %6162   ;;  %70 = vst.msk [vmem:[#allocation0 + $0x88] sm:$0x10] %vm4_vm1, %v6665_v3  }
 0x3ff   :  { %6177 = vst.msk [vmem:[#allocation0 + $0xa83] ss:$4 sm:$0xff] %vm4_vm1, %v6174_v21   ;;  %v6683_v21 = vld [vmem:[%s12463_s0 + $0xa8] sm:$0xff]  }
 0x400   :  { %6166 = vst.msk [vmem:[#allocation0 + $0xa63] ss:$4 sm:$0xff] %vm4_vm1, %v6163_v22   ;;  %6646 = vrot.lane.b32.xlu2 %v6645_v23, %s7584_s27  ;;  %v6684_v22 = vld [vmem:[%s12463_s0 + $0xb0] sm:$0xff]   ;;  %v6685_v23 = vld [vmem:[%s12463_s0 + $0xb8] sm:$0xff]  }
 0x401   :  { %72 = vst.msk [vmem:[#allocation0 + $0xa7] sm:$0x20] %vm4_vm1, %v6665_v3  }
 0x402   :  { %v6284_v24 = vpop.permute.xlu2 %6283   ;;  %74 = vst.msk [vmem:[#allocation0 + $0xc6] sm:$0x40] %vm4_vm1, %v6665_v3  }
 0x403   :  { %6287 = vst.msk [vmem:[#allocation0 + $0xbc3] ss:$4 sm:$0xff] %vm4_vm1, %v6284_v24   ;;  %v6686_v24 = vld [vmem:[%s12463_s0 + $0xc0] sm:$0xff]  }
 0x404   :  { %76 = vst.msk [vmem:[#allocation0 + $0xe5] sm:$0x80] %vm4_vm1, %v6665_v3   ;;  %v6729_v3 = vld [vmem:[%s12463_s0 + $0x218] sm:$0xff]  }
 0x405   :  { %81 = vst.msk [vmem:[#allocation0 + $0x10] sm:$0x1] %vm4_vm1, %v6666_v4  }
 0x406   :  { %v6207_v25 = vpop.permute.xlu1 %6206   ;;  %v6196_v26 = vpop.permute.xlu0 %6195   ;;  %83 = vst.msk [vmem:[#allocation0 + $0x2f] sm:$0x2] %vm4_vm1, %v6666_v4  }
 0x407   :  { %6210 = vst.msk [vmem:[#allocation0 + $0xae3] ss:$4 sm:$0xff] %vm4_vm1, %v6207_v25   ;;  %v6687_v25 = vld [vmem:[%s12463_s0 + $0xc8] sm:$0xff]  }
 0x408   :  { %6199 = vst.msk [vmem:[#allocation0 + $0xac3] ss:$4 sm:$0xff] %vm4_vm1, %v6196_v26   ;;  %v6688_v26 = vld [vmem:[%s12463_s0 + $0xd0] sm:$0xff]  }
 0x409   :  { %85 = vst.msk [vmem:[#allocation0 + $0x4e] sm:$0x4] %vm4_vm1, %v6666_v4  }
 0x40a   :  { %v6317_v27 = vpop.permute.xlu2 %6316   ;;  %87 = vst.msk [vmem:[#allocation0 + $0x6d] sm:$0x8] %vm4_vm1, %v6666_v4  }
 0x40b   :  { %6320 = vst.msk [vmem:[#allocation0 + $0xc23] ss:$4 sm:$0xff] %vm4_vm1, %v6317_v27   ;;  %v6689_v27 = vld [vmem:[%s12463_s0 + $0xd8] sm:$0xff]  }
 0x40c   :  { %89 = vst.msk [vmem:[#allocation0 + $0x8c] sm:$0x10] %vm4_vm1, %v6666_v4  }
 0x40d   :  { %91 = vst.msk [vmem:[#allocation0 + $0xab] sm:$0x20] %vm4_vm1, %v6666_v4  }
 0x40e   :  { %v6240_v28 = vpop.permute.xlu1 %6239   ;;  %v6229_v29 = vpop.permute.xlu0 %6228   ;;  %93 = vst.msk [vmem:[#allocation0 + $0xca] sm:$0x40] %vm4_vm1, %v6666_v4  }
 0x40f   :  { %6243 = vst.msk [vmem:[#allocation0 + $0xb43] ss:$4 sm:$0xff] %vm4_vm1, %v6240_v28   ;;  %v6690_v28 = vld [vmem:[%s12463_s0 + $0xe0] sm:$0xff]  }
 0x410   :  { %6232 = vst.msk [vmem:[#allocation0 + $0xb23] ss:$4 sm:$0xff] %vm4_vm1, %v6229_v29   ;;  %v6691_v29 = vld [vmem:[%s12463_s0 + $0xe8] sm:$0xff]  }
 0x411   :  { %95 = vst.msk [vmem:[#allocation0 + $0xe9] sm:$0x80] %vm4_vm1, %v6666_v4   ;;  %v6730_v4 = vld [vmem:[%s12463_s0 + $0x220] sm:$0xff]  }
 0x412   :  { %v6350_v30 = vpop.permute.xlu2 %6349   ;;  %100 = vst.msk [vmem:[#allocation0 + $0x14] sm:$0x1] %vm4_vm1, %v6667_v5  }
 0x413   :  { %6353 = vst.msk [vmem:[#allocation0 + $0xc83] ss:$4 sm:$0xff] %vm4_vm1, %v6350_v30   ;;  %v6692_v30 = vld [vmem:[%s12463_s0 + $0xf0] sm:$0xff]  }
 0x414   :  { %102 = vst.msk [vmem:[#allocation0 + $0x33] sm:$0x2] %vm4_vm1, %v6667_v5  }
 0x415   :  { %104 = vst.msk [vmem:[#allocation0 + $0x52] sm:$0x4] %vm4_vm1, %v6667_v5  }
 0x416   :  { %v6273_v31 = vpop.permute.xlu1 %6272   ;;  %v6262_v32 = vpop.permute.xlu0 %6261   ;;  %106 = vst.msk [vmem:[#allocation0 + $0x71] sm:$0x8] %vm4_vm1, %v6667_v5  }
 0x417   :  { %6276 = vst.msk [vmem:[#allocation0 + $0xba3] ss:$4 sm:$0xff] %vm4_vm1, %v6273_v31   ;;  %v6693_v31 = vld [vmem:[%s12463_s0 + $0xf8] sm:$0xff]  }
 0x418   :  { %6265 = vst.msk [vmem:[#allocation0 + $0xb83] ss:$4 sm:$0xff] %vm4_vm1, %v6262_v32   ;;  %v6694_v32 = vld [vmem:[%s12463_s0 + $0x100] sm:$0xff]  }
 0x419   :  { %108 = vst.msk [vmem:[#allocation0 + $0x90] sm:$0x10] %vm4_vm1, %v6667_v5  }
 0x41a   :  { %v6383_v33 = vpop.permute.xlu2 %6382   ;;  %110 = vst.msk [vmem:[#allocation0 + $0xaf] sm:$0x20] %vm4_vm1, %v6667_v5  }
 0x41b   :  { %6386 = vst.msk [vmem:[#allocation0 + $0xce3] ss:$4 sm:$0xff] %vm4_vm1, %v6383_v33   ;;  %v6695_v33 = vld [vmem:[%s12463_s0 + $0x108] sm:$0xff]  }
 0x41c   :  { %112 = vst.msk [vmem:[#allocation0 + $0xce] sm:$0x40] %vm4_vm1, %v6667_v5  }
 0x41d   :  { %114 = vst.msk [vmem:[#allocation0 + $0xed] sm:$0x80] %vm4_vm1, %v6667_v5   ;;  %v6731_v5 = vld [vmem:[%s12463_s0 + $0x228] sm:$0xff]  }
 0x41e   :  { %v6306_v34 = vpop.permute.xlu1 %6305   ;;  %v6295_v35 = vpop.permute.xlu0 %6294   ;;  %119 = vst.msk [vmem:[#allocation0 + $0x18] sm:$0x1] %vm4_vm1, %v6668_v6  }
 0x41f   :  { %6309 = vst.msk [vmem:[#allocation0 + $0xc03] ss:$4 sm:$0xff] %vm4_vm1, %v6306_v34   ;;  %v6696_v34 = vld [vmem:[%s12463_s0 + $0x110] sm:$0xff]  }
 0x420   :  { %6298 = vst.msk [vmem:[#allocation0 + $0xbe3] ss:$4 sm:$0xff] %vm4_vm1, %v6295_v35   ;;  %v6697_v35 = vld [vmem:[%s12463_s0 + $0x118] sm:$0xff]  }
 0x421   :  { %121 = vst.msk [vmem:[#allocation0 + $0x37] sm:$0x2] %vm4_vm1, %v6668_v6  }
 0x422   :  { %v6416_v36 = vpop.permute.xlu2 %6415   ;;  %123 = vst.msk [vmem:[#allocation0 + $0x56] sm:$0x4] %vm4_vm1, %v6668_v6  }
 0x423   :  { %6419 = vst.msk [vmem:[#allocation0 + $0xd43] ss:$4 sm:$0xff] %vm4_vm1, %v6416_v36   ;;  %v6698_v36 = vld [vmem:[%s12463_s0 + $0x120] sm:$0xff]  }
 0x424   :  { %125 = vst.msk [vmem:[#allocation0 + $0x75] sm:$0x8] %vm4_vm1, %v6668_v6  }
 0x425   :  { %127 = vst.msk [vmem:[#allocation0 + $0x94] sm:$0x10] %vm4_vm1, %v6668_v6  }
 0x426   :  { %v6339_v37 = vpop.permute.xlu1 %6338   ;;  %v6328_v38 = vpop.permute.xlu0 %6327   ;;  %129 = vst.msk [vmem:[#allocation0 + $0xb3] sm:$0x20] %vm4_vm1, %v6668_v6  }
 0x427   :  { %6342 = vst.msk [vmem:[#allocation0 + $0xc63] ss:$4 sm:$0xff] %vm4_vm1, %v6339_v37   ;;  %v6699_v37 = vld [vmem:[%s12463_s0 + $0x128] sm:$0xff]  }
 0x428   :  { %6331 = vst.msk [vmem:[#allocation0 + $0xc43] ss:$4 sm:$0xff] %vm4_vm1, %v6328_v38   ;;  %v6700_v38 = vld [vmem:[%s12463_s0 + $0x130] sm:$0xff]  }
 0x429   :  { %131 = vst.msk [vmem:[#allocation0 + $0xd2] sm:$0x40] %vm4_vm1, %v6668_v6  }
 0x42a   :  { %v6449_v39 = vpop.permute.xlu2 %6448   ;;  %133 = vst.msk [vmem:[#allocation0 + $0xf1] sm:$0x80] %vm4_vm1, %v6668_v6   ;;  %v6732_v6 = vld [vmem:[%s12463_s0 + $0x230] sm:$0xff]  }
 0x42b   :  { %6452 = vst.msk [vmem:[#allocation0 + $0xda3] ss:$4 sm:$0xff] %vm4_vm1, %v6449_v39   ;;  %v6701_v39 = vld [vmem:[%s12463_s0 + $0x138] sm:$0xff]  }
 0x42c   :  { %157 = vst.msk [vmem:[#allocation0 + $0x100] sm:$0x1] %vm4_vm1, %v6670_v8  }
 0x42d   :  { %159 = vst.msk [vmem:[#allocation0 + $0x11f] sm:$0x2] %vm4_vm1, %v6670_v8  }
 0x42e   :  { %v6372_v40 = vpop.permute.xlu1 %6371   ;;  %v6361_v41 = vpop.permute.xlu0 %6360   ;;  %161 = vst.msk [vmem:[#allocation0 + $0x13e] sm:$0x4] %vm4_vm1, %v6670_v8  }
 0x42f   :  { %6375 = vst.msk [vmem:[#allocation0 + $0xcc3] ss:$4 sm:$0xff] %vm4_vm1, %v6372_v40   ;;  %v6702_v40 = vld [vmem:[%s12463_s0 + $0x140] sm:$0xff]  }
 0x430   :  { %6364 = vst.msk [vmem:[#allocation0 + $0xca3] ss:$4 sm:$0xff] %vm4_vm1, %v6361_v41   ;;  %v6703_v41 = vld [vmem:[%s12463_s0 + $0x148] sm:$0xff]  }
 0x431   :  { %163 = vst.msk [vmem:[#allocation0 + $0x15d] sm:$0x8] %vm4_vm1, %v6670_v8  }
 0x432   :  { %v6482_v42 = vpop.permute.xlu2 %6481   ;;  %165 = vst.msk [vmem:[#allocation0 + $0x17c] sm:$0x10] %vm4_vm1, %v6670_v8  }
 0x433   :  { %6485 = vst.msk [vmem:[#allocation0 + $0xe03] ss:$4 sm:$0xff] %vm4_vm1, %v6482_v42   ;;  %v6704_v42 = vld [vmem:[%s12463_s0 + $0x150] sm:$0xff]  }
 0x434   :  { %167 = vst.msk [vmem:[#allocation0 + $0x19b] sm:$0x20] %vm4_vm1, %v6670_v8  }
 0x435   :  { %169 = vst.msk [vmem:[#allocation0 + $0x1ba] sm:$0x40] %vm4_vm1, %v6670_v8  }
 0x436   :  { %v6405_v43 = vpop.permute.xlu1 %6404   ;;  %v6394_v44 = vpop.permute.xlu0 %6393   ;;  %171 = vst.msk [vmem:[#allocation0 + $0x1d9] sm:$0x80] %vm4_vm1, %v6670_v8   ;;  %v6734_v8 = vld [vmem:[%s12463_s0 + $0x240] sm:$0xff]  }
 0x437   :  { %6408 = vst.msk [vmem:[#allocation0 + $0xd23] ss:$4 sm:$0xff] %vm4_vm1, %v6405_v43   ;;  %v6705_v43 = vld [vmem:[%s12463_s0 + $0x158] sm:$0xff]  }
 0x438   :  { %6397 = vst.msk [vmem:[#allocation0 + $0xd03] ss:$4 sm:$0xff] %vm4_vm1, %v6394_v44   ;;  %v6706_v44 = vld [vmem:[%s12463_s0 + $0x160] sm:$0xff]  }
 0x439   :  { %176 = vst.msk [vmem:[#allocation0 + $0x104] sm:$0x1] %vm4_vm1, %v6671_v9  }
 0x43a   :  { %v6515_v45 = vpop.permute.xlu2 %6514   ;;  %178 = vst.msk [vmem:[#allocation0 + $0x123] sm:$0x2] %vm4_vm1, %v6671_v9  }
 0x43b   :  { %6518 = vst.msk [vmem:[#allocation0 + $0xe63] ss:$4 sm:$0xff] %vm4_vm1, %v6515_v45   ;;  %v6707_v45 = vld [vmem:[%s12463_s0 + $0x168] sm:$0xff]  }
 0x43c   :  { %180 = vst.msk [vmem:[#allocation0 + $0x142] sm:$0x4] %vm4_vm1, %v6671_v9  }
 0x43d   :  { %182 = vst.msk [vmem:[#allocation0 + $0x161] sm:$0x8] %vm4_vm1, %v6671_v9  }
 0x43e   :  { %v6438_v46 = vpop.permute.xlu1 %6437   ;;  %v6427_v47 = vpop.permute.xlu0 %6426   ;;  %184 = vst.msk [vmem:[#allocation0 + $0x180] sm:$0x10] %vm4_vm1, %v6671_v9  }
 0x43f   :  { %6441 = vst.msk [vmem:[#allocation0 + $0xd83] ss:$4 sm:$0xff] %vm4_vm1, %v6438_v46   ;;  %v6708_v46 = vld [vmem:[%s12463_s0 + $0x170] sm:$0xff]  }
 0x440   :  { %6430 = vst.msk [vmem:[#allocation0 + $0xd63] ss:$4 sm:$0xff] %vm4_vm1, %v6427_v47   ;;  %v6709_v47 = vld [vmem:[%s12463_s0 + $0x178] sm:$0xff]  }
 0x441   :  { %186 = vst.msk [vmem:[#allocation0 + $0x19f] sm:$0x20] %vm4_vm1, %v6671_v9  }
 0x442   :  { %v6548_v48 = vpop.permute.xlu2 %6547   ;;  %188 = vst.msk [vmem:[#allocation0 + $0x1be] sm:$0x40] %vm4_vm1, %v6671_v9  }
 0x443   :  { %6551 = vst.msk [vmem:[#allocation0 + $0xec3] ss:$4 sm:$0xff] %vm4_vm1, %v6548_v48   ;;  %v6710_v48 = vld [vmem:[%s12463_s0 + $0x180] sm:$0xff]  }
 0x444   :  { %190 = vst.msk [vmem:[#allocation0 + $0x1dd] sm:$0x80] %vm4_vm1, %v6671_v9   ;;  %v6735_v9 = vld [vmem:[%s12463_s0 + $0x248] sm:$0xff]  }
 0x445   :  { %195 = vst.msk [vmem:[#allocation0 + $0x108] sm:$0x1] %vm4_vm1, %v6672_v10  }
 0x446   :  { %v6471_v49 = vpop.permute.xlu1 %6470   ;;  %v6460_v50 = vpop.permute.xlu0 %6459   ;;  %197 = vst.msk [vmem:[#allocation0 + $0x127] sm:$0x2] %vm4_vm1, %v6672_v10  }
 0x447   :  { %6474 = vst.msk [vmem:[#allocation0 + $0xde3] ss:$4 sm:$0xff] %vm4_vm1, %v6471_v49   ;;  %v6711_v49 = vld [vmem:[%s12463_s0 + $0x188] sm:$0xff]  }
 0x448   :  { %6463 = vst.msk [vmem:[#allocation0 + $0xdc3] ss:$4 sm:$0xff] %vm4_vm1, %v6460_v50   ;;  %v6712_v50 = vld [vmem:[%s12463_s0 + $0x190] sm:$0xff]  }
 0x449   :  { %199 = vst.msk [vmem:[#allocation0 + $0x146] sm:$0x4] %vm4_vm1, %v6672_v10  }
 0x44a   :  { %v6581_v51 = vpop.permute.xlu2 %6580   ;;  %201 = vst.msk [vmem:[#allocation0 + $0x165] sm:$0x8] %vm4_vm1, %v6672_v10  }
 0x44b   :  { %6584 = vst.msk [vmem:[#allocation0 + $0xf23] ss:$4 sm:$0xff] %vm4_vm1, %v6581_v51   ;;  %v6713_v51 = vld [vmem:[%s12463_s0 + $0x198] sm:$0xff]  }
 0x44c   :  { %203 = vst.msk [vmem:[#allocation0 + $0x184] sm:$0x10] %vm4_vm1, %v6672_v10  }
 0x44d   :  { %205 = vst.msk [vmem:[#allocation0 + $0x1a3] sm:$0x20] %vm4_vm1, %v6672_v10  }
 0x44e   :  { %v6504_v52 = vpop.permute.xlu1 %6503   ;;  %v6493_v53 = vpop.permute.xlu0 %6492   ;;  %207 = vst.msk [vmem:[#allocation0 + $0x1c2] sm:$0x40] %vm4_vm1, %v6672_v10  }
 0x44f   :  { %6507 = vst.msk [vmem:[#allocation0 + $0xe43] ss:$4 sm:$0xff] %vm4_vm1, %v6504_v52   ;;  %v6714_v52 = vld [vmem:[%s12463_s0 + $0x1a0] sm:$0xff]  }
 0x450   :  { %6496 = vst.msk [vmem:[#allocation0 + $0xe23] ss:$4 sm:$0xff] %vm4_vm1, %v6493_v53   ;;  %v6715_v53 = vld [vmem:[%s12463_s0 + $0x1a8] sm:$0xff]  }
 0x451   :  { %209 = vst.msk [vmem:[#allocation0 + $0x1e1] sm:$0x80] %vm4_vm1, %v6672_v10   ;;  %v6736_v10 = vld [vmem:[%s12463_s0 + $0x250] sm:$0xff]  }
 0x452   :  { %v6614_v55 = vpop.permute.xlu2 %6613   ;;  %214 = vst.msk [vmem:[#allocation0 + $0x10c] sm:$0x1] %vm4_vm1, %v6673_v11  }
 0x453   :  { %6617 = vst.msk [vmem:[#allocation0 + $0xf83] ss:$4 sm:$0xff] %vm4_vm1, %v6614_v55   ;;  %v6717_v55 = vld [vmem:[%s12463_s0 + $0x1b8] sm:$0xff]  }
 0x454   :  { %216 = vst.msk [vmem:[#allocation0 + $0x12b] sm:$0x2] %vm4_vm1, %v6673_v11  }
 0x455   :  { %218 = vst.msk [vmem:[#allocation0 + $0x14a] sm:$0x4] %vm4_vm1, %v6673_v11  }
 0x456   :  { %v6537_v56 = vpop.permute.xlu1 %6536   ;;  %v6526_v57 = vpop.permute.xlu0 %6525   ;;  %220 = vst.msk [vmem:[#allocation0 + $0x169] sm:$0x8] %vm4_vm1, %v6673_v11  }
 0x457   :  { %6540 = vst.msk [vmem:[#allocation0 + $0xea3] ss:$4 sm:$0xff] %vm4_vm1, %v6537_v56   ;;  %v6718_v56 = vld [vmem:[%s12463_s0 + $0x1c0] sm:$0xff]  }
 0x458   :  { %6529 = vst.msk [vmem:[#allocation0 + $0xe83] ss:$4 sm:$0xff] %vm4_vm1, %v6526_v57   ;;  %v6719_v57 = vld [vmem:[%s12463_s0 + $0x1c8] sm:$0xff]  }
 0x459   :  { %222 = vst.msk [vmem:[#allocation0 + $0x188] sm:$0x10] %vm4_vm1, %v6673_v11  }
 0x45a   :  { %v6647_v59 = vpop.permute.xlu2 %6646   ;;  %224 = vst.msk [vmem:[#allocation0 + $0x1a7] sm:$0x20] %vm4_vm1, %v6673_v11  }
 0x45b   :  { %6650 = vst.msk [vmem:[#allocation0 + $0xfe3] ss:$4 sm:$0xff] %vm4_vm1, %v6647_v59   ;;  %v6721_v59 = vld [vmem:[%s12463_s0 + $0x1d8] sm:$0xff]  }
 0x45c   :  { %226 = vst.msk [vmem:[#allocation0 + $0x1c6] sm:$0x40] %vm4_vm1, %v6673_v11  }
 0x45d   :  { %228 = vst.msk [vmem:[#allocation0 + $0x1e5] sm:$0x80] %vm4_vm1, %v6673_v11   ;;  %v6737_v11 = vld [vmem:[%s12463_s0 + $0x258] sm:$0xff]  }
 0x45e   :  { %v6570_v60 = vpop.permute.xlu1 %6569   ;;  %v6559_v61 = vpop.permute.xlu0 %6558   ;;  %233 = vst.msk [vmem:[#allocation0 + $0x110] sm:$0x1] %vm4_vm1, %v6674_v12  }
 0x45f   :  { %6573 = vst.msk [vmem:[#allocation0 + $0xf03] ss:$4 sm:$0xff] %vm4_vm1, %v6570_v60   ;;  %v6722_v60 = vld [vmem:[%s12463_s0 + $0x1e0] sm:$0xff]  }
 0x460   :  { %6562 = vst.msk [vmem:[#allocation0 + $0xee3] ss:$4 sm:$0xff] %vm4_vm1, %v6559_v61   ;;  %v6723_v61 = vld [vmem:[%s12463_s0 + $0x1e8] sm:$0xff]  }
 0x461   :  { %235 = vst.msk [vmem:[#allocation0 + $0x12f] sm:$0x2] %vm4_vm1, %v6674_v12  }
 0x462   :  { %237 = vst.msk [vmem:[#allocation0 + $0x14e] sm:$0x4] %vm4_vm1, %v6674_v12  }
 0x463   :  { %239 = vst.msk [vmem:[#allocation0 + $0x16d] sm:$0x8] %vm4_vm1, %v6674_v12  }
 0x464   :  { %241 = vst.msk [vmem:[#allocation0 + $0x18c] sm:$0x10] %vm4_vm1, %v6674_v12  }
 0x465   :  { %243 = vst.msk [vmem:[#allocation0 + $0x1ab] sm:$0x20] %vm4_vm1, %v6674_v12  }
 0x466   :  { %v6603_v62 = vpop.permute.xlu1 %6602   ;;  %v6592_v0 = vpop.permute.xlu0 %6591   ;;  %245 = vst.msk [vmem:[#allocation0 + $0x1ca] sm:$0x40] %vm4_vm1, %v6674_v12  }
 0x467   :  { %6606 = vst.msk [vmem:[#allocation0 + $0xf63] ss:$4 sm:$0xff] %vm4_vm1, %v6603_v62   ;;  %v6724_v62 = vld [vmem:[%s12463_s0 + $0x1f0] sm:$0xff]  }
 0x468   :  { %6595 = vst.msk [vmem:[#allocation0 + $0xf43] ss:$4 sm:$0xff] %vm4_vm1, %v6592_v0   ;;  %v6726_v0 = vld [vmem:[%s12463_s0 + $0x200] sm:$0xff]  }
 0x469   :  { %247 = vst.msk [vmem:[#allocation0 + $0x1e9] sm:$0x80] %vm4_vm1, %v6674_v12   ;;  %v6738_v12 = vld [vmem:[%s12463_s0 + $0x260] sm:$0xff]  }
 0x46a   :  { %252 = vst.msk [vmem:[#allocation0 + $0x114] sm:$0x1] %vm4_vm1, %v6675_v13  }
 0x46b   :  { %254 = vst.msk [vmem:[#allocation0 + $0x133] sm:$0x2] %vm4_vm1, %v6675_v13  }
 0x46c   :  { %256 = vst.msk [vmem:[#allocation0 + $0x152] sm:$0x4] %vm4_vm1, %v6675_v13  }
 0x46d   :  { %258 = vst.msk [vmem:[#allocation0 + $0x171] sm:$0x8] %vm4_vm1, %v6675_v13  }
 0x46e   :  { %v6636_v1 = vpop.permute.xlu1 %6635   ;;  %v6625_v2 = vpop.permute.xlu0 %6624   ;;  %260 = vst.msk [vmem:[#allocation0 + $0x190] sm:$0x10] %vm4_vm1, %v6675_v13  }
 0x46f   :  { %6639 = vst.msk [vmem:[#allocation0 + $0xfc3] ss:$4 sm:$0xff] %vm4_vm1, %v6636_v1   ;;  %v6727_v1 = vld [vmem:[%s12463_s0 + $0x208] sm:$0xff]  }
 0x470   :  { %6628 = vst.msk [vmem:[#allocation0 + $0xfa3] ss:$4 sm:$0xff] %vm4_vm1, %v6625_v2   ;;  %v6728_v2 = vld [vmem:[%s12463_s0 + $0x210] sm:$0xff]  }
 0x471   :  { %262 = vst.msk [vmem:[#allocation0 + $0x1af] sm:$0x20] %vm4_vm1, %v6675_v13  }
 0x472   :  { %264 = vst.msk [vmem:[#allocation0 + $0x1ce] sm:$0x40] %vm4_vm1, %v6675_v13  }
 0x473   :  { %266 = vst.msk [vmem:[#allocation0 + $0x1ed] sm:$0x80] %vm4_vm1, %v6675_v13   ;;  %v6739_v13 = vld [vmem:[%s12463_s0 + $0x268] sm:$0xff]  }
 0x474   :  { %271 = vst.msk [vmem:[#allocation0 + $0x118] sm:$0x1] %vm4_vm1, %v6676_v14  }
 0x475   :  { %273 = vst.msk [vmem:[#allocation0 + $0x137] sm:$0x2] %vm4_vm1, %v6676_v14  }
 0x476   :  { %275 = vst.msk [vmem:[#allocation0 + $0x156] sm:$0x4] %vm4_vm1, %v6676_v14  }
 0x477   :  { %277 = vst.msk [vmem:[#allocation0 + $0x175] sm:$0x8] %vm4_vm1, %v6676_v14  }
 0x478   :  { %279 = vst.msk [vmem:[#allocation0 + $0x194] sm:$0x10] %vm4_vm1, %v6676_v14  }
 0x479   :  { %281 = vst.msk [vmem:[#allocation0 + $0x1b3] sm:$0x20] %vm4_vm1, %v6676_v14  }
 0x47a   :  { %283 = vst.msk [vmem:[#allocation0 + $0x1d2] sm:$0x40] %vm4_vm1, %v6676_v14  }
 0x47b   :  { %285 = vst.msk [vmem:[#allocation0 + $0x1f1] sm:$0x80] %vm4_vm1, %v6676_v14   ;;  %v6740_v14 = vld [vmem:[%s12463_s0 + $0x270] sm:$0xff]  }
 0x47c   :  { %290 = vst.msk [vmem:[#allocation0 + $0x11c] sm:$0x1] %vm4_vm1, %v6677_v15  }
 0x47d   :  { %292 = vst.msk [vmem:[#allocation0 + $0x13b] sm:$0x2] %vm4_vm1, %v6677_v15  }
 0x47e   :  { %294 = vst.msk [vmem:[#allocation0 + $0x15a] sm:$0x4] %vm4_vm1, %v6677_v15  }
 0x47f   :  { %296 = vst.msk [vmem:[#allocation0 + $0x179] sm:$0x8] %vm4_vm1, %v6677_v15  }
 0x480   :  { %298 = vst.msk [vmem:[#allocation0 + $0x198] sm:$0x10] %vm4_vm1, %v6677_v15  }
 0x481   :  { %300 = vst.msk [vmem:[#allocation0 + $0x1b7] sm:$0x20] %vm4_vm1, %v6677_v15  }
 0x482   :  { %302 = vst.msk [vmem:[#allocation0 + $0x1d6] sm:$0x40] %vm4_vm1, %v6677_v15  }
 0x483   :  { %304 = vst.msk [vmem:[#allocation0 + $0x1f5] sm:$0x80] %vm4_vm1, %v6677_v15   ;;  %v6741_v15 = vld [vmem:[%s12463_s0 + $0x278] sm:$0xff]  }
 0x484   :  { %309 = vst.msk [vmem:[#allocation0 + $0x200] sm:$0x1] %vm4_vm1, %v6678_v16  }
 0x485   :  { %311 = vst.msk [vmem:[#allocation0 + $0x21f] sm:$0x2] %vm4_vm1, %v6678_v16  }
 0x486   :  { %313 = vst.msk [vmem:[#allocation0 + $0x23e] sm:$0x4] %vm4_vm1, %v6678_v16  }
 0x487   :  { %315 = vst.msk [vmem:[#allocation0 + $0x25d] sm:$0x8] %vm4_vm1, %v6678_v16  }
 0x488   :  { %317 = vst.msk [vmem:[#allocation0 + $0x27c] sm:$0x10] %vm4_vm1, %v6678_v16  }
 0x489   :  { %319 = vst.msk [vmem:[#allocation0 + $0x29b] sm:$0x20] %vm4_vm1, %v6678_v16  }
 0x48a   :  { %321 = vst.msk [vmem:[#allocation0 + $0x2ba] sm:$0x40] %vm4_vm1, %v6678_v16  }
 0x48b   :  { %323 = vst.msk [vmem:[#allocation0 + $0x2d9] sm:$0x80] %vm4_vm1, %v6678_v16   ;;  %v6742_v16 = vld [vmem:[%s12463_s0 + $0x280] sm:$0xff]  }
 0x48c   :  { %328 = vst.msk [vmem:[#allocation0 + $0x204] sm:$0x1] %vm4_vm1, %v6679_v17  }
 0x48d   :  { %330 = vst.msk [vmem:[#allocation0 + $0x223] sm:$0x2] %vm4_vm1, %v6679_v17  }
 0x48e   :  { %332 = vst.msk [vmem:[#allocation0 + $0x242] sm:$0x4] %vm4_vm1, %v6679_v17  }
 0x48f   :  { %334 = vst.msk [vmem:[#allocation0 + $0x261] sm:$0x8] %vm4_vm1, %v6679_v17  }
 0x490   :  { %336 = vst.msk [vmem:[#allocation0 + $0x280] sm:$0x10] %vm4_vm1, %v6679_v17  }
 0x491   :  { %338 = vst.msk [vmem:[#allocation0 + $0x29f] sm:$0x20] %vm4_vm1, %v6679_v17  }
 0x492   :  { %340 = vst.msk [vmem:[#allocation0 + $0x2be] sm:$0x40] %vm4_vm1, %v6679_v17  }
 0x493   :  { %342 = vst.msk [vmem:[#allocation0 + $0x2dd] sm:$0x80] %vm4_vm1, %v6679_v17   ;;  %v6743_v17 = vld [vmem:[%s12463_s0 + $0x288] sm:$0xff]  }
 0x494   :  { %347 = vst.msk [vmem:[#allocation0 + $0x208] sm:$0x1] %vm4_vm1, %v6680_v18  }
 0x495   :  { %349 = vst.msk [vmem:[#allocation0 + $0x227] sm:$0x2] %vm4_vm1, %v6680_v18  }
 0x496   :  { %351 = vst.msk [vmem:[#allocation0 + $0x246] sm:$0x4] %vm4_vm1, %v6680_v18  }
 0x497   :  { %353 = vst.msk [vmem:[#allocation0 + $0x265] sm:$0x8] %vm4_vm1, %v6680_v18  }
 0x498   :  { %355 = vst.msk [vmem:[#allocation0 + $0x284] sm:$0x10] %vm4_vm1, %v6680_v18  }
 0x499   :  { %357 = vst.msk [vmem:[#allocation0 + $0x2a3] sm:$0x20] %vm4_vm1, %v6680_v18  }
 0x49a   :  { %359 = vst.msk [vmem:[#allocation0 + $0x2c2] sm:$0x40] %vm4_vm1, %v6680_v18  }
 0x49b   :  { %361 = vst.msk [vmem:[#allocation0 + $0x2e1] sm:$0x80] %vm4_vm1, %v6680_v18   ;;  %v6744_v18 = vld [vmem:[%s12463_s0 + $0x290] sm:$0xff]  }
 0x49c   :  { %366 = vst.msk [vmem:[#allocation0 + $0x20c] sm:$0x1] %vm4_vm1, %v6681_v19  }
 0x49d   :  { %368 = vst.msk [vmem:[#allocation0 + $0x22b] sm:$0x2] %vm4_vm1, %v6681_v19  }
 0x49e   :  { %370 = vst.msk [vmem:[#allocation0 + $0x24a] sm:$0x4] %vm4_vm1, %v6681_v19  }
 0x49f   :  { %372 = vst.msk [vmem:[#allocation0 + $0x269] sm:$0x8] %vm4_vm1, %v6681_v19  }
 0x4a0   :  { %374 = vst.msk [vmem:[#allocation0 + $0x288] sm:$0x10] %vm4_vm1, %v6681_v19  }
 0x4a1   :  { %376 = vst.msk [vmem:[#allocation0 + $0x2a7] sm:$0x20] %vm4_vm1, %v6681_v19  }
 0x4a2   :  { %378 = vst.msk [vmem:[#allocation0 + $0x2c6] sm:$0x40] %vm4_vm1, %v6681_v19  }
 0x4a3   :  { %380 = vst.msk [vmem:[#allocation0 + $0x2e5] sm:$0x80] %vm4_vm1, %v6681_v19   ;;  %v6745_v19 = vld [vmem:[%s12463_s0 + $0x298] sm:$0xff]  }
 0x4a4   :  { %385 = vst.msk [vmem:[#allocation0 + $0x210] sm:$0x1] %vm4_vm1, %v6682_v20  }
 0x4a5   :  { %387 = vst.msk [vmem:[#allocation0 + $0x22f] sm:$0x2] %vm4_vm1, %v6682_v20  }
 0x4a6   :  { %389 = vst.msk [vmem:[#allocation0 + $0x24e] sm:$0x4] %vm4_vm1, %v6682_v20  }
 0x4a7   :  { %391 = vst.msk [vmem:[#allocation0 + $0x26d] sm:$0x8] %vm4_vm1, %v6682_v20  }
 0x4a8   :  { %393 = vst.msk [vmem:[#allocation0 + $0x28c] sm:$0x10] %vm4_vm1, %v6682_v20  }
 0x4a9   :  { %395 = vst.msk [vmem:[#allocation0 + $0x2ab] sm:$0x20] %vm4_vm1, %v6682_v20  }
 0x4aa   :  { %397 = vst.msk [vmem:[#allocation0 + $0x2ca] sm:$0x40] %vm4_vm1, %v6682_v20  }
 0x4ab   :  { %399 = vst.msk [vmem:[#allocation0 + $0x2e9] sm:$0x80] %vm4_vm1, %v6682_v20   ;;  %v6746_v20 = vld [vmem:[%s12463_s0 + $0x2a0] sm:$0xff]  }
 0x4ac   :  { %404 = vst.msk [vmem:[#allocation0 + $0x214] sm:$0x1] %vm4_vm1, %v6683_v21  }
 0x4ad   :  { %406 = vst.msk [vmem:[#allocation0 + $0x233] sm:$0x2] %vm4_vm1, %v6683_v21  }
 0x4ae   :  { %408 = vst.msk [vmem:[#allocation0 + $0x252] sm:$0x4] %vm4_vm1, %v6683_v21  }
 0x4af   :  { %410 = vst.msk [vmem:[#allocation0 + $0x271] sm:$0x8] %vm4_vm1, %v6683_v21  }
 0x4b0   :  { %412 = vst.msk [vmem:[#allocation0 + $0x290] sm:$0x10] %vm4_vm1, %v6683_v21  }
 0x4b1   :  { %414 = vst.msk [vmem:[#allocation0 + $0x2af] sm:$0x20] %vm4_vm1, %v6683_v21  }
 0x4b2   :  { %416 = vst.msk [vmem:[#allocation0 + $0x2ce] sm:$0x40] %vm4_vm1, %v6683_v21  }
 0x4b3   :  { %418 = vst.msk [vmem:[#allocation0 + $0x2ed] sm:$0x80] %vm4_vm1, %v6683_v21   ;;  %v6747_v21 = vld [vmem:[%s12463_s0 + $0x2a8] sm:$0xff]  }
 0x4b4   :  { %423 = vst.msk [vmem:[#allocation0 + $0x218] sm:$0x1] %vm4_vm1, %v6684_v22  }
 0x4b5   :  { %425 = vst.msk [vmem:[#allocation0 + $0x237] sm:$0x2] %vm4_vm1, %v6684_v22  }
 0x4b6   :  { %427 = vst.msk [vmem:[#allocation0 + $0x256] sm:$0x4] %vm4_vm1, %v6684_v22  }
 0x4b7   :  { %429 = vst.msk [vmem:[#allocation0 + $0x275] sm:$0x8] %vm4_vm1, %v6684_v22  }
 0x4b8   :  { %431 = vst.msk [vmem:[#allocation0 + $0x294] sm:$0x10] %vm4_vm1, %v6684_v22  }
 0x4b9   :  { %433 = vst.msk [vmem:[#allocation0 + $0x2b3] sm:$0x20] %vm4_vm1, %v6684_v22  }
 0x4ba   :  { %435 = vst.msk [vmem:[#allocation0 + $0x2d2] sm:$0x40] %vm4_vm1, %v6684_v22  }
 0x4bb   :  { %437 = vst.msk [vmem:[#allocation0 + $0x2f1] sm:$0x80] %vm4_vm1, %v6684_v22   ;;  %v6748_v22 = vld [vmem:[%s12463_s0 + $0x2b0] sm:$0xff]  }
 0x4bc   :  { %442 = vst.msk [vmem:[#allocation0 + $0x21c] sm:$0x1] %vm4_vm1, %v6685_v23  }
 0x4bd   :  { %444 = vst.msk [vmem:[#allocation0 + $0x23b] sm:$0x2] %vm4_vm1, %v6685_v23  }
 0x4be   :  { %446 = vst.msk [vmem:[#allocation0 + $0x25a] sm:$0x4] %vm4_vm1, %v6685_v23  }
 0x4bf   :  { %448 = vst.msk [vmem:[#allocation0 + $0x279] sm:$0x8] %vm4_vm1, %v6685_v23  }
 0x4c0   :  { %450 = vst.msk [vmem:[#allocation0 + $0x298] sm:$0x10] %vm4_vm1, %v6685_v23  }
 0x4c1   :  { %452 = vst.msk [vmem:[#allocation0 + $0x2b7] sm:$0x20] %vm4_vm1, %v6685_v23  }
 0x4c2   :  { %454 = vst.msk [vmem:[#allocation0 + $0x2d6] sm:$0x40] %vm4_vm1, %v6685_v23  }
 0x4c3   :  { %456 = vst.msk [vmem:[#allocation0 + $0x2f5] sm:$0x80] %vm4_vm1, %v6685_v23   ;;  %v6749_v23 = vld [vmem:[%s12463_s0 + $0x2b8] sm:$0xff]  }
 0x4c4   :  { %461 = vst.msk [vmem:[#allocation0 + $0x300] sm:$0x1] %vm4_vm1, %v6686_v24  }
 0x4c5   :  { %463 = vst.msk [vmem:[#allocation0 + $0x31f] sm:$0x2] %vm4_vm1, %v6686_v24  }
 0x4c6   :  { %465 = vst.msk [vmem:[#allocation0 + $0x33e] sm:$0x4] %vm4_vm1, %v6686_v24  }
 0x4c7   :  { %467 = vst.msk [vmem:[#allocation0 + $0x35d] sm:$0x8] %vm4_vm1, %v6686_v24  }
 0x4c8   :  { %469 = vst.msk [vmem:[#allocation0 + $0x37c] sm:$0x10] %vm4_vm1, %v6686_v24  }
 0x4c9   :  { %471 = vst.msk [vmem:[#allocation0 + $0x39b] sm:$0x20] %vm4_vm1, %v6686_v24  }
 0x4ca   :  { %473 = vst.msk [vmem:[#allocation0 + $0x3ba] sm:$0x40] %vm4_vm1, %v6686_v24  }
 0x4cb   :  { %475 = vst.msk [vmem:[#allocation0 + $0x3d9] sm:$0x80] %vm4_vm1, %v6686_v24   ;;  %v6750_v24 = vld [vmem:[%s12463_s0 + $0x2c0] sm:$0xff]  }
 0x4cc   :  { %480 = vst.msk [vmem:[#allocation0 + $0x304] sm:$0x1] %vm4_vm1, %v6687_v25  }
 0x4cd   :  { %482 = vst.msk [vmem:[#allocation0 + $0x323] sm:$0x2] %vm4_vm1, %v6687_v25  }
 0x4ce   :  { %484 = vst.msk [vmem:[#allocation0 + $0x342] sm:$0x4] %vm4_vm1, %v6687_v25  }
 0x4cf   :  { %486 = vst.msk [vmem:[#allocation0 + $0x361] sm:$0x8] %vm4_vm1, %v6687_v25  }
 0x4d0   :  { %488 = vst.msk [vmem:[#allocation0 + $0x380] sm:$0x10] %vm4_vm1, %v6687_v25  }
 0x4d1   :  { %490 = vst.msk [vmem:[#allocation0 + $0x39f] sm:$0x20] %vm4_vm1, %v6687_v25  }
 0x4d2   :  { %492 = vst.msk [vmem:[#allocation0 + $0x3be] sm:$0x40] %vm4_vm1, %v6687_v25  }
 0x4d3   :  { %494 = vst.msk [vmem:[#allocation0 + $0x3dd] sm:$0x80] %vm4_vm1, %v6687_v25   ;;  %v6751_v25 = vld [vmem:[%s12463_s0 + $0x2c8] sm:$0xff]  }
 0x4d4   :  { %499 = vst.msk [vmem:[#allocation0 + $0x308] sm:$0x1] %vm4_vm1, %v6688_v26  }
 0x4d5   :  { %501 = vst.msk [vmem:[#allocation0 + $0x327] sm:$0x2] %vm4_vm1, %v6688_v26  }
 0x4d6   :  { %503 = vst.msk [vmem:[#allocation0 + $0x346] sm:$0x4] %vm4_vm1, %v6688_v26  }
 0x4d7   :  { %505 = vst.msk [vmem:[#allocation0 + $0x365] sm:$0x8] %vm4_vm1, %v6688_v26  }
 0x4d8   :  { %507 = vst.msk [vmem:[#allocation0 + $0x384] sm:$0x10] %vm4_vm1, %v6688_v26  }
 0x4d9   :  { %509 = vst.msk [vmem:[#allocation0 + $0x3a3] sm:$0x20] %vm4_vm1, %v6688_v26  }
 0x4da   :  { %511 = vst.msk [vmem:[#allocation0 + $0x3c2] sm:$0x40] %vm4_vm1, %v6688_v26  }
 0x4db   :  { %513 = vst.msk [vmem:[#allocation0 + $0x3e1] sm:$0x80] %vm4_vm1, %v6688_v26   ;;  %v6752_v26 = vld [vmem:[%s12463_s0 + $0x2d0] sm:$0xff]  }
 0x4dc   :  { %518 = vst.msk [vmem:[#allocation0 + $0x30c] sm:$0x1] %vm4_vm1, %v6689_v27  }
 0x4dd   :  { %520 = vst.msk [vmem:[#allocation0 + $0x32b] sm:$0x2] %vm4_vm1, %v6689_v27  }
 0x4de   :  { %522 = vst.msk [vmem:[#allocation0 + $0x34a] sm:$0x4] %vm4_vm1, %v6689_v27  }
 0x4df   :  { %524 = vst.msk [vmem:[#allocation0 + $0x369] sm:$0x8] %vm4_vm1, %v6689_v27  }
 0x4e0   :  { %526 = vst.msk [vmem:[#allocation0 + $0x388] sm:$0x10] %vm4_vm1, %v6689_v27  }
 0x4e1   :  { %528 = vst.msk [vmem:[#allocation0 + $0x3a7] sm:$0x20] %vm4_vm1, %v6689_v27  }
 0x4e2   :  { %530 = vst.msk [vmem:[#allocation0 + $0x3c6] sm:$0x40] %vm4_vm1, %v6689_v27  }
 0x4e3   :  { %532 = vst.msk [vmem:[#allocation0 + $0x3e5] sm:$0x80] %vm4_vm1, %v6689_v27   ;;  %v6753_v27 = vld [vmem:[%s12463_s0 + $0x2d8] sm:$0xff]  }
 0x4e4   :  { %537 = vst.msk [vmem:[#allocation0 + $0x310] sm:$0x1] %vm4_vm1, %v6690_v28  }
 0x4e5   :  { %539 = vst.msk [vmem:[#allocation0 + $0x32f] sm:$0x2] %vm4_vm1, %v6690_v28  }
 0x4e6   :  { %541 = vst.msk [vmem:[#allocation0 + $0x34e] sm:$0x4] %vm4_vm1, %v6690_v28  }
 0x4e7   :  { %543 = vst.msk [vmem:[#allocation0 + $0x36d] sm:$0x8] %vm4_vm1, %v6690_v28  }
 0x4e8   :  { %545 = vst.msk [vmem:[#allocation0 + $0x38c] sm:$0x10] %vm4_vm1, %v6690_v28  }
 0x4e9   :  { %547 = vst.msk [vmem:[#allocation0 + $0x3ab] sm:$0x20] %vm4_vm1, %v6690_v28  }
 0x4ea   :  { %549 = vst.msk [vmem:[#allocation0 + $0x3ca] sm:$0x40] %vm4_vm1, %v6690_v28  }
 0x4eb   :  { %551 = vst.msk [vmem:[#allocation0 + $0x3e9] sm:$0x80] %vm4_vm1, %v6690_v28   ;;  %v6754_v28 = vld [vmem:[%s12463_s0 + $0x2e0] sm:$0xff]  }
 0x4ec   :  { %556 = vst.msk [vmem:[#allocation0 + $0x314] sm:$0x1] %vm4_vm1, %v6691_v29  }
 0x4ed   :  { %558 = vst.msk [vmem:[#allocation0 + $0x333] sm:$0x2] %vm4_vm1, %v6691_v29  }
 0x4ee   :  { %560 = vst.msk [vmem:[#allocation0 + $0x352] sm:$0x4] %vm4_vm1, %v6691_v29  }
 0x4ef   :  { %562 = vst.msk [vmem:[#allocation0 + $0x371] sm:$0x8] %vm4_vm1, %v6691_v29  }
 0x4f0   :  { %564 = vst.msk [vmem:[#allocation0 + $0x390] sm:$0x10] %vm4_vm1, %v6691_v29  }
 0x4f1   :  { %566 = vst.msk [vmem:[#allocation0 + $0x3af] sm:$0x20] %vm4_vm1, %v6691_v29  }
 0x4f2   :  { %568 = vst.msk [vmem:[#allocation0 + $0x3ce] sm:$0x40] %vm4_vm1, %v6691_v29  }
 0x4f3   :  { %570 = vst.msk [vmem:[#allocation0 + $0x3ed] sm:$0x80] %vm4_vm1, %v6691_v29   ;;  %v6755_v29 = vld [vmem:[%s12463_s0 + $0x2e8] sm:$0xff]  }
 0x4f4   :  { %575 = vst.msk [vmem:[#allocation0 + $0x318] sm:$0x1] %vm4_vm1, %v6692_v30  }
 0x4f5   :  { %577 = vst.msk [vmem:[#allocation0 + $0x337] sm:$0x2] %vm4_vm1, %v6692_v30  }
 0x4f6   :  { %579 = vst.msk [vmem:[#allocation0 + $0x356] sm:$0x4] %vm4_vm1, %v6692_v30  }
 0x4f7   :  { %581 = vst.msk [vmem:[#allocation0 + $0x375] sm:$0x8] %vm4_vm1, %v6692_v30  }
 0x4f8   :  { %583 = vst.msk [vmem:[#allocation0 + $0x394] sm:$0x10] %vm4_vm1, %v6692_v30  }
 0x4f9   :  { %585 = vst.msk [vmem:[#allocation0 + $0x3b3] sm:$0x20] %vm4_vm1, %v6692_v30  }
 0x4fa   :  { %587 = vst.msk [vmem:[#allocation0 + $0x3d2] sm:$0x40] %vm4_vm1, %v6692_v30  }
 0x4fb   :  { %589 = vst.msk [vmem:[#allocation0 + $0x3f1] sm:$0x80] %vm4_vm1, %v6692_v30   ;;  %v6756_v30 = vld [vmem:[%s12463_s0 + $0x2f0] sm:$0xff]  }
 0x4fc   :  { %594 = vst.msk [vmem:[#allocation0 + $0x31c] sm:$0x1] %vm4_vm1, %v6693_v31  }
 0x4fd   :  { %596 = vst.msk [vmem:[#allocation0 + $0x33b] sm:$0x2] %vm4_vm1, %v6693_v31  }
 0x4fe   :  { %598 = vst.msk [vmem:[#allocation0 + $0x35a] sm:$0x4] %vm4_vm1, %v6693_v31  }
 0x4ff   :  { %600 = vst.msk [vmem:[#allocation0 + $0x379] sm:$0x8] %vm4_vm1, %v6693_v31  }
 0x500   :  { %602 = vst.msk [vmem:[#allocation0 + $0x398] sm:$0x10] %vm4_vm1, %v6693_v31  }
 0x501   :  { %604 = vst.msk [vmem:[#allocation0 + $0x3b7] sm:$0x20] %vm4_vm1, %v6693_v31  }
 0x502   :  { %606 = vst.msk [vmem:[#allocation0 + $0x3d6] sm:$0x40] %vm4_vm1, %v6693_v31  }
 0x503   :  { %608 = vst.msk [vmem:[#allocation0 + $0x3f5] sm:$0x80] %vm4_vm1, %v6693_v31   ;;  %v6757_v31 = vld [vmem:[%s12463_s0 + $0x2f8] sm:$0xff]  }
 0x504   :  { %613 = vst.msk [vmem:[#allocation0 + $0x400] sm:$0x1] %vm4_vm1, %v6694_v32  }
 0x505   :  { %615 = vst.msk [vmem:[#allocation0 + $0x41f] sm:$0x2] %vm4_vm1, %v6694_v32  }
 0x506   :  { %617 = vst.msk [vmem:[#allocation0 + $0x43e] sm:$0x4] %vm4_vm1, %v6694_v32  }
 0x507   :  { %619 = vst.msk [vmem:[#allocation0 + $0x45d] sm:$0x8] %vm4_vm1, %v6694_v32  }
 0x508   :  { %621 = vst.msk [vmem:[#allocation0 + $0x47c] sm:$0x10] %vm4_vm1, %v6694_v32  }
 0x509   :  { %623 = vst.msk [vmem:[#allocation0 + $0x49b] sm:$0x20] %vm4_vm1, %v6694_v32  }
 0x50a   :  { %625 = vst.msk [vmem:[#allocation0 + $0x4ba] sm:$0x40] %vm4_vm1, %v6694_v32  }
 0x50b   :  { %627 = vst.msk [vmem:[#allocation0 + $0x4d9] sm:$0x80] %vm4_vm1, %v6694_v32   ;;  %v6758_v32 = vld [vmem:[%s12463_s0 + $0x300] sm:$0xff]  }
 0x50c   :  { %632 = vst.msk [vmem:[#allocation0 + $0x404] sm:$0x1] %vm4_vm1, %v6695_v33  }
 0x50d   :  { %634 = vst.msk [vmem:[#allocation0 + $0x423] sm:$0x2] %vm4_vm1, %v6695_v33  }
 0x50e   :  { %636 = vst.msk [vmem:[#allocation0 + $0x442] sm:$0x4] %vm4_vm1, %v6695_v33  }
 0x50f   :  { %638 = vst.msk [vmem:[#allocation0 + $0x461] sm:$0x8] %vm4_vm1, %v6695_v33  }
 0x510   :  { %640 = vst.msk [vmem:[#allocation0 + $0x480] sm:$0x10] %vm4_vm1, %v6695_v33  }
 0x511   :  { %642 = vst.msk [vmem:[#allocation0 + $0x49f] sm:$0x20] %vm4_vm1, %v6695_v33  }
 0x512   :  { %644 = vst.msk [vmem:[#allocation0 + $0x4be] sm:$0x40] %vm4_vm1, %v6695_v33  }
 0x513   :  { %646 = vst.msk [vmem:[#allocation0 + $0x4dd] sm:$0x80] %vm4_vm1, %v6695_v33   ;;  %v6759_v33 = vld [vmem:[%s12463_s0 + $0x308] sm:$0xff]  }
 0x514   :  { %651 = vst.msk [vmem:[#allocation0 + $0x408] sm:$0x1] %vm4_vm1, %v6696_v34  }
 0x515   :  { %653 = vst.msk [vmem:[#allocation0 + $0x427] sm:$0x2] %vm4_vm1, %v6696_v34  }
 0x516   :  { %655 = vst.msk [vmem:[#allocation0 + $0x446] sm:$0x4] %vm4_vm1, %v6696_v34  }
 0x517   :  { %657 = vst.msk [vmem:[#allocation0 + $0x465] sm:$0x8] %vm4_vm1, %v6696_v34  }
 0x518   :  { %659 = vst.msk [vmem:[#allocation0 + $0x484] sm:$0x10] %vm4_vm1, %v6696_v34  }
 0x519   :  { %661 = vst.msk [vmem:[#allocation0 + $0x4a3] sm:$0x20] %vm4_vm1, %v6696_v34  }
 0x51a   :  { %663 = vst.msk [vmem:[#allocation0 + $0x4c2] sm:$0x40] %vm4_vm1, %v6696_v34  }
 0x51b   :  { %665 = vst.msk [vmem:[#allocation0 + $0x4e1] sm:$0x80] %vm4_vm1, %v6696_v34   ;;  %v6760_v34 = vld [vmem:[%s12463_s0 + $0x310] sm:$0xff]  }
 0x51c   :  { %670 = vst.msk [vmem:[#allocation0 + $0x40c] sm:$0x1] %vm4_vm1, %v6697_v35  }
 0x51d   :  { %672 = vst.msk [vmem:[#allocation0 + $0x42b] sm:$0x2] %vm4_vm1, %v6697_v35  }
 0x51e   :  { %674 = vst.msk [vmem:[#allocation0 + $0x44a] sm:$0x4] %vm4_vm1, %v6697_v35  }
 0x51f   :  { %676 = vst.msk [vmem:[#allocation0 + $0x469] sm:$0x8] %vm4_vm1, %v6697_v35  }
 0x520   :  { %678 = vst.msk [vmem:[#allocation0 + $0x488] sm:$0x10] %vm4_vm1, %v6697_v35  }
 0x521   :  { %680 = vst.msk [vmem:[#allocation0 + $0x4a7] sm:$0x20] %vm4_vm1, %v6697_v35  }
 0x522   :  { %682 = vst.msk [vmem:[#allocation0 + $0x4c6] sm:$0x40] %vm4_vm1, %v6697_v35  }
 0x523   :  { %684 = vst.msk [vmem:[#allocation0 + $0x4e5] sm:$0x80] %vm4_vm1, %v6697_v35   ;;  %v6761_v35 = vld [vmem:[%s12463_s0 + $0x318] sm:$0xff]  }
 0x524   :  { %689 = vst.msk [vmem:[#allocation0 + $0x410] sm:$0x1] %vm4_vm1, %v6698_v36  }
 0x525   :  { %691 = vst.msk [vmem:[#allocation0 + $0x42f] sm:$0x2] %vm4_vm1, %v6698_v36  }
 0x526   :  { %693 = vst.msk [vmem:[#allocation0 + $0x44e] sm:$0x4] %vm4_vm1, %v6698_v36  }
 0x527   :  { %695 = vst.msk [vmem:[#allocation0 + $0x46d] sm:$0x8] %vm4_vm1, %v6698_v36  }
 0x528   :  { %697 = vst.msk [vmem:[#allocation0 + $0x48c] sm:$0x10] %vm4_vm1, %v6698_v36  }
 0x529   :  { %699 = vst.msk [vmem:[#allocation0 + $0x4ab] sm:$0x20] %vm4_vm1, %v6698_v36  }
 0x52a   :  { %701 = vst.msk [vmem:[#allocation0 + $0x4ca] sm:$0x40] %vm4_vm1, %v6698_v36  }
 0x52b   :  { %703 = vst.msk [vmem:[#allocation0 + $0x4e9] sm:$0x80] %vm4_vm1, %v6698_v36   ;;  %v6762_v36 = vld [vmem:[%s12463_s0 + $0x320] sm:$0xff]  }
 0x52c   :  { %708 = vst.msk [vmem:[#allocation0 + $0x414] sm:$0x1] %vm4_vm1, %v6699_v37  }
 0x52d   :  { %710 = vst.msk [vmem:[#allocation0 + $0x433] sm:$0x2] %vm4_vm1, %v6699_v37  }
 0x52e   :  { %712 = vst.msk [vmem:[#allocation0 + $0x452] sm:$0x4] %vm4_vm1, %v6699_v37  }
 0x52f   :  { %714 = vst.msk [vmem:[#allocation0 + $0x471] sm:$0x8] %vm4_vm1, %v6699_v37  }
 0x530   :  { %716 = vst.msk [vmem:[#allocation0 + $0x490] sm:$0x10] %vm4_vm1, %v6699_v37  }
 0x531   :  { %718 = vst.msk [vmem:[#allocation0 + $0x4af] sm:$0x20] %vm4_vm1, %v6699_v37  }
 0x532   :  { %720 = vst.msk [vmem:[#allocation0 + $0x4ce] sm:$0x40] %vm4_vm1, %v6699_v37  }
 0x533   :  { %722 = vst.msk [vmem:[#allocation0 + $0x4ed] sm:$0x80] %vm4_vm1, %v6699_v37   ;;  %v6763_v37 = vld [vmem:[%s12463_s0 + $0x328] sm:$0xff]  }
 0x534   :  { %727 = vst.msk [vmem:[#allocation0 + $0x418] sm:$0x1] %vm4_vm1, %v6700_v38  }
 0x535   :  { %729 = vst.msk [vmem:[#allocation0 + $0x437] sm:$0x2] %vm4_vm1, %v6700_v38  }
 0x536   :  { %731 = vst.msk [vmem:[#allocation0 + $0x456] sm:$0x4] %vm4_vm1, %v6700_v38  }
 0x537   :  { %733 = vst.msk [vmem:[#allocation0 + $0x475] sm:$0x8] %vm4_vm1, %v6700_v38  }
 0x538   :  { %735 = vst.msk [vmem:[#allocation0 + $0x494] sm:$0x10] %vm4_vm1, %v6700_v38  }
 0x539   :  { %737 = vst.msk [vmem:[#allocation0 + $0x4b3] sm:$0x20] %vm4_vm1, %v6700_v38  }
 0x53a   :  { %739 = vst.msk [vmem:[#allocation0 + $0x4d2] sm:$0x40] %vm4_vm1, %v6700_v38  }
 0x53b   :  { %741 = vst.msk [vmem:[#allocation0 + $0x4f1] sm:$0x80] %vm4_vm1, %v6700_v38   ;;  %v6764_v38 = vld [vmem:[%s12463_s0 + $0x330] sm:$0xff]  }
 0x53c   :  { %746 = vst.msk [vmem:[#allocation0 + $0x41c] sm:$0x1] %vm4_vm1, %v6701_v39  }
 0x53d   :  { %748 = vst.msk [vmem:[#allocation0 + $0x43b] sm:$0x2] %vm4_vm1, %v6701_v39  }
 0x53e   :  { %750 = vst.msk [vmem:[#allocation0 + $0x45a] sm:$0x4] %vm4_vm1, %v6701_v39  }
 0x53f   :  { %752 = vst.msk [vmem:[#allocation0 + $0x479] sm:$0x8] %vm4_vm1, %v6701_v39  }
 0x540   :  { %754 = vst.msk [vmem:[#allocation0 + $0x498] sm:$0x10] %vm4_vm1, %v6701_v39  }
 0x541   :  { %756 = vst.msk [vmem:[#allocation0 + $0x4b7] sm:$0x20] %vm4_vm1, %v6701_v39  }
 0x542   :  { %758 = vst.msk [vmem:[#allocation0 + $0x4d6] sm:$0x40] %vm4_vm1, %v6701_v39  }
 0x543   :  { %760 = vst.msk [vmem:[#allocation0 + $0x4f5] sm:$0x80] %vm4_vm1, %v6701_v39   ;;  %v6765_v39 = vld [vmem:[%s12463_s0 + $0x338] sm:$0xff]  }
 0x544   :  { %765 = vst.msk [vmem:[#allocation0 + $0x500] sm:$0x1] %vm4_vm1, %v6702_v40  }
 0x545   :  { %767 = vst.msk [vmem:[#allocation0 + $0x51f] sm:$0x2] %vm4_vm1, %v6702_v40  }
 0x546   :  { %769 = vst.msk [vmem:[#allocation0 + $0x53e] sm:$0x4] %vm4_vm1, %v6702_v40  }
 0x547   :  { %771 = vst.msk [vmem:[#allocation0 + $0x55d] sm:$0x8] %vm4_vm1, %v6702_v40  }
 0x548   :  { %773 = vst.msk [vmem:[#allocation0 + $0x57c] sm:$0x10] %vm4_vm1, %v6702_v40  }
 0x549   :  { %775 = vst.msk [vmem:[#allocation0 + $0x59b] sm:$0x20] %vm4_vm1, %v6702_v40  }
 0x54a   :  { %777 = vst.msk [vmem:[#allocation0 + $0x5ba] sm:$0x40] %vm4_vm1, %v6702_v40  }
 0x54b   :  { %779 = vst.msk [vmem:[#allocation0 + $0x5d9] sm:$0x80] %vm4_vm1, %v6702_v40   ;;  %v6766_v40 = vld [vmem:[%s12463_s0 + $0x340] sm:$0xff]  }
 0x54c   :  { %784 = vst.msk [vmem:[#allocation0 + $0x504] sm:$0x1] %vm4_vm1, %v6703_v41  }
 0x54d   :  { %786 = vst.msk [vmem:[#allocation0 + $0x523] sm:$0x2] %vm4_vm1, %v6703_v41  }
 0x54e   :  { %788 = vst.msk [vmem:[#allocation0 + $0x542] sm:$0x4] %vm4_vm1, %v6703_v41  }
 0x54f   :  { %790 = vst.msk [vmem:[#allocation0 + $0x561] sm:$0x8] %vm4_vm1, %v6703_v41  }
 0x550   :  { %792 = vst.msk [vmem:[#allocation0 + $0x580] sm:$0x10] %vm4_vm1, %v6703_v41  }
 0x551   :  { %794 = vst.msk [vmem:[#allocation0 + $0x59f] sm:$0x20] %vm4_vm1, %v6703_v41  }
 0x552   :  { %796 = vst.msk [vmem:[#allocation0 + $0x5be] sm:$0x40] %vm4_vm1, %v6703_v41  }
 0x553   :  { %798 = vst.msk [vmem:[#allocation0 + $0x5dd] sm:$0x80] %vm4_vm1, %v6703_v41   ;;  %v6767_v41 = vld [vmem:[%s12463_s0 + $0x348] sm:$0xff]  }
 0x554   :  { %803 = vst.msk [vmem:[#allocation0 + $0x508] sm:$0x1] %vm4_vm1, %v6704_v42  }
 0x555   :  { %805 = vst.msk [vmem:[#allocation0 + $0x527] sm:$0x2] %vm4_vm1, %v6704_v42  }
 0x556   :  { %807 = vst.msk [vmem:[#allocation0 + $0x546] sm:$0x4] %vm4_vm1, %v6704_v42  }
 0x557   :  { %809 = vst.msk [vmem:[#allocation0 + $0x565] sm:$0x8] %vm4_vm1, %v6704_v42  }
 0x558   :  { %811 = vst.msk [vmem:[#allocation0 + $0x584] sm:$0x10] %vm4_vm1, %v6704_v42  }
 0x559   :  { %813 = vst.msk [vmem:[#allocation0 + $0x5a3] sm:$0x20] %vm4_vm1, %v6704_v42  }
 0x55a   :  { %815 = vst.msk [vmem:[#allocation0 + $0x5c2] sm:$0x40] %vm4_vm1, %v6704_v42  }
 0x55b   :  { %817 = vst.msk [vmem:[#allocation0 + $0x5e1] sm:$0x80] %vm4_vm1, %v6704_v42   ;;  %v6768_v42 = vld [vmem:[%s12463_s0 + $0x350] sm:$0xff]  }
 0x55c   :  { %822 = vst.msk [vmem:[#allocation0 + $0x50c] sm:$0x1] %vm4_vm1, %v6705_v43  }
 0x55d   :  { %824 = vst.msk [vmem:[#allocation0 + $0x52b] sm:$0x2] %vm4_vm1, %v6705_v43  }
 0x55e   :  { %826 = vst.msk [vmem:[#allocation0 + $0x54a] sm:$0x4] %vm4_vm1, %v6705_v43  }
 0x55f   :  { %828 = vst.msk [vmem:[#allocation0 + $0x569] sm:$0x8] %vm4_vm1, %v6705_v43  }
 0x560   :  { %830 = vst.msk [vmem:[#allocation0 + $0x588] sm:$0x10] %vm4_vm1, %v6705_v43  }
 0x561   :  { %832 = vst.msk [vmem:[#allocation0 + $0x5a7] sm:$0x20] %vm4_vm1, %v6705_v43  }
 0x562   :  { %834 = vst.msk [vmem:[#allocation0 + $0x5c6] sm:$0x40] %vm4_vm1, %v6705_v43  }
 0x563   :  { %836 = vst.msk [vmem:[#allocation0 + $0x5e5] sm:$0x80] %vm4_vm1, %v6705_v43   ;;  %v6769_v43 = vld [vmem:[%s12463_s0 + $0x358] sm:$0xff]  }
 0x564   :  { %841 = vst.msk [vmem:[#allocation0 + $0x510] sm:$0x1] %vm4_vm1, %v6706_v44  }
 0x565   :  { %843 = vst.msk [vmem:[#allocation0 + $0x52f] sm:$0x2] %vm4_vm1, %v6706_v44  }
 0x566   :  { %845 = vst.msk [vmem:[#allocation0 + $0x54e] sm:$0x4] %vm4_vm1, %v6706_v44  }
 0x567   :  { %847 = vst.msk [vmem:[#allocation0 + $0x56d] sm:$0x8] %vm4_vm1, %v6706_v44  }
 0x568   :  { %849 = vst.msk [vmem:[#allocation0 + $0x58c] sm:$0x10] %vm4_vm1, %v6706_v44  }
 0x569   :  { %851 = vst.msk [vmem:[#allocation0 + $0x5ab] sm:$0x20] %vm4_vm1, %v6706_v44  }
 0x56a   :  { %853 = vst.msk [vmem:[#allocation0 + $0x5ca] sm:$0x40] %vm4_vm1, %v6706_v44  }
 0x56b   :  { %855 = vst.msk [vmem:[#allocation0 + $0x5e9] sm:$0x80] %vm4_vm1, %v6706_v44   ;;  %v6770_v44 = vld [vmem:[%s12463_s0 + $0x360] sm:$0xff]  }
 0x56c   :  { %860 = vst.msk [vmem:[#allocation0 + $0x514] sm:$0x1] %vm4_vm1, %v6707_v45  }
 0x56d   :  { %862 = vst.msk [vmem:[#allocation0 + $0x533] sm:$0x2] %vm4_vm1, %v6707_v45  }
 0x56e   :  { %864 = vst.msk [vmem:[#allocation0 + $0x552] sm:$0x4] %vm4_vm1, %v6707_v45  }
 0x56f   :  { %866 = vst.msk [vmem:[#allocation0 + $0x571] sm:$0x8] %vm4_vm1, %v6707_v45  }
 0x570   :  { %868 = vst.msk [vmem:[#allocation0 + $0x590] sm:$0x10] %vm4_vm1, %v6707_v45  }
 0x571   :  { %870 = vst.msk [vmem:[#allocation0 + $0x5af] sm:$0x20] %vm4_vm1, %v6707_v45  }
 0x572   :  { %872 = vst.msk [vmem:[#allocation0 + $0x5ce] sm:$0x40] %vm4_vm1, %v6707_v45  }
 0x573   :  { %874 = vst.msk [vmem:[#allocation0 + $0x5ed] sm:$0x80] %vm4_vm1, %v6707_v45   ;;  %v6771_v45 = vld [vmem:[%s12463_s0 + $0x368] sm:$0xff]  }
 0x574   :  { %879 = vst.msk [vmem:[#allocation0 + $0x518] sm:$0x1] %vm4_vm1, %v6708_v46  }
 0x575   :  { %881 = vst.msk [vmem:[#allocation0 + $0x537] sm:$0x2] %vm4_vm1, %v6708_v46  }
 0x576   :  { %883 = vst.msk [vmem:[#allocation0 + $0x556] sm:$0x4] %vm4_vm1, %v6708_v46  }
 0x577   :  { %885 = vst.msk [vmem:[#allocation0 + $0x575] sm:$0x8] %vm4_vm1, %v6708_v46  }
 0x578   :  { %887 = vst.msk [vmem:[#allocation0 + $0x594] sm:$0x10] %vm4_vm1, %v6708_v46  }
 0x579   :  { %889 = vst.msk [vmem:[#allocation0 + $0x5b3] sm:$0x20] %vm4_vm1, %v6708_v46  }
 0x57a   :  { %891 = vst.msk [vmem:[#allocation0 + $0x5d2] sm:$0x40] %vm4_vm1, %v6708_v46  }
 0x57b   :  { %893 = vst.msk [vmem:[#allocation0 + $0x5f1] sm:$0x80] %vm4_vm1, %v6708_v46   ;;  %v6772_v46 = vld [vmem:[%s12463_s0 + $0x370] sm:$0xff]  }
 0x57c   :  { %898 = vst.msk [vmem:[#allocation0 + $0x51c] sm:$0x1] %vm4_vm1, %v6709_v47  }
 0x57d   :  { %900 = vst.msk [vmem:[#allocation0 + $0x53b] sm:$0x2] %vm4_vm1, %v6709_v47  }
 0x57e   :  { %902 = vst.msk [vmem:[#allocation0 + $0x55a] sm:$0x4] %vm4_vm1, %v6709_v47  }
 0x57f   :  { %904 = vst.msk [vmem:[#allocation0 + $0x579] sm:$0x8] %vm4_vm1, %v6709_v47  }
 0x580   :  { %906 = vst.msk [vmem:[#allocation0 + $0x598] sm:$0x10] %vm4_vm1, %v6709_v47  }
 0x581   :  { %908 = vst.msk [vmem:[#allocation0 + $0x5b7] sm:$0x20] %vm4_vm1, %v6709_v47  }
 0x582   :  { %910 = vst.msk [vmem:[#allocation0 + $0x5d6] sm:$0x40] %vm4_vm1, %v6709_v47  }
 0x583   :  { %912 = vst.msk [vmem:[#allocation0 + $0x5f5] sm:$0x80] %vm4_vm1, %v6709_v47   ;;  %v6773_v47 = vld [vmem:[%s12463_s0 + $0x378] sm:$0xff]  }
 0x584   :  { %917 = vst.msk [vmem:[#allocation0 + $0x600] sm:$0x1] %vm4_vm1, %v6710_v48  }
 0x585   :  { %919 = vst.msk [vmem:[#allocation0 + $0x61f] sm:$0x2] %vm4_vm1, %v6710_v48  }
 0x586   :  { %921 = vst.msk [vmem:[#allocation0 + $0x63e] sm:$0x4] %vm4_vm1, %v6710_v48  }
 0x587   :  { %923 = vst.msk [vmem:[#allocation0 + $0x65d] sm:$0x8] %vm4_vm1, %v6710_v48  }
 0x588   :  { %925 = vst.msk [vmem:[#allocation0 + $0x67c] sm:$0x10] %vm4_vm1, %v6710_v48  }
 0x589   :  { %927 = vst.msk [vmem:[#allocation0 + $0x69b] sm:$0x20] %vm4_vm1, %v6710_v48  }
 0x58a   :  { %929 = vst.msk [vmem:[#allocation0 + $0x6ba] sm:$0x40] %vm4_vm1, %v6710_v48  }
 0x58b   :  { %931 = vst.msk [vmem:[#allocation0 + $0x6d9] sm:$0x80] %vm4_vm1, %v6710_v48   ;;  %v6774_v48 = vld [vmem:[%s12463_s0 + $0x380] sm:$0xff]  }
 0x58c   :  { %936 = vst.msk [vmem:[#allocation0 + $0x604] sm:$0x1] %vm4_vm1, %v6711_v49  }
 0x58d   :  { %938 = vst.msk [vmem:[#allocation0 + $0x623] sm:$0x2] %vm4_vm1, %v6711_v49  }
 0x58e   :  { %940 = vst.msk [vmem:[#allocation0 + $0x642] sm:$0x4] %vm4_vm1, %v6711_v49  }
 0x58f   :  { %942 = vst.msk [vmem:[#allocation0 + $0x661] sm:$0x8] %vm4_vm1, %v6711_v49  }
 0x590   :  { %944 = vst.msk [vmem:[#allocation0 + $0x680] sm:$0x10] %vm4_vm1, %v6711_v49  }
 0x591   :  { %946 = vst.msk [vmem:[#allocation0 + $0x69f] sm:$0x20] %vm4_vm1, %v6711_v49  }
 0x592   :  { %948 = vst.msk [vmem:[#allocation0 + $0x6be] sm:$0x40] %vm4_vm1, %v6711_v49  }
 0x593   :  { %950 = vst.msk [vmem:[#allocation0 + $0x6dd] sm:$0x80] %vm4_vm1, %v6711_v49   ;;  %v6775_v49 = vld [vmem:[%s12463_s0 + $0x388] sm:$0xff]  }
 0x594   :  { %955 = vst.msk [vmem:[#allocation0 + $0x608] sm:$0x1] %vm4_vm1, %v6712_v50  }
 0x595   :  { %957 = vst.msk [vmem:[#allocation0 + $0x627] sm:$0x2] %vm4_vm1, %v6712_v50  }
 0x596   :  { %959 = vst.msk [vmem:[#allocation0 + $0x646] sm:$0x4] %vm4_vm1, %v6712_v50  }
 0x597   :  { %961 = vst.msk [vmem:[#allocation0 + $0x665] sm:$0x8] %vm4_vm1, %v6712_v50  }
 0x598   :  { %963 = vst.msk [vmem:[#allocation0 + $0x684] sm:$0x10] %vm4_vm1, %v6712_v50  }
 0x599   :  { %965 = vst.msk [vmem:[#allocation0 + $0x6a3] sm:$0x20] %vm4_vm1, %v6712_v50  }
 0x59a   :  { %967 = vst.msk [vmem:[#allocation0 + $0x6c2] sm:$0x40] %vm4_vm1, %v6712_v50  }
 0x59b   :  { %969 = vst.msk [vmem:[#allocation0 + $0x6e1] sm:$0x80] %vm4_vm1, %v6712_v50   ;;  %v6776_v50 = vld [vmem:[%s12463_s0 + $0x390] sm:$0xff]  }
 0x59c   :  { %974 = vst.msk [vmem:[#allocation0 + $0x60c] sm:$0x1] %vm4_vm1, %v6713_v51  }
 0x59d   :  { %976 = vst.msk [vmem:[#allocation0 + $0x62b] sm:$0x2] %vm4_vm1, %v6713_v51  }
 0x59e   :  { %978 = vst.msk [vmem:[#allocation0 + $0x64a] sm:$0x4] %vm4_vm1, %v6713_v51  }
 0x59f   :  { %980 = vst.msk [vmem:[#allocation0 + $0x669] sm:$0x8] %vm4_vm1, %v6713_v51  }
 0x5a0   :  { %982 = vst.msk [vmem:[#allocation0 + $0x688] sm:$0x10] %vm4_vm1, %v6713_v51  }
 0x5a1   :  { %984 = vst.msk [vmem:[#allocation0 + $0x6a7] sm:$0x20] %vm4_vm1, %v6713_v51  }
 0x5a2   :  { %986 = vst.msk [vmem:[#allocation0 + $0x6c6] sm:$0x40] %vm4_vm1, %v6713_v51  }
 0x5a3   :  { %988 = vst.msk [vmem:[#allocation0 + $0x6e5] sm:$0x80] %vm4_vm1, %v6713_v51   ;;  %v6777_v51 = vld [vmem:[%s12463_s0 + $0x398] sm:$0xff]  }
 0x5a4   :  { %993 = vst.msk [vmem:[#allocation0 + $0x610] sm:$0x1] %vm4_vm1, %v6714_v52  }
 0x5a5   :  { %995 = vst.msk [vmem:[#allocation0 + $0x62f] sm:$0x2] %vm4_vm1, %v6714_v52  }
 0x5a6   :  { %997 = vst.msk [vmem:[#allocation0 + $0x64e] sm:$0x4] %vm4_vm1, %v6714_v52  }
 0x5a7   :  { %999 = vst.msk [vmem:[#allocation0 + $0x66d] sm:$0x8] %vm4_vm1, %v6714_v52  }
 0x5a8   :  { %1001 = vst.msk [vmem:[#allocation0 + $0x68c] sm:$0x10] %vm4_vm1, %v6714_v52  }
 0x5a9   :  { %1003 = vst.msk [vmem:[#allocation0 + $0x6ab] sm:$0x20] %vm4_vm1, %v6714_v52  }
 0x5aa   :  { %1005 = vst.msk [vmem:[#allocation0 + $0x6ca] sm:$0x40] %vm4_vm1, %v6714_v52  }
 0x5ab   :  { %1007 = vst.msk [vmem:[#allocation0 + $0x6e9] sm:$0x80] %vm4_vm1, %v6714_v52   ;;  %v6778_v52 = vld [vmem:[%s12463_s0 + $0x3a0] sm:$0xff]  }
 0x5ac   :  { %1012 = vst.msk [vmem:[#allocation0 + $0x614] sm:$0x1] %vm4_vm1, %v6715_v53  }
 0x5ad   :  { %1014 = vst.msk [vmem:[#allocation0 + $0x633] sm:$0x2] %vm4_vm1, %v6715_v53  }
 0x5ae   :  { %1016 = vst.msk [vmem:[#allocation0 + $0x652] sm:$0x4] %vm4_vm1, %v6715_v53  }
 0x5af   :  { %1018 = vst.msk [vmem:[#allocation0 + $0x671] sm:$0x8] %vm4_vm1, %v6715_v53  }
 0x5b0   :  { %1020 = vst.msk [vmem:[#allocation0 + $0x690] sm:$0x10] %vm4_vm1, %v6715_v53  }
 0x5b1   :  { %1022 = vst.msk [vmem:[#allocation0 + $0x6af] sm:$0x20] %vm4_vm1, %v6715_v53  }
 0x5b2   :  { %1024 = vst.msk [vmem:[#allocation0 + $0x6ce] sm:$0x40] %vm4_vm1, %v6715_v53  }
 0x5b3   :  { %1026 = vst.msk [vmem:[#allocation0 + $0x6ed] sm:$0x80] %vm4_vm1, %v6715_v53   ;;  %v6779_v53 = vld [vmem:[%s12463_s0 + $0x3a8] sm:$0xff]  }
 0x5b4   :  { %1031 = vst.msk [vmem:[#allocation0 + $0x618] sm:$0x1] %vm4_vm1, %v6716_v54  }
 0x5b5   :  { %1033 = vst.msk [vmem:[#allocation0 + $0x637] sm:$0x2] %vm4_vm1, %v6716_v54  }
 0x5b6   :  { %1035 = vst.msk [vmem:[#allocation0 + $0x656] sm:$0x4] %vm4_vm1, %v6716_v54  }
 0x5b7   :  { %1037 = vst.msk [vmem:[#allocation0 + $0x675] sm:$0x8] %vm4_vm1, %v6716_v54  }
 0x5b8   :  { %1039 = vst.msk [vmem:[#allocation0 + $0x694] sm:$0x10] %vm4_vm1, %v6716_v54  }
 0x5b9   :  { %1041 = vst.msk [vmem:[#allocation0 + $0x6b3] sm:$0x20] %vm4_vm1, %v6716_v54  }
 0x5ba   :  { %1043 = vst.msk [vmem:[#allocation0 + $0x6d2] sm:$0x40] %vm4_vm1, %v6716_v54  }
 0x5bb   :  { %1045 = vst.msk [vmem:[#allocation0 + $0x6f1] sm:$0x80] %vm4_vm1, %v6716_v54   ;;  %v6780_v54 = vld [vmem:[%s12463_s0 + $0x3b0] sm:$0xff]  }
 0x5bc   :  { %1050 = vst.msk [vmem:[#allocation0 + $0x61c] sm:$0x1] %vm4_vm1, %v6717_v55  }
 0x5bd   :  { %1052 = vst.msk [vmem:[#allocation0 + $0x63b] sm:$0x2] %vm4_vm1, %v6717_v55  }
 0x5be   :  { %1054 = vst.msk [vmem:[#allocation0 + $0x65a] sm:$0x4] %vm4_vm1, %v6717_v55  }
 0x5bf   :  { %1056 = vst.msk [vmem:[#allocation0 + $0x679] sm:$0x8] %vm4_vm1, %v6717_v55  }
 0x5c0   :  { %1058 = vst.msk [vmem:[#allocation0 + $0x698] sm:$0x10] %vm4_vm1, %v6717_v55  }
 0x5c1   :  { %1060 = vst.msk [vmem:[#allocation0 + $0x6b7] sm:$0x20] %vm4_vm1, %v6717_v55  }
 0x5c2   :  { %1062 = vst.msk [vmem:[#allocation0 + $0x6d6] sm:$0x40] %vm4_vm1, %v6717_v55  }
 0x5c3   :  { %1064 = vst.msk [vmem:[#allocation0 + $0x6f5] sm:$0x80] %vm4_vm1, %v6717_v55   ;;  %v6781_v55 = vld [vmem:[%s12463_s0 + $0x3b8] sm:$0xff]  }
 0x5c4   :  { %1069 = vst.msk [vmem:[#allocation0 + $0x700] sm:$0x1] %vm4_vm1, %v6718_v56  }
 0x5c5   :  { %1071 = vst.msk [vmem:[#allocation0 + $0x71f] sm:$0x2] %vm4_vm1, %v6718_v56  }
 0x5c6   :  { %1073 = vst.msk [vmem:[#allocation0 + $0x73e] sm:$0x4] %vm4_vm1, %v6718_v56  }
 0x5c7   :  { %1075 = vst.msk [vmem:[#allocation0 + $0x75d] sm:$0x8] %vm4_vm1, %v6718_v56  }
 0x5c8   :  { %1077 = vst.msk [vmem:[#allocation0 + $0x77c] sm:$0x10] %vm4_vm1, %v6718_v56  }
 0x5c9   :  { %1079 = vst.msk [vmem:[#allocation0 + $0x79b] sm:$0x20] %vm4_vm1, %v6718_v56  }
 0x5ca   :  { %1081 = vst.msk [vmem:[#allocation0 + $0x7ba] sm:$0x40] %vm4_vm1, %v6718_v56  }
 0x5cb   :  { %1083 = vst.msk [vmem:[#allocation0 + $0x7d9] sm:$0x80] %vm4_vm1, %v6718_v56   ;;  %v6782_v56 = vld [vmem:[%s12463_s0 + $0x3c0] sm:$0xff]  }
 0x5cc   :  { %1088 = vst.msk [vmem:[#allocation0 + $0x704] sm:$0x1] %vm4_vm1, %v6719_v57  }
 0x5cd   :  { %1090 = vst.msk [vmem:[#allocation0 + $0x723] sm:$0x2] %vm4_vm1, %v6719_v57  }
 0x5ce   :  { %1092 = vst.msk [vmem:[#allocation0 + $0x742] sm:$0x4] %vm4_vm1, %v6719_v57  }
 0x5cf   :  { %1094 = vst.msk [vmem:[#allocation0 + $0x761] sm:$0x8] %vm4_vm1, %v6719_v57  }
 0x5d0   :  { %1096 = vst.msk [vmem:[#allocation0 + $0x780] sm:$0x10] %vm4_vm1, %v6719_v57  }
 0x5d1   :  { %1098 = vst.msk [vmem:[#allocation0 + $0x79f] sm:$0x20] %vm4_vm1, %v6719_v57  }
 0x5d2   :  { %1100 = vst.msk [vmem:[#allocation0 + $0x7be] sm:$0x40] %vm4_vm1, %v6719_v57  }
 0x5d3   :  { %1102 = vst.msk [vmem:[#allocation0 + $0x7dd] sm:$0x80] %vm4_vm1, %v6719_v57   ;;  %v6783_v57 = vld [vmem:[%s12463_s0 + $0x3c8] sm:$0xff]  }
 0x5d4   :  { %1107 = vst.msk [vmem:[#allocation0 + $0x708] sm:$0x1] %vm4_vm1, %v6720_v58  }
 0x5d5   :  { %1109 = vst.msk [vmem:[#allocation0 + $0x727] sm:$0x2] %vm4_vm1, %v6720_v58  }
 0x5d6   :  { %1111 = vst.msk [vmem:[#allocation0 + $0x746] sm:$0x4] %vm4_vm1, %v6720_v58  }
 0x5d7   :  { %1113 = vst.msk [vmem:[#allocation0 + $0x765] sm:$0x8] %vm4_vm1, %v6720_v58  }
 0x5d8   :  { %1115 = vst.msk [vmem:[#allocation0 + $0x784] sm:$0x10] %vm4_vm1, %v6720_v58  }
 0x5d9   :  { %1117 = vst.msk [vmem:[#allocation0 + $0x7a3] sm:$0x20] %vm4_vm1, %v6720_v58  }
 0x5da   :  { %1119 = vst.msk [vmem:[#allocation0 + $0x7c2] sm:$0x40] %vm4_vm1, %v6720_v58  }
 0x5db   :  { %1121 = vst.msk [vmem:[#allocation0 + $0x7e1] sm:$0x80] %vm4_vm1, %v6720_v58   ;;  %v6784_v58 = vld [vmem:[%s12463_s0 + $0x3d0] sm:$0xff]  }
 0x5dc   :  { %1126 = vst.msk [vmem:[#allocation0 + $0x70c] sm:$0x1] %vm4_vm1, %v6721_v59  }
 0x5dd   :  { %1128 = vst.msk [vmem:[#allocation0 + $0x72b] sm:$0x2] %vm4_vm1, %v6721_v59  }
 0x5de   :  { %1130 = vst.msk [vmem:[#allocation0 + $0x74a] sm:$0x4] %vm4_vm1, %v6721_v59  }
 0x5df   :  { %1132 = vst.msk [vmem:[#allocation0 + $0x769] sm:$0x8] %vm4_vm1, %v6721_v59  }
 0x5e0   :  { %1134 = vst.msk [vmem:[#allocation0 + $0x788] sm:$0x10] %vm4_vm1, %v6721_v59  }
 0x5e1   :  { %1136 = vst.msk [vmem:[#allocation0 + $0x7a7] sm:$0x20] %vm4_vm1, %v6721_v59  }
 0x5e2   :  { %1138 = vst.msk [vmem:[#allocation0 + $0x7c6] sm:$0x40] %vm4_vm1, %v6721_v59  }
 0x5e3   :  { %1140 = vst.msk [vmem:[#allocation0 + $0x7e5] sm:$0x80] %vm4_vm1, %v6721_v59   ;;  %v6785_v59 = vld [vmem:[%s12463_s0 + $0x3d8] sm:$0xff]  }
 0x5e4   :  { %1145 = vst.msk [vmem:[#allocation0 + $0x710] sm:$0x1] %vm4_vm1, %v6722_v60  }
 0x5e5   :  { %1147 = vst.msk [vmem:[#allocation0 + $0x72f] sm:$0x2] %vm4_vm1, %v6722_v60  }
 0x5e6   :  { %1149 = vst.msk [vmem:[#allocation0 + $0x74e] sm:$0x4] %vm4_vm1, %v6722_v60  }
 0x5e7   :  { %1151 = vst.msk [vmem:[#allocation0 + $0x76d] sm:$0x8] %vm4_vm1, %v6722_v60  }
 0x5e8   :  { %1153 = vst.msk [vmem:[#allocation0 + $0x78c] sm:$0x10] %vm4_vm1, %v6722_v60  }
 0x5e9   :  { %1155 = vst.msk [vmem:[#allocation0 + $0x7ab] sm:$0x20] %vm4_vm1, %v6722_v60  }
 0x5ea   :  { %1157 = vst.msk [vmem:[#allocation0 + $0x7ca] sm:$0x40] %vm4_vm1, %v6722_v60  }
 0x5eb   :  { %1159 = vst.msk [vmem:[#allocation0 + $0x7e9] sm:$0x80] %vm4_vm1, %v6722_v60   ;;  %v6786_v60 = vld [vmem:[%s12463_s0 + $0x3e0] sm:$0xff]  }
 0x5ec   :  { %1164 = vst.msk [vmem:[#allocation0 + $0x714] sm:$0x1] %vm4_vm1, %v6723_v61  }
 0x5ed   :  { %1166 = vst.msk [vmem:[#allocation0 + $0x733] sm:$0x2] %vm4_vm1, %v6723_v61  }
 0x5ee   :  { %1168 = vst.msk [vmem:[#allocation0 + $0x752] sm:$0x4] %vm4_vm1, %v6723_v61  }
 0x5ef   :  { %1170 = vst.msk [vmem:[#allocation0 + $0x771] sm:$0x8] %vm4_vm1, %v6723_v61  }
 0x5f0   :  { %1172 = vst.msk [vmem:[#allocation0 + $0x790] sm:$0x10] %vm4_vm1, %v6723_v61  }
 0x5f1   :  { %1174 = vst.msk [vmem:[#allocation0 + $0x7af] sm:$0x20] %vm4_vm1, %v6723_v61  }
 0x5f2   :  { %1176 = vst.msk [vmem:[#allocation0 + $0x7ce] sm:$0x40] %vm4_vm1, %v6723_v61  }
 0x5f3   :  { %1178 = vst.msk [vmem:[#allocation0 + $0x7ed] sm:$0x80] %vm4_vm1, %v6723_v61   ;;  %v6787_v61 = vld [vmem:[%s12463_s0 + $0x3e8] sm:$0xff]  }
 0x5f4   :  { %1183 = vst.msk [vmem:[#allocation0 + $0x718] sm:$0x1] %vm4_vm1, %v6724_v62  }
 0x5f5   :  { %1185 = vst.msk [vmem:[#allocation0 + $0x737] sm:$0x2] %vm4_vm1, %v6724_v62  }
 0x5f6   :  { %1187 = vst.msk [vmem:[#allocation0 + $0x756] sm:$0x4] %vm4_vm1, %v6724_v62  }
 0x5f7   :  { %1189 = vst.msk [vmem:[#allocation0 + $0x775] sm:$0x8] %vm4_vm1, %v6724_v62  }
 0x5f8   :  { %1191 = vst.msk [vmem:[#allocation0 + $0x794] sm:$0x10] %vm4_vm1, %v6724_v62  }
 0x5f9   :  { %1193 = vst.msk [vmem:[#allocation0 + $0x7b3] sm:$0x20] %vm4_vm1, %v6724_v62  }
 0x5fa   :  { %1195 = vst.msk [vmem:[#allocation0 + $0x7d2] sm:$0x40] %vm4_vm1, %v6724_v62  }
 0x5fb   :  { %1197 = vst.msk [vmem:[#allocation0 + $0x7f1] sm:$0x80] %vm4_vm1, %v6724_v62   ;;  %v6788_v62 = vld [vmem:[%s12463_s0 + $0x3f0] sm:$0xff]  }
 0x5fc   :  { %1202 = vst.msk [vmem:[#allocation0 + $0x71c] sm:$0x1] %vm4_vm1, %v6725_v63  }
 0x5fd   :  { %1204 = vst.msk [vmem:[#allocation0 + $0x73b] sm:$0x2] %vm4_vm1, %v6725_v63  }
 0x5fe   :  { %1206 = vst.msk [vmem:[#allocation0 + $0x75a] sm:$0x4] %vm4_vm1, %v6725_v63  }
 0x5ff   :  { %1208 = vst.msk [vmem:[#allocation0 + $0x779] sm:$0x8] %vm4_vm1, %v6725_v63  }
 0x600   :  { %1210 = vst.msk [vmem:[#allocation0 + $0x798] sm:$0x10] %vm4_vm1, %v6725_v63  }
 0x601   :  { %1212 = vst.msk [vmem:[#allocation0 + $0x7b7] sm:$0x20] %vm4_vm1, %v6725_v63  }
 0x602   :  { %1214 = vst.msk [vmem:[#allocation0 + $0x7d6] sm:$0x40] %vm4_vm1, %v6725_v63  }
 0x603   :  { %1216 = vst.msk [vmem:[#allocation0 + $0x7f5] sm:$0x80] %vm4_vm1, %v6725_v63   ;;  %v6789_v63 = vld [vmem:[%s12463_s0 + $0x3f8] sm:$0xff]   ;;  %s7585_s0 = smov [#allocation0]  }
 0x604   :  { %1221 = vst.msk [vmem:[#allocation0 + $0x800] sm:$0x1] %vm4_vm1, %v6726_v0   ;;  %s6654_s25 = sshll.u32 %s7585_s0, 4  ;;  %s6655_s25 = int_to_ptr.vmem [resolvable:$true] %s6654_s25 }
 0x605   :  { %1223 = vst.msk [vmem:[#allocation0 + $0x81f] sm:$0x2] %vm4_vm1, %v6726_v0  }
 0x606   :  { %1225 = vst.msk [vmem:[#allocation0 + $0x83e] sm:$0x4] %vm4_vm1, %v6726_v0  }
 0x607   :  { %1227 = vst.msk [vmem:[#allocation0 + $0x85d] sm:$0x8] %vm4_vm1, %v6726_v0  }
 0x608   :  { %1229 = vst.msk [vmem:[#allocation0 + $0x87c] sm:$0x10] %vm4_vm1, %v6726_v0  }
 0x609   :  { %1231 = vst.msk [vmem:[#allocation0 + $0x89b] sm:$0x20] %vm4_vm1, %v6726_v0  }
 0x60a   :  { %1233 = vst.msk [vmem:[#allocation0 + $0x8ba] sm:$0x40] %vm4_vm1, %v6726_v0  }
 0x60b   :  { %1235 = vst.msk [vmem:[#allocation0 + $0x8d9] sm:$0x80] %vm4_vm1, %v6726_v0  }
 0x60c   :  { %1240 = vst.msk [vmem:[#allocation0 + $0x804] sm:$0x1] %vm4_vm1, %v6727_v1  }
 0x60d   :  { %1242 = vst.msk [vmem:[#allocation0 + $0x823] sm:$0x2] %vm4_vm1, %v6727_v1  }
 0x60e   :  { %1244 = vst.msk [vmem:[#allocation0 + $0x842] sm:$0x4] %vm4_vm1, %v6727_v1  }
 0x60f   :  { %1246 = vst.msk [vmem:[#allocation0 + $0x861] sm:$0x8] %vm4_vm1, %v6727_v1  }
 0x610   :  { %1248 = vst.msk [vmem:[#allocation0 + $0x880] sm:$0x10] %vm4_vm1, %v6727_v1  }
 0x611   :  { %1250 = vst.msk [vmem:[#allocation0 + $0x89f] sm:$0x20] %vm4_vm1, %v6727_v1  }
 0x612   :  { %1252 = vst.msk [vmem:[#allocation0 + $0x8be] sm:$0x40] %vm4_vm1, %v6727_v1  }
 0x613   :  { %1254 = vst.msk [vmem:[#allocation0 + $0x8dd] sm:$0x80] %vm4_vm1, %v6727_v1  }
 0x614   :  { %1259 = vst.msk [vmem:[#allocation0 + $0x808] sm:$0x1] %vm4_vm1, %v6728_v2  }
 0x615   :  { %1261 = vst.msk [vmem:[#allocation0 + $0x827] sm:$0x2] %vm4_vm1, %v6728_v2  }
 0x616   :  { %1263 = vst.msk [vmem:[#allocation0 + $0x846] sm:$0x4] %vm4_vm1, %v6728_v2  }
 0x617   :  { %1265 = vst.msk [vmem:[#allocation0 + $0x865] sm:$0x8] %vm4_vm1, %v6728_v2  }
 0x618   :  { %1267 = vst.msk [vmem:[#allocation0 + $0x884] sm:$0x10] %vm4_vm1, %v6728_v2  }
 0x619   :  { %1269 = vst.msk [vmem:[#allocation0 + $0x8a3] sm:$0x20] %vm4_vm1, %v6728_v2  }
 0x61a   :  { %1271 = vst.msk [vmem:[#allocation0 + $0x8c2] sm:$0x40] %vm4_vm1, %v6728_v2  }
 0x61b   :  { %1273 = vst.msk [vmem:[#allocation0 + $0x8e1] sm:$0x80] %vm4_vm1, %v6728_v2  }
 0x61c   :  { %1278 = vst.msk [vmem:[#allocation0 + $0x80c] sm:$0x1] %vm4_vm1, %v6729_v3  }
 0x61d   :  { %1280 = vst.msk [vmem:[#allocation0 + $0x82b] sm:$0x2] %vm4_vm1, %v6729_v3  }
 0x61e   :  { %1282 = vst.msk [vmem:[#allocation0 + $0x84a] sm:$0x4] %vm4_vm1, %v6729_v3  }
 0x61f   :  { %1284 = vst.msk [vmem:[#allocation0 + $0x869] sm:$0x8] %vm4_vm1, %v6729_v3  }
 0x620   :  { %1286 = vst.msk [vmem:[#allocation0 + $0x888] sm:$0x10] %vm4_vm1, %v6729_v3  }
 0x621   :  { %1288 = vst.msk [vmem:[#allocation0 + $0x8a7] sm:$0x20] %vm4_vm1, %v6729_v3  }
 0x622   :  { %1290 = vst.msk [vmem:[#allocation0 + $0x8c6] sm:$0x40] %vm4_vm1, %v6729_v3  }
 0x623   :  { %1292 = vst.msk [vmem:[#allocation0 + $0x8e5] sm:$0x80] %vm4_vm1, %v6729_v3  }
 0x624   :  { %1297 = vst.msk [vmem:[#allocation0 + $0x810] sm:$0x1] %vm4_vm1, %v6730_v4  }
 0x625   :  { %1299 = vst.msk [vmem:[#allocation0 + $0x82f] sm:$0x2] %vm4_vm1, %v6730_v4  }
 0x626   :  { %1301 = vst.msk [vmem:[#allocation0 + $0x84e] sm:$0x4] %vm4_vm1, %v6730_v4  }
 0x627   :  { %1303 = vst.msk [vmem:[#allocation0 + $0x86d] sm:$0x8] %vm4_vm1, %v6730_v4  }
 0x628   :  { %1305 = vst.msk [vmem:[#allocation0 + $0x88c] sm:$0x10] %vm4_vm1, %v6730_v4  }
 0x629   :  { %1307 = vst.msk [vmem:[#allocation0 + $0x8ab] sm:$0x20] %vm4_vm1, %v6730_v4  }
 0x62a   :  { %1309 = vst.msk [vmem:[#allocation0 + $0x8ca] sm:$0x40] %vm4_vm1, %v6730_v4  }
 0x62b   :  { %1311 = vst.msk [vmem:[#allocation0 + $0x8e9] sm:$0x80] %vm4_vm1, %v6730_v4  }
 0x62c   :  { %1316 = vst.msk [vmem:[#allocation0 + $0x814] sm:$0x1] %vm4_vm1, %v6731_v5  }
 0x62d   :  { %1318 = vst.msk [vmem:[#allocation0 + $0x833] sm:$0x2] %vm4_vm1, %v6731_v5  }
 0x62e   :  { %1320 = vst.msk [vmem:[#allocation0 + $0x852] sm:$0x4] %vm4_vm1, %v6731_v5  }
 0x62f   :  { %1322 = vst.msk [vmem:[#allocation0 + $0x871] sm:$0x8] %vm4_vm1, %v6731_v5  }
 0x630   :  { %1324 = vst.msk [vmem:[#allocation0 + $0x890] sm:$0x10] %vm4_vm1, %v6731_v5  }
 0x631   :  { %1326 = vst.msk [vmem:[#allocation0 + $0x8af] sm:$0x20] %vm4_vm1, %v6731_v5  }
 0x632   :  { %1328 = vst.msk [vmem:[#allocation0 + $0x8ce] sm:$0x40] %vm4_vm1, %v6731_v5  }
 0x633   :  { %1330 = vst.msk [vmem:[#allocation0 + $0x8ed] sm:$0x80] %vm4_vm1, %v6731_v5  }
 0x634   :  { %1335 = vst.msk [vmem:[#allocation0 + $0x818] sm:$0x1] %vm4_vm1, %v6732_v6  }
 0x635   :  { %1337 = vst.msk [vmem:[#allocation0 + $0x837] sm:$0x2] %vm4_vm1, %v6732_v6  }
 0x636   :  { %1339 = vst.msk [vmem:[#allocation0 + $0x856] sm:$0x4] %vm4_vm1, %v6732_v6  }
 0x637   :  { %1341 = vst.msk [vmem:[#allocation0 + $0x875] sm:$0x8] %vm4_vm1, %v6732_v6  }
 0x638   :  { %1343 = vst.msk [vmem:[#allocation0 + $0x894] sm:$0x10] %vm4_vm1, %v6732_v6  }
 0x639   :  { %1345 = vst.msk [vmem:[#allocation0 + $0x8b3] sm:$0x20] %vm4_vm1, %v6732_v6  }
 0x63a   :  { %1347 = vst.msk [vmem:[#allocation0 + $0x8d2] sm:$0x40] %vm4_vm1, %v6732_v6  }
 0x63b   :  { %1349 = vst.msk [vmem:[#allocation0 + $0x8f1] sm:$0x80] %vm4_vm1, %v6732_v6  }
 0x63c   :  { %1354 = vst.msk [vmem:[#allocation0 + $0x81c] sm:$0x1] %vm4_vm1, %v6733_v7  }
 0x63d   :  { %1356 = vst.msk [vmem:[#allocation0 + $0x83b] sm:$0x2] %vm4_vm1, %v6733_v7  }
 0x63e   :  { %1358 = vst.msk [vmem:[#allocation0 + $0x85a] sm:$0x4] %vm4_vm1, %v6733_v7  }
 0x63f   :  { %1360 = vst.msk [vmem:[#allocation0 + $0x879] sm:$0x8] %vm4_vm1, %v6733_v7  }
 0x640   :  { %1362 = vst.msk [vmem:[#allocation0 + $0x898] sm:$0x10] %vm4_vm1, %v6733_v7  }
 0x641   :  { %1364 = vst.msk [vmem:[#allocation0 + $0x8b7] sm:$0x20] %vm4_vm1, %v6733_v7  }
 0x642   :  { %1366 = vst.msk [vmem:[#allocation0 + $0x8d6] sm:$0x40] %vm4_vm1, %v6733_v7  }
 0x643   :  { %1368 = vst.msk [vmem:[#allocation0 + $0x8f5] sm:$0x80] %vm4_vm1, %v6733_v7  }
 0x644   :  { %1373 = vst.msk [vmem:[#allocation0 + $0x900] sm:$0x1] %vm4_vm1, %v6734_v8  }
 0x645   :  { %1375 = vst.msk [vmem:[#allocation0 + $0x91f] sm:$0x2] %vm4_vm1, %v6734_v8  }
 0x646   :  { %1377 = vst.msk [vmem:[#allocation0 + $0x93e] sm:$0x4] %vm4_vm1, %v6734_v8  }
 0x647   :  { %1379 = vst.msk [vmem:[#allocation0 + $0x95d] sm:$0x8] %vm4_vm1, %v6734_v8  }
 0x648   :  { %1381 = vst.msk [vmem:[#allocation0 + $0x97c] sm:$0x10] %vm4_vm1, %v6734_v8  }
 0x649   :  { %1383 = vst.msk [vmem:[#allocation0 + $0x99b] sm:$0x20] %vm4_vm1, %v6734_v8  }
 0x64a   :  { %1385 = vst.msk [vmem:[#allocation0 + $0x9ba] sm:$0x40] %vm4_vm1, %v6734_v8  }
 0x64b   :  { %1387 = vst.msk [vmem:[#allocation0 + $0x9d9] sm:$0x80] %vm4_vm1, %v6734_v8  }
 0x64c   :  { %1392 = vst.msk [vmem:[#allocation0 + $0x904] sm:$0x1] %vm4_vm1, %v6735_v9  }
 0x64d   :  { %1394 = vst.msk [vmem:[#allocation0 + $0x923] sm:$0x2] %vm4_vm1, %v6735_v9  }
 0x64e   :  { %1396 = vst.msk [vmem:[#allocation0 + $0x942] sm:$0x4] %vm4_vm1, %v6735_v9  }
 0x64f   :  { %1398 = vst.msk [vmem:[#allocation0 + $0x961] sm:$0x8] %vm4_vm1, %v6735_v9  }
 0x650   :  { %1400 = vst.msk [vmem:[#allocation0 + $0x980] sm:$0x10] %vm4_vm1, %v6735_v9  }
 0x651   :  { %1402 = vst.msk [vmem:[#allocation0 + $0x99f] sm:$0x20] %vm4_vm1, %v6735_v9  }
 0x652   :  { %1404 = vst.msk [vmem:[#allocation0 + $0x9be] sm:$0x40] %vm4_vm1, %v6735_v9  }
 0x653   :  { %1406 = vst.msk [vmem:[#allocation0 + $0x9dd] sm:$0x80] %vm4_vm1, %v6735_v9  }
 0x654   :  { %1411 = vst.msk [vmem:[#allocation0 + $0x908] sm:$0x1] %vm4_vm1, %v6736_v10  }
 0x655   :  { %1413 = vst.msk [vmem:[#allocation0 + $0x927] sm:$0x2] %vm4_vm1, %v6736_v10  }
 0x656   :  { %1415 = vst.msk [vmem:[#allocation0 + $0x946] sm:$0x4] %vm4_vm1, %v6736_v10  }
 0x657   :  { %1417 = vst.msk [vmem:[#allocation0 + $0x965] sm:$0x8] %vm4_vm1, %v6736_v10  }
 0x658   :  { %1419 = vst.msk [vmem:[#allocation0 + $0x984] sm:$0x10] %vm4_vm1, %v6736_v10  }
 0x659   :  { %1421 = vst.msk [vmem:[#allocation0 + $0x9a3] sm:$0x20] %vm4_vm1, %v6736_v10  }
 0x65a   :  { %1423 = vst.msk [vmem:[#allocation0 + $0x9c2] sm:$0x40] %vm4_vm1, %v6736_v10  }
 0x65b   :  { %1425 = vst.msk [vmem:[#allocation0 + $0x9e1] sm:$0x80] %vm4_vm1, %v6736_v10  }
 0x65c   :  { %1430 = vst.msk [vmem:[#allocation0 + $0x90c] sm:$0x1] %vm4_vm1, %v6737_v11  }
 0x65d   :  { %1432 = vst.msk [vmem:[#allocation0 + $0x92b] sm:$0x2] %vm4_vm1, %v6737_v11  }
 0x65e   :  { %1434 = vst.msk [vmem:[#allocation0 + $0x94a] sm:$0x4] %vm4_vm1, %v6737_v11  }
 0x65f   :  { %1436 = vst.msk [vmem:[#allocation0 + $0x969] sm:$0x8] %vm4_vm1, %v6737_v11  }
 0x660   :  { %1438 = vst.msk [vmem:[#allocation0 + $0x988] sm:$0x10] %vm4_vm1, %v6737_v11  }
 0x661   :  { %1440 = vst.msk [vmem:[#allocation0 + $0x9a7] sm:$0x20] %vm4_vm1, %v6737_v11  }
 0x662   :  { %1442 = vst.msk [vmem:[#allocation0 + $0x9c6] sm:$0x40] %vm4_vm1, %v6737_v11  }
 0x663   :  { %1444 = vst.msk [vmem:[#allocation0 + $0x9e5] sm:$0x80] %vm4_vm1, %v6737_v11  }
 0x664   :  { %1449 = vst.msk [vmem:[#allocation0 + $0x910] sm:$0x1] %vm4_vm1, %v6738_v12  }
 0x665   :  { %1451 = vst.msk [vmem:[#allocation0 + $0x92f] sm:$0x2] %vm4_vm1, %v6738_v12  }
 0x666   :  { %1453 = vst.msk [vmem:[#allocation0 + $0x94e] sm:$0x4] %vm4_vm1, %v6738_v12  }
 0x667   :  { %1455 = vst.msk [vmem:[#allocation0 + $0x96d] sm:$0x8] %vm4_vm1, %v6738_v12  }
 0x668   :  { %1457 = vst.msk [vmem:[#allocation0 + $0x98c] sm:$0x10] %vm4_vm1, %v6738_v12  }
 0x669   :  { %1459 = vst.msk [vmem:[#allocation0 + $0x9ab] sm:$0x20] %vm4_vm1, %v6738_v12  }
 0x66a   :  { %1461 = vst.msk [vmem:[#allocation0 + $0x9ca] sm:$0x40] %vm4_vm1, %v6738_v12  }
 0x66b   :  { %1463 = vst.msk [vmem:[#allocation0 + $0x9e9] sm:$0x80] %vm4_vm1, %v6738_v12  }
 0x66c   :  { %1468 = vst.msk [vmem:[#allocation0 + $0x914] sm:$0x1] %vm4_vm1, %v6739_v13  }
 0x66d   :  { %1470 = vst.msk [vmem:[#allocation0 + $0x933] sm:$0x2] %vm4_vm1, %v6739_v13  }
 0x66e   :  { %1472 = vst.msk [vmem:[#allocation0 + $0x952] sm:$0x4] %vm4_vm1, %v6739_v13  }
 0x66f   :  { %1474 = vst.msk [vmem:[#allocation0 + $0x971] sm:$0x8] %vm4_vm1, %v6739_v13  }
 0x670   :  { %1476 = vst.msk [vmem:[#allocation0 + $0x990] sm:$0x10] %vm4_vm1, %v6739_v13  }
 0x671   :  { %1478 = vst.msk [vmem:[#allocation0 + $0x9af] sm:$0x20] %vm4_vm1, %v6739_v13  }
 0x672   :  { %1480 = vst.msk [vmem:[#allocation0 + $0x9ce] sm:$0x40] %vm4_vm1, %v6739_v13  }
 0x673   :  { %1482 = vst.msk [vmem:[#allocation0 + $0x9ed] sm:$0x80] %vm4_vm1, %v6739_v13  }
 0x674   :  { %1487 = vst.msk [vmem:[#allocation0 + $0x918] sm:$0x1] %vm4_vm1, %v6740_v14  }
 0x675   :  { %1489 = vst.msk [vmem:[#allocation0 + $0x937] sm:$0x2] %vm4_vm1, %v6740_v14  }
 0x676   :  { %1491 = vst.msk [vmem:[#allocation0 + $0x956] sm:$0x4] %vm4_vm1, %v6740_v14  }
 0x677   :  { %1493 = vst.msk [vmem:[#allocation0 + $0x975] sm:$0x8] %vm4_vm1, %v6740_v14  }
 0x678   :  { %1495 = vst.msk [vmem:[#allocation0 + $0x994] sm:$0x10] %vm4_vm1, %v6740_v14  }
 0x679   :  { %1497 = vst.msk [vmem:[#allocation0 + $0x9b3] sm:$0x20] %vm4_vm1, %v6740_v14  }
 0x67a   :  { %1499 = vst.msk [vmem:[#allocation0 + $0x9d2] sm:$0x40] %vm4_vm1, %v6740_v14  }
 0x67b   :  { %1501 = vst.msk [vmem:[#allocation0 + $0x9f1] sm:$0x80] %vm4_vm1, %v6740_v14  }
 0x67c   :  { %1506 = vst.msk [vmem:[#allocation0 + $0x91c] sm:$0x1] %vm4_vm1, %v6741_v15  }
 0x67d   :  { %1508 = vst.msk [vmem:[#allocation0 + $0x93b] sm:$0x2] %vm4_vm1, %v6741_v15  }
 0x67e   :  { %1510 = vst.msk [vmem:[#allocation0 + $0x95a] sm:$0x4] %vm4_vm1, %v6741_v15  }
 0x67f   :  { %1512 = vst.msk [vmem:[#allocation0 + $0x979] sm:$0x8] %vm4_vm1, %v6741_v15  }
 0x680   :  { %1514 = vst.msk [vmem:[#allocation0 + $0x998] sm:$0x10] %vm4_vm1, %v6741_v15  }
 0x681   :  { %1516 = vst.msk [vmem:[#allocation0 + $0x9b7] sm:$0x20] %vm4_vm1, %v6741_v15  }
 0x682   :  { %1518 = vst.msk [vmem:[#allocation0 + $0x9d6] sm:$0x40] %vm4_vm1, %v6741_v15  }
 0x683   :  { %1520 = vst.msk [vmem:[#allocation0 + $0x9f5] sm:$0x80] %vm4_vm1, %v6741_v15  }
 0x684   :  { %1525 = vst.msk [vmem:[#allocation0 + $0xa00] sm:$0x1] %vm4_vm1, %v6742_v16  }
 0x685   :  { %1527 = vst.msk [vmem:[#allocation0 + $0xa1f] sm:$0x2] %vm4_vm1, %v6742_v16  }
 0x686   :  { %1529 = vst.msk [vmem:[#allocation0 + $0xa3e] sm:$0x4] %vm4_vm1, %v6742_v16  }
 0x687   :  { %1531 = vst.msk [vmem:[#allocation0 + $0xa5d] sm:$0x8] %vm4_vm1, %v6742_v16  }
 0x688   :  { %1533 = vst.msk [vmem:[#allocation0 + $0xa7c] sm:$0x10] %vm4_vm1, %v6742_v16  }
 0x689   :  { %1535 = vst.msk [vmem:[#allocation0 + $0xa9b] sm:$0x20] %vm4_vm1, %v6742_v16  }
 0x68a   :  { %1537 = vst.msk [vmem:[#allocation0 + $0xaba] sm:$0x40] %vm4_vm1, %v6742_v16  }
 0x68b   :  { %1539 = vst.msk [vmem:[#allocation0 + $0xad9] sm:$0x80] %vm4_vm1, %v6742_v16  }
 0x68c   :  { %1544 = vst.msk [vmem:[#allocation0 + $0xa04] sm:$0x1] %vm4_vm1, %v6743_v17  }
 0x68d   :  { %1546 = vst.msk [vmem:[#allocation0 + $0xa23] sm:$0x2] %vm4_vm1, %v6743_v17  }
 0x68e   :  { %1548 = vst.msk [vmem:[#allocation0 + $0xa42] sm:$0x4] %vm4_vm1, %v6743_v17  }
 0x68f   :  { %1550 = vst.msk [vmem:[#allocation0 + $0xa61] sm:$0x8] %vm4_vm1, %v6743_v17  }
 0x690   :  { %1552 = vst.msk [vmem:[#allocation0 + $0xa80] sm:$0x10] %vm4_vm1, %v6743_v17  }
 0x691   :  { %1554 = vst.msk [vmem:[#allocation0 + $0xa9f] sm:$0x20] %vm4_vm1, %v6743_v17  }
 0x692   :  { %1556 = vst.msk [vmem:[#allocation0 + $0xabe] sm:$0x40] %vm4_vm1, %v6743_v17  }
 0x693   :  { %1558 = vst.msk [vmem:[#allocation0 + $0xadd] sm:$0x80] %vm4_vm1, %v6743_v17  }
 0x694   :  { %1563 = vst.msk [vmem:[#allocation0 + $0xa08] sm:$0x1] %vm4_vm1, %v6744_v18  }
 0x695   :  { %1565 = vst.msk [vmem:[#allocation0 + $0xa27] sm:$0x2] %vm4_vm1, %v6744_v18  }
 0x696   :  { %1567 = vst.msk [vmem:[#allocation0 + $0xa46] sm:$0x4] %vm4_vm1, %v6744_v18  }
 0x697   :  { %1569 = vst.msk [vmem:[#allocation0 + $0xa65] sm:$0x8] %vm4_vm1, %v6744_v18  }
 0x698   :  { %1571 = vst.msk [vmem:[#allocation0 + $0xa84] sm:$0x10] %vm4_vm1, %v6744_v18  }
 0x699   :  { %1573 = vst.msk [vmem:[#allocation0 + $0xaa3] sm:$0x20] %vm4_vm1, %v6744_v18  }
 0x69a   :  { %1575 = vst.msk [vmem:[#allocation0 + $0xac2] sm:$0x40] %vm4_vm1, %v6744_v18  }
 0x69b   :  { %1577 = vst.msk [vmem:[#allocation0 + $0xae1] sm:$0x80] %vm4_vm1, %v6744_v18  }
 0x69c   :  { %1582 = vst.msk [vmem:[#allocation0 + $0xa0c] sm:$0x1] %vm4_vm1, %v6745_v19  }
 0x69d   :  { %1584 = vst.msk [vmem:[#allocation0 + $0xa2b] sm:$0x2] %vm4_vm1, %v6745_v19  }
 0x69e   :  { %1586 = vst.msk [vmem:[#allocation0 + $0xa4a] sm:$0x4] %vm4_vm1, %v6745_v19  }
 0x69f   :  { %1588 = vst.msk [vmem:[#allocation0 + $0xa69] sm:$0x8] %vm4_vm1, %v6745_v19  }
 0x6a0   :  { %1590 = vst.msk [vmem:[#allocation0 + $0xa88] sm:$0x10] %vm4_vm1, %v6745_v19  }
 0x6a1   :  { %1592 = vst.msk [vmem:[#allocation0 + $0xaa7] sm:$0x20] %vm4_vm1, %v6745_v19  }
 0x6a2   :  { %1594 = vst.msk [vmem:[#allocation0 + $0xac6] sm:$0x40] %vm4_vm1, %v6745_v19  }
 0x6a3   :  { %1596 = vst.msk [vmem:[#allocation0 + $0xae5] sm:$0x80] %vm4_vm1, %v6745_v19  }
 0x6a4   :  { %1601 = vst.msk [vmem:[#allocation0 + $0xa10] sm:$0x1] %vm4_vm1, %v6746_v20  }
 0x6a5   :  { %1603 = vst.msk [vmem:[#allocation0 + $0xa2f] sm:$0x2] %vm4_vm1, %v6746_v20  }
 0x6a6   :  { %1605 = vst.msk [vmem:[#allocation0 + $0xa4e] sm:$0x4] %vm4_vm1, %v6746_v20  }
 0x6a7   :  { %1607 = vst.msk [vmem:[#allocation0 + $0xa6d] sm:$0x8] %vm4_vm1, %v6746_v20  }
 0x6a8   :  { %1609 = vst.msk [vmem:[#allocation0 + $0xa8c] sm:$0x10] %vm4_vm1, %v6746_v20  }
 0x6a9   :  { %1611 = vst.msk [vmem:[#allocation0 + $0xaab] sm:$0x20] %vm4_vm1, %v6746_v20  }
 0x6aa   :  { %1613 = vst.msk [vmem:[#allocation0 + $0xaca] sm:$0x40] %vm4_vm1, %v6746_v20  }
 0x6ab   :  { %1615 = vst.msk [vmem:[#allocation0 + $0xae9] sm:$0x80] %vm4_vm1, %v6746_v20  }
 0x6ac   :  { %1620 = vst.msk [vmem:[#allocation0 + $0xa14] sm:$0x1] %vm4_vm1, %v6747_v21  }
 0x6ad   :  { %1622 = vst.msk [vmem:[#allocation0 + $0xa33] sm:$0x2] %vm4_vm1, %v6747_v21  }
 0x6ae   :  { %1624 = vst.msk [vmem:[#allocation0 + $0xa52] sm:$0x4] %vm4_vm1, %v6747_v21  }
 0x6af   :  { %1626 = vst.msk [vmem:[#allocation0 + $0xa71] sm:$0x8] %vm4_vm1, %v6747_v21  }
 0x6b0   :  { %1628 = vst.msk [vmem:[#allocation0 + $0xa90] sm:$0x10] %vm4_vm1, %v6747_v21  }
 0x6b1   :  { %1630 = vst.msk [vmem:[#allocation0 + $0xaaf] sm:$0x20] %vm4_vm1, %v6747_v21  }
 0x6b2   :  { %1632 = vst.msk [vmem:[#allocation0 + $0xace] sm:$0x40] %vm4_vm1, %v6747_v21  }
 0x6b3   :  { %1634 = vst.msk [vmem:[#allocation0 + $0xaed] sm:$0x80] %vm4_vm1, %v6747_v21  }
 0x6b4   :  { %1639 = vst.msk [vmem:[#allocation0 + $0xa18] sm:$0x1] %vm4_vm1, %v6748_v22  }
 0x6b5   :  { %1641 = vst.msk [vmem:[#allocation0 + $0xa37] sm:$0x2] %vm4_vm1, %v6748_v22  }
 0x6b6   :  { %1643 = vst.msk [vmem:[#allocation0 + $0xa56] sm:$0x4] %vm4_vm1, %v6748_v22  }
 0x6b7   :  { %1645 = vst.msk [vmem:[#allocation0 + $0xa75] sm:$0x8] %vm4_vm1, %v6748_v22  }
 0x6b8   :  { %1647 = vst.msk [vmem:[#allocation0 + $0xa94] sm:$0x10] %vm4_vm1, %v6748_v22  }
 0x6b9   :  { %1649 = vst.msk [vmem:[#allocation0 + $0xab3] sm:$0x20] %vm4_vm1, %v6748_v22  }
 0x6ba   :  { %1651 = vst.msk [vmem:[#allocation0 + $0xad2] sm:$0x40] %vm4_vm1, %v6748_v22  }
 0x6bb   :  { %1653 = vst.msk [vmem:[#allocation0 + $0xaf1] sm:$0x80] %vm4_vm1, %v6748_v22  }
 0x6bc   :  { %1658 = vst.msk [vmem:[#allocation0 + $0xa1c] sm:$0x1] %vm4_vm1, %v6749_v23  }
 0x6bd   :  { %1660 = vst.msk [vmem:[#allocation0 + $0xa3b] sm:$0x2] %vm4_vm1, %v6749_v23  }
 0x6be   :  { %1662 = vst.msk [vmem:[#allocation0 + $0xa5a] sm:$0x4] %vm4_vm1, %v6749_v23  }
 0x6bf   :  { %1664 = vst.msk [vmem:[#allocation0 + $0xa79] sm:$0x8] %vm4_vm1, %v6749_v23  }
 0x6c0   :  { %1666 = vst.msk [vmem:[#allocation0 + $0xa98] sm:$0x10] %vm4_vm1, %v6749_v23  }
 0x6c1   :  { %1668 = vst.msk [vmem:[#allocation0 + $0xab7] sm:$0x20] %vm4_vm1, %v6749_v23  }
 0x6c2   :  { %1670 = vst.msk [vmem:[#allocation0 + $0xad6] sm:$0x40] %vm4_vm1, %v6749_v23  }
 0x6c3   :  { %1672 = vst.msk [vmem:[#allocation0 + $0xaf5] sm:$0x80] %vm4_vm1, %v6749_v23  }
 0x6c4   :  { %1677 = vst.msk [vmem:[#allocation0 + $0xb00] sm:$0x1] %vm4_vm1, %v6750_v24  }
 0x6c5   :  { %1679 = vst.msk [vmem:[#allocation0 + $0xb1f] sm:$0x2] %vm4_vm1, %v6750_v24  }
 0x6c6   :  { %1681 = vst.msk [vmem:[#allocation0 + $0xb3e] sm:$0x4] %vm4_vm1, %v6750_v24  }
 0x6c7   :  { %1683 = vst.msk [vmem:[#allocation0 + $0xb5d] sm:$0x8] %vm4_vm1, %v6750_v24  }
 0x6c8   :  { %1685 = vst.msk [vmem:[#allocation0 + $0xb7c] sm:$0x10] %vm4_vm1, %v6750_v24  }
 0x6c9   :  { %1687 = vst.msk [vmem:[#allocation0 + $0xb9b] sm:$0x20] %vm4_vm1, %v6750_v24  }
 0x6ca   :  { %1689 = vst.msk [vmem:[#allocation0 + $0xbba] sm:$0x40] %vm4_vm1, %v6750_v24  }
 0x6cb   :  { %1691 = vst.msk [vmem:[#allocation0 + $0xbd9] sm:$0x80] %vm4_vm1, %v6750_v24  }
 0x6cc   :  { %1696 = vst.msk [vmem:[#allocation0 + $0xb04] sm:$0x1] %vm4_vm1, %v6751_v25  }
 0x6cd   :  { %1698 = vst.msk [vmem:[#allocation0 + $0xb23] sm:$0x2] %vm4_vm1, %v6751_v25  }
 0x6ce   :  { %1700 = vst.msk [vmem:[#allocation0 + $0xb42] sm:$0x4] %vm4_vm1, %v6751_v25  }
 0x6cf   :  { %1702 = vst.msk [vmem:[#allocation0 + $0xb61] sm:$0x8] %vm4_vm1, %v6751_v25  }
 0x6d0   :  { %1704 = vst.msk [vmem:[#allocation0 + $0xb80] sm:$0x10] %vm4_vm1, %v6751_v25  }
 0x6d1   :  { %1706 = vst.msk [vmem:[#allocation0 + $0xb9f] sm:$0x20] %vm4_vm1, %v6751_v25  }
 0x6d2   :  { %1708 = vst.msk [vmem:[#allocation0 + $0xbbe] sm:$0x40] %vm4_vm1, %v6751_v25  }
 0x6d3   :  { %1710 = vst.msk [vmem:[#allocation0 + $0xbdd] sm:$0x80] %vm4_vm1, %v6751_v25  }
 0x6d4   :  { %1715 = vst.msk [vmem:[#allocation0 + $0xb08] sm:$0x1] %vm4_vm1, %v6752_v26  }
 0x6d5   :  { %1717 = vst.msk [vmem:[#allocation0 + $0xb27] sm:$0x2] %vm4_vm1, %v6752_v26  }
 0x6d6   :  { %1719 = vst.msk [vmem:[#allocation0 + $0xb46] sm:$0x4] %vm4_vm1, %v6752_v26  }
 0x6d7   :  { %1721 = vst.msk [vmem:[#allocation0 + $0xb65] sm:$0x8] %vm4_vm1, %v6752_v26  }
 0x6d8   :  { %1723 = vst.msk [vmem:[#allocation0 + $0xb84] sm:$0x10] %vm4_vm1, %v6752_v26  }
 0x6d9   :  { %1725 = vst.msk [vmem:[#allocation0 + $0xba3] sm:$0x20] %vm4_vm1, %v6752_v26  }
 0x6da   :  { %1727 = vst.msk [vmem:[#allocation0 + $0xbc2] sm:$0x40] %vm4_vm1, %v6752_v26  }
 0x6db   :  { %1729 = vst.msk [vmem:[#allocation0 + $0xbe1] sm:$0x80] %vm4_vm1, %v6752_v26  }
 0x6dc   :  { %1734 = vst.msk [vmem:[#allocation0 + $0xb0c] sm:$0x1] %vm4_vm1, %v6753_v27  }
 0x6dd   :  { %1736 = vst.msk [vmem:[#allocation0 + $0xb2b] sm:$0x2] %vm4_vm1, %v6753_v27  }
 0x6de   :  { %1738 = vst.msk [vmem:[#allocation0 + $0xb4a] sm:$0x4] %vm4_vm1, %v6753_v27  }
 0x6df   :  { %1740 = vst.msk [vmem:[#allocation0 + $0xb69] sm:$0x8] %vm4_vm1, %v6753_v27  }
 0x6e0   :  { %1742 = vst.msk [vmem:[#allocation0 + $0xb88] sm:$0x10] %vm4_vm1, %v6753_v27  }
 0x6e1   :  { %1744 = vst.msk [vmem:[#allocation0 + $0xba7] sm:$0x20] %vm4_vm1, %v6753_v27  }
 0x6e2   :  { %1746 = vst.msk [vmem:[#allocation0 + $0xbc6] sm:$0x40] %vm4_vm1, %v6753_v27  }
 0x6e3   :  { %1748 = vst.msk [vmem:[#allocation0 + $0xbe5] sm:$0x80] %vm4_vm1, %v6753_v27  }
 0x6e4   :  { %1753 = vst.msk [vmem:[#allocation0 + $0xb10] sm:$0x1] %vm4_vm1, %v6754_v28  }
 0x6e5   :  { %1755 = vst.msk [vmem:[#allocation0 + $0xb2f] sm:$0x2] %vm4_vm1, %v6754_v28  }
 0x6e6   :  { %1757 = vst.msk [vmem:[#allocation0 + $0xb4e] sm:$0x4] %vm4_vm1, %v6754_v28  }
 0x6e7   :  { %1759 = vst.msk [vmem:[#allocation0 + $0xb6d] sm:$0x8] %vm4_vm1, %v6754_v28  }
 0x6e8   :  { %1761 = vst.msk [vmem:[#allocation0 + $0xb8c] sm:$0x10] %vm4_vm1, %v6754_v28  }
 0x6e9   :  { %1763 = vst.msk [vmem:[#allocation0 + $0xbab] sm:$0x20] %vm4_vm1, %v6754_v28  }
 0x6ea   :  { %1765 = vst.msk [vmem:[#allocation0 + $0xbca] sm:$0x40] %vm4_vm1, %v6754_v28  }
 0x6eb   :  { %1767 = vst.msk [vmem:[#allocation0 + $0xbe9] sm:$0x80] %vm4_vm1, %v6754_v28  }
 0x6ec   :  { %1772 = vst.msk [vmem:[#allocation0 + $0xb14] sm:$0x1] %vm4_vm1, %v6755_v29  }
 0x6ed   :  { %1774 = vst.msk [vmem:[#allocation0 + $0xb33] sm:$0x2] %vm4_vm1, %v6755_v29  }
 0x6ee   :  { %1776 = vst.msk [vmem:[#allocation0 + $0xb52] sm:$0x4] %vm4_vm1, %v6755_v29  }
 0x6ef   :  { %1778 = vst.msk [vmem:[#allocation0 + $0xb71] sm:$0x8] %vm4_vm1, %v6755_v29  }
 0x6f0   :  { %1780 = vst.msk [vmem:[#allocation0 + $0xb90] sm:$0x10] %vm4_vm1, %v6755_v29  }
 0x6f1   :  { %1782 = vst.msk [vmem:[#allocation0 + $0xbaf] sm:$0x20] %vm4_vm1, %v6755_v29  }
 0x6f2   :  { %1784 = vst.msk [vmem:[#allocation0 + $0xbce] sm:$0x40] %vm4_vm1, %v6755_v29  }
 0x6f3   :  { %1786 = vst.msk [vmem:[#allocation0 + $0xbed] sm:$0x80] %vm4_vm1, %v6755_v29  }
 0x6f4   :  { %1791 = vst.msk [vmem:[#allocation0 + $0xb18] sm:$0x1] %vm4_vm1, %v6756_v30  }
 0x6f5   :  { %1793 = vst.msk [vmem:[#allocation0 + $0xb37] sm:$0x2] %vm4_vm1, %v6756_v30  }
 0x6f6   :  { %1795 = vst.msk [vmem:[#allocation0 + $0xb56] sm:$0x4] %vm4_vm1, %v6756_v30  }
 0x6f7   :  { %1797 = vst.msk [vmem:[#allocation0 + $0xb75] sm:$0x8] %vm4_vm1, %v6756_v30  }
 0x6f8   :  { %1799 = vst.msk [vmem:[#allocation0 + $0xb94] sm:$0x10] %vm4_vm1, %v6756_v30  }
 0x6f9   :  { %1801 = vst.msk [vmem:[#allocation0 + $0xbb3] sm:$0x20] %vm4_vm1, %v6756_v30  }
 0x6fa   :  { %1803 = vst.msk [vmem:[#allocation0 + $0xbd2] sm:$0x40] %vm4_vm1, %v6756_v30  }
 0x6fb   :  { %1805 = vst.msk [vmem:[#allocation0 + $0xbf1] sm:$0x80] %vm4_vm1, %v6756_v30  }
 0x6fc   :  { %1810 = vst.msk [vmem:[#allocation0 + $0xb1c] sm:$0x1] %vm4_vm1, %v6757_v31  }
 0x6fd   :  { %1812 = vst.msk [vmem:[#allocation0 + $0xb3b] sm:$0x2] %vm4_vm1, %v6757_v31  }
 0x6fe   :  { %1814 = vst.msk [vmem:[#allocation0 + $0xb5a] sm:$0x4] %vm4_vm1, %v6757_v31  }
 0x6ff   :  { %1816 = vst.msk [vmem:[#allocation0 + $0xb79] sm:$0x8] %vm4_vm1, %v6757_v31  }
 0x700   :  { %1818 = vst.msk [vmem:[#allocation0 + $0xb98] sm:$0x10] %vm4_vm1, %v6757_v31  }
 0x701   :  { %1820 = vst.msk [vmem:[#allocation0 + $0xbb7] sm:$0x20] %vm4_vm1, %v6757_v31  }
 0x702   :  { %1822 = vst.msk [vmem:[#allocation0 + $0xbd6] sm:$0x40] %vm4_vm1, %v6757_v31  }
 0x703   :  { %1824 = vst.msk [vmem:[#allocation0 + $0xbf5] sm:$0x80] %vm4_vm1, %v6757_v31  }
 0x704   :  { %1829 = vst.msk [vmem:[#allocation0 + $0xc00] sm:$0x1] %vm4_vm1, %v6758_v32  }
 0x705   :  { %1831 = vst.msk [vmem:[#allocation0 + $0xc1f] sm:$0x2] %vm4_vm1, %v6758_v32  }
 0x706   :  { %1833 = vst.msk [vmem:[#allocation0 + $0xc3e] sm:$0x4] %vm4_vm1, %v6758_v32  }
 0x707   :  { %1835 = vst.msk [vmem:[#allocation0 + $0xc5d] sm:$0x8] %vm4_vm1, %v6758_v32  }
 0x708   :  { %1837 = vst.msk [vmem:[#allocation0 + $0xc7c] sm:$0x10] %vm4_vm1, %v6758_v32  }
 0x709   :  { %1839 = vst.msk [vmem:[#allocation0 + $0xc9b] sm:$0x20] %vm4_vm1, %v6758_v32  }
 0x70a   :  { %1841 = vst.msk [vmem:[#allocation0 + $0xcba] sm:$0x40] %vm4_vm1, %v6758_v32  }
 0x70b   :  { %1843 = vst.msk [vmem:[#allocation0 + $0xcd9] sm:$0x80] %vm4_vm1, %v6758_v32  }
 0x70c   :  { %1848 = vst.msk [vmem:[#allocation0 + $0xc04] sm:$0x1] %vm4_vm1, %v6759_v33  }
 0x70d   :  { %1850 = vst.msk [vmem:[#allocation0 + $0xc23] sm:$0x2] %vm4_vm1, %v6759_v33  }
 0x70e   :  { %1852 = vst.msk [vmem:[#allocation0 + $0xc42] sm:$0x4] %vm4_vm1, %v6759_v33  }
 0x70f   :  { %1854 = vst.msk [vmem:[#allocation0 + $0xc61] sm:$0x8] %vm4_vm1, %v6759_v33  }
 0x710   :  { %1856 = vst.msk [vmem:[#allocation0 + $0xc80] sm:$0x10] %vm4_vm1, %v6759_v33  }
 0x711   :  { %1858 = vst.msk [vmem:[#allocation0 + $0xc9f] sm:$0x20] %vm4_vm1, %v6759_v33  }
 0x712   :  { %1860 = vst.msk [vmem:[#allocation0 + $0xcbe] sm:$0x40] %vm4_vm1, %v6759_v33  }
 0x713   :  { %1862 = vst.msk [vmem:[#allocation0 + $0xcdd] sm:$0x80] %vm4_vm1, %v6759_v33  }
 0x714   :  { %1867 = vst.msk [vmem:[#allocation0 + $0xc08] sm:$0x1] %vm4_vm1, %v6760_v34  }
 0x715   :  { %1869 = vst.msk [vmem:[#allocation0 + $0xc27] sm:$0x2] %vm4_vm1, %v6760_v34  }
 0x716   :  { %1871 = vst.msk [vmem:[#allocation0 + $0xc46] sm:$0x4] %vm4_vm1, %v6760_v34  }
 0x717   :  { %1873 = vst.msk [vmem:[#allocation0 + $0xc65] sm:$0x8] %vm4_vm1, %v6760_v34  }
 0x718   :  { %1875 = vst.msk [vmem:[#allocation0 + $0xc84] sm:$0x10] %vm4_vm1, %v6760_v34  }
 0x719   :  { %1877 = vst.msk [vmem:[#allocation0 + $0xca3] sm:$0x20] %vm4_vm1, %v6760_v34  }
 0x71a   :  { %1879 = vst.msk [vmem:[#allocation0 + $0xcc2] sm:$0x40] %vm4_vm1, %v6760_v34  }
 0x71b   :  { %1881 = vst.msk [vmem:[#allocation0 + $0xce1] sm:$0x80] %vm4_vm1, %v6760_v34  }
 0x71c   :  { %1886 = vst.msk [vmem:[#allocation0 + $0xc0c] sm:$0x1] %vm4_vm1, %v6761_v35  }
 0x71d   :  { %1888 = vst.msk [vmem:[#allocation0 + $0xc2b] sm:$0x2] %vm4_vm1, %v6761_v35  }
 0x71e   :  { %1890 = vst.msk [vmem:[#allocation0 + $0xc4a] sm:$0x4] %vm4_vm1, %v6761_v35  }
 0x71f   :  { %1892 = vst.msk [vmem:[#allocation0 + $0xc69] sm:$0x8] %vm4_vm1, %v6761_v35  }
 0x720   :  { %1894 = vst.msk [vmem:[#allocation0 + $0xc88] sm:$0x10] %vm4_vm1, %v6761_v35  }
 0x721   :  { %1896 = vst.msk [vmem:[#allocation0 + $0xca7] sm:$0x20] %vm4_vm1, %v6761_v35  }
 0x722   :  { %1898 = vst.msk [vmem:[#allocation0 + $0xcc6] sm:$0x40] %vm4_vm1, %v6761_v35  }
 0x723   :  { %1900 = vst.msk [vmem:[#allocation0 + $0xce5] sm:$0x80] %vm4_vm1, %v6761_v35  }
 0x724   :  { %1905 = vst.msk [vmem:[#allocation0 + $0xc10] sm:$0x1] %vm4_vm1, %v6762_v36  }
 0x725   :  { %1907 = vst.msk [vmem:[#allocation0 + $0xc2f] sm:$0x2] %vm4_vm1, %v6762_v36  }
 0x726   :  { %1909 = vst.msk [vmem:[#allocation0 + $0xc4e] sm:$0x4] %vm4_vm1, %v6762_v36  }
 0x727   :  { %1911 = vst.msk [vmem:[#allocation0 + $0xc6d] sm:$0x8] %vm4_vm1, %v6762_v36  }
 0x728   :  { %1913 = vst.msk [vmem:[#allocation0 + $0xc8c] sm:$0x10] %vm4_vm1, %v6762_v36  }
 0x729   :  { %1915 = vst.msk [vmem:[#allocation0 + $0xcab] sm:$0x20] %vm4_vm1, %v6762_v36  }
 0x72a   :  { %1917 = vst.msk [vmem:[#allocation0 + $0xcca] sm:$0x40] %vm4_vm1, %v6762_v36  }
 0x72b   :  { %1919 = vst.msk [vmem:[#allocation0 + $0xce9] sm:$0x80] %vm4_vm1, %v6762_v36  }
 0x72c   :  { %1924 = vst.msk [vmem:[#allocation0 + $0xc14] sm:$0x1] %vm4_vm1, %v6763_v37  }
 0x72d   :  { %1926 = vst.msk [vmem:[#allocation0 + $0xc33] sm:$0x2] %vm4_vm1, %v6763_v37  }
 0x72e   :  { %1928 = vst.msk [vmem:[#allocation0 + $0xc52] sm:$0x4] %vm4_vm1, %v6763_v37  }
 0x72f   :  { %1930 = vst.msk [vmem:[#allocation0 + $0xc71] sm:$0x8] %vm4_vm1, %v6763_v37  }
 0x730   :  { %1932 = vst.msk [vmem:[#allocation0 + $0xc90] sm:$0x10] %vm4_vm1, %v6763_v37  }
 0x731   :  { %1934 = vst.msk [vmem:[#allocation0 + $0xcaf] sm:$0x20] %vm4_vm1, %v6763_v37  }
 0x732   :  { %1936 = vst.msk [vmem:[#allocation0 + $0xcce] sm:$0x40] %vm4_vm1, %v6763_v37  }
 0x733   :  { %1938 = vst.msk [vmem:[#allocation0 + $0xced] sm:$0x80] %vm4_vm1, %v6763_v37  }
 0x734   :  { %1943 = vst.msk [vmem:[#allocation0 + $0xc18] sm:$0x1] %vm4_vm1, %v6764_v38  }
 0x735   :  { %1945 = vst.msk [vmem:[#allocation0 + $0xc37] sm:$0x2] %vm4_vm1, %v6764_v38  }
 0x736   :  { %1947 = vst.msk [vmem:[#allocation0 + $0xc56] sm:$0x4] %vm4_vm1, %v6764_v38  }
 0x737   :  { %1949 = vst.msk [vmem:[#allocation0 + $0xc75] sm:$0x8] %vm4_vm1, %v6764_v38  }
 0x738   :  { %1951 = vst.msk [vmem:[#allocation0 + $0xc94] sm:$0x10] %vm4_vm1, %v6764_v38  }
 0x739   :  { %1953 = vst.msk [vmem:[#allocation0 + $0xcb3] sm:$0x20] %vm4_vm1, %v6764_v38  }
 0x73a   :  { %1955 = vst.msk [vmem:[#allocation0 + $0xcd2] sm:$0x40] %vm4_vm1, %v6764_v38  }
 0x73b   :  { %1957 = vst.msk [vmem:[#allocation0 + $0xcf1] sm:$0x80] %vm4_vm1, %v6764_v38  }
 0x73c   :  { %1962 = vst.msk [vmem:[#allocation0 + $0xc1c] sm:$0x1] %vm4_vm1, %v6765_v39  }
 0x73d   :  { %1964 = vst.msk [vmem:[#allocation0 + $0xc3b] sm:$0x2] %vm4_vm1, %v6765_v39  }
 0x73e   :  { %1966 = vst.msk [vmem:[#allocation0 + $0xc5a] sm:$0x4] %vm4_vm1, %v6765_v39  }
 0x73f   :  { %1968 = vst.msk [vmem:[#allocation0 + $0xc79] sm:$0x8] %vm4_vm1, %v6765_v39  }
 0x740   :  { %1970 = vst.msk [vmem:[#allocation0 + $0xc98] sm:$0x10] %vm4_vm1, %v6765_v39  }
 0x741   :  { %1972 = vst.msk [vmem:[#allocation0 + $0xcb7] sm:$0x20] %vm4_vm1, %v6765_v39  }
 0x742   :  { %1974 = vst.msk [vmem:[#allocation0 + $0xcd6] sm:$0x40] %vm4_vm1, %v6765_v39  }
 0x743   :  { %1976 = vst.msk [vmem:[#allocation0 + $0xcf5] sm:$0x80] %vm4_vm1, %v6765_v39  }
 0x744   :  { %1981 = vst.msk [vmem:[#allocation0 + $0xd00] sm:$0x1] %vm4_vm1, %v6766_v40  }
 0x745   :  { %1983 = vst.msk [vmem:[#allocation0 + $0xd1f] sm:$0x2] %vm4_vm1, %v6766_v40  }
 0x746   :  { %1985 = vst.msk [vmem:[#allocation0 + $0xd3e] sm:$0x4] %vm4_vm1, %v6766_v40  }
 0x747   :  { %1987 = vst.msk [vmem:[#allocation0 + $0xd5d] sm:$0x8] %vm4_vm1, %v6766_v40  }
 0x748   :  { %1989 = vst.msk [vmem:[#allocation0 + $0xd7c] sm:$0x10] %vm4_vm1, %v6766_v40  }
 0x749   :  { %1991 = vst.msk [vmem:[#allocation0 + $0xd9b] sm:$0x20] %vm4_vm1, %v6766_v40  }
 0x74a   :  { %1993 = vst.msk [vmem:[#allocation0 + $0xdba] sm:$0x40] %vm4_vm1, %v6766_v40  }
 0x74b   :  { %1995 = vst.msk [vmem:[#allocation0 + $0xdd9] sm:$0x80] %vm4_vm1, %v6766_v40  }
 0x74c   :  { %2000 = vst.msk [vmem:[#allocation0 + $0xd04] sm:$0x1] %vm4_vm1, %v6767_v41  }
 0x74d   :  { %2002 = vst.msk [vmem:[#allocation0 + $0xd23] sm:$0x2] %vm4_vm1, %v6767_v41  }
 0x74e   :  { %2004 = vst.msk [vmem:[#allocation0 + $0xd42] sm:$0x4] %vm4_vm1, %v6767_v41  }
 0x74f   :  { %2006 = vst.msk [vmem:[#allocation0 + $0xd61] sm:$0x8] %vm4_vm1, %v6767_v41  }
 0x750   :  { %2008 = vst.msk [vmem:[#allocation0 + $0xd80] sm:$0x10] %vm4_vm1, %v6767_v41  }
 0x751   :  { %2010 = vst.msk [vmem:[#allocation0 + $0xd9f] sm:$0x20] %vm4_vm1, %v6767_v41  }
 0x752   :  { %2012 = vst.msk [vmem:[#allocation0 + $0xdbe] sm:$0x40] %vm4_vm1, %v6767_v41  }
 0x753   :  { %2014 = vst.msk [vmem:[#allocation0 + $0xddd] sm:$0x80] %vm4_vm1, %v6767_v41  }
 0x754   :  { %2019 = vst.msk [vmem:[#allocation0 + $0xd08] sm:$0x1] %vm4_vm1, %v6768_v42  }
 0x755   :  { %2021 = vst.msk [vmem:[#allocation0 + $0xd27] sm:$0x2] %vm4_vm1, %v6768_v42  }
 0x756   :  { %2023 = vst.msk [vmem:[#allocation0 + $0xd46] sm:$0x4] %vm4_vm1, %v6768_v42  }
 0x757   :  { %2025 = vst.msk [vmem:[#allocation0 + $0xd65] sm:$0x8] %vm4_vm1, %v6768_v42  }
 0x758   :  { %2027 = vst.msk [vmem:[#allocation0 + $0xd84] sm:$0x10] %vm4_vm1, %v6768_v42  }
 0x759   :  { %2029 = vst.msk [vmem:[#allocation0 + $0xda3] sm:$0x20] %vm4_vm1, %v6768_v42  }
 0x75a   :  { %2031 = vst.msk [vmem:[#allocation0 + $0xdc2] sm:$0x40] %vm4_vm1, %v6768_v42  }
 0x75b   :  { %2033 = vst.msk [vmem:[#allocation0 + $0xde1] sm:$0x80] %vm4_vm1, %v6768_v42  }
 0x75c   :  { %2038 = vst.msk [vmem:[#allocation0 + $0xd0c] sm:$0x1] %vm4_vm1, %v6769_v43  }
 0x75d   :  { %2040 = vst.msk [vmem:[#allocation0 + $0xd2b] sm:$0x2] %vm4_vm1, %v6769_v43  }
 0x75e   :  { %2042 = vst.msk [vmem:[#allocation0 + $0xd4a] sm:$0x4] %vm4_vm1, %v6769_v43  }
 0x75f   :  { %2044 = vst.msk [vmem:[#allocation0 + $0xd69] sm:$0x8] %vm4_vm1, %v6769_v43  }
 0x760   :  { %2046 = vst.msk [vmem:[#allocation0 + $0xd88] sm:$0x10] %vm4_vm1, %v6769_v43  }
 0x761   :  { %2048 = vst.msk [vmem:[#allocation0 + $0xda7] sm:$0x20] %vm4_vm1, %v6769_v43  }
 0x762   :  { %2050 = vst.msk [vmem:[#allocation0 + $0xdc6] sm:$0x40] %vm4_vm1, %v6769_v43  }
 0x763   :  { %2052 = vst.msk [vmem:[#allocation0 + $0xde5] sm:$0x80] %vm4_vm1, %v6769_v43  }
 0x764   :  { %2057 = vst.msk [vmem:[#allocation0 + $0xd10] sm:$0x1] %vm4_vm1, %v6770_v44  }
 0x765   :  { %2059 = vst.msk [vmem:[#allocation0 + $0xd2f] sm:$0x2] %vm4_vm1, %v6770_v44  }
 0x766   :  { %2061 = vst.msk [vmem:[#allocation0 + $0xd4e] sm:$0x4] %vm4_vm1, %v6770_v44  }
 0x767   :  { %2063 = vst.msk [vmem:[#allocation0 + $0xd6d] sm:$0x8] %vm4_vm1, %v6770_v44  }
 0x768   :  { %2065 = vst.msk [vmem:[#allocation0 + $0xd8c] sm:$0x10] %vm4_vm1, %v6770_v44  }
 0x769   :  { %2067 = vst.msk [vmem:[#allocation0 + $0xdab] sm:$0x20] %vm4_vm1, %v6770_v44  }
 0x76a   :  { %2069 = vst.msk [vmem:[#allocation0 + $0xdca] sm:$0x40] %vm4_vm1, %v6770_v44  }
 0x76b   :  { %2071 = vst.msk [vmem:[#allocation0 + $0xde9] sm:$0x80] %vm4_vm1, %v6770_v44  }
 0x76c   :  { %2076 = vst.msk [vmem:[#allocation0 + $0xd14] sm:$0x1] %vm4_vm1, %v6771_v45  }
 0x76d   :  { %2078 = vst.msk [vmem:[#allocation0 + $0xd33] sm:$0x2] %vm4_vm1, %v6771_v45  }
 0x76e   :  { %2080 = vst.msk [vmem:[#allocation0 + $0xd52] sm:$0x4] %vm4_vm1, %v6771_v45  }
 0x76f   :  { %2082 = vst.msk [vmem:[#allocation0 + $0xd71] sm:$0x8] %vm4_vm1, %v6771_v45  }
 0x770   :  { %2084 = vst.msk [vmem:[#allocation0 + $0xd90] sm:$0x10] %vm4_vm1, %v6771_v45  }
 0x771   :  { %2086 = vst.msk [vmem:[#allocation0 + $0xdaf] sm:$0x20] %vm4_vm1, %v6771_v45  }
 0x772   :  { %2088 = vst.msk [vmem:[#allocation0 + $0xdce] sm:$0x40] %vm4_vm1, %v6771_v45  }
 0x773   :  { %2090 = vst.msk [vmem:[#allocation0 + $0xded] sm:$0x80] %vm4_vm1, %v6771_v45  }
 0x774   :  { %2095 = vst.msk [vmem:[#allocation0 + $0xd18] sm:$0x1] %vm4_vm1, %v6772_v46  }
 0x775   :  { %2097 = vst.msk [vmem:[#allocation0 + $0xd37] sm:$0x2] %vm4_vm1, %v6772_v46  }
 0x776   :  { %2099 = vst.msk [vmem:[#allocation0 + $0xd56] sm:$0x4] %vm4_vm1, %v6772_v46  }
 0x777   :  { %2101 = vst.msk [vmem:[#allocation0 + $0xd75] sm:$0x8] %vm4_vm1, %v6772_v46  }
 0x778   :  { %2103 = vst.msk [vmem:[#allocation0 + $0xd94] sm:$0x10] %vm4_vm1, %v6772_v46  }
 0x779   :  { %2105 = vst.msk [vmem:[#allocation0 + $0xdb3] sm:$0x20] %vm4_vm1, %v6772_v46  }
 0x77a   :  { %2107 = vst.msk [vmem:[#allocation0 + $0xdd2] sm:$0x40] %vm4_vm1, %v6772_v46  }
 0x77b   :  { %2109 = vst.msk [vmem:[#allocation0 + $0xdf1] sm:$0x80] %vm4_vm1, %v6772_v46  }
 0x77c   :  { %2114 = vst.msk [vmem:[#allocation0 + $0xd1c] sm:$0x1] %vm4_vm1, %v6773_v47  }
 0x77d   :  { %2116 = vst.msk [vmem:[#allocation0 + $0xd3b] sm:$0x2] %vm4_vm1, %v6773_v47  }
 0x77e   :  { %2118 = vst.msk [vmem:[#allocation0 + $0xd5a] sm:$0x4] %vm4_vm1, %v6773_v47  }
 0x77f   :  { %2120 = vst.msk [vmem:[#allocation0 + $0xd79] sm:$0x8] %vm4_vm1, %v6773_v47  }
 0x780   :  { %2122 = vst.msk [vmem:[#allocation0 + $0xd98] sm:$0x10] %vm4_vm1, %v6773_v47  }
 0x781   :  { %2124 = vst.msk [vmem:[#allocation0 + $0xdb7] sm:$0x20] %vm4_vm1, %v6773_v47  }
 0x782   :  { %2126 = vst.msk [vmem:[#allocation0 + $0xdd6] sm:$0x40] %vm4_vm1, %v6773_v47  }
 0x783   :  { %2128 = vst.msk [vmem:[#allocation0 + $0xdf5] sm:$0x80] %vm4_vm1, %v6773_v47  }
 0x784   :  { %2133 = vst.msk [vmem:[#allocation0 + $0xe00] sm:$0x1] %vm4_vm1, %v6774_v48  }
 0x785   :  { %2135 = vst.msk [vmem:[#allocation0 + $0xe1f] sm:$0x2] %vm4_vm1, %v6774_v48  }
 0x786   :  { %2137 = vst.msk [vmem:[#allocation0 + $0xe3e] sm:$0x4] %vm4_vm1, %v6774_v48  }
 0x787   :  { %2139 = vst.msk [vmem:[#allocation0 + $0xe5d] sm:$0x8] %vm4_vm1, %v6774_v48  }
 0x788   :  { %2141 = vst.msk [vmem:[#allocation0 + $0xe7c] sm:$0x10] %vm4_vm1, %v6774_v48  }
 0x789   :  { %2143 = vst.msk [vmem:[#allocation0 + $0xe9b] sm:$0x20] %vm4_vm1, %v6774_v48  }
 0x78a   :  { %2145 = vst.msk [vmem:[#allocation0 + $0xeba] sm:$0x40] %vm4_vm1, %v6774_v48  }
 0x78b   :  { %2147 = vst.msk [vmem:[#allocation0 + $0xed9] sm:$0x80] %vm4_vm1, %v6774_v48  }
 0x78c   :  { %2152 = vst.msk [vmem:[#allocation0 + $0xe04] sm:$0x1] %vm4_vm1, %v6775_v49  }
 0x78d   :  { %2154 = vst.msk [vmem:[#allocation0 + $0xe23] sm:$0x2] %vm4_vm1, %v6775_v49  }
 0x78e   :  { %2156 = vst.msk [vmem:[#allocation0 + $0xe42] sm:$0x4] %vm4_vm1, %v6775_v49  }
 0x78f   :  { %2158 = vst.msk [vmem:[#allocation0 + $0xe61] sm:$0x8] %vm4_vm1, %v6775_v49  }
 0x790   :  { %2160 = vst.msk [vmem:[#allocation0 + $0xe80] sm:$0x10] %vm4_vm1, %v6775_v49  }
 0x791   :  { %2162 = vst.msk [vmem:[#allocation0 + $0xe9f] sm:$0x20] %vm4_vm1, %v6775_v49  }
 0x792   :  { %2164 = vst.msk [vmem:[#allocation0 + $0xebe] sm:$0x40] %vm4_vm1, %v6775_v49  }
 0x793   :  { %2166 = vst.msk [vmem:[#allocation0 + $0xedd] sm:$0x80] %vm4_vm1, %v6775_v49  }
 0x794   :  { %2171 = vst.msk [vmem:[#allocation0 + $0xe08] sm:$0x1] %vm4_vm1, %v6776_v50  }
 0x795   :  { %2173 = vst.msk [vmem:[#allocation0 + $0xe27] sm:$0x2] %vm4_vm1, %v6776_v50  }
 0x796   :  { %2175 = vst.msk [vmem:[#allocation0 + $0xe46] sm:$0x4] %vm4_vm1, %v6776_v50  }
 0x797   :  { %2177 = vst.msk [vmem:[#allocation0 + $0xe65] sm:$0x8] %vm4_vm1, %v6776_v50  }
 0x798   :  { %2179 = vst.msk [vmem:[#allocation0 + $0xe84] sm:$0x10] %vm4_vm1, %v6776_v50  }
 0x799   :  { %2181 = vst.msk [vmem:[#allocation0 + $0xea3] sm:$0x20] %vm4_vm1, %v6776_v50  }
 0x79a   :  { %2183 = vst.msk [vmem:[#allocation0 + $0xec2] sm:$0x40] %vm4_vm1, %v6776_v50  }
 0x79b   :  { %2185 = vst.msk [vmem:[#allocation0 + $0xee1] sm:$0x80] %vm4_vm1, %v6776_v50  }
 0x79c   :  { %2190 = vst.msk [vmem:[#allocation0 + $0xe0c] sm:$0x1] %vm4_vm1, %v6777_v51  }
 0x79d   :  { %2192 = vst.msk [vmem:[#allocation0 + $0xe2b] sm:$0x2] %vm4_vm1, %v6777_v51  }
 0x79e   :  { %2194 = vst.msk [vmem:[#allocation0 + $0xe4a] sm:$0x4] %vm4_vm1, %v6777_v51  }
 0x79f   :  { %2196 = vst.msk [vmem:[#allocation0 + $0xe69] sm:$0x8] %vm4_vm1, %v6777_v51  }
 0x7a0   :  { %2198 = vst.msk [vmem:[#allocation0 + $0xe88] sm:$0x10] %vm4_vm1, %v6777_v51  }
 0x7a1   :  { %2200 = vst.msk [vmem:[#allocation0 + $0xea7] sm:$0x20] %vm4_vm1, %v6777_v51  }
 0x7a2   :  { %2202 = vst.msk [vmem:[#allocation0 + $0xec6] sm:$0x40] %vm4_vm1, %v6777_v51  }
 0x7a3   :  { %2204 = vst.msk [vmem:[#allocation0 + $0xee5] sm:$0x80] %vm4_vm1, %v6777_v51  }
 0x7a4   :  { %2209 = vst.msk [vmem:[#allocation0 + $0xe10] sm:$0x1] %vm4_vm1, %v6778_v52  }
 0x7a5   :  { %2211 = vst.msk [vmem:[#allocation0 + $0xe2f] sm:$0x2] %vm4_vm1, %v6778_v52  }
 0x7a6   :  { %2213 = vst.msk [vmem:[#allocation0 + $0xe4e] sm:$0x4] %vm4_vm1, %v6778_v52  }
 0x7a7   :  { %2215 = vst.msk [vmem:[#allocation0 + $0xe6d] sm:$0x8] %vm4_vm1, %v6778_v52  }
 0x7a8   :  { %2217 = vst.msk [vmem:[#allocation0 + $0xe8c] sm:$0x10] %vm4_vm1, %v6778_v52  }
 0x7a9   :  { %2219 = vst.msk [vmem:[#allocation0 + $0xeab] sm:$0x20] %vm4_vm1, %v6778_v52  }
 0x7aa   :  { %2221 = vst.msk [vmem:[#allocation0 + $0xeca] sm:$0x40] %vm4_vm1, %v6778_v52  }
 0x7ab   :  { %2223 = vst.msk [vmem:[#allocation0 + $0xee9] sm:$0x80] %vm4_vm1, %v6778_v52  }
 0x7ac   :  { %2228 = vst.msk [vmem:[#allocation0 + $0xe14] sm:$0x1] %vm4_vm1, %v6779_v53  }
 0x7ad   :  { %2230 = vst.msk [vmem:[#allocation0 + $0xe33] sm:$0x2] %vm4_vm1, %v6779_v53  }
 0x7ae   :  { %2232 = vst.msk [vmem:[#allocation0 + $0xe52] sm:$0x4] %vm4_vm1, %v6779_v53  }
 0x7af   :  { %2234 = vst.msk [vmem:[#allocation0 + $0xe71] sm:$0x8] %vm4_vm1, %v6779_v53  }
 0x7b0   :  { %2236 = vst.msk [vmem:[#allocation0 + $0xe90] sm:$0x10] %vm4_vm1, %v6779_v53  }
 0x7b1   :  { %2238 = vst.msk [vmem:[#allocation0 + $0xeaf] sm:$0x20] %vm4_vm1, %v6779_v53  }
 0x7b2   :  { %2240 = vst.msk [vmem:[#allocation0 + $0xece] sm:$0x40] %vm4_vm1, %v6779_v53  }
 0x7b3   :  { %2242 = vst.msk [vmem:[#allocation0 + $0xeed] sm:$0x80] %vm4_vm1, %v6779_v53  }
 0x7b4   :  { %2247 = vst.msk [vmem:[#allocation0 + $0xe18] sm:$0x1] %vm4_vm1, %v6780_v54  }
 0x7b5   :  { %2249 = vst.msk [vmem:[#allocation0 + $0xe37] sm:$0x2] %vm4_vm1, %v6780_v54  }
 0x7b6   :  { %2251 = vst.msk [vmem:[#allocation0 + $0xe56] sm:$0x4] %vm4_vm1, %v6780_v54  }
 0x7b7   :  { %2253 = vst.msk [vmem:[#allocation0 + $0xe75] sm:$0x8] %vm4_vm1, %v6780_v54  }
 0x7b8   :  { %2255 = vst.msk [vmem:[#allocation0 + $0xe94] sm:$0x10] %vm4_vm1, %v6780_v54  }
 0x7b9   :  { %2257 = vst.msk [vmem:[#allocation0 + $0xeb3] sm:$0x20] %vm4_vm1, %v6780_v54  }
 0x7ba   :  { %2259 = vst.msk [vmem:[#allocation0 + $0xed2] sm:$0x40] %vm4_vm1, %v6780_v54  }
 0x7bb   :  { %2261 = vst.msk [vmem:[#allocation0 + $0xef1] sm:$0x80] %vm4_vm1, %v6780_v54  }
 0x7bc   :  { %2266 = vst.msk [vmem:[#allocation0 + $0xe1c] sm:$0x1] %vm4_vm1, %v6781_v55  }
 0x7bd   :  { %2268 = vst.msk [vmem:[#allocation0 + $0xe3b] sm:$0x2] %vm4_vm1, %v6781_v55  }
 0x7be   :  { %2270 = vst.msk [vmem:[#allocation0 + $0xe5a] sm:$0x4] %vm4_vm1, %v6781_v55  }
 0x7bf   :  { %2272 = vst.msk [vmem:[#allocation0 + $0xe79] sm:$0x8] %vm4_vm1, %v6781_v55  }
 0x7c0   :  { %2274 = vst.msk [vmem:[#allocation0 + $0xe98] sm:$0x10] %vm4_vm1, %v6781_v55  }
 0x7c1   :  { %2276 = vst.msk [vmem:[#allocation0 + $0xeb7] sm:$0x20] %vm4_vm1, %v6781_v55  }
 0x7c2   :  { %2278 = vst.msk [vmem:[#allocation0 + $0xed6] sm:$0x40] %vm4_vm1, %v6781_v55  }
 0x7c3   :  { %2280 = vst.msk [vmem:[#allocation0 + $0xef5] sm:$0x80] %vm4_vm1, %v6781_v55  }
 0x7c4   :  { %2285 = vst.msk [vmem:[#allocation0 + $0xf00] sm:$0x1] %vm4_vm1, %v6782_v56  }
 0x7c5   :  { %2287 = vst.msk [vmem:[#allocation0 + $0xf1f] sm:$0x2] %vm4_vm1, %v6782_v56  }
 0x7c6   :  { %2289 = vst.msk [vmem:[#allocation0 + $0xf3e] sm:$0x4] %vm4_vm1, %v6782_v56  }
 0x7c7   :  { %2291 = vst.msk [vmem:[#allocation0 + $0xf5d] sm:$0x8] %vm4_vm1, %v6782_v56  }
 0x7c8   :  { %2293 = vst.msk [vmem:[#allocation0 + $0xf7c] sm:$0x10] %vm4_vm1, %v6782_v56  }
 0x7c9   :  { %2295 = vst.msk [vmem:[#allocation0 + $0xf9b] sm:$0x20] %vm4_vm1, %v6782_v56  }
 0x7ca   :  { %2297 = vst.msk [vmem:[#allocation0 + $0xfba] sm:$0x40] %vm4_vm1, %v6782_v56  }
 0x7cb   :  { %2299 = vst.msk [vmem:[#allocation0 + $0xfd9] sm:$0x80] %vm4_vm1, %v6782_v56  }
 0x7cc   :  { %2304 = vst.msk [vmem:[#allocation0 + $0xf04] sm:$0x1] %vm4_vm1, %v6783_v57  }
 0x7cd   :  { %2306 = vst.msk [vmem:[#allocation0 + $0xf23] sm:$0x2] %vm4_vm1, %v6783_v57  }
 0x7ce   :  { %2308 = vst.msk [vmem:[#allocation0 + $0xf42] sm:$0x4] %vm4_vm1, %v6783_v57  }
 0x7cf   :  { %2310 = vst.msk [vmem:[#allocation0 + $0xf61] sm:$0x8] %vm4_vm1, %v6783_v57  }
 0x7d0   :  { %2312 = vst.msk [vmem:[#allocation0 + $0xf80] sm:$0x10] %vm4_vm1, %v6783_v57  }
 0x7d1   :  { %2314 = vst.msk [vmem:[#allocation0 + $0xf9f] sm:$0x20] %vm4_vm1, %v6783_v57  }
 0x7d2   :  { %2316 = vst.msk [vmem:[#allocation0 + $0xfbe] sm:$0x40] %vm4_vm1, %v6783_v57  }
 0x7d3   :  { %2318 = vst.msk [vmem:[#allocation0 + $0xfdd] sm:$0x80] %vm4_vm1, %v6783_v57  }
 0x7d4   :  { %2323 = vst.msk [vmem:[#allocation0 + $0xf08] sm:$0x1] %vm4_vm1, %v6784_v58  }
 0x7d5   :  { %2325 = vst.msk [vmem:[#allocation0 + $0xf27] sm:$0x2] %vm4_vm1, %v6784_v58  }
 0x7d6   :  { %2327 = vst.msk [vmem:[#allocation0 + $0xf46] sm:$0x4] %vm4_vm1, %v6784_v58  }
 0x7d7   :  { %2329 = vst.msk [vmem:[#allocation0 + $0xf65] sm:$0x8] %vm4_vm1, %v6784_v58  }
 0x7d8   :  { %2331 = vst.msk [vmem:[#allocation0 + $0xf84] sm:$0x10] %vm4_vm1, %v6784_v58  }
 0x7d9   :  { %2333 = vst.msk [vmem:[#allocation0 + $0xfa3] sm:$0x20] %vm4_vm1, %v6784_v58  }
 0x7da   :  { %2335 = vst.msk [vmem:[#allocation0 + $0xfc2] sm:$0x40] %vm4_vm1, %v6784_v58  }
 0x7db   :  { %2337 = vst.msk [vmem:[#allocation0 + $0xfe1] sm:$0x80] %vm4_vm1, %v6784_v58  }
 0x7dc   :  { %2342 = vst.msk [vmem:[#allocation0 + $0xf0c] sm:$0x1] %vm4_vm1, %v6785_v59  }
 0x7dd   :  { %2344 = vst.msk [vmem:[#allocation0 + $0xf2b] sm:$0x2] %vm4_vm1, %v6785_v59  }
 0x7de   :  { %2346 = vst.msk [vmem:[#allocation0 + $0xf4a] sm:$0x4] %vm4_vm1, %v6785_v59  }
 0x7df   :  { %2348 = vst.msk [vmem:[#allocation0 + $0xf69] sm:$0x8] %vm4_vm1, %v6785_v59  }
 0x7e0   :  { %2350 = vst.msk [vmem:[#allocation0 + $0xf88] sm:$0x10] %vm4_vm1, %v6785_v59  }
 0x7e1   :  { %2352 = vst.msk [vmem:[#allocation0 + $0xfa7] sm:$0x20] %vm4_vm1, %v6785_v59  }
 0x7e2   :  { %2354 = vst.msk [vmem:[#allocation0 + $0xfc6] sm:$0x40] %vm4_vm1, %v6785_v59  }
 0x7e3   :  { %2356 = vst.msk [vmem:[#allocation0 + $0xfe5] sm:$0x80] %vm4_vm1, %v6785_v59  }
 0x7e4   :  { %2361 = vst.msk [vmem:[#allocation0 + $0xf10] sm:$0x1] %vm4_vm1, %v6786_v60  }
 0x7e5   :  { %2363 = vst.msk [vmem:[#allocation0 + $0xf2f] sm:$0x2] %vm4_vm1, %v6786_v60  }
 0x7e6   :  { %2365 = vst.msk [vmem:[#allocation0 + $0xf4e] sm:$0x4] %vm4_vm1, %v6786_v60  }
 0x7e7   :  { %2367 = vst.msk [vmem:[#allocation0 + $0xf6d] sm:$0x8] %vm4_vm1, %v6786_v60  }
 0x7e8   :  { %2369 = vst.msk [vmem:[#allocation0 + $0xf8c] sm:$0x10] %vm4_vm1, %v6786_v60  }
 0x7e9   :  { %2371 = vst.msk [vmem:[#allocation0 + $0xfab] sm:$0x20] %vm4_vm1, %v6786_v60  }
 0x7ea   :  { %2373 = vst.msk [vmem:[#allocation0 + $0xfca] sm:$0x40] %vm4_vm1, %v6786_v60  }
 0x7eb   :  { %2375 = vst.msk [vmem:[#allocation0 + $0xfe9] sm:$0x80] %vm4_vm1, %v6786_v60  }
 0x7ec   :  { %2380 = vst.msk [vmem:[#allocation0 + $0xf14] sm:$0x1] %vm4_vm1, %v6787_v61  }
 0x7ed   :  { %2382 = vst.msk [vmem:[#allocation0 + $0xf33] sm:$0x2] %vm4_vm1, %v6787_v61  }
 0x7ee   :  { %2384 = vst.msk [vmem:[#allocation0 + $0xf52] sm:$0x4] %vm4_vm1, %v6787_v61  }
 0x7ef   :  { %2386 = vst.msk [vmem:[#allocation0 + $0xf71] sm:$0x8] %vm4_vm1, %v6787_v61  }
 0x7f0   :  { %2388 = vst.msk [vmem:[#allocation0 + $0xf90] sm:$0x10] %vm4_vm1, %v6787_v61  }
 0x7f1   :  { %2390 = vst.msk [vmem:[#allocation0 + $0xfaf] sm:$0x20] %vm4_vm1, %v6787_v61  }
 0x7f2   :  { %2392 = vst.msk [vmem:[#allocation0 + $0xfce] sm:$0x40] %vm4_vm1, %v6787_v61  }
 0x7f3   :  { %2394 = vst.msk [vmem:[#allocation0 + $0xfed] sm:$0x80] %vm4_vm1, %v6787_v61  }
 0x7f4   :  { %2399 = vst.msk [vmem:[#allocation0 + $0xf18] sm:$0x1] %vm4_vm1, %v6788_v62  }
 0x7f5   :  { %2401 = vst.msk [vmem:[#allocation0 + $0xf37] sm:$0x2] %vm4_vm1, %v6788_v62  }
 0x7f6   :  { %2403 = vst.msk [vmem:[#allocation0 + $0xf56] sm:$0x4] %vm4_vm1, %v6788_v62  }
 0x7f7   :  { %2405 = vst.msk [vmem:[#allocation0 + $0xf75] sm:$0x8] %vm4_vm1, %v6788_v62  }
 0x7f8   :  { %2407 = vst.msk [vmem:[#allocation0 + $0xf94] sm:$0x10] %vm4_vm1, %v6788_v62  }
 0x7f9   :  { %2409 = vst.msk [vmem:[#allocation0 + $0xfb3] sm:$0x20] %vm4_vm1, %v6788_v62  }
 0x7fa   :  { %2411 = vst.msk [vmem:[#allocation0 + $0xfd2] sm:$0x40] %vm4_vm1, %v6788_v62  }
 0x7fb   :  { %2413 = vst.msk [vmem:[#allocation0 + $0xff1] sm:$0x80] %vm4_vm1, %v6788_v62  }
 0x7fc   :  { %2418 = vst.msk [vmem:[#allocation0 + $0xf1c] sm:$0x1] %vm4_vm1, %v6789_v63  }
 0x7fd   :  { %2420 = vst.msk [vmem:[#allocation0 + $0xf3b] sm:$0x2] %vm4_vm1, %v6789_v63  }
 0x7fe   :  { %2422 = vst.msk [vmem:[#allocation0 + $0xf5a] sm:$0x4] %vm4_vm1, %v6789_v63  }
 0x7ff   :  { %2424 = vst.msk [vmem:[#allocation0 + $0xf79] sm:$0x8] %vm4_vm1, %v6789_v63  }
 0x800   :  { %2426 = vst.msk [vmem:[#allocation0 + $0xf98] sm:$0x10] %vm4_vm1, %v6789_v63  }
 0x801   :  { %2428 = vst.msk [vmem:[#allocation0 + $0xfb7] sm:$0x20] %vm4_vm1, %v6789_v63  }
 0x802   :  { %2430 = vst.msk [vmem:[#allocation0 + $0xfd6] sm:$0x40] %vm4_vm1, %v6789_v63  }
 0x803   :  { %2432 = vst.msk [vmem:[#allocation0 + $0xff5] sm:$0x80] %vm4_vm1, %v6789_v63  }
 0x804   :  { %6659 = dma.vmem_to_hbm [thread:$0]  %s6655_s25, 65536, %s6657_s1, [#allocation1]  }
 0x805   :  { %7580 = dma.done.wait [#allocation1], 65536  }
 0x806   :  { %7581 = vsyncadd [#allocation1], 4294901760 }
 0x807   :  { %6662 = vsyncpa [#allocation1], 1 }

// kernel: _lambda_.1
= control target key start
LH: loop header
LB: loop body
LE: loop exit
PB: predicated region body
PF: predicated region fallthrough
CT: control target
= control target key end

     0   :  { %s3651_s0 = inlined_call_operand.vmem [shape: f32[3,4,128], index: 0, kind: input, shape index: {}]   ;;  %s3652_s1 = inlined_call_operand.hbm [shape: f32[3,33,109], index: 1, kind: input, shape index: {}]   ;;  %s3653_s2 = inlined_call_operand.hbm [shape: f32[3,27,33], index: 2, kind: input, shape index: {}]   ;;  %s3654_s3 = inlined_call_operand.hbm [shape: f32[27,128], index: 3, kind: input, shape index: {}]   ;;  %s3655_s4 = inlined_call_operand.hbm [shape: f32[64,128], index: 4, kind: input, shape index: {}]   ;;  %s3656_s5 = inlined_call_operand.hbm [shape: f32[128,16], index: 5, kind: input, shape index: {}]   ;;  %s3657_s6 = inlined_call_operand.hbm [shape: f32[16,1024], index: 6, kind: input, shape index: {}]   ;;  %s3658_s7 = inlined_call_operand.vmem [shape: f32[3,2,2,32,1024], index: 7, kind: output, shape index: {}]  }
   0x1   :  { %3667 = sst [smem:[#allocation18_spill]] %s3652_s1 }
   0x2   :  { %3668 = sst [smem:[#allocation19_spill]] %s3654_s3 }
   0x3   :  { %3669 = sst [smem:[#allocation20_spill]] %s3655_s4 }
   0x4   :  { %3670 = sst [smem:[#allocation21_spill]] %s3656_s5 }
   0x5   :  { %12 = vsyncpa [#allocation4], 0 }
   0x6   :  { %14 = vsyncpa [#allocation4 + $0x1], 0 }
   0x7   :  { %15 = vsyncpa [#allocation6], 0 }
   0x8   :  { %17 = vsyncpa [#allocation6 + $0x1], 0 }
   0x9   :  { %18 = vsyncpa [#allocation9], 0 }
   0xa   :  { %19 = vsyncpa [#allocation12], 0  ;;  %s3067_s24 = smov 0   ;;  %s3069_s25 = smov 0  }
   0xb   :  { %s3071_s26 = smov 0   ;;  %s3073_s27 = smov 0  }
   0xc LB: > { %s3086_s28 = sadd.s32 4294967295, %s2990_s27   ;;  %p71_p0 = scmp.ne.s32.totalorder %s2982_s25, %s2978_s24  ;;  %s2990_s27 = sphi %s3073_s27, %s3689_s27   ;;  %s2986_s26 = sphi %s3071_s26, %s3688_s26   ;;  %s2982_s25 = sphi %s3069_s25, %s3687_s25   ;;  %s2978_s24 = sphi %s3067_s24, %s3686_s24  }
   0xd   : > { %p72_p1 = scmp.eq.s32.totalorder %s3086_s28, 0  ;;  %p2146_p2 = scmp.ge.s32.totalorder %s2990_s27, 1 }
   0xe   : > { %p218_p3 = scmp.lt.s32.totalorder %s2990_s27, 4  ;;  %s3672_s3 = sld [smem:[#allocation19_spill]] }
   0xf   : > { %p3094_p4 = por %p72_p1, %p71_p0  ;;  %s2992_s11 = smov [#allocation7]  }
  0x10   : > { %p3101_p5 = pnand %p2146_p2, %p218_p3  ;;  %s231_s12 = sshll.u32 %s2992_s11, 4  ;;  %s232_s12 = int_to_ptr.vmem [resolvable:$true] %s231_s12 }
  0x11   : > { %s3675_s4 = sld [smem:[#allocation20_spill]]  ;;  %s3659_s17 = smov 128  }
  0x12   : > { %p2381_p6 = pneg %p3101_p5  ;;  %s2994_s18 = smov 8  }
  0x13   : > { %s2995_s19 = smov [#allocation8]   ;;  %s3676_s5 = sld [smem:[#allocation21_spill]] }
  0x14   : > { %s229_s9 = sshll.u32 %s3672_s3, 4  ;;  %p3109_p7 = pnand %p2381_p6, %p72_p1  ;;  %s230_s9 = int_to_ptr.hbm [resolvable:$true] %s229_s9 }
  0x15   : > { %s245_s20 = sshll.u32 %s2995_s19, 4  ;;  %s271_s8 = sshll.u32 %s3657_s6, 4  ;;  %s246_s20 = int_to_ptr.vmem [resolvable:$true] %s245_s20  ;;  %s272_s8 = int_to_ptr.hbm [resolvable:$true] %s271_s8 }
  0x16   : > { %2384 = dma.hbm_to_vmem [thread:$0]  (!%p3109_p7), %s230_s9, 512, %s232_s12, [#allocation6], %s3659_s17, %s3659_s17, %s2994_s18  }
  0x17   : > { %s243_s16 = sshll.u32 %s3675_s4, 4  ;;  %s2996_s9 = smov [#allocation10]   ;;  %s244_s16 = int_to_ptr.hbm [resolvable:$true] %s243_s16 }
  0x18   : > { %2387 = dma.hbm_to_vmem [thread:$0]  (!%p3109_p7), %s244_s16, 1024, %s246_s20, [#allocation9], %s3659_s17, %s3659_s17, %s2994_s18  }
  0x19   : > { %s257_s23 = sshll.u32 %s3676_s5, 4  ;;  %s259_s11 = sshll.u32 %s2996_s9, 4  ;;  %s258_s23 = int_to_ptr.hbm [resolvable:$true] %s257_s23  ;;  %s260_s11 = int_to_ptr.vmem [resolvable:$true] %s259_s11 }
  0x1a   : > { %2390 = dma.hbm_to_vmem [thread:$0]  (!%p3109_p7), %s258_s23, 2048, %s260_s11, [#allocation9], %s3659_s17, %s3659_s17, %s2994_s18  }
  0x1b   : > { %s2997_s12 = smov [#allocation11]   ;;  %s2998_s15 = smov 1024  }
  0x1c   : > { %s273_s14 = sshll.u32 %s2997_s12, 4  ;;  %s2999_s16 = smov 64   ;;  %s274_s14 = int_to_ptr.vmem [resolvable:$true] %s273_s14 }
  0x1d   : > { %2393 = dma.hbm_to_vmem [thread:$0]  (!%p3109_p7), %s272_s8, 2048, %s274_s14, [#allocation12], %s2998_s15, %s2998_s15, %s2999_s16  }
  0x1e   : > { %s3140_s19 = sadd.s32 1, %s2990_s27   ;;  %s58_s21 = sadd.s32 1, %s2986_s26 }
  0x1f   : > { %s55_s20 = ssub.s32 %s2990_s27, %s3140_s19  ;;  %p65_p9 = scmp.ne.s32.totalorder %s2986_s26, %s2982_s25 }
  0x20   : > { %p56_p8 = scmp.eq.s32.totalorder %s55_s20, 0  ;;  %p66_p10 = scmp.eq.s32.totalorder %s2990_s27, 0 }
  0x21   : > { %p2405_p12 = scmp.lt.s32.totalorder %s2990_s27, 3  ;;  %s3153_s23 = sand.u32 1, %s2986_s26  }
  0x22   : > { %s3149_s22 = scalar_select %p56_p8, %s2986_s26, %s58_s21  }
  0x23   : > { %p67_p11 = por %p66_p10, %p65_p9  ;;  %s2359_s24 = smul.u32 40, %s2990_s27 }
  0x24   : > { %s2358_s30 = smul.u32 40, %s3153_s23  ;;  %s3677_s1 = sld [smem:[#allocation18_spill]] }
  0x25   : > { %p3160_p13 = pnand %p2405_p12, %p67_p11  ;;  %s295_s16 = scalar_lea.sflag [#allocation4], %s3153_s23 }
  0x26   : > { %s298_s14 = scalar_lea.vmem [#allocation3], %s2358_s30 }
  0x27   : > { %s306_s15 = sshll.u32 %s298_s14, 4  ;;  %p2884_p2 = pneg %p3160_p13  ;;  %s307_s15 = int_to_ptr.vmem [resolvable:$true] %s306_s15 }
  0x2a   : > { %s303_s9 = scalar_lea.hbm %s3677_s1, %s2359_s24  ;;  %s2887_s8 = scalar_lea.hbm %s3677_s1, 120 }
  0x2b   : > { %s304_s12 = sshll.u32 %s303_s9, 4  ;;  %s305_s12 = int_to_ptr.hbm [resolvable:$true] %s304_s12 }
  0x2c   : > { %s2880_s20 = sshra.s32 %s305_s12, 4  ;;  %s2881_s20 = int_to_ptr.hbm [resolvable:$true] %s2880_s20 }
  0x2d   : > { %s2882_s21 = scalar_lea.hbm %s2881_s20, 40  ;;  %p2888_p7 = scmp.lt.s32.totalorder %s2881_s20, %s3677_s1 }
  0x2e   : > { %p2883_p0 = scmp.ne.s32.totalorder %s2881_s20, %s2882_s21  ;;  %p2889_p8 = scmp.lt.s32.totalorder %s2887_s8, %s2882_s21 }
  0x30   : > { %p2885_p3 = pnand %p2884_p2, %p2883_p0  ;;  %p2890_p9 = por %p2889_p8, %p2888_p7 }
  0x32   : > { %p2886_p6 = pneg %p2885_p3 }
  0x34   : > { %p2891_p10 = pnand %p2890_p9, %p2886_p6 }
  0x36   : > { %2894 = shalt.err (!%p2891_p10)
}
  0x37   : > { %s3679_s30 = smov 128   ;;  %s316_s14 = sand.u32 1, %s2990_s27  }
  0x38   : > { %2397 = dma.hbm_to_vmem [thread:$0]  (!%p3160_p13), %s305_s12, 640, %s307_s15, %s295_s16, %s3679_s30, %s3679_s30, %s2994_s18  }
  0x39   : > { %s2153_s24 = sshll.u32 %s3153_s23, 5  ;;  %s2338_s13 = sshll.u32 %s2990_s27, 5 }
  0x3a   : > { %s320_s3 = scalar_lea.vmem [#allocation5], %s2153_s24  ;;  %s325_s8 = scalar_lea.hbm %s3653_s2, %s2338_s13 }
  0x3b   : > { %s328_s17 = sshll.u32 %s320_s3, 4  ;;  %s326_s9 = sshll.u32 %s325_s8, 4  ;;  %s329_s17 = int_to_ptr.vmem [resolvable:$true] %s328_s17  ;;  %s327_s9 = int_to_ptr.hbm [resolvable:$true] %s326_s9 }
  0x3c   : > { %s317_s1 = scalar_lea.sflag [#allocation6], %s316_s14  ;;  %s2910_s4 = sshra.s32 %s327_s9, 4  ;;  %s2911_s4 = int_to_ptr.hbm [resolvable:$true] %s2910_s4 }
  0x3d   : > { %s2912_s5 = scalar_lea.hbm %s2911_s4, 32  ;;  %s2917_s3 = scalar_lea.hbm %s3653_s2, 96 }
  0x3e   : > { %p2913_p11 = scmp.ne.s32.totalorder %s2911_s4, %s2912_s5  ;;  %p2918_p3 = scmp.lt.s32.totalorder %s2911_s4, %s3653_s2 }
  0x3f   : > { %p2919_p6 = scmp.lt.s32.totalorder %s2917_s3, %s2912_s5 }
  0x40   : > { %p2915_p12 = pnand %p2913_p11, %p2884_p2 }
  0x41   : > { %p2920_p7 = por %p2919_p6, %p2918_p3 }
  0x42   : > { %p2916_p0 = pneg %p2915_p12 }
  0x44   : > { %p2921_p8 = pnand %p2920_p7, %p2916_p0 }
  0x46   : > { %2924 = shalt.err (!%p2921_p8)
}
  0x47   : > { %2400 = dma.hbm_to_vmem [thread:$0]  (!%p3160_p13), %s327_s9, 512, %s329_s17, %s317_s1, %s3679_s30, %s3679_s30, %s2994_s18  }
  0x48   : > { %340 = sbr.rel (%p3101_p5) target bundleno = 1219 (0x4c3), region = 48  ;;  %s342_s16 = sand.u32 (!%p3101_p5), 1, %s2982_s25  }
  0x49   : > { %s2360_s14 = smul.u32 (!%p3101_p5), 40, %s342_s16  ;;  %s343_s24 = scalar_lea.sflag (!%p3101_p5), [#allocation4], %s342_s16 }
  0x4b   : > { %s3204_s13 = scalar_lea.vmem (!%p3101_p5), [#allocation3], %s2360_s14 }
  0x4d   : > { %2957 = dma.done.wait (%p3094_p4), %s343_s24, 640  }
  0x4e   : > { %2959 = vsyncadd (%p3094_p4), %s343_s24, 4294966656  ;;  %s352_s4 = sand.u32 1, %s3086_s28   ;;  %s2157_s5 = sshll.u32 %s342_s16, 5 }
  0x4f   : > { %s353_s1 = scalar_lea.sflag [#allocation6], %s352_s4  ;;  %s3211_s18 = scalar_lea.vmem [#allocation5], %s2157_s5 }
  0x50   : > { %2961 = dma.done.wait (%p3094_p4), %s353_s1, 512  }
  0x51   : > { %2963 = vsyncadd (%p3094_p4), %s353_s1, 4294966784 }
  0x52   : > { %2965 = dma.done.wait (%p72_p1), [#allocation6], 512  }
  0x53   : > { %2967 = vsyncadd (%p72_p1), [#allocation6], 4294966784 }
  0x54   : > { %2969 = dma.done.wait (%p72_p1), [#allocation9], 3072  }
  0x55   : > { %2971 = vsyncadd (%p72_p1), [#allocation9], 4294964224 }
  0x56   : > { %2973 = dma.done.wait (%p72_p1), [#allocation12], 2048  }
  0x57   : > { %2975 = vsyncadd (%p72_p1), [#allocation12], 4294965248  ;;  %p417_p4 = scmp.lt.s32.totalorder %s3086_s28, 2  ;;  %s3662_s17 = smov 108   ;;  %v3026_v1 = vmov 1.0   ;;  %vm623_vm0 = vcmask 1044480  }
  0x58   : > { %s3661_s20 = smov 107   ;;  %s3664_s21 = smov 111   ;;  %587 = vst [vmem:[#allocation2 + $0x6c] sm:$0x1] %v3026_v1  ;;  %v2477_v2 = vld [vmem:[#allocation7 + $0x17] ss:$0 sm:$0xff] }
  0x59   : > { %s3691_s28 = smov (!%p417_p4, %s3086_s28), 2  ;;  %s3665_s8 = smov 112   ;;  %v2480_v5 = vld [vmem:[#allocation7 + $0x14] ss:$0 sm:$0xff]  ;;  %v2483_v8 = vld [vmem:[#allocation7 + $0x13] ss:$0 sm:$0xff] }
  0x5a   : > { %s2162_s29 = sshll.u32 %s3691_s28, 2  ;;  %s3663_s9 = smov 109   ;;  %v2478_v11 = vld [vmem:[#allocation7 + $0x19] ss:$0 sm:$0xff]  ;;  %v2479_v12 = vld [vmem:[#allocation7 + $0x1a] ss:$0 sm:$0xff] }
  0x5b   : > { %s420_s30 = scalar_lea.vmem %s3651_s0, %s2162_s29  ;;  %s3666_s23 = smov 115   ;;  %v2486_v13 = vld [vmem:[#allocation7 + $0xe] ss:$0 sm:$0xff]  ;;  %v2495_v16 = vld [vmem:[#allocation7 + $0xd] ss:$0 sm:$0xff]  ;;  %vm607_vm1 = vcmask 891904  }
  0x5c   : > { %v3237_v0 = vld [vmem:[%s420_s30] sm:$0xf]  ;;  %s3006_s27 = smov 117   ;;  %s3007_s3 = smov 113   ;;  %v2481_v22 = vld [vmem:[#allocation7 + $0x16] ss:$0 sm:$0xff] }
  0x5d   : > { %575 = vrot.lane.b32.xlu1 %v3237_v0, %s3662_s17  ;;  %581 = vrot.lane.b32.xlu0 %v3237_v0, %s3661_s20  ;;  %s3008_s12 = smov 116   ;;  %s3009_s15 = smov 123   ;;  %v507_v21 = vmul.f32 %v2495_v16, %v3237_v0  ;;  %v2482_v23 = vld [vmem:[#allocation7 + $0x18] ss:$0 sm:$0xff]  ;;  %v2489_v24 = vld [vmem:[#allocation7 + $0xa] ss:$0 sm:$0xff] }
  0x5e   : > { %563 = vrot.lane.b32.xlu2 %v3237_v0, %s3664_s21  ;;  %s3010_s16 = smov 124   ;;  %s3011_s14 = smov 127   ;;  %v2484_v32 = vld [vmem:[#allocation7 + $0x12] ss:$0 sm:$0xff]  ;;  %v2485_v33 = vld [vmem:[#allocation7 + $0x15] ss:$0 sm:$0xff] }
  0x5f   : > { %s3012_s24 = smov 1   ;;  %s3013_s4 = smov 125   ;;  %508 = vst [vmem:[#allocation2 + $0x34] sm:$0xf] %v507_v21  ;;  %v2492_v34 = vld [vmem:[#allocation7 + $0x9] ss:$0 sm:$0xff] }
  0x60   : > { %s3014_s5 = smov 4   ;;  %s3015_s1 = smov 11   ;;  %v2487_v42 = vld [vmem:[#allocation7 + $0x11] ss:$0 sm:$0xff]  ;;  %v2488_v44 = vld [vmem:[#allocation7 + $0x10] ss:$0 sm:$0xff] }
  0x61   : > { %s3016_s29 = smov 3   ;;  %s3017_s10 = smov 5   ;;  %v2496_v45 = vld [vmem:[#allocation7 + $0x4] ss:$0 sm:$0xff]  ;;  %v2490_v53 = vld [vmem:[#allocation7 + $0xc] ss:$0 sm:$0xff] }
  0x62   : > { %s3018_s11 = smov 12   ;;  %s3019_s30 = smov 13   ;;  %v2491_v55 = vld [vmem:[#allocation7 + $0xf] ss:$0 sm:$0xff]  ;;  %v2499_v56 = vld [vmem:[#allocation7 + $0x3] ss:$0 sm:$0xff] }
  0x63   : > { %s3020_s20 = smov 16   ;;  %s3021_s17 = smov 19   ;;  %v2494_v1 = vld [vmem:[#allocation7 + $0xb] ss:$0 sm:$0xff]  ;;  %v2500_v16 = vld [vmem:[#allocation7 + $0x2] ss:$0 sm:$0xff] }
  0x64   : > { %s3023_s21 = smov 17   ;;  %vm676_vm2 = vcmask 1040384   ;;  %vm663_vm3 = vcmask 269312   ;;  %vm985_vm4 = vcmask 130048  }
  0x65   : > { %557 = vrot.lane.b32.xlu1 %v3237_v0, %s3665_s8  ;;  %569 = vrot.lane.b32.xlu0 %v3237_v0, %s3663_s9  ;;  %s3022_s9 = smov 15   ;;  %s3024_s8 = smov 20  }
  0x66   : > { %545 = vrot.lane.b32.xlu2 %v3237_v0, %s3666_s23  ;;  %s3025_s23 = smov 21  }
  0x6d   : > { %533 = vrot.lane.b32.xlu1 %v3237_v0, %s3006_s27  ;;  %551 = vrot.lane.b32.xlu0 %v3237_v0, %s3007_s3 }
  0x6e   : > { %539 = vrot.lane.b32.xlu2 %v3237_v0, %s3008_s12 }
  0x75   : > { %527 = vrot.lane.b32.xlu1 %v3237_v0, %s3009_s15  ;;  %521 = vrot.lane.b32.xlu0 %v3237_v0, %s3010_s16 }
  0x76   : > { %509 = vrot.lane.b32.xlu2 %v3237_v0, %s3011_s14 }
  0x7d   : > { %499 = vrot.lane.b32.xlu1 %v3237_v0, %s3012_s24  ;;  %515 = vrot.lane.b32.xlu0 %v3237_v0, %s3013_s4 }
  0x7e   : > { %487 = vrot.lane.b32.xlu2 %v3237_v0, %s3014_s5 }
  0x85   : > { %475 = vrot.lane.b32.xlu1 %v3237_v0, %s3015_s1  ;;  %493 = vrot.lane.b32.xlu0 %v3237_v0, %s3016_s29 }
  0x86   : > { %481 = vrot.lane.b32.xlu2 %v3237_v0, %s3017_s10 }
  0x8d   : > { %469 = vrot.lane.b32.xlu1 %v3237_v0, %s3018_s11  ;;  %463 = vrot.lane.b32.xlu0 %v3237_v0, %s3019_s30 }
  0x8e   : > { %451 = vrot.lane.b32.xlu2 %v3237_v0, %s3020_s20 }
  0x95   : > { %439 = vrot.lane.b32.xlu1 %v3237_v0, %s3021_s17  ;;  %457 = vrot.lane.b32.xlu0 %v3237_v0, %s3022_s9 }
  0x96   : > { %445 = vrot.lane.b32.xlu2 %v3237_v0, %s3023_s21 }
  0x9d   : > { %433 = vrot.lane.b32.xlu1 %v3237_v0, %s3024_s8  ;;  %427 = vrot.lane.b32.xlu0 %v3237_v0, %s3025_s23  ;;  %v2493_v0 = vld [vmem:[#allocation7 + $0x8] ss:$0 sm:$0xff] }
  0xb8   : > { %v564_v3 = vpop.permute.xlu2 %563 }
  0xb9   : > { %v567_v4 = vmul.f32 %v2477_v2, %v564_v3 }
  0xbb   : > { %568 = vst [vmem:[#allocation2 + $0x5c] sm:$0xf] %v567_v4 }
  0xc0   : > { %v546_v6 = vpop.permute.xlu2 %545 }
  0xc1   : > { %v549_v7 = vmul.f32 %v2480_v5, %v546_v6 }
  0xc3   : > { %550 = vst [vmem:[#allocation2 + $0x50] sm:$0xf] %v549_v7 }
  0xc8   : > { %v540_v9 = vpop.permute.xlu2 %539 }
  0xc9   : > { %v543_v10 = vmul.f32 %v2483_v8, %v540_v9  ;;  %v2497_v8 = vld [vmem:[#allocation7 + $0x7] ss:$0 sm:$0xff]  ;;  %v2498_v9 = vld [vmem:[#allocation7 + $0x6] ss:$0 sm:$0xff] }
  0xcb   : > { %544 = vst [vmem:[#allocation2 + $0x4c] sm:$0xf] %v543_v10 }
  0xcf   : > { %v576_v14 = vpop.permute.xlu1 %575  ;;  %v582_v15 = vpop.permute.xlu0 %581 }
  0xd0   : > { %v579_v17 = vmul.f32 %v2478_v11, %v576_v14  ;;  %v585_v18 = vmul.f32 %v2479_v12, %v582_v15  ;;  %v510_v19 = vpop.permute.xlu2 %509 }
  0xd1   : > { %v513_v20 = vmul.f32 %v2486_v13, %v510_v19 }
  0xd2   : > { %580 = vst [vmem:[#allocation2 + $0x64] sm:$0xf] %v579_v17  ;;  %v2501_v17 = vld [vmem:[#allocation7 + $0x5] ss:$0 sm:$0xff] }
  0xd3   : > { %586 = vst [vmem:[#allocation2 + $0x68] sm:$0xf] %v585_v18 }
  0xd4   : > { %514 = vst [vmem:[#allocation2 + $0x38] sm:$0xf] %v513_v20 }
  0xd7   : > { %v558_v25 = vpop.permute.xlu1 %557  ;;  %v570_v26 = vpop.permute.xlu0 %569 }
  0xd8   : > { %v561_v27 = vmul.f32 %v2481_v22, %v558_v25  ;;  %v573_v28 = vmul.f32 %v2482_v23, %v570_v26  ;;  %v488_v29 = vpop.permute.xlu2 %487  ;;  %v2502_v23 = vld [vmem:[#allocation7 + $0x1] ss:$0 sm:$0xff] }
  0xd9   : > { %v491_v30 = vmul.f32 %v2489_v24, %v488_v29  ;;  %v2503_v24 = vld [vmem:[#allocation7] ss:$0 sm:$0xff] }
  0xda   : > { %562 = vst [vmem:[#allocation2 + $0x58] sm:$0xf] %v561_v27  ;;  %v606_v31 = vld [vmem:[#allocation2 + $0x68] sm:$0x1f] }
  0xdb   : > { %574 = vst [vmem:[#allocation2 + $0x60] sm:$0xf] %v573_v28  ;;  %2165 = vmatpush.msk.msra.mxu0 %vm623_vm0, %v606_v31  ;;  %v588_v31 = vld [vmem:[%s3204_s13] sm:$0xff] }
  0xdc   : > { %492 = vst [vmem:[#allocation2 + $0x28] sm:$0xf] %v491_v30 }
  0xdf   : > { %v534_v35 = vpop.permute.xlu1 %533  ;;  %v552_v36 = vpop.permute.xlu0 %551 }
  0xe0   : > { %v537_v37 = vmul.f32 %v2484_v32, %v534_v35  ;;  %v555_v38 = vmul.f32 %v2485_v33, %v552_v36  ;;  %v482_v39 = vpop.permute.xlu2 %481  ;;  %v589_v33 = vld [vmem:[%s3204_s13 + $0x8] sm:$0xff]  ;;  %v591_v35 = vld [vmem:[%s3204_s13 + $0x18] sm:$0xff]  ;;  %v592_v36 = vld [vmem:[%s3204_s13 + $0x20] sm:$0x1] }
  0xe1   : > { %v485_v40 = vmul.f32 %v2492_v34, %v482_v39  ;;  %v604_v43 = vld [vmem:[#allocation2 + $0x58] sm:$0xff]  ;;  %v590_v34 = vld [vmem:[%s3204_s13 + $0x10] sm:$0xff]  ;;  %s3680_s13 = smov 115  }
  0xe2   : > { %538 = vst [vmem:[#allocation2 + $0x48] sm:$0xf] %v537_v37  ;;  %v605_v41 = vld [vmem:[#allocation2 + $0x60] sm:$0xff] }
  0xe3   : > { %556 = vst [vmem:[#allocation2 + $0x54] sm:$0xf] %v555_v38  ;;  %630 = vmatpush.msra.mxu0 %v605_v41 }
  0xe4   : > { %486 = vst [vmem:[#allocation2 + $0x24] sm:$0xf] %v485_v40 }
  0xe5   : > { %631 = vmatpush.msra.mxu0 %v604_v43  ;;  %v660_v43 = vld [vmem:[%s3211_s18 + $0x8] sm:$0xff] }
  0xe7   : > { %v528_v46 = vpop.permute.xlu1 %527  ;;  %v522_v47 = vpop.permute.xlu0 %521 }
  0xe8   : > { %v531_v48 = vmul.f32 %v2487_v42, %v528_v46  ;;  %v525_v49 = vmul.f32 %v2488_v44, %v522_v47  ;;  %v452_v50 = vpop.permute.xlu2 %451  ;;  %v659_v42 = vld [vmem:[%s3211_s18] sm:$0xff]  ;;  %v661_v44 = vld [vmem:[%s3211_s18 + $0x10] sm:$0xff] }
  0xe9   : > { %v455_v51 = vmul.f32 %v2496_v45, %v452_v50  ;;  %v602_v54 = vld [vmem:[#allocation2 + $0x48] sm:$0xff]  ;;  %v662_v45 = vld [vmem:[%s3211_s18 + $0x18] sm:$0x7]  ;;  %s3681_s18 = smov 112  }
  0xea   : > { %532 = vst [vmem:[#allocation2 + $0x44] sm:$0xf] %v531_v48  ;;  %v603_v52 = vld [vmem:[#allocation2 + $0x50] sm:$0xff] }
  0xeb   : > { %526 = vst [vmem:[#allocation2 + $0x40] sm:$0xf] %v525_v49  ;;  %632 = vmatpush.msra.mxu0 %v603_v52 }
  0xec   : > { %456 = vst [vmem:[#allocation2 + $0x10] sm:$0xf] %v455_v51 }
  0xed   : > { %633 = vmatpush.msra.mxu0 %v602_v54 }
  0xef   : > { %v500_v57 = vpop.permute.xlu1 %499  ;;  %v516_v58 = vpop.permute.xlu0 %515 }
  0xf0   : > { %v503_v59 = vmul.f32 %v2490_v53, %v500_v57  ;;  %v519_v60 = vmul.f32 %v2491_v55, %v516_v58  ;;  %v446_v61 = vpop.permute.xlu2 %445 }
  0xf1   : > { %v449_v62 = vmul.f32 %v2499_v56, %v446_v61 }
  0xf2   : > { %504 = vst [vmem:[#allocation2 + $0x30] sm:$0xf] %v503_v59  ;;  %v601_v63 = vld [vmem:[#allocation2 + $0x40] sm:$0xff] }
  0xf3   : > { %520 = vst [vmem:[#allocation2 + $0x3c] sm:$0xf] %v519_v60  ;;  %634 = vmatpush.msra.mxu0 %v601_v63 }
  0xf4   : > { %450 = vst [vmem:[#allocation2 + $0xc] sm:$0xf] %v449_v62 }
  0xf7   : > { %v476_v2 = vpop.permute.xlu1 %475  ;;  %v494_v3 = vpop.permute.xlu0 %493 }
  0xf8   : > { %v479_v4 = vmul.f32 %v2493_v0, %v476_v2  ;;  %v497_v5 = vmul.f32 %v2494_v1, %v494_v3 }
  0xf9   : > { %v599_v7 = vld [vmem:[#allocation2 + $0x30] sm:$0xff] }
  0xfa   : > { %480 = vst [vmem:[#allocation2 + $0x20] sm:$0xf] %v479_v4  ;;  %v600_v6 = vld [vmem:[#allocation2 + $0x38] sm:$0xff] }
  0xfb   : > { %498 = vst [vmem:[#allocation2 + $0x2c] sm:$0xf] %v497_v5  ;;  %635 = vmatpush.msra.mxu0 %v600_v6 }
  0xfd   : > { %636 = vmatpush.msra.mxu0 %v599_v7 }
  0xff   : > { %v470_v10 = vpop.permute.xlu1 %469  ;;  %v464_v11 = vpop.permute.xlu0 %463 }
 0x100   : > { %v473_v12 = vmul.f32 %v2497_v8, %v470_v10  ;;  %v467_v13 = vmul.f32 %v2498_v9, %v464_v11 }
 0x101   : > { %v597_v15 = vld [vmem:[#allocation2 + $0x20] sm:$0xff] }
 0x102   : > { %474 = vst [vmem:[#allocation2 + $0x1c] sm:$0xf] %v473_v12  ;;  %v598_v14 = vld [vmem:[#allocation2 + $0x28] sm:$0xff] }
 0x103   : > { %468 = vst [vmem:[#allocation2 + $0x18] sm:$0xf] %v467_v13  ;;  %637 = vmatpush.msra.mxu0 %v598_v14 }
 0x105   : > { %638 = vmatpush.msra.mxu0 %v597_v15 }
 0x107   : > { %v440_v18 = vpop.permute.xlu1 %439  ;;  %v458_v19 = vpop.permute.xlu0 %457 }
 0x108   : > { %v443_v20 = vmul.f32 %v2500_v16, %v440_v18  ;;  %v461_v21 = vmul.f32 %v2501_v17, %v458_v19  ;;  %v927_v16 = vld [vmem:[#allocation10 + $0x78] sm:$0xff]  ;;  %v926_v17 = vld [vmem:[#allocation10 + $0x70] sm:$0xff] }
 0x109   : > { %2340 = vmatpush.msra.mxu2 %v927_v16 }
 0x10a   : > { %444 = vst [vmem:[#allocation2 + $0x8] sm:$0xf] %v443_v20  ;;  %v596_v22 = vld [vmem:[#allocation2 + $0x18] sm:$0xff]  ;;  %v925_v20 = vld [vmem:[#allocation10 + $0x68] sm:$0xff] }
 0x10b   : > { %462 = vst [vmem:[#allocation2 + $0x14] sm:$0xf] %v461_v21  ;;  %639 = vmatpush.msra.mxu0 %v596_v22  ;;  %2341 = vmatpush.msra.mxu2 %v926_v17  ;;  %v924_v21 = vld [vmem:[#allocation10 + $0x60] sm:$0xff]  ;;  %v923_v22 = vld [vmem:[#allocation10 + $0x58] sm:$0xff] }
 0x10d   : > { %2342 = vmatpush.msra.mxu2 %v925_v20 }
 0x10f   : > { %v434_v25 = vpop.permute.xlu1 %433  ;;  %v428_v26 = vpop.permute.xlu0 %427  ;;  %2343 = vmatpush.msra.mxu2 %v924_v21 }
 0x110   : > { %v437_v27 = vmul.f32 %v2502_v23, %v434_v25  ;;  %v431_v28 = vmul.f32 %v2503_v24, %v428_v26  ;;  %v922_v24 = vld [vmem:[#allocation10 + $0x50] sm:$0xff] }
 0x111   : > { %v594_v30 = vld [vmem:[#allocation2 + $0x8] sm:$0xff]  ;;  %2344 = vmatpush.msra.mxu2 %v923_v22 }
 0x112   : > { %438 = vst [vmem:[#allocation2 + $0x4] sm:$0xf] %v437_v27  ;;  %v595_v29 = vld [vmem:[#allocation2 + $0x10] sm:$0xff]  ;;  %v921_v27 = vld [vmem:[#allocation10 + $0x48] sm:$0xff] }
 0x113   : > { %432 = vst [vmem:[#allocation2] sm:$0xf] %v431_v28  ;;  %640 = vmatpush.msra.mxu0 %v595_v29  ;;  %2345 = vmatpush.msra.mxu2 %v922_v24  ;;  %v920_v28 = vld [vmem:[#allocation10 + $0x40] sm:$0xff]  ;;  %v919_v29 = vld [vmem:[#allocation10 + $0x38] sm:$0xff] }
 0x115   : > { %641 = vmatpush.msra.mxu0 %v594_v30  ;;  %2346 = vmatpush.msra.mxu2 %v921_v27  ;;  %v918_v30 = vld [vmem:[#allocation10 + $0x30] sm:$0xff] }
 0x117   : > { %2347 = vmatpush.msra.mxu2 %v920_v28 }
 0x119   : > { %2348 = vmatpush.msra.mxu2 %v919_v29 }
 0x11a   : > { %v593_v32 = vld [vmem:[#allocation2] sm:$0xff] }
 0x11b   : > { %642 = vmatpush.msra.mxu0 %v593_v32  ;;  %2349 = vmatpush.msra.mxu2 %v918_v30 }
 0x11c   : > { %2166 = vmatmul.msk.f32.vlgmr.msra.gmra.mxu0 %vm607_vm1, %v588_v31 }
 0x124   : > { %2167 = vmatmul.msk.f32.gmra.mxu0 %vm607_vm1, %v589_v33 }
 0x12c   : > { %2168 = vmatmul.msk.f32.gmra.mxu0 %vm607_vm1, %v590_v34  ;;  %v917_v34 = vld [vmem:[#allocation10 + $0x28] sm:$0xff] }
 0x12d   : > { %2350 = vmatpush.msra.mxu2 %v917_v34 }
 0x134   : > { %2169 = vmatmul.msk.f32.gmra.mxu0 %vm607_vm1, %v591_v35  ;;  %v916_v35 = vld [vmem:[#allocation10 + $0x20] sm:$0xff] }
 0x135   : > { %2351 = vmatpush.msra.mxu2 %v916_v35 }
 0x13c   : > { %2170 = vmatmul.msk.f32.gmra.mxu0 %vm607_vm1, %v592_v36  ;;  %v785_v36 = vld [vmem:[#allocation7 + $0xd] sm:$0x1] }
 0x199   : > { %v644_v37 = vpop.f32.mrf.mxu0 }
 0x1a1   : > { %v647_v38 = vpop.f32.mrf.mxu0 }
 0x1a9   : > { %v650_v39 = vpop.f32.mrf.mxu0 }
 0x1b1   : > { %v653_v40 = vpop.f32.mrf.mxu0 }
 0x1b9   : > { %v656_v41 = vpop.f32.mrf.mxu0 }
 0x1ba   : > { %2171 = vmatpush.msk.msra.mxu1 %vm676_vm2, %v656_v41  ;;  %v914_v41 = vld [vmem:[#allocation10 + $0x10] sm:$0xff] }
 0x1bc   : > { %692 = vmatpush.msra.mxu1 %v653_v40 }
 0x1be   : > { %693 = vmatpush.msra.mxu1 %v650_v39 }
 0x1c0   : > { %694 = vmatpush.msra.mxu1 %v647_v38  ;;  %v787_v38 = vrot.slane %v785_v36, 3 }
 0x1c2   : > { %695 = vmatpush.msra.mxu1 %v644_v37  ;;  %v915_v37 = vld [vmem:[#allocation10 + $0x18] sm:$0xff] }
 0x1c3   : > { %2172 = vmatmul.msk.f32.vlgmr.msra.gmra.mxu1 %vm663_vm3, %v659_v42  ;;  %2352 = vmatpush.msra.mxu2 %v915_v37  ;;  %v913_v42 = vld [vmem:[#allocation10 + $0x8] sm:$0xff] }
 0x1c4   : > { %928 = vmatpush.msrb.mxu1 %v927_v16 }
 0x1c5   : > { %2353 = vmatpush.msra.mxu2 %v914_v41 }
 0x1c6   : > { %929 = vmatpush.msrb.mxu1 %v926_v17 }
 0x1c7   : > { %2354 = vmatpush.msra.mxu2 %v913_v42 }
 0x1c8   : > { %930 = vmatpush.msrb.mxu1 %v925_v20 }
 0x1ca   : > { %931 = vmatpush.msrb.mxu1 %v924_v21 }
 0x1cb   : > { %2173 = vmatmul.msk.f32.gmra.mxu1 %vm663_vm3, %v660_v43 }
 0x1cc   : > { %932 = vmatpush.msrb.mxu1 %v923_v22  ;;  %v835_v22 = vld [vmem:[#allocation7 + $0x15] sm:$0x1] }
 0x1ce   : > { %933 = vmatpush.msrb.mxu1 %v922_v24  ;;  %v829_v24 = vld [vmem:[#allocation7 + $0x14] sm:$0x1] }
 0x1d0   : > { %934 = vmatpush.msrb.mxu1 %v921_v27  ;;  %v847_v27 = vld [vmem:[#allocation7 + $0x17] sm:$0x1] }
 0x1d2   : > { %935 = vmatpush.msrb.mxu1 %v920_v28  ;;  %v765_v28 = vld [vmem:[#allocation7 + $0x9] sm:$0x1] }
 0x1d3   : > { %2174 = vmatmul.msk.f32.gmra.mxu1 %vm663_vm3, %v661_v44  ;;  %v912_v44 = vld [vmem:[#allocation10] sm:$0xff] }
 0x1d4   : > { %936 = vmatpush.msrb.mxu1 %v919_v29  ;;  %2355 = vmatpush.msra.mxu2 %v912_v44 }
 0x1d6   : > { %937 = vmatpush.msrb.mxu1 %v918_v30 }
 0x1d8   : > { %938 = vmatpush.msrb.mxu1 %v917_v34 }
 0x1da   : > { %939 = vmatpush.msrb.mxu1 %v916_v35 }
 0x1db   : > { %2175 = vmatmul.msk.f32.gmra.mxu1 %vm663_vm3, %v662_v45 }
 0x1dc   : > { %940 = vmatpush.msrb.mxu1 %v915_v37 }
 0x1de   : > { %941 = vmatpush.msrb.mxu1 %v914_v41 }
 0x1e0   : > { %942 = vmatpush.msrb.mxu1 %v913_v42 }
 0x1e2   : > { %943 = vmatpush.msrb.mxu1 %v912_v44 }
 0x240   : > { %v697_v46 = vpop.f32.mrf.mxu1 }
 0x241   : > { %709 = vrot.lane.b32.xlu2 %v697_v46, %s3025_s23  ;;  %v720_v47 = vrot.slane %v697_v46, 2  ;;  %v714_v48 = vrot.slane %v697_v46, 1  ;;  %v726_v49 = vrot.slane %v697_v46, 3  ;;  %v738_v50 = vrot.slane %v697_v46, 5 }
 0x242   : > { %v732_v51 = vrot.slane %v697_v46, 4  ;;  %v744_v52 = vrot.slane %v697_v46, 6  ;;  %v750_v54 = vrot.slane %v697_v46, 7  ;;  %v711_v46 = vld [vmem:[#allocation7] sm:$0x1] }
 0x243   : > { %722 = vrot.lane.b32.xlu1 %v720_v47, %s3021_s17  ;;  %716 = vrot.lane.b32.xlu0 %v714_v48, %s3024_s8  ;;  %s3682_s17 = smov 111   ;;  %s3685_s8 = smov 107   ;;  %v730_v47 = vld [vmem:[#allocation7 + $0x3] sm:$0x1] }
 0x248   : > { %v3307_v53 = vpop.f32.mrf.mxu1 }
 0x249   : > { %728 = vrot.lane.b32.xlu2 %v726_v49, %s3023_s21  ;;  %v761_v55 = vrot.slane %v3307_v53, 1  ;;  %v773_v56 = vrot.slane %v3307_v53, 3  ;;  %v767_v57 = vrot.slane %v3307_v53, 2  ;;  %v779_v58 = vrot.slane %v3307_v53, 4  ;;  %s3684_s21 = smov 108  }
 0x24a   : > { %v796_v59 = vrot.slane %v3307_v53, 7  ;;  %v790_v60 = vrot.slane %v3307_v53, 6  ;;  %v789_v45 = vmul.f32 %v787_v38, %v3307_v53 }
 0x24b   : > { %740 = vrot.lane.b32.xlu1 %v738_v50, %s3022_s9  ;;  %734 = vrot.lane.b32.xlu0 %v732_v51, %s3020_s20  ;;  %s3683_s20 = smov 109   ;;  %v748_v51 = vld [vmem:[#allocation7 + $0x6] sm:$0x1]  ;;  %s2339_s9 = sshll.u32 %s3691_s28, 10 }
 0x24c   : > { %v873_v48 = vrot.slane %v789_v45, 5 }
 0x250   : > { %v703_v61 = vpop.f32.mrf.mxu1 }
 0x251   : > { %746 = vrot.lane.b32.xlu2 %v744_v52, %s3019_s30  ;;  %v813_v62 = vrot.slane %v703_v61, 2  ;;  %v807_v63 = vrot.slane %v703_v61, 1  ;;  %v819_v0 = vrot.slane %v703_v61, 3  ;;  %v831_v1 = vrot.slane %v703_v61, 5  ;;  %v800_v52 = vld [vmem:[#allocation7 + $0xf] sm:$0x1] }
 0x252   : > { %v825_v2 = vrot.slane %v703_v61, 4  ;;  %v837_v3 = vrot.slane %v703_v61, 6  ;;  %v843_v5 = vrot.slane %v703_v61, 7 }
 0x253   : > { %752 = vrot.lane.b32.xlu0 %v750_v54, %s3018_s11  ;;  %756 = vrot.lane.b32.xlu1 %v3307_v53, %s3015_s1  ;;  %v794_v54 = vld [vmem:[#allocation7 + $0xe] sm:$0x1] }
 0x258   : > { %v706_v4 = vpop.f32.mrf.mxu1 }
 0x259   : > { %763 = vrot.lane.b32.xlu2 %v761_v55, %s3017_s10  ;;  %v854_v6 = vrot.slane %v706_v4, 1  ;;  %v860_v7 = vrot.slane %v706_v4, 2  ;;  %v724_v55 = vld [vmem:[#allocation7 + $0x2] sm:$0x1] }
 0x25b   : > { %775 = vrot.lane.b32.xlu1 %v773_v56, %s3016_s29  ;;  %769 = vrot.lane.b32.xlu0 %v767_v57, %s3014_s5  ;;  %v718_v56 = vld [vmem:[#allocation7 + $0x1] sm:$0x1]  ;;  %v783_v57 = vld [vmem:[#allocation7 + $0xc] sm:$0x1] }
 0x261   : > { %781 = vrot.lane.b32.xlu2 %v779_v58, %s3012_s24  ;;  %v742_v58 = vld [vmem:[#allocation7 + $0x5] sm:$0x1] }
 0x263   : > { %798 = vrot.lane.b32.xlu1 %v796_v59, %s3013_s4  ;;  %792 = vrot.lane.b32.xlu0 %v790_v60, %s3011_s14  ;;  %v736_v59 = vld [vmem:[#allocation7 + $0x4] sm:$0x1]  ;;  %v754_v60 = vld [vmem:[#allocation7 + $0x7] sm:$0x1] }
 0x269   : > { %802 = vrot.lane.b32.xlu2 %v703_v61, %s3010_s16  ;;  %v758_v61 = vld [vmem:[#allocation7 + $0x8] sm:$0x1] }
 0x26b   : > { %815 = vrot.lane.b32.xlu1 %v813_v62, %s3006_s27  ;;  %809 = vrot.lane.b32.xlu0 %v807_v63, %s3009_s15  ;;  %v777_v62 = vld [vmem:[#allocation7 + $0xb] sm:$0x1]  ;;  %v771_v63 = vld [vmem:[#allocation7 + $0xa] sm:$0x1] }
 0x271   : > { %821 = vrot.lane.b32.xlu2 %v819_v0, %s3008_s12 }
 0x273   : > { %833 = vrot.lane.b32.xlu1 %v831_v1, %s3007_s3  ;;  %827 = vrot.lane.b32.xlu0 %v825_v2, %s3680_s13  ;;  %s3500_s3 = scalar_lea.vmem %s3658_s7, %s2339_s9 }
 0x279   : > { %839 = vrot.lane.b32.xlu2 %v837_v3, %s3681_s18 }
 0x27b   : > { %845 = vrot.lane.b32.xlu0 %v843_v5, %s3682_s17  ;;  %849 = vrot.lane.b32.xlu1 %v706_v4, %s3683_s20  ;;  %v841_v5 = vld [vmem:[#allocation7 + $0x16] sm:$0x1] }
 0x281   : > { %856 = vrot.lane.b32.xlu2 %v854_v6, %s3684_s21  ;;  %v817_v6 = vld [vmem:[#allocation7 + $0x12] sm:$0x1] }
 0x283   : > { %862 = vrot.lane.b32.xlu0 %v860_v7, %s3685_s8  ;;  %v811_v7 = vld [vmem:[#allocation7 + $0x11] sm:$0x1] }
 0x29b   : > { %v3336_v8 = vpop.permute.xlu2 %709 }
 0x29c   : > { %v712_v2 = vmul.f32 %v711_v46, %v3336_v8 }
 0x2a3   : > { %v3338_v9 = vpop.permute.xlu2 %728 }
 0x2a4   : > { %v731_v3 = vmul.f32 %v730_v47, %v3338_v9  ;;  %v804_v9 = vld [vmem:[#allocation7 + $0x10] sm:$0x1] }
 0x2ab   : > { %v3344_v12 = vpop.permute.xlu2 %746 }
 0x2ac   : > { %v749_v4 = vmul.f32 %v748_v51, %v3344_v12 }
 0x2b3   : > { %v3350_v15 = vpop.permute.xlu2 %763 }
 0x2b5   : > { %v3340_v10 = vpop.permute.xlu1 %722  ;;  %v3342_v11 = vpop.permute.xlu0 %716 }
 0x2b6   : > { %v725_v16 = vmul.f32 %v724_v55, %v3340_v10  ;;  %v719_v17 = vmul.f32 %v718_v56, %v3342_v11  ;;  %v823_v11 = vld [vmem:[#allocation7 + $0x13] sm:$0x1] }
 0x2b8   : > { %v867_v38 = vadd.f32 %v731_v3, %v725_v16  ;;  %v866_v46 = vadd.f32 %v719_v17, %v712_v2  ;;  %v897_v17 = vld [vmem:[#allocation8 + $0x10] sm:$0xff] }
 0x2bb   : > { %v3356_v23 = vpop.permute.xlu2 %781 }
 0x2bc   : > { %v784_v20 = vmul.f32 %v783_v57, %v3356_v23 }
 0x2bd   : > { %v3346_v13 = vpop.permute.xlu1 %740  ;;  %v3348_v14 = vpop.permute.xlu0 %734 }
 0x2be   : > { %v743_v21 = vmul.f32 %v742_v58, %v3346_v13  ;;  %v737_v8 = vmul.f32 %v736_v59, %v3348_v14  ;;  %v766_v14 = vmul.f32 %v765_v28, %v3350_v15  ;;  %v875_v41 = vadd.f32 %v873_v48, %v784_v20  ;;  %v864_v48 = vld [vmem:[#allocation7 + $0x1a] sm:$0x1] }
 0x2bf   : > { %v882_v58 = vadd.f32 %v867_v38, %v866_v46  ;;  %v980_v28 = vld [vmem:[#allocation11 + $0x58] sm:$0xff]  ;;  %v970_v38 = vld [vmem:[#allocation11 + $0x8] sm:$0xff] }
 0x2c0   : > { %1099 = vmatpush.msrb.mxu0 %v980_v28 }
 0x2c3   : > { %v3362_v31 = vpop.permute.xlu2 %802 }
 0x2c5   : > { %v3352_v18 = vpop.permute.xlu0 %752  ;;  %v3354_v19 = vpop.permute.xlu1 %756 }
 0x2c6   : > { %v755_v12 = vmul.f32 %v754_v60, %v3352_v18  ;;  %v759_v10 = vmul.f32 %v758_v61, %v3354_v19  ;;  %v805_v18 = vmul.f32 %v804_v9, %v3362_v31  ;;  %v899_v9 = vld [vmem:[#allocation8 + $0x20] sm:$0xff] }
 0x2c8   : > { %v870_v47 = vadd.f32 %v766_v14, %v759_v10  ;;  %v901_v10 = vld [vmem:[#allocation8 + $0x30] sm:$0xff]  ;;  %v976_v14 = vld [vmem:[#allocation11 + $0x38] sm:$0xff] }
 0x2cb   : > { %v3364_v43 = vpop.permute.xlu2 %821 }
 0x2cc   : > { %v824_v19 = vmul.f32 %v823_v11, %v3364_v43 }
 0x2cd   : > { %v3358_v25 = vpop.permute.xlu1 %775  ;;  %v3360_v26 = vpop.permute.xlu0 %769 }
 0x2ce   : > { %v778_v29 = vmul.f32 %v777_v62, %v3358_v25  ;;  %v772_v30 = vmul.f32 %v771_v63, %v3360_v26  ;;  %v851_v25 = vld [vmem:[#allocation7 + $0x18] sm:$0x1]  ;;  %v869_v26 = vadd.f32 %v755_v12, %v749_v4  ;;  %v895_v4 = vld [vmem:[#allocation8] sm:$0xff] }
 0x2d0   : > { %v871_v44 = vadd.f32 %v778_v29, %v772_v30  ;;  %v900_v29 = vld [vmem:[#allocation8 + $0x28] sm:$0xff] }
 0x2d2   : > { %v884_v31 = vadd.f32 %v871_v44, %v870_v47 }
 0x2d3   : > { %v840_v53 = vpop.permute.xlu2 %839 }
 0x2d5   : > { %v799_v32 = vpop.permute.xlu1 %798  ;;  %v793_v33 = vpop.permute.xlu0 %792 }
 0x2d6   : > { %v801_v0 = vmul.f32 %v800_v52, %v799_v32  ;;  %v795_v1 = vmul.f32 %v794_v54, %v793_v33  ;;  %v842_v32 = vmul.f32 %v841_v5, %v840_v53  ;;  %v896_v5 = vld [vmem:[#allocation8 + $0x8] sm:$0xff] }
 0x2d8   : > { %v876_v23 = vadd.f32 %v801_v0, %v795_v1 }
 0x2dd   : > { %v816_v39 = vpop.permute.xlu1 %815  ;;  %v810_v40 = vpop.permute.xlu0 %809 }
 0x2de   : > { %v818_v33 = vmul.f32 %v817_v6, %v816_v39  ;;  %v812_v34 = vmul.f32 %v811_v7, %v810_v40  ;;  %v868_v39 = vadd.f32 %v743_v21, %v737_v8  ;;  %v885_v40 = vadd.f32 %v876_v23, %v875_v41  ;;  %v898_v21 = vld [vmem:[#allocation8 + $0x18] sm:$0xff]  ;;  %v983_v8 = vld [vmem:[#allocation11 + $0x70] sm:$0xff]  ;;  %v982_v41 = vld [vmem:[#allocation11 + $0x68] sm:$0xff] }
 0x2df   : > { %1186 = vmatpush.msrb.mxu2 %v983_v8 }
 0x2e0   : > { %v878_v51 = vadd.f32 %v824_v19, %v818_v33  ;;  %v877_v52 = vadd.f32 %v812_v34, %v805_v18  ;;  %v883_v55 = vadd.f32 %v869_v26, %v868_v39  ;;  %v890_v43 = vadd.f32 %v885_v40, %v884_v31  ;;  %v3385_v33 = vld [vmem:[#allocation11] sm:$0xff]  ;;  %v972_v34 = vld [vmem:[#allocation11 + $0x18] sm:$0xff] }
 0x2e1   : > { %1100 = vmatpush.msrb.mxu0 %v972_v34  ;;  %v973_v39 = vld [vmem:[#allocation11 + $0x20] sm:$0xff] }
 0x2e2   : > { %v886_v60 = vadd.f32 %v878_v51, %v877_v52  ;;  %v889_v63 = vadd.f32 %v883_v55, %v882_v58 }
 0x2e4   : > { %v892_v1 = vadd.f32 %v890_v43, %v889_v63 }
 0x2e5   : > { %v834_v49 = vpop.permute.xlu1 %833  ;;  %v828_v50 = vpop.permute.xlu0 %827 }
 0x2e6   : > { %v836_v35 = vmul.f32 %v835_v22, %v834_v49  ;;  %v830_v36 = vmul.f32 %v829_v24, %v828_v50  ;;  %v858_v49 = vld [vmem:[#allocation7 + $0x19] sm:$0x1]  ;;  %v857_v50 = vpop.permute.xlu2 %856  ;;  %v3382_v24 = vld [vmem:[#allocation11 + $0x40] sm:$0xff] }
 0x2e7   : > { %v859_v56 = vmul.f32 %v858_v49, %v857_v50  ;;  %1012 = vmatpush.msra.mxu3 %v3382_v24 }
 0x2e8   : > { %v879_v15 = vadd.f32 %v836_v35, %v830_v36  ;;  %v975_v35 = vld [vmem:[#allocation11 + $0x30] sm:$0xff]  ;;  %v978_v36 = vld [vmem:[#allocation11 + $0x48] sm:$0xff] }
 0x2e9   : > { %1013 = vmatpush.msra.mxu3 %v3385_v33  ;;  %1187 = vmatpush.msrb.mxu2 %v975_v35 }
 0x2eb   : > { %1041 = vmatpush.msrb.mxu3 %v978_v36 }
 0x2ed   : > { %v846_v13 = vpop.permute.xlu0 %845  ;;  %v850_v42 = vpop.permute.xlu1 %849  ;;  %1042 = vmatpush.msrb.mxu3 %v970_v38 }
 0x2ee   : > { %v848_v37 = vmul.f32 %v847_v27, %v846_v13  ;;  %v852_v54 = vmul.f32 %v851_v25, %v850_v42  ;;  %v979_v27 = vld [vmem:[#allocation11 + $0x50] sm:$0xff]  ;;  %v974_v25 = vld [vmem:[#allocation11 + $0x28] sm:$0xff] }
 0x2ef   : > { %1070 = vmatpush.msra.mxu1 %v979_v27  ;;  %v971_v13 = vld [vmem:[#allocation11 + $0x10] sm:$0xff] }
 0x2f0   : > { %v880_v45 = vadd.f32 %v848_v37, %v842_v32  ;;  %v881_v61 = vadd.f32 %v859_v56, %v852_v54  ;;  %v902_v32 = vld [vmem:[#allocation8 + $0x38] sm:$0xff] }
 0x2f1   : > { %1071 = vmatpush.msra.mxu1 %v971_v13  ;;  %v984_v37 = vld [vmem:[#allocation11 + $0x78] sm:$0xff] }
 0x2f2   : > { %v887_v57 = vadd.f32 %v880_v45, %v879_v15  ;;  %1215 = vmatpush.msra.mxu0 %v984_v37  ;;  %v981_v45 = vld [vmem:[#allocation11 + $0x60] sm:$0xff] }
 0x2f4   : > { %v891_v53 = vadd.f32 %v887_v57, %v886_v60  ;;  %1216 = vmatpush.msra.mxu0 %v976_v14 }
 0x2f5   : > { %v863_v59 = vpop.permute.xlu0 %862 }
 0x2f6   : > { %v865_v62 = vmul.f32 %v864_v48, %v863_v59 }
 0x2f8   : > { %v888_v0 = vadd.f32 %v881_v61, %v865_v62 }
 0x2fa   : > { %v893_v2 = vadd.f32 %v891_v53, %v888_v0 }
 0x2fc   : > { %v894_v3 = vadd.f32 %v893_v2, %v892_v1 }
 0x2fe   : > { %v903_v6 = vperm.slane %v894_v3, 0 }
 0x300   : > { %v904_v7 = vmul.f32 %v903_v6, %v895_v4  ;;  %v905_v16 = vmul.f32 %v903_v6, %v896_v5  ;;  %v906_v20 = vmul.f32 %v903_v6, %v897_v17  ;;  %v907_v22 = vmul.f32 %v903_v6, %v898_v21 }
 0x301   : > { %v908_v12 = vmul.f32 %v903_v6, %v899_v9  ;;  %v909_v30 = vmul.f32 %v903_v6, %v900_v29  ;;  %v910_v11 = vmul.f32 %v903_v6, %v901_v10  ;;  %v911_v23 = vmul.f32 %v903_v6, %v902_v32 }
 0x302   : > { %944 = vmatmul.f32.vlgmr.msrb.gmra.mxu1 %v904_v7  ;;  %947 = vmatmul.f32.vlgmr.msra.gmra.mxu2 %v905_v16 }
 0x303   : > { %1587 = vmatpush.msra.mxu2 %v979_v27  ;;  %1157 = vmatpush.msrb.mxu1 %v982_v41 }
 0x305   : > { %1588 = vmatpush.msra.mxu2 %v971_v13  ;;  %1158 = vmatpush.msrb.mxu1 %v974_v25 }
 0x30a   : > { %950 = vmatmul.f32.gmra.mxu2 %v906_v20 }
 0x312   : > { %953 = vmatmul.f32.gmra.mxu2 %v907_v22 }
 0x31a   : > { %956 = vmatmul.f32.gmra.mxu2 %v908_v12 }
 0x322   : > { %959 = vmatmul.f32.gmra.mxu2 %v909_v30 }
 0x32a   : > { %962 = vmatmul.f32.gmra.mxu2 %v910_v11 }
 0x332   : > { %965 = vmatmul.f32.gmra.mxu2 %v911_v23 }
 0x37f   : > { %v3388_v18 = vpop.f32.mrf.mxu1 }
 0x380   : > { %2176 = vmatmul.msk.f32.vlgmr.msra.gmra.mxu3 %vm985_vm4, %v3388_v18  ;;  %2184 = vmatmul.msk.f32.vlgmr.msra.gmra.mxu1 %vm985_vm4, %v3388_v18 }
 0x381   : > { %2188 = vmatmul.msk.f32.vlgmr.msrb.gmra.mxu0 %vm985_vm4, %v3388_v18  ;;  %2200 = vmatmul.msk.f32.vlgmr.msrb.gmra.mxu2 %vm985_vm4, %v3388_v18 }
 0x382   : > { %2356 = vmatpush.msra.mxu3 %v980_v28  ;;  %1616 = vmatpush.msrb.mxu0 %v980_v28 }
 0x383   : > { %1558 = vmatpush.msra.mxu1 %v978_v36  ;;  %1703 = vmatpush.msrb.mxu2 %v983_v8 }
 0x384   : > { %2357 = vmatpush.msra.mxu3 %v972_v34  ;;  %1617 = vmatpush.msrb.mxu0 %v972_v34 }
 0x385   : > { %v948_v42 = vpop.f32.mrf.mxu2  ;;  %1559 = vmatpush.msra.mxu1 %v970_v38  ;;  %1704 = vmatpush.msrb.mxu2 %v975_v35 }
 0x388   : > { %2177 = vmatmul.msk.f32.gmra.mxu3 %vm985_vm4, %v948_v42  ;;  %2185 = vmatmul.msk.f32.gmra.mxu1 %vm985_vm4, %v948_v42 }
 0x389   : > { %2189 = vmatmul.msk.f32.gmra.mxu0 %vm985_vm4, %v948_v42  ;;  %2201 = vmatmul.msk.f32.gmra.mxu2 %vm985_vm4, %v948_v42 }
 0x38d   : > { %v951_v26 = vpop.f32.mrf.mxu2 }
 0x390   : > { %2178 = vmatmul.msk.f32.gmra.mxu3 %vm985_vm4, %v951_v26  ;;  %2186 = vmatmul.msk.f32.gmra.mxu1 %vm985_vm4, %v951_v26 }
 0x391   : > { %2202 = vmatmul.msk.f32.gmra.mxu2 %vm985_vm4, %v951_v26  ;;  %2204 = vmatmul.msk.f32.vlgmr.msra.gmra.mxu0 %vm985_vm4, %v3388_v18 }
 0x392   : > { %1732 = vmatpush.msra.mxu0 %v984_v37 }
 0x394   : > { %1733 = vmatpush.msra.mxu0 %v976_v14 }
 0x395   : > { %v954_v19 = vpop.f32.mrf.mxu2 }
 0x398   : > { %2179 = vmatmul.msk.f32.gmra.mxu3 %vm985_vm4, %v954_v19  ;;  %2187 = vmatmul.msk.f32.gmra.mxu1 %vm985_vm4, %v954_v19 }
 0x399   : > { %2203 = vmatmul.msk.f32.gmra.mxu2 %vm985_vm4, %v954_v19  ;;  %2205 = vmatmul.msk.f32.gmra.mxu0 %vm985_vm4, %v948_v42 }
 0x39d   : > { %v3411_v44 = vpop.f32.mrf.mxu2 }
 0x3a0   : > { %2180 = vmatmul.msk.f32.vlgmr.msrb.gmra.mxu3 %vm985_vm4, %v3388_v18  ;;  %2196 = vmatmul.msk.f32.vlgmr.msrb.gmra.mxu1 %vm985_vm4, %v3388_v18 }
 0x3a1   : > { %2206 = vmatmul.msk.f32.gmra.mxu0 %vm985_vm4, %v951_v26  ;;  %2248 = vmatmul.msk.f32.vlgmr.msra.gmra.mxu2 %vm985_vm4, %v3411_v44 }
 0x3a2   : > { %1128 = vmatpush.msrb.mxu3 %v981_v45  ;;  %1674 = vmatpush.msrb.mxu1 %v982_v41 }
 0x3a4   : > { %1675 = vmatpush.msrb.mxu1 %v974_v25  ;;  %1129 = vmatpush.msrb.mxu3 %v973_v39 }
 0x3a5   : > { %v3420_v46 = vpop.f32.mrf.mxu2 }
 0x3a8   : > { %2181 = vmatmul.msk.f32.gmra.mxu3 %vm985_vm4, %v948_v42  ;;  %2197 = vmatmul.msk.f32.gmra.mxu1 %vm985_vm4, %v948_v42 }
 0x3a9   : > { %2207 = vmatmul.msk.f32.gmra.mxu0 %vm985_vm4, %v954_v19  ;;  %2249 = vmatmul.msk.f32.gmra.mxu2 %vm985_vm4, %v3420_v46 }
 0x3ad   : > { %v3427_v47 = vpop.f32.mrf.mxu2 }
 0x3b0   : > { %2182 = vmatmul.msk.f32.gmra.mxu3 %vm985_vm4, %v951_v26  ;;  %2198 = vmatmul.msk.f32.gmra.mxu1 %vm985_vm4, %v951_v26 }
 0x3b1   : > { %2250 = vmatmul.msk.f32.gmra.mxu2 %vm985_vm4, %v3427_v47  ;;  %2252 = vmatmul.msk.f32.vlgmr.msrb.gmra.mxu0 %vm985_vm4, %v3411_v44 }
 0x3b5   : > { %v3435_v40 = vpop.f32.mrf.mxu2 }
 0x3b8   : > { %2183 = vmatmul.msk.f32.gmra.mxu3 %vm985_vm4, %v954_v19  ;;  %2199 = vmatmul.msk.f32.gmra.mxu1 %vm985_vm4, %v954_v19 }
 0x3b9   : > { %2251 = vmatmul.msk.f32.gmra.mxu2 %vm985_vm4, %v3435_v40  ;;  %2253 = vmatmul.msk.f32.gmra.mxu0 %vm985_vm4, %v3420_v46 }
 0x3c0   : > { %2190 = vmatmul.msk.f32.vlgmr.msra.gmra.mxu3 %vm985_vm4, %v951_v26  ;;  %2244 = vmatmul.msk.f32.vlgmr.msra.gmra.mxu1 %vm985_vm4, %v3411_v44 }
 0x3c1   : > { %2254 = vmatmul.msk.f32.gmra.mxu0 %vm985_vm4, %v3427_v47  ;;  %2264 = vmatmul.msk.f32.vlgmr.msrb.gmra.mxu2 %vm985_vm4, %v3411_v44 }
 0x3c2   : > { %1529 = vmatpush.msra.mxu3 %v3382_v24 }
 0x3c4   : > { %1530 = vmatpush.msra.mxu3 %v3385_v33 }
 0x3c8   : > { %2191 = vmatmul.msk.f32.gmra.mxu3 %vm985_vm4, %v954_v19  ;;  %2245 = vmatmul.msk.f32.gmra.mxu1 %vm985_vm4, %v3420_v46 }
 0x3c9   : > { %2255 = vmatmul.msk.f32.gmra.mxu0 %vm985_vm4, %v3435_v40  ;;  %2265 = vmatmul.msk.f32.gmra.mxu2 %vm985_vm4, %v3420_v46 }
 0x3d0   : > { %2192 = vmatmul.msk.f32.vlgmr.msrb.gmra.mxu3 %vm985_vm4, %v3388_v18  ;;  %2246 = vmatmul.msk.f32.gmra.mxu1 %vm985_vm4, %v3427_v47 }
 0x3d1   : > { %2266 = vmatmul.msk.f32.gmra.mxu2 %vm985_vm4, %v3427_v47  ;;  %2268 = vmatmul.msk.f32.vlgmr.msra.gmra.mxu0 %vm985_vm4, %v3411_v44 }
 0x3d2   : > { %1645 = vmatpush.msrb.mxu3 %v981_v45 }
 0x3d4   : > { %1646 = vmatpush.msrb.mxu3 %v973_v39 }
 0x3d8   : > { %2193 = vmatmul.msk.f32.gmra.mxu3 %vm985_vm4, %v948_v42  ;;  %2247 = vmatmul.msk.f32.gmra.mxu1 %vm985_vm4, %v3435_v40 }
 0x3d9   : > { %2267 = vmatmul.msk.f32.gmra.mxu2 %vm985_vm4, %v3435_v40  ;;  %2269 = vmatmul.msk.f32.gmra.mxu0 %vm985_vm4, %v3420_v46 }
 0x3e0   : > { %2194 = vmatmul.msk.f32.gmra.mxu3 %vm985_vm4, %v951_v26  ;;  %2260 = vmatmul.msk.f32.vlgmr.msrb.gmra.mxu1 %vm985_vm4, %v3411_v44 }
 0x3e1   : > { %2270 = vmatmul.msk.f32.gmra.mxu0 %vm985_vm4, %v3427_v47 }
 0x3e8   : > { %2195 = vmatmul.msk.f32.gmra.mxu3 %vm985_vm4, %v954_v19  ;;  %2261 = vmatmul.msk.f32.gmra.mxu1 %vm985_vm4, %v3420_v46 }
 0x3e9   : > { %2271 = vmatmul.msk.f32.gmra.mxu0 %vm985_vm4, %v3435_v40 }
 0x3f0   : > { %2240 = vmatmul.msk.f32.vlgmr.msra.gmra.mxu3 %vm985_vm4, %v3411_v44  ;;  %2262 = vmatmul.msk.f32.gmra.mxu1 %vm985_vm4, %v3427_v47 }
 0x3f8   : > { %2241 = vmatmul.msk.f32.gmra.mxu3 %vm985_vm4, %v3420_v46  ;;  %2263 = vmatmul.msk.f32.gmra.mxu1 %vm985_vm4, %v3435_v40 }
 0x3fd   : > { %v1073_v49 = vpop.f32.mrf.mxu1 }
 0x3fe   : > { %v1232_v50 = vsub.f32 0.0, %v1073_v49  ;;  %v1102_v51 = vpop.f32.mrf.mxu0 }
 0x3ff   : > { %v1233_v52 = vsub.f32 0.0, %v1102_v51 }
 0x400   : > { %v1266_v15 = vmul.f32 1.442695, %v1232_v50  ;;  %2242 = vmatmul.msk.f32.gmra.mxu3 %vm985_vm4, %v3427_v47 }
 0x401   : > { %v1268_v54 = vmul.f32 1.442695, %v1233_v52 }
 0x402   : > { %2504 = vpow2.f32 %v1266_v15 }
 0x403   : > { %2506 = vpow2.f32 %v1268_v54  ;;  %v1015_v48 = vpop.f32.mrf.mxu3 }
 0x404   : > { %v1230_v55 = vsub.f32 0.0, %v1015_v48  ;;  %v1189_v31 = vpop.f32.mrf.mxu2 }
 0x405   : > { %v1236_v56 = vsub.f32 0.0, %v1189_v31  ;;  %v1076_v57 = vpop.f32.mrf.mxu1 }
 0x406   : > { %v1262_v58 = vmul.f32 1.442695, %v1230_v55  ;;  %v1240_v59 = vsub.f32 0.0, %v1076_v57  ;;  %v1105_v43 = vpop.f32.mrf.mxu0 }
 0x407   : > { %v1274_v60 = vmul.f32 1.442695, %v1236_v56  ;;  %v1241_v61 = vsub.f32 0.0, %v1105_v43 }
 0x408   : > { %v2505_v62 = vpop.eup %2504  ;;  %2508 = vpow2.f32 %v1262_v58  ;;  %v1282_v63 = vmul.f32 1.442695, %v1240_v59  ;;  %2243 = vmatmul.msk.f32.gmra.mxu3 %vm985_vm4, %v3435_v40 }
 0x409   : > { %v2507_v53 = vpop.eup %2506  ;;  %v1328_v0 = vadd.f32 1.0, %v2505_v62  ;;  %2510 = vpow2.f32 %v1274_v60  ;;  %v1284_v1 = vmul.f32 1.442695, %v1241_v61 }
 0x40a   : > { %v1329_v2 = vadd.f32 1.0, %v2507_v53  ;;  %2512 = vpow2.f32 %v1282_v63 }
 0x40b   : > { %2514 = vrcp.f32 %v1328_v0  ;;  %v1018_v3 = vpop.f32.mrf.mxu3 }
 0x40c   : > { %2516 = vrcp.f32 %v1329_v2  ;;  %v1238_v4 = vsub.f32 0.0, %v1018_v3  ;;  %v1192_v5 = vpop.f32.mrf.mxu2 }
 0x40d   : > { %2518 = vpow2.f32 %v1284_v1  ;;  %v1244_v6 = vsub.f32 0.0, %v1192_v5  ;;  %v1079_v7 = vpop.f32.mrf.mxu1 }
 0x40e   : > { %v2509_v16 = vpop.eup %2508  ;;  %v1278_v17 = vmul.f32 1.442695, %v1238_v4  ;;  %v1248_v20 = vsub.f32 0.0, %v1079_v7  ;;  %v1218_v21 = vpop.f32.mrf.mxu0 }
 0x40f   : > { %v2511_v22 = vpop.eup %2510  ;;  %v1326_v24 = vadd.f32 1.0, %v2509_v16  ;;  %v1237_v27 = vsub.f32 0.0, %v1218_v21  ;;  %v1290_v9 = vmul.f32 1.442695, %v1244_v6 }
 0x410   : > { %v2513_v28 = vpop.eup %2512  ;;  %v1332_v8 = vadd.f32 1.0, %v2511_v22  ;;  %2520 = vpow2.f32 %v1278_v17  ;;  %2256 = vmatmul.msk.f32.vlgmr.msrb.gmra.mxu3 %vm985_vm4, %v3411_v44  ;;  %v1298_v30 = vmul.f32 1.442695, %v1248_v20 }
 0x411   : > { %v2515_v12 = vpop.eup %2514  ;;  %2522 = vrcp.f32 %v1326_v24  ;;  %v1336_v29 = vadd.f32 1.0, %v2513_v28  ;;  %v1276_v33 = vmul.f32 1.442695, %v1237_v27 }
 0x412   : > { %v2517_v10 = vpop.eup %2516  ;;  %1392 = vst [vmem:[%s3500_s3 + $0x10] sm:$0xff] %v2515_v12  ;;  %v1424_v11 = vsub.f32 1.0, %v2515_v12  ;;  %2524 = vrcp.f32 %v1332_v8 }
 0x413   : > { %v2519_v32 = vpop.eup %2518  ;;  %1393 = vst [vmem:[%s3500_s3 + $0x18] sm:$0xff] %v2517_v10  ;;  %v1425_v23 = vsub.f32 1.0, %v2517_v10  ;;  %2526 = vrcp.f32 %v1336_v29  ;;  %v1021_v13 = vpop.f32.mrf.mxu3 }
 0x414   : > { %2210 = vst [vmem:[%s3500_s3 + $0x110] sm:$0xff] %v1424_v11  ;;  %v1337_v34 = vadd.f32 1.0, %v2519_v32  ;;  %2528 = vpow2.f32 %v1290_v9  ;;  %v1246_v35 = vsub.f32 0.0, %v1021_v13  ;;  %v1195_v36 = vpop.f32.mrf.mxu2 }
 0x415   : > { %2211 = vst [vmem:[%s3500_s3 + $0x118] sm:$0xff] %v1425_v23  ;;  %2530 = vpow2.f32 %v1298_v30  ;;  %v1252_v37 = vsub.f32 0.0, %v1195_v36  ;;  %v1082_v14 = vpop.f32.mrf.mxu1 }
 0x416   : > { %v2521_v38 = vpop.eup %2520  ;;  %2532 = vrcp.f32 %v1337_v34  ;;  %v1294_v41 = vmul.f32 1.442695, %v1246_v35  ;;  %v1256_v18 = vsub.f32 0.0, %v1082_v14  ;;  %v1221_v25 = vpop.f32.mrf.mxu0 }
 0x417   : > { %v2523_v42 = vpop.eup %2522  ;;  %v1334_v26 = vadd.f32 1.0, %v2521_v38  ;;  %2534 = vpow2.f32 %v1276_v33  ;;  %v1306_v19 = vmul.f32 1.442695, %v1252_v37  ;;  %v1245_v44 = vsub.f32 0.0, %v1221_v25 }
 0x418   : > { %v2525_v45 = vpop.eup %2524  ;;  %1390 = vst [vmem:[%s3500_s3] sm:$0xff] %v2523_v42  ;;  %v1422_v39 = vsub.f32 1.0, %v2523_v42  ;;  %2536 = vpow2.f32 %v1294_v41  ;;  %v1314_v49 = vmul.f32 1.442695, %v1256_v18  ;;  %2257 = vmatmul.msk.f32.gmra.mxu3 %vm985_vm4, %v3420_v46 }
 0x419   : > { %v2527_v50 = vpop.eup %2526  ;;  %1396 = vst [vmem:[%s3500_s3 + $0x30] sm:$0xff] %v2525_v45  ;;  %v1428_v51 = vsub.f32 1.0, %v2525_v45  ;;  %2538 = vrcp.f32 %v1334_v26  ;;  %v1292_v52 = vmul.f32 1.442695, %v1245_v44 }
 0x41a   : > { %v2529_v15 = vpop.eup %2528  ;;  %2208 = vst [vmem:[%s3500_s3 + $0x100] sm:$0xff] %v1422_v39  ;;  %v1432_v54 = vsub.f32 1.0, %v2527_v50  ;;  %2540 = vpow2.f32 %v1306_v19 }
 0x41b   : > { %v2531_v48 = vpop.eup %2530  ;;  %2214 = vst [vmem:[%s3500_s3 + $0x130] sm:$0xff] %v1428_v51  ;;  %v1340_v55 = vadd.f32 1.0, %v2529_v15  ;;  %2542 = vpow2.f32 %v1314_v49  ;;  %v1024_v31 = vpop.f32.mrf.mxu3 }
 0x41c   : > { %v2533_v56 = vpop.eup %2532  ;;  %1400 = vst [vmem:[%s3500_s3 + $0x50] sm:$0xff] %v2527_v50  ;;  %v1344_v46 = vadd.f32 1.0, %v2531_v48  ;;  %2544 = vpow2.f32 %v1292_v52  ;;  %v1254_v57 = vsub.f32 0.0, %v1024_v31  ;;  %v1198_v58 = vpop.f32.mrf.mxu2 }
 0x41d   : > { %v2535_v59 = vpop.eup %2534  ;;  %2218 = vst [vmem:[%s3500_s3 + $0x150] sm:$0xff] %v1432_v54  ;;  %v1433_v43 = vsub.f32 1.0, %v2533_v56  ;;  %2546 = vrcp.f32 %v1340_v55  ;;  %v1160_v60 = vpop.f32.mrf.mxu1  ;;  %v1260_v53 = vsub.f32 0.0, %v1198_v58 }
 0x41e   : > { %v2537_v61 = vpop.eup %2536  ;;  %1401 = vst [vmem:[%s3500_s3 + $0x58] sm:$0xff] %v2533_v56  ;;  %2548 = vrcp.f32 %v1344_v46  ;;  %v1333_v62 = vadd.f32 1.0, %v2535_v59  ;;  %v1310_v63 = vmul.f32 1.442695, %v1254_v57  ;;  %v1224_v0 = vpop.f32.mrf.mxu0  ;;  %v1235_v3 = vsub.f32 0.0, %v1160_v60 }
 0x41f   : > { %v2539_v1 = vpop.eup %2538  ;;  %2219 = vst [vmem:[%s3500_s3 + $0x158] sm:$0xff] %v1433_v43  ;;  %v1342_v2 = vadd.f32 1.0, %v2537_v61  ;;  %v1253_v6 = vsub.f32 0.0, %v1224_v0  ;;  %v1322_v21 = vmul.f32 1.442695, %v1260_v53 }
 0x420   : > { %v2541_v4 = vpop.eup %2540  ;;  %1398 = vst [vmem:[%s3500_s3 + $0x40] sm:$0xff] %v2539_v1  ;;  %v1430_v5 = vsub.f32 1.0, %v2539_v1  ;;  %2550 = vrcp.f32 %v1333_v62  ;;  %2258 = vmatmul.msk.f32.gmra.mxu3 %vm985_vm4, %v3427_v47  ;;  %v1272_v27 = vmul.f32 1.442695, %v1235_v3 }
 0x421   : > { %v2543_v7 = vpop.eup %2542  ;;  %2552 = vrcp.f32 %v1342_v2  ;;  %v1348_v16 = vadd.f32 1.0, %v2541_v4  ;;  %v1308_v47 = vmul.f32 1.442695, %v1253_v6 }
 0x422   : > { %v2545_v17 = vpop.eup %2544  ;;  %2216 = vst [vmem:[%s3500_s3 + $0x140] sm:$0xff] %v1430_v5  ;;  %v1352_v20 = vadd.f32 1.0, %v2543_v7  ;;  %2554 = vpow2.f32 %v1310_v63 }
 0x423   : > { %v2547_v22 = vpop.eup %2546  ;;  %2556 = vrcp.f32 %v1348_v16  ;;  %v1341_v24 = vadd.f32 1.0, %v2545_v17  ;;  %v1044_v28 = vpop.f32.mrf.mxu3 }
 0x424   : > { %v2549_v8 = vpop.eup %2548  ;;  %1404 = vst [vmem:[%s3500_s3 + $0x70] sm:$0xff] %v2547_v22  ;;  %v1436_v9 = vsub.f32 1.0, %v2547_v22  ;;  %2558 = vrcp.f32 %v1352_v20  ;;  %v1231_v12 = vsub.f32 0.0, %v1044_v28  ;;  %v1590_v29 = vpop.f32.mrf.mxu2 }
 0x425   : > { %1408 = vst [vmem:[%s3500_s3 + $0x90] sm:$0xff] %v2549_v8  ;;  %v1440_v30 = vsub.f32 1.0, %v2549_v8  ;;  %2560 = vrcp.f32 %v1341_v24  ;;  %v1749_v10 = vsub.f32 0.0, %v1590_v29  ;;  %v1163_v11 = vpop.f32.mrf.mxu1 }
 0x426   : > { %v2551_v32 = vpop.eup %2550  ;;  %2222 = vst [vmem:[%s3500_s3 + $0x170] sm:$0xff] %v1436_v9  ;;  %2562 = vpow2.f32 %v1322_v21  ;;  %v1264_v23 = vmul.f32 1.442695, %v1231_v12  ;;  %v1243_v33 = vsub.f32 0.0, %v1163_v11  ;;  %v1227_v13 = vpop.f32.mrf.mxu0 }
 0x427   : > { %v2553_v34 = vpop.eup %2552  ;;  %2226 = vst [vmem:[%s3500_s3 + $0x190] sm:$0xff] %v1440_v30  ;;  %v1429_v35 = vsub.f32 1.0, %v2551_v32  ;;  %2564 = vpow2.f32 %v1272_v27  ;;  %v1783_v36 = vmul.f32 1.442695, %v1749_v10  ;;  %v1261_v37 = vsub.f32 0.0, %v1227_v13 }
 0x428   : > { %v2555_v14 = vpop.eup %2554  ;;  %1397 = vst [vmem:[%s3500_s3 + $0x38] sm:$0xff] %v2551_v32  ;;  %v1438_v38 = vsub.f32 1.0, %v2553_v34  ;;  %2566 = vpow2.f32 %v1308_v47  ;;  %v1288_v41 = vmul.f32 1.442695, %v1243_v33  ;;  %2259 = vmatmul.msk.f32.gmra.mxu3 %vm985_vm4, %v3435_v40 }
 0x429   : > { %v2557_v18 = vpop.eup %2556  ;;  %2215 = vst [vmem:[%s3500_s3 + $0x138] sm:$0xff] %v1429_v35  ;;  %v1350_v25 = vadd.f32 1.0, %v2555_v14  ;;  %2568 = vpow2.f32 %v1264_v23  ;;  %v1324_v42 = vmul.f32 1.442695, %v1261_v37 }
 0x42a   : > { %v2559_v26 = vpop.eup %2558  ;;  %1406 = vst [vmem:[%s3500_s3 + $0x80] sm:$0xff] %v2553_v34  ;;  %v1444_v19 = vsub.f32 1.0, %v2557_v18  ;;  %2570 = vpow2.f32 %v1783_v36 }
 0x42b   : > { %v2561_v44 = vpop.eup %2560  ;;  %2224 = vst [vmem:[%s3500_s3 + $0x180] sm:$0xff] %v1438_v38  ;;  %v1448_v45 = vsub.f32 1.0, %v2559_v26  ;;  %2572 = vrcp.f32 %v1350_v25  ;;  %v1047_v39 = vpop.f32.mrf.mxu3 }
 0x42c   : > { %v2563_v49 = vpop.eup %2562  ;;  %1412 = vst [vmem:[%s3500_s3 + $0xb0] sm:$0xff] %v2557_v18  ;;  %2574 = vpow2.f32 %v1288_v41  ;;  %v1239_v40 = vsub.f32 0.0, %v1047_v39  ;;  %v1593_v50 = vpop.f32.mrf.mxu2  ;;  %v1437_v52 = vsub.f32 1.0, %v2561_v44 }
 0x42d   : > { %v2565_v51 = vpop.eup %2564  ;;  %2230 = vst [vmem:[%s3500_s3 + $0x1b0] sm:$0xff] %v1444_v19  ;;  %v1356_v15 = vadd.f32 1.0, %v2563_v49  ;;  %2576 = vpow2.f32 %v1324_v42  ;;  %v1166_v54 = vpop.f32.mrf.mxu1  ;;  %v1757_v57 = vsub.f32 0.0, %v1593_v50 }
 0x42e   : > { %v2567_v48 = vpop.eup %2566  ;;  %1416 = vst [vmem:[%s3500_s3 + $0xd0] sm:$0xff] %v2559_v26  ;;  %v1331_v55 = vadd.f32 1.0, %v2565_v51  ;;  %v1619_v31 = vpop.f32.mrf.mxu0  ;;  %v1280_v43 = vmul.f32 1.442695, %v1239_v40  ;;  %v1251_v60 = vsub.f32 0.0, %v1166_v54 }
 0x42f   : > { %v2569_v56 = vpop.eup %2568  ;;  %2234 = vst [vmem:[%s3500_s3 + $0x1d0] sm:$0xff] %v1448_v45  ;;  %2578 = vrcp.f32 %v1356_v15  ;;  %v1349_v46 = vadd.f32 1.0, %v2567_v48  ;;  %v1750_v63 = vsub.f32 0.0, %v1619_v31  ;;  %v1799_v3 = vmul.f32 1.442695, %v1757_v57 }
 0x430   : > { %v2571_v58 = vpop.eup %2570  ;;  %1405 = vst [vmem:[%s3500_s3 + $0x78] sm:$0xff] %v2561_v44  ;;  %2580 = vrcp.f32 %v1331_v55  ;;  %v1327_v59 = vadd.f32 1.0, %v2569_v56  ;;  %v1304_v6 = vmul.f32 1.442695, %v1251_v60 }
 0x431   : > { %v2573_v61 = vpop.eup %2572  ;;  %2223 = vst [vmem:[%s3500_s3 + $0x178] sm:$0xff] %v1437_v52  ;;  %2582 = vrcp.f32 %v1349_v46  ;;  %v1845_v62 = vadd.f32 1.0, %v2571_v58  ;;  %v1785_v20 = vmul.f32 1.442695, %v1750_v63 }
 0x432   : > { %v2575_v53 = vpop.eup %2574  ;;  %1414 = vst [vmem:[%s3500_s3 + $0xc0] sm:$0xff] %v2573_v61  ;;  %v1446_v0 = vsub.f32 1.0, %v2573_v61  ;;  %2584 = vrcp.f32 %v1327_v59 }
 0x433   : > { %v2577_v1 = vpop.eup %2576  ;;  %2586 = vrcp.f32 %v1845_v62  ;;  %v1339_v2 = vadd.f32 1.0, %v2575_v53  ;;  %v1050_v4 = vpop.f32.mrf.mxu3 }
 0x434   : > { %2232 = vst [vmem:[%s3500_s3 + $0x1c0] sm:$0xff] %v1446_v0  ;;  %v1357_v5 = vadd.f32 1.0, %v2577_v1  ;;  %2588 = vpow2.f32 %v1280_v43  ;;  %v1247_v7 = vsub.f32 0.0, %v1050_v4  ;;  %v1596_v16 = vpop.f32.mrf.mxu2 }
 0x435   : > { %v2579_v17 = vpop.eup %2578  ;;  %2590 = vrcp.f32 %v1339_v2  ;;  %v1765_v21 = vsub.f32 0.0, %v1596_v16  ;;  %v1169_v22 = vpop.f32.mrf.mxu1 }
 0x436   : > { %v2581_v24 = vpop.eup %2580  ;;  %1420 = vst [vmem:[%s3500_s3 + $0xf0] sm:$0xff] %v2579_v17  ;;  %v1452_v27 = vsub.f32 1.0, %v2579_v17  ;;  %2592 = vrcp.f32 %v1357_v5  ;;  %v1296_v28 = vmul.f32 1.442695, %v1247_v7  ;;  %v1259_v8 = vsub.f32 0.0, %v1169_v22  ;;  %v1622_v9 = vpop.f32.mrf.mxu0 }
 0x437   : > { %v2583_v47 = vpop.eup %2582  ;;  %1395 = vst [vmem:[%s3500_s3 + $0x28] sm:$0xff] %v2581_v24  ;;  %v1427_v12 = vsub.f32 1.0, %v2581_v24  ;;  %2594 = vpow2.f32 %v1799_v3  ;;  %v1815_v29 = vmul.f32 1.442695, %v1765_v21  ;;  %v1758_v30 = vsub.f32 0.0, %v1622_v9 }
 0x438   : > { %v2585_v10 = vpop.eup %2584  ;;  %2238 = vst [vmem:[%s3500_s3 + $0x1f0] sm:$0xff] %v1452_v27  ;;  %v1445_v11 = vsub.f32 1.0, %v2583_v47  ;;  %2596 = vpow2.f32 %v1304_v6  ;;  %v1320_v32 = vmul.f32 1.442695, %v1259_v8 }
 0x439   : > { %v2587_v23 = vpop.eup %2586  ;;  %2213 = vst [vmem:[%s3500_s3 + $0x128] sm:$0xff] %v1427_v12  ;;  %v1423_v33 = vsub.f32 1.0, %v2585_v10  ;;  %2598 = vpow2.f32 %v1785_v20  ;;  %v1801_v34 = vmul.f32 1.442695, %v1758_v30 }
 0x43a   : > { %v2589_v13 = vpop.eup %2588  ;;  %1413 = vst [vmem:[%s3500_s3 + $0xb8] sm:$0xff] %v2583_v47  ;;  %2600 = vpow2.f32 %v1296_v28  ;;  %v1942_v36 = vsub.f32 1.0, %v2587_v23 }
 0x43b   : > { %v2591_v35 = vpop.eup %2590  ;;  %2231 = vst [vmem:[%s3500_s3 + $0x1b8] sm:$0xff] %v1445_v11  ;;  %v1335_v37 = vadd.f32 1.0, %v2589_v13  ;;  %2602 = vpow2.f32 %v1815_v29  ;;  %v1053_v14 = vpop.f32.mrf.mxu3 }
 0x43c   : > { %v2593_v38 = vpop.eup %2592  ;;  %1391 = vst [vmem:[%s3500_s3 + $0x8] sm:$0xff] %v2585_v10  ;;  %2604 = vpow2.f32 %v1320_v32  ;;  %v1599_v41 = vpop.f32.mrf.mxu2  ;;  %v1435_v25 = vsub.f32 1.0, %v2591_v35  ;;  %v1255_v44 = vsub.f32 0.0, %v1053_v14 }
 0x43d   : > { %v2595_v18 = vpop.eup %2594  ;;  %2209 = vst [vmem:[%s3500_s3 + $0x108] sm:$0xff] %v1423_v33  ;;  %2606 = vrcp.f32 %v1335_v37  ;;  %v1561_v42 = vpop.f32.mrf.mxu1  ;;  %v1453_v49 = vsub.f32 1.0, %v2593_v38  ;;  %v1773_v52 = vsub.f32 0.0, %v1599_v41 }
 0x43e   : > { %v2597_v26 = vpop.eup %2596  ;;  %2274 = vst [vmem:[%s3500_s3 + $0x210] sm:$0xff] %v2587_v23  ;;  %v1853_v19 = vadd.f32 1.0, %v2595_v18  ;;  %2608 = vpow2.f32 %v1801_v34  ;;  %v1625_v45 = vpop.f32.mrf.mxu0  ;;  %v1748_v48 = vsub.f32 0.0, %v1561_v42  ;;  %v1312_v56 = vmul.f32 1.442695, %v1255_v44 }
 0x43f   : > { %v2599_v39 = vpop.eup %2598  ;;  %2306 = vst [vmem:[%s3500_s3 + $0x310] sm:$0xff] %v1942_v36  ;;  %v1347_v40 = vadd.f32 1.0, %v2597_v26  ;;  %v1766_v46 = vsub.f32 0.0, %v1625_v45  ;;  %v1831_v61 = vmul.f32 1.442695, %v1773_v52 }
 0x440   : > { %v2601_v50 = vpop.eup %2600  ;;  %1403 = vst [vmem:[%s3500_s3 + $0x68] sm:$0xff] %v2591_v35  ;;  %2610 = vrcp.f32 %v1853_v19  ;;  %v1846_v51 = vadd.f32 1.0, %v2599_v39  ;;  %v1781_v0 = vmul.f32 1.442695, %v1748_v48 }
 0x441   : > { %v2603_v15 = vpop.eup %2602  ;;  %2221 = vst [vmem:[%s3500_s3 + $0x168] sm:$0xff] %v1435_v25  ;;  %2612 = vrcp.f32 %v1347_v40  ;;  %v1343_v54 = vadd.f32 1.0, %v2601_v50  ;;  %v1817_v4 = vmul.f32 1.442695, %v1766_v46 }
 0x442   : > { %v2605_v55 = vpop.eup %2604  ;;  %1421 = vst [vmem:[%s3500_s3 + $0xf8] sm:$0xff] %v2593_v38  ;;  %2614 = vrcp.f32 %v1846_v51  ;;  %v1861_v31 = vadd.f32 1.0, %v2603_v15 }
 0x443   : > { %v2607_v57 = vpop.eup %2606  ;;  %2239 = vst [vmem:[%s3500_s3 + $0x1f8] sm:$0xff] %v1453_v49  ;;  %2616 = vrcp.f32 %v1343_v54  ;;  %v1355_v58 = vadd.f32 1.0, %v2605_v55  ;;  %v1108_v59 = vpop.f32.mrf.mxu3 }
 0x444   : > { %v2609_v43 = vpop.eup %2608  ;;  %1399 = vst [vmem:[%s3500_s3 + $0x48] sm:$0xff] %v2607_v57  ;;  %v1431_v60 = vsub.f32 1.0, %v2607_v57  ;;  %2618 = vrcp.f32 %v1861_v31  ;;  %v1249_v62 = vsub.f32 0.0, %v1108_v59  ;;  %v1706_v63 = vpop.f32.mrf.mxu2 }
 0x445   : > { %2620 = vrcp.f32 %v1355_v58  ;;  %v1854_v53 = vadd.f32 1.0, %v2609_v43  ;;  %v1753_v1 = vsub.f32 0.0, %v1706_v63  ;;  %v1564_v2 = vpop.f32.mrf.mxu1 }
 0x446   : > { %v2611_v3 = vpop.eup %2610  ;;  %2217 = vst [vmem:[%s3500_s3 + $0x148] sm:$0xff] %v1431_v60  ;;  %2622 = vpow2.f32 %v1312_v56  ;;  %v1756_v5 = vsub.f32 0.0, %v1564_v2  ;;  %v1628_v6 = vpop.f32.mrf.mxu0  ;;  %v1300_v17 = vmul.f32 1.442695, %v1249_v62 }
 0x447   : > { %v2613_v7 = vpop.eup %2612  ;;  %2282 = vst [vmem:[%s3500_s3 + $0x250] sm:$0xff] %v2611_v3  ;;  %v1950_v16 = vsub.f32 1.0, %v2611_v3  ;;  %2624 = vrcp.f32 %v1854_v53  ;;  %v1774_v20 = vsub.f32 0.0, %v1628_v6  ;;  %v1791_v24 = vmul.f32 1.442695, %v1753_v1 }
 0x448   : > { %v2615_v21 = vpop.eup %2614  ;;  %1411 = vst [vmem:[%s3500_s3 + $0xa8] sm:$0xff] %v2613_v7  ;;  %v1443_v22 = vsub.f32 1.0, %v2613_v7  ;;  %2626 = vpow2.f32 %v1831_v61  ;;  %v1797_v8 = vmul.f32 1.442695, %v1756_v5 }
 0x449   : > { %v2617_v27 = vpop.eup %2616  ;;  %2314 = vst [vmem:[%s3500_s3 + $0x350] sm:$0xff] %v1950_v16  ;;  %v1943_v28 = vsub.f32 1.0, %v2615_v21  ;;  %2628 = vpow2.f32 %v1781_v0  ;;  %v1833_v12 = vmul.f32 1.442695, %v1774_v20 }
 0x44a   : > { %v2619_v9 = vpop.eup %2618  ;;  %2229 = vst [vmem:[%s3500_s3 + $0x1a8] sm:$0xff] %v1443_v22  ;;  %v1439_v47 = vsub.f32 1.0, %v2617_v27  ;;  %2630 = vpow2.f32 %v1817_v4 }
 0x44b   : > { %v2621_v29 = vpop.eup %2620  ;;  %2275 = vst [vmem:[%s3500_s3 + $0x218] sm:$0xff] %v2615_v21  ;;  %2632 = vpow2.f32 %v1300_v17  ;;  %v1111_v30 = vpop.f32.mrf.mxu3  ;;  %v1958_v11 = vsub.f32 1.0, %v2619_v9 }
 0x44c   : > { %v2623_v10 = vpop.eup %2622  ;;  %2307 = vst [vmem:[%s3500_s3 + $0x318] sm:$0xff] %v1943_v28  ;;  %2634 = vpow2.f32 %v1791_v24  ;;  %v1257_v32 = vsub.f32 0.0, %v1111_v30  ;;  %v1709_v23 = vpop.f32.mrf.mxu2  ;;  %v1451_v36 = vsub.f32 1.0, %v2621_v29 }
 0x44d   : > { %v2625_v33 = vpop.eup %2624  ;;  %1407 = vst [vmem:[%s3500_s3 + $0x88] sm:$0xff] %v2617_v27  ;;  %v1351_v13 = vadd.f32 1.0, %v2623_v10  ;;  %2636 = vpow2.f32 %v1797_v8  ;;  %v1567_v34 = vpop.f32.mrf.mxu1  ;;  %v1761_v26 = vsub.f32 0.0, %v1709_v23 }
 0x44e   : > { %v2627_v35 = vpop.eup %2626  ;;  %2225 = vst [vmem:[%s3500_s3 + $0x188] sm:$0xff] %v1439_v47  ;;  %2638 = vpow2.f32 %v1833_v12  ;;  %v1316_v37 = vmul.f32 1.442695, %v1257_v32  ;;  %v1735_v14 = vpop.f32.mrf.mxu0  ;;  %v1951_v25 = vsub.f32 1.0, %v2625_v33  ;;  %v1764_v49 = vsub.f32 0.0, %v1567_v34 }
 0x44f   : > { %v2629_v38 = vpop.eup %2628  ;;  %2290 = vst [vmem:[%s3500_s3 + $0x290] sm:$0xff] %v2619_v9  ;;  %2640 = vrcp.f32 %v1351_v13  ;;  %v1869_v41 = vadd.f32 1.0, %v2627_v35  ;;  %v1754_v51 = vsub.f32 0.0, %v1735_v14  ;;  %v1807_v48 = vmul.f32 1.442695, %v1761_v26 }
 0x450   : > { %v2631_v18 = vpop.eup %2630  ;;  %2322 = vst [vmem:[%s3500_s3 + $0x390] sm:$0xff] %v1958_v11  ;;  %v1844_v42 = vadd.f32 1.0, %v2629_v38  ;;  %2642 = vpow2.f32 %v1316_v37  ;;  %v1813_v60 = vmul.f32 1.442695, %v1764_v49 }
 0x451   : > { %v2633_v19 = vpop.eup %2632  ;;  %1419 = vst [vmem:[%s3500_s3 + $0xe8] sm:$0xff] %v2621_v29  ;;  %2644 = vrcp.f32 %v1869_v41  ;;  %v1862_v44 = vadd.f32 1.0, %v2631_v18  ;;  %v1793_v0 = vmul.f32 1.442695, %v1754_v51 }
 0x452   : > { %v2635_v45 = vpop.eup %2634  ;;  %2237 = vst [vmem:[%s3500_s3 + $0x1e8] sm:$0xff] %v1451_v36  ;;  %2646 = vrcp.f32 %v1844_v42  ;;  %v1345_v39 = vadd.f32 1.0, %v2633_v19 }
 0x453   : > { %v2637_v40 = vpop.eup %2636  ;;  %2283 = vst [vmem:[%s3500_s3 + $0x258] sm:$0xff] %v2625_v33  ;;  %2648 = vrcp.f32 %v1862_v44  ;;  %v1849_v50 = vadd.f32 1.0, %v2635_v45  ;;  %v1131_v52 = vpop.f32.mrf.mxu3 }
 0x454   : > { %v2639_v15 = vpop.eup %2638  ;;  %2315 = vst [vmem:[%s3500_s3 + $0x358] sm:$0xff] %v1951_v25  ;;  %2650 = vrcp.f32 %v1345_v39  ;;  %v1852_v54 = vadd.f32 1.0, %v2637_v40  ;;  %v1234_v55 = vsub.f32 0.0, %v1131_v52  ;;  %v1712_v31 = vpop.f32.mrf.mxu2 }
 0x455   : > { %v2641_v56 = vpop.eup %2640  ;;  %2652 = vrcp.f32 %v1849_v50  ;;  %v1870_v46 = vadd.f32 1.0, %v2639_v15  ;;  %v1769_v57 = vsub.f32 0.0, %v1712_v31  ;;  %v1570_v58 = vpop.f32.mrf.mxu1 }
 0x456   : > { %v2643_v59 = vpop.eup %2642  ;;  %1415 = vst [vmem:[%s3500_s3 + $0xc8] sm:$0xff] %v2641_v56  ;;  %v1447_v43 = vsub.f32 1.0, %v2641_v56  ;;  %2654 = vrcp.f32 %v1852_v54  ;;  %v1772_v61 = vsub.f32 0.0, %v1570_v58  ;;  %v1738_v62 = vpop.f32.mrf.mxu0  ;;  %v1270_v4 = vmul.f32 1.442695, %v1234_v55 }
 0x457   : > { %v2645_v63 = vpop.eup %2644  ;;  %2656 = vrcp.f32 %v1870_v46  ;;  %v1353_v53 = vadd.f32 1.0, %v2643_v59  ;;  %v1762_v1 = vsub.f32 0.0, %v1738_v62  ;;  %v1823_v7 = vmul.f32 1.442695, %v1769_v57 }
 0x458   : > { %v2647_v2 = vpop.eup %2646  ;;  %2233 = vst [vmem:[%s3500_s3 + $0x1c8] sm:$0xff] %v1447_v43  ;;  %v1966_v3 = vsub.f32 1.0, %v2645_v63  ;;  %2658 = vpow2.f32 %v1807_v48  ;;  %v1829_v20 = vmul.f32 1.442695, %v1772_v61 }
 0x459   : > { %v2649_v5 = vpop.eup %2648  ;;  %2298 = vst [vmem:[%s3500_s3 + $0x2d0] sm:$0xff] %v2645_v63  ;;  %v1941_v6 = vsub.f32 1.0, %v2647_v2  ;;  %2660 = vrcp.f32 %v1353_v53  ;;  %v1809_v22 = vmul.f32 1.442695, %v1762_v1 }
 0x45a   : > { %v2651_v16 = vpop.eup %2650  ;;  %2330 = vst [vmem:[%s3500_s3 + $0x3d0] sm:$0xff] %v1966_v3  ;;  %v1959_v17 = vsub.f32 1.0, %v2649_v5  ;;  %2662 = vpow2.f32 %v1813_v60 }
 0x45b   : > { %v2653_v21 = vpop.eup %2652  ;;  %2273 = vst [vmem:[%s3500_s3 + $0x208] sm:$0xff] %v2647_v2  ;;  %2664 = vpow2.f32 %v1793_v0  ;;  %v1134_v24 = vpop.f32.mrf.mxu3  ;;  %v1441_v28 = vsub.f32 1.0, %v2651_v16 }
 0x45c   : > { %v2655_v27 = vpop.eup %2654  ;;  %2305 = vst [vmem:[%s3500_s3 + $0x308] sm:$0xff] %v1941_v6  ;;  %2666 = vpow2.f32 %v1270_v4  ;;  %v1242_v8 = vsub.f32 0.0, %v1134_v24  ;;  %v1715_v9 = vpop.f32.mrf.mxu2  ;;  %v1946_v10 = vsub.f32 1.0, %v2653_v21 }
 0x45d   : > { %v2657_v47 = vpop.eup %2656  ;;  %2291 = vst [vmem:[%s3500_s3 + $0x298] sm:$0xff] %v2649_v5  ;;  %2668 = vpow2.f32 %v1823_v7  ;;  %v1777_v12 = vsub.f32 0.0, %v1715_v9  ;;  %v1677_v29 = vpop.f32.mrf.mxu1  ;;  %v1949_v35 = vsub.f32 1.0, %v2655_v27 }
 0x45e   : > { %v2659_v30 = vpop.eup %2658  ;;  %2323 = vst [vmem:[%s3500_s3 + $0x398] sm:$0xff] %v1959_v17  ;;  %2670 = vpow2.f32 %v1829_v20  ;;  %v1286_v11 = vmul.f32 1.442695, %v1242_v8  ;;  %v1741_v32 = vpop.f32.mrf.mxu0  ;;  %v1967_v38 = vsub.f32 1.0, %v2657_v47  ;;  %v1752_v18 = vsub.f32 0.0, %v1677_v29 }
 0x45f   : > { %v2661_v23 = vpop.eup %2660  ;;  %1409 = vst [vmem:[%s3500_s3 + $0x98] sm:$0xff] %v2651_v16  ;;  %v1857_v33 = vadd.f32 1.0, %v2659_v30  ;;  %2672 = vpow2.f32 %v1809_v22  ;;  %v1839_v13 = vmul.f32 1.442695, %v1777_v12  ;;  %v1770_v39 = vsub.f32 0.0, %v1741_v32 }
 0x460   : > { %v2663_v34 = vpop.eup %2662  ;;  %2227 = vst [vmem:[%s3500_s3 + $0x198] sm:$0xff] %v1441_v28  ;;  %2674 = vpow2.f32 %v1286_v11  ;;  %v1449_v44 = vsub.f32 1.0, %v2661_v23  ;;  %v1789_v54 = vmul.f32 1.442695, %v1752_v18 }
 0x461   : > { %v2665_v36 = vpop.eup %2664  ;;  %2278 = vst [vmem:[%s3500_s3 + $0x230] sm:$0xff] %v2653_v21  ;;  %2676 = vrcp.f32 %v1857_v33  ;;  %v1860_v37 = vadd.f32 1.0, %v2663_v34  ;;  %v1825_v59 = vmul.f32 1.442695, %v1770_v39 }
 0x462   : > { %v2667_v14 = vpop.eup %2666  ;;  %2310 = vst [vmem:[%s3500_s3 + $0x330] sm:$0xff] %v1946_v10  ;;  %v1850_v41 = vadd.f32 1.0, %v2665_v36  ;;  %2678 = vpow2.f32 %v1839_v13 }
 0x463   : > { %v2669_v25 = vpop.eup %2668  ;;  %2281 = vst [vmem:[%s3500_s3 + $0x248] sm:$0xff] %v2655_v27  ;;  %2680 = vrcp.f32 %v1860_v37  ;;  %v1330_v42 = vadd.f32 1.0, %v2667_v14  ;;  %v1137_v26 = vpop.f32.mrf.mxu3 }
 0x464   : > { %v2671_v19 = vpop.eup %2670  ;;  %2313 = vst [vmem:[%s3500_s3 + $0x348] sm:$0xff] %v1949_v35  ;;  %2682 = vrcp.f32 %v1850_v41  ;;  %v1865_v45 = vadd.f32 1.0, %v2669_v25  ;;  %v1250_v50 = vsub.f32 0.0, %v1137_v26 }
 0x465   : > { %v2673_v49 = vpop.eup %2672  ;;  %2299 = vst [vmem:[%s3500_s3 + $0x2d8] sm:$0xff] %v2657_v47  ;;  %2684 = vrcp.f32 %v1330_v42  ;;  %v1868_v40 = vadd.f32 1.0, %v2671_v19  ;;  %v1680_v51 = vpop.f32.mrf.mxu1 }
 0x466   : > { %v2675_v52 = vpop.eup %2674  ;;  %2331 = vst [vmem:[%s3500_s3 + $0x3d8] sm:$0xff] %v1967_v38  ;;  %2686 = vrcp.f32 %v1865_v45  ;;  %v1858_v15 = vadd.f32 1.0, %v2673_v49  ;;  %v1760_v48 = vsub.f32 0.0, %v1680_v51  ;;  %v1744_v55 = vpop.f32.mrf.mxu0  ;;  %v1302_v61 = vmul.f32 1.442695, %v1250_v50 }
 0x467   : > { %v2677_v31 = vpop.eup %2676  ;;  %1417 = vst [vmem:[%s3500_s3 + $0xd8] sm:$0xff] %v2661_v23  ;;  %2688 = vrcp.f32 %v1868_v40  ;;  %v1338_v56 = vadd.f32 1.0, %v2675_v52  ;;  %v1778_v46 = vsub.f32 0.0, %v1744_v55 }
 0x468   : > { %v2679_v57 = vpop.eup %2678  ;;  %2235 = vst [vmem:[%s3500_s3 + $0x1d8] sm:$0xff] %v1449_v44  ;;  %v1954_v58 = vsub.f32 1.0, %v2677_v31  ;;  %2690 = vrcp.f32 %v1858_v15  ;;  %v1805_v53 = vmul.f32 1.442695, %v1760_v48 }
 0x469   : > { %v2681_v43 = vpop.eup %2680  ;;  %2286 = vst [vmem:[%s3500_s3 + $0x270] sm:$0xff] %v2677_v31  ;;  %2692 = vrcp.f32 %v1338_v56  ;;  %v1873_v60 = vadd.f32 1.0, %v2679_v57  ;;  %v1841_v2 = vmul.f32 1.442695, %v1778_v46 }
 0x46a   : > { %v2683_v62 = vpop.eup %2682  ;;  %2318 = vst [vmem:[%s3500_s3 + $0x370] sm:$0xff] %v1954_v58  ;;  %v1957_v63 = vsub.f32 1.0, %v2681_v43  ;;  %2694 = vpow2.f32 %v1789_v54 }
 0x46b   : > { %v2685_v0 = vpop.eup %2684  ;;  %2289 = vst [vmem:[%s3500_s3 + $0x288] sm:$0xff] %v2681_v43  ;;  %v1947_v1 = vsub.f32 1.0, %v2683_v62  ;;  %2696 = vrcp.f32 %v1873_v60  ;;  %v1140_v3 = vpop.f32.mrf.mxu3 }
 0x46c   : > { %v2687_v4 = vpop.eup %2686  ;;  %2321 = vst [vmem:[%s3500_s3 + $0x388] sm:$0xff] %v1957_v63  ;;  %v1426_v5 = vsub.f32 1.0, %v2685_v0  ;;  %2698 = vpow2.f32 %v1825_v59  ;;  %v1258_v6 = vsub.f32 0.0, %v1140_v3 }
 0x46d   : > { %v2689_v7 = vpop.eup %2688  ;;  %2279 = vst [vmem:[%s3500_s3 + $0x238] sm:$0xff] %v2683_v62  ;;  %2700 = vpow2.f32 %v1302_v61  ;;  %v1683_v16 = vpop.f32.mrf.mxu1  ;;  %v1962_v20 = vsub.f32 1.0, %v2687_v4 }
 0x46e   : > { %v2691_v17 = vpop.eup %2690  ;;  %2311 = vst [vmem:[%s3500_s3 + $0x338] sm:$0xff] %v1947_v1  ;;  %2702 = vpow2.f32 %v1805_v53  ;;  %v1318_v21 = vmul.f32 1.442695, %v1258_v6  ;;  %v1768_v22 = vsub.f32 0.0, %v1683_v16  ;;  %v1965_v28 = vsub.f32 1.0, %v2689_v7 }
 0x46f   : > { %v2693_v24 = vpop.eup %2692  ;;  %1394 = vst [vmem:[%s3500_s3 + $0x20] sm:$0xff] %v2685_v0  ;;  %2704 = vpow2.f32 %v1841_v2  ;;  %v1955_v29 = vsub.f32 1.0, %v2691_v17 }
 0x470   : > { %v2695_v27 = vpop.eup %2694  ;;  %2212 = vst [vmem:[%s3500_s3 + $0x120] sm:$0xff] %v1426_v5  ;;  %2706 = vpow2.f32 %v1318_v21  ;;  %v1821_v8 = vmul.f32 1.442695, %v1768_v22  ;;  %v1434_v23 = vsub.f32 1.0, %v2693_v24 }
 0x471   : > { %v2697_v9 = vpop.eup %2696  ;;  %2294 = vst [vmem:[%s3500_s3 + $0x2b0] sm:$0xff] %v2687_v4  ;;  %v1848_v47 = vadd.f32 1.0, %v2695_v27 }
 0x472   : > { %v2699_v12 = vpop.eup %2698  ;;  %2326 = vst [vmem:[%s3500_s3 + $0x3b0] sm:$0xff] %v1962_v20  ;;  %2708 = vpow2.f32 %v1821_v8  ;;  %v1970_v35 = vsub.f32 1.0, %v2697_v9 }
 0x473   : > { %v2701_v30 = vpop.eup %2700  ;;  %2297 = vst [vmem:[%s3500_s3 + $0x2c8] sm:$0xff] %v2689_v7  ;;  %2710 = vrcp.f32 %v1848_v47  ;;  %v1866_v10 = vadd.f32 1.0, %v2699_v12  ;;  %v1532_v11 = vpop.f32.mrf.mxu3 }
 0x474   : > { %v2703_v32 = vpop.eup %2702  ;;  %2329 = vst [vmem:[%s3500_s3 + $0x3c8] sm:$0xff] %v1965_v28  ;;  %v1346_v33 = vadd.f32 1.0, %v2701_v30  ;;  %v1747_v13 = vsub.f32 0.0, %v1532_v11 }
 0x475   : > { %v2705_v34 = vpop.eup %2704  ;;  %2287 = vst [vmem:[%s3500_s3 + $0x278] sm:$0xff] %v2691_v17  ;;  %2712 = vrcp.f32 %v1866_v10  ;;  %v1856_v36 = vadd.f32 1.0, %v2703_v32  ;;  %v1686_v37 = vpop.f32.mrf.mxu1 }
 0x476   : > { %v2707_v14 = vpop.eup %2706  ;;  %2319 = vst [vmem:[%s3500_s3 + $0x378] sm:$0xff] %v1955_v29  ;;  %2714 = vrcp.f32 %v1346_v33  ;;  %v1874_v38 = vadd.f32 1.0, %v2705_v34  ;;  %v1779_v41 = vmul.f32 1.442695, %v1747_v13  ;;  %v1776_v18 = vsub.f32 0.0, %v1686_v37 }
 0x477   : > { %1402 = vst [vmem:[%s3500_s3 + $0x60] sm:$0xff] %v2693_v24  ;;  %2716 = vrcp.f32 %v1856_v36  ;;  %v1354_v25 = vadd.f32 1.0, %v2707_v14 }
 0x478   : > { %v2709_v42 = vpop.eup %2708  ;;  %2220 = vst [vmem:[%s3500_s3 + $0x160] sm:$0xff] %v1434_v23  ;;  %2718 = vrcp.f32 %v1874_v38  ;;  %v1837_v26 = vmul.f32 1.442695, %v1776_v18 }
 0x479   : > { %v2711_v19 = vpop.eup %2710  ;;  %2302 = vst [vmem:[%s3500_s3 + $0x2f0] sm:$0xff] %v2697_v9  ;;  %2720 = vrcp.f32 %v1354_v25  ;;  %v1864_v44 = vadd.f32 1.0, %v2709_v42 }
 0x47a   : > { %2334 = vst [vmem:[%s3500_s3 + $0x3f0] sm:$0xff] %v1970_v35  ;;  %v1945_v45 = vsub.f32 1.0, %v2711_v19  ;;  %2722 = vpow2.f32 %v1779_v41 }
 0x47b   : > { %v2713_v39 = vpop.eup %2712  ;;  %2277 = vst [vmem:[%s3500_s3 + $0x228] sm:$0xff] %v2711_v19  ;;  %2724 = vrcp.f32 %v1864_v44  ;;  %v1535_v49 = vpop.f32.mrf.mxu3 }
 0x47c   : > { %v2715_v40 = vpop.eup %2714  ;;  %2309 = vst [vmem:[%s3500_s3 + $0x328] sm:$0xff] %v1945_v45  ;;  %v1963_v50 = vsub.f32 1.0, %v2713_v39  ;;  %2726 = vpow2.f32 %v1837_v26  ;;  %v1755_v51 = vsub.f32 0.0, %v1535_v49 }
 0x47d   : > { %v2717_v52 = vpop.eup %2716  ;;  %2295 = vst [vmem:[%s3500_s3 + $0x2b8] sm:$0xff] %v2713_v39  ;;  %v1442_v15 = vsub.f32 1.0, %v2715_v40 }
 0x47e   : > { %v2719_v54 = vpop.eup %2718  ;;  %2327 = vst [vmem:[%s3500_s3 + $0x3b8] sm:$0xff] %v1963_v50  ;;  %v1953_v48 = vsub.f32 1.0, %v2717_v52  ;;  %v1795_v55 = vmul.f32 1.442695, %v1755_v51 }
 0x47f   : > { %v2721_v31 = vpop.eup %2720  ;;  %1410 = vst [vmem:[%s3500_s3 + $0xa0] sm:$0xff] %v2715_v40  ;;  %v1971_v46 = vsub.f32 1.0, %v2719_v54 }
 0x480   : > { %v2723_v56 = vpop.eup %2722  ;;  %2228 = vst [vmem:[%s3500_s3 + $0x1a0] sm:$0xff] %v1442_v15  ;;  %2728 = vpow2.f32 %v1795_v55  ;;  %v1450_v43 = vsub.f32 1.0, %v2721_v31 }
 0x481   : > { %v2725_v57 = vpop.eup %2724  ;;  %2285 = vst [vmem:[%s3500_s3 + $0x268] sm:$0xff] %v2717_v52  ;;  %v1843_v58 = vadd.f32 1.0, %v2723_v56 }
 0x482   : > { %v2727_v59 = vpop.eup %2726  ;;  %2317 = vst [vmem:[%s3500_s3 + $0x368] sm:$0xff] %v1953_v48  ;;  %v1961_v62 = vsub.f32 1.0, %v2725_v57 }
 0x483   : > { %2303 = vst [vmem:[%s3500_s3 + $0x2f8] sm:$0xff] %v2719_v54  ;;  %2730 = vrcp.f32 %v1843_v58  ;;  %v1872_v60 = vadd.f32 1.0, %v2727_v59  ;;  %v1538_v61 = vpop.f32.mrf.mxu3 }
 0x484   : > { %2335 = vst [vmem:[%s3500_s3 + $0x3f8] sm:$0xff] %v1971_v46  ;;  %v1763_v63 = vsub.f32 0.0, %v1538_v61 }
 0x485   : > { %1418 = vst [vmem:[%s3500_s3 + $0xe0] sm:$0xff] %v2721_v31  ;;  %2732 = vrcp.f32 %v1872_v60 }
 0x486   : > { %v2729_v53 = vpop.eup %2728  ;;  %2236 = vst [vmem:[%s3500_s3 + $0x1e0] sm:$0xff] %v1450_v43  ;;  %v1811_v0 = vmul.f32 1.442695, %v1763_v63 }
 0x487   : > { %2293 = vst [vmem:[%s3500_s3 + $0x2a8] sm:$0xff] %v2725_v57  ;;  %v1851_v1 = vadd.f32 1.0, %v2729_v53 }
 0x488   : > { %2325 = vst [vmem:[%s3500_s3 + $0x3a8] sm:$0xff] %v1961_v62  ;;  %2734 = vpow2.f32 %v1811_v0 }
 0x489   : > { %v2731_v2 = vpop.eup %2730  ;;  %2736 = vrcp.f32 %v1851_v1 }
 0x48a   : > { %2272 = vst [vmem:[%s3500_s3 + $0x200] sm:$0xff] %v2731_v2  ;;  %v1940_v3 = vsub.f32 1.0, %v2731_v2 }
 0x48b   : > { %v2733_v4 = vpop.eup %2732  ;;  %v1541_v5 = vpop.f32.mrf.mxu3 }
 0x48c   : > { %2304 = vst [vmem:[%s3500_s3 + $0x300] sm:$0xff] %v1940_v3  ;;  %v1969_v6 = vsub.f32 1.0, %v2733_v4  ;;  %v1771_v7 = vsub.f32 0.0, %v1541_v5 }
 0x48d   : > { %2301 = vst [vmem:[%s3500_s3 + $0x2e8] sm:$0xff] %v2733_v4 }
 0x48e   : > { %v2735_v16 = vpop.eup %2734  ;;  %2333 = vst [vmem:[%s3500_s3 + $0x3e8] sm:$0xff] %v1969_v6  ;;  %v1827_v17 = vmul.f32 1.442695, %v1771_v7 }
 0x48f   : > { %v2737_v20 = vpop.eup %2736  ;;  %v1859_v21 = vadd.f32 1.0, %v2735_v16 }
 0x490   : > { %2280 = vst [vmem:[%s3500_s3 + $0x240] sm:$0xff] %v2737_v20  ;;  %v1948_v22 = vsub.f32 1.0, %v2737_v20  ;;  %2738 = vpow2.f32 %v1827_v17 }
 0x491   : > { %2740 = vrcp.f32 %v1859_v21 }
 0x492   : > { %2312 = vst [vmem:[%s3500_s3 + $0x340] sm:$0xff] %v1948_v22 }
 0x493   : > { %v1648_v24 = vpop.f32.mrf.mxu3 }
 0x494   : > { %v1751_v27 = vsub.f32 0.0, %v1648_v24 }
 0x496   : > { %v2739_v28 = vpop.eup %2738  ;;  %v1787_v8 = vmul.f32 1.442695, %v1751_v27 }
 0x497   : > { %v2741_v9 = vpop.eup %2740  ;;  %v1867_v47 = vadd.f32 1.0, %v2739_v28 }
 0x498   : > { %2288 = vst [vmem:[%s3500_s3 + $0x280] sm:$0xff] %v2741_v9  ;;  %v1956_v12 = vsub.f32 1.0, %v2741_v9  ;;  %2742 = vpow2.f32 %v1787_v8 }
 0x499   : > { %2744 = vrcp.f32 %v1867_v47 }
 0x49a   : > { %2320 = vst [vmem:[%s3500_s3 + $0x380] sm:$0xff] %v1956_v12 }
 0x49b   : > { %v1651_v29 = vpop.f32.mrf.mxu3 }
 0x49c   : > { %v1759_v30 = vsub.f32 0.0, %v1651_v29 }
 0x49e   : > { %v2743_v10 = vpop.eup %2742  ;;  %v1803_v11 = vmul.f32 1.442695, %v1759_v30 }
 0x49f   : > { %v2745_v32 = vpop.eup %2744  ;;  %v1847_v23 = vadd.f32 1.0, %v2743_v10 }
 0x4a0   : > { %2296 = vst [vmem:[%s3500_s3 + $0x2c0] sm:$0xff] %v2745_v32  ;;  %v1964_v33 = vsub.f32 1.0, %v2745_v32  ;;  %2746 = vpow2.f32 %v1803_v11 }
 0x4a1   : > { %2748 = vrcp.f32 %v1847_v23 }
 0x4a2   : > { %2328 = vst [vmem:[%s3500_s3 + $0x3c0] sm:$0xff] %v1964_v33 }
 0x4a3   : > { %v1654_v13 = vpop.f32.mrf.mxu3 }
 0x4a4   : > { %v1767_v34 = vsub.f32 0.0, %v1654_v13 }
 0x4a6   : > { %v2747_v35 = vpop.eup %2746  ;;  %v1819_v36 = vmul.f32 1.442695, %v1767_v34 }
 0x4a7   : > { %v2749_v37 = vpop.eup %2748  ;;  %v1855_v14 = vadd.f32 1.0, %v2747_v35 }
 0x4a8   : > { %2276 = vst [vmem:[%s3500_s3 + $0x220] sm:$0xff] %v2749_v37  ;;  %v1944_v38 = vsub.f32 1.0, %v2749_v37  ;;  %2750 = vpow2.f32 %v1819_v36 }
 0x4a9   : > { %2752 = vrcp.f32 %v1855_v14 }
 0x4aa   : > { %2308 = vst [vmem:[%s3500_s3 + $0x320] sm:$0xff] %v1944_v38 }
 0x4ab   : > { %v1657_v41 = vpop.f32.mrf.mxu3 }
 0x4ac   : > { %v1775_v18 = vsub.f32 0.0, %v1657_v41 }
 0x4ae   : > { %v2751_v25 = vpop.eup %2750  ;;  %v1835_v42 = vmul.f32 1.442695, %v1775_v18 }
 0x4af   : > { %v2753_v26 = vpop.eup %2752  ;;  %v1863_v19 = vadd.f32 1.0, %v2751_v25 }
 0x4b0   : > { %2284 = vst [vmem:[%s3500_s3 + $0x260] sm:$0xff] %v2753_v26  ;;  %v1952_v44 = vsub.f32 1.0, %v2753_v26  ;;  %2754 = vpow2.f32 %v1835_v42 }
 0x4b1   : > { %2756 = vrcp.f32 %v1863_v19 }
 0x4b2   : > { %2316 = vst [vmem:[%s3500_s3 + $0x360] sm:$0xff] %v1952_v44 }
 0x4b6   : > { %v2755_v45 = vpop.eup %2754 }
 0x4b7   : > { %v2757_v39 = vpop.eup %2756  ;;  %v1871_v49 = vadd.f32 1.0, %v2755_v45 }
 0x4b8   : > { %2292 = vst [vmem:[%s3500_s3 + $0x2a0] sm:$0xff] %v2757_v39  ;;  %v1960_v40 = vsub.f32 1.0, %v2757_v39 }
 0x4b9   : > { %2758 = vrcp.f32 %v1871_v49 }
 0x4ba   : > { %2324 = vst [vmem:[%s3500_s3 + $0x3a0] sm:$0xff] %v1960_v40 }
 0x4bf   : > { %v2759_v50 = vpop.eup %2758 }
 0x4c0   : > { %2300 = vst [vmem:[%s3500_s3 + $0x2e0] sm:$0xff] %v2759_v50  ;;  %v1968_v51 = vsub.f32 1.0, %v2759_v50 }
 0x4c2   : > { %2332 = vst [vmem:[%s3500_s3 + $0x3e0] sm:$0xff] %v1968_v51 }
 0x4c3 PF: > { %p22_p1 = scmp.ge.s32.totalorder %s3140_s19, 5   ;;  %s3686_s24 = smov %s2982_s25 }
 0x4c4   : > { %s3687_s25 = smov %s2986_s26  ;;  %s3688_s26 = smov %s3149_s22 }
 0x4c5   : > { %s3689_s27 = smov %s3140_s19  ;;  %24 = sbr.rel (!%p22_p1) target bundleno = 12 (0xc), region = 123 }
 0x4ca   :  { %2026 = vsyncpa [#allocation4], 1 }
 0x4cb   :  { %2028 = vsyncpa [#allocation4 + $0x1], 1 }
 0x4cc   :  { %2029 = vsyncpa [#allocation6], 1 }
 0x4cd   :  { %2031 = vsyncpa [#allocation6 + $0x1], 1 }
 0x4ce   :  { %2032 = vsyncpa [#allocation9], 1 }
 0x4cf   :  { %2033 = vsyncpa [#allocation12], 1 }

</bundles_post_ra>
